<compile_context>
chip_gen: v5e
topology: v5e:2x2
jax: 0.10.0
libtpu: 0.0.40
codegen_flags: <defaults>
</compile_context>

<pallas_src>
import math

import jax
import jax.numpy as jnp
from jax.experimental import pallas as pl
from jax.experimental.pallas import tpu as pltpu


def _attention_fusion_kernel(x1_ref, x2_ref, x3_ref, w_ref, o_ref):
    # Per-node scores: cat([x1,x2,x3], -1) @ w == x1@w1 + x2@w2 + x3@w3.
    # bf16 operands -> native MXU cadence; f32 accumulation keeps precision.
    s = jnp.dot(x1_ref[...].astype(jnp.bfloat16), w_ref[0],
                preferred_element_type=jnp.float32)
    s += jnp.dot(x2_ref[...].astype(jnp.bfloat16), w_ref[1],
                 preferred_element_type=jnp.float32)
    s += jnp.dot(x3_ref[...].astype(jnp.bfloat16), w_ref[2],
                 preferred_element_type=jnp.float32)
    s = jnp.abs(s)                                      # [TM, 3] f32

    # Numerically stable softmax over the 3 views, column-wise on [TM, 1] slices
    # (VPU + EUP only, no cross-lane reductions).
    s1, s2, s3 = s[:, 0:1], s[:, 1:2], s[:, 2:3]
    m = jnp.maximum(jnp.maximum(s1, s2), s3)
    e1 = jnp.exp(s1 - m)
    e2 = jnp.exp(s2 - m)
    e3 = jnp.exp(s3 - m)
    inv = pl.reciprocal(e1 + e2 + e3, approx=True)      # denom in [1, 3]; EUP slot

    # Weighted fusion; [TM,1] weights broadcast across lanes. Re-index the x refs
    # (fresh VMEM loads) so full-tile values are not held live across the matmuls.
    o_ref[...] = ((e1 * inv) * x1_ref[...]
                  + (e2 * inv) * x2_ref[...]
                  + (e3 * inv) * x3_ref[...]).astype(o_ref.dtype)


def _round_up(x: int, m: int) -> int:
    return ((x + m - 1) // m) * m


def _vmem_capacity_bytes() -> int:
    """Per-core VMEM capacity; conservative (v7x-sized) fallback if unavailable."""
    try:
        info = pltpu.get_tpu_info()
        cap = getattr(info, "vmem_capacity_bytes", None)
        if cap:
            return int(cap)
    except Exception:
        pass
    return 64 << 20


def attention_fusion(x1, x2, x3, w, *, tm: int | None = None):
    """Pallas AttentionFusion: softmax(|[x1 x2 x3] @ w|)-weighted sum of x1, x2, x3.

    x1, x2, x3: [N, H] float32
    w:          [3*H, 3] float32
    returns:    [N, H] float32
    """
    n, h = x1.shape
    assert x2.shape == (n, h) and x3.shape == (n, h)
    assert w.shape == (3 * h, 3)

    # Single resident weight: (3, H, 3) bf16 panel stack (w[k] multiplies x_{k+1}).
    w3 = w.reshape(3, h, 3).astype(jnp.bfloat16)

    itemsize = jnp.dtype(x1.dtype).itemsize
    hp_lane = _round_up(h, 128)               # per-tile VMEM lane padding
    vmem_cap = _vmem_capacity_bytes()
    budget = min(vmem_cap // 2, 64 << 20)     # pipelined-stream budget (32 MiB on v7x)
    vmem_limit = int(min(vmem_cap * 3 // 4, 100 << 20))

    if tm is None:
        # VMEM cap: 2 buffers x (3 inputs + 1 output) x TM x hp_lane x itemsize <= budget.
        tm_vmem = max(8, budget // (2 * 4 * hp_lane * itemsize))
        # Bandwidth: aim for >= ~1 MiB per streamed block (HBM-roofline regime).
        tm_big = max(256, (1 << 20) // (hp_lane * itemsize))
        tm = min(tm_vmem, tm_big)
        # Keep >= ~8 grid steps when N allows (pipelining + v7x megacore), floor 256 rows.
        tm = min(tm, max(256, pl.cdiv(n, 8)))
    # Row tile must be a multiple of 8 sublanes (or equal N); never bigger than needed.
    tm = max(8, min(_round_up(tm, 8), _round_up(n, 8)))

    grid = (pl.cdiv(n, tm),)                  # partial last block is masked by Pallas

    row_spec = lambda i: (i, 0)               # streamed row tiles
    resident = lambda i: (0, 0, 0)            # weight stays resident in VMEM

    cost = pl.CostEstimate(
        flops=int(2 * n * h * 9 + 8 * n * h),
        transcendentals=int(4 * n),
        bytes_accessed=int(itemsize * 4 * n * h + 2 * 3 * h * 3),
    )

    out = pl.pallas_call(
        _attention_fusion_kernel,
        out_shape=jax.ShapeDtypeStruct((n, h), x1.dtype),
        grid_spec=pltpu.PrefetchScalarGridSpec(
            num_scalar_prefetch=0,
            grid=grid,
            in_specs=[
                pl.BlockSpec((tm, h), row_spec),
                pl.BlockSpec((tm, h), row_spec),
                pl.BlockSpec((tm, h), row_spec),
                pl.BlockSpec((3, h, 3), resident),
            ],
            out_specs=pl.BlockSpec((tm, h), row_spec),
        ),
        compiler_params=pltpu.CompilerParams(
            dimension_semantics=("parallel",),
            vmem_limit_bytes=vmem_limit,
        ),
        cost_estimate=cost,
    )(x1, x2, x3, w3)

    return out


def _reference(x1, x2, x3, w):
    a = jnp.concatenate([x1, x2, x3], axis=-1) @ w
    a = jnp.abs(a)
    a = jax.nn.softmax(a, axis=-1)                 # [N, 3]
    x = jnp.stack([x1, x2, x3], axis=-1)           # [N, H, 3]
    return jnp.sum(x * a[:, None, :], axis=-1)     # [N, H]


def _make_inputs(key, n, nhid):
    k1, k2, k3, kw = jax.random.split(key, 4)
    stdv = 1.0 / math.sqrt(3 * nhid)               # mirrors the module's init
    w = jax.random.uniform(kw, (3 * nhid, 3), jnp.float32, -stdv, stdv)
    x1 = jax.random.normal(k1, (n, nhid), jnp.float32)
    x2 = jax.random.normal(k2, (n, nhid), jnp.float32)
    x3 = jax.random.normal(k3, (n, nhid), jnp.float32)
    return x1, x2, x3, w


if __name__ == "__main__":
    key = jax.random.PRNGKey(0)
    key_a, key_b = jax.random.split(key)

    # Aligned case: N=4096, NHID=128 -> lane-dense stores, multi-step pipelined grid.
    N, NHID = 4096, 128
    x1, x2, x3, w = _make_inputs(key_a, N, NHID)
    out = jax.block_until_ready(attention_fusion(x1, x2, x3, w))
    ref = _reference(x1, x2, x3, w)
    assert out.shape == (N, NHID)
    # bf16 score matmul shifts mixing weights at the ~1e-3 level -> looser tolerance.
    assert jnp.allclose(out, ref, atol=2e-2, rtol=2e-2), "mismatch vs reference (aligned)"

    # Unaligned case: exercises the masked partial row-block and sub-128-lane path
    # (no wrapper-side pad/slice passes).
    N2, H2 = 1000, 96
    y1, y2, y3, w2 = _make_inputs(key_b, N2, H2)
    out2 = jax.block_until_ready(attention_fusion(y1, y2, y3, w2))
    ref2 = _reference(y1, y2, y3, w2)
    assert out2.shape == (N2, H2)
    assert jnp.allclose(out2, ref2, atol=2e-2, rtol=2e-2), "mismatch vs reference (unaligned)"

    print("KERNEL_OK")
</pallas_src>

<mosaic_0001>
module attributes {stable_mosaic.version = 11 : i64} {
  func.func @_attention_fusion_kernel(%arg0: i32, %arg1: memref<512x128xf32, #tpu.memory_space<vmem>>, %arg2: memref<512x128xf32, #tpu.memory_space<vmem>>, %arg3: memref<512x128xf32, #tpu.memory_space<vmem>>, %arg4: memref<3x128x3xbf16, #tpu.memory_space<vmem>>, %arg5: memref<512x128xf32, #tpu.memory_space<vmem>>) attributes {dimension_semantics = [#tpu.dimension_semantics<parallel>], iteration_bounds = array<i64: 8>, scalar_prefetch = 0 : i64, scratch_operands = 0 : i64, tpu.core_type = #tpu.core_type<tc>, window_params = [{transform_indices = @transform_0, window_bounds = array<i64: 512, 128>}, {transform_indices = @transform_1, window_bounds = array<i64: 512, 128>}, {transform_indices = @transform_2, window_bounds = array<i64: 512, 128>}, {pipeline_mode = #tpu.pipeline_mode<synchronous>, transform_indices = @transform_3, window_bounds = array<i64: 3, 128, 3>}, {transform_indices = @transform_4, window_bounds = array<i64: 512, 128>}]} {
    %c0 = arith.constant 0 : index
    %c0_0 = arith.constant 0 : index
    %0 = vector.load %arg1[%c0, %c0_0] : memref<512x128xf32, #tpu.memory_space<vmem>>, vector<512x128xf32>
    %1 = arith.truncf %0 : vector<512x128xf32> to vector<512x128xbf16>
    %c0_1 = arith.constant 0 : index
    %c0_2 = arith.constant 0 : index
    %c0_3 = arith.constant 0 : index
    %2 = vector.load %arg4[%c0_1, %c0_2, %c0_3] : memref<3x128x3xbf16, #tpu.memory_space<vmem>>, vector<1x128x3xbf16>
    %3 = vector.shape_cast %2 : vector<1x128x3xbf16> to vector<128x3xbf16>
    %cst = arith.constant dense<0.000000e+00> : vector<512x3xf32>
    %4 = tpu.matmul %1, %3, %cst {dimension_numbers = #tpu.dot_dimension_numbers<[1], [0], [0], [1], [0, 0, 1, 1], [], []>} : vector<512x128xbf16>, vector<128x3xbf16>, vector<512x3xf32> -> vector<512x3xf32>
    %c0_4 = arith.constant 0 : index
    %c0_5 = arith.constant 0 : index
    %5 = vector.load %arg2[%c0_4, %c0_5] : memref<512x128xf32, #tpu.memory_space<vmem>>, vector<512x128xf32>
    %6 = arith.truncf %5 : vector<512x128xf32> to vector<512x128xbf16>
    %c1 = arith.constant 1 : index
    %c0_6 = arith.constant 0 : index
    %c0_7 = arith.constant 0 : index
    %7 = vector.load %arg4[%c1, %c0_6, %c0_7] : memref<3x128x3xbf16, #tpu.memory_space<vmem>>, vector<1x128x3xbf16>
    %8 = vector.shape_cast %7 : vector<1x128x3xbf16> to vector<128x3xbf16>
    %cst_8 = arith.constant dense<0.000000e+00> : vector<512x3xf32>
    %9 = tpu.matmul %6, %8, %cst_8 {dimension_numbers = #tpu.dot_dimension_numbers<[1], [0], [0], [1], [0, 0, 1, 1], [], []>} : vector<512x128xbf16>, vector<128x3xbf16>, vector<512x3xf32> -> vector<512x3xf32>
    %10 = arith.addf %4, %9 : vector<512x3xf32>
    %c0_9 = arith.constant 0 : index
    %c0_10 = arith.constant 0 : index
    %11 = vector.load %arg3[%c0_9, %c0_10] : memref<512x128xf32, #tpu.memory_space<vmem>>, vector<512x128xf32>
    %12 = arith.truncf %11 : vector<512x128xf32> to vector<512x128xbf16>
    %c2 = arith.constant 2 : index
    %c0_11 = arith.constant 0 : index
    %c0_12 = arith.constant 0 : index
    %13 = vector.load %arg4[%c2, %c0_11, %c0_12] : memref<3x128x3xbf16, #tpu.memory_space<vmem>>, vector<1x128x3xbf16>
    %14 = vector.shape_cast %13 : vector<1x128x3xbf16> to vector<128x3xbf16>
    %cst_13 = arith.constant dense<0.000000e+00> : vector<512x3xf32>
    %15 = tpu.matmul %12, %14, %cst_13 {dimension_numbers = #tpu.dot_dimension_numbers<[1], [0], [0], [1], [0, 0, 1, 1], [], []>} : vector<512x128xbf16>, vector<128x3xbf16>, vector<512x3xf32> -> vector<512x3xf32>
    %16 = arith.addf %10, %15 : vector<512x3xf32>
    %17 = math.absf %16 : vector<512x3xf32>
    %18 = vector.extract_strided_slice %17 {offsets = [0, 0], sizes = [512, 1], strides = [1, 1]} : vector<512x3xf32> to vector<512x1xf32>
    %19 = vector.extract_strided_slice %17 {offsets = [0, 1], sizes = [512, 1], strides = [1, 1]} : vector<512x3xf32> to vector<512x1xf32>
    %20 = vector.extract_strided_slice %17 {offsets = [0, 2], sizes = [512, 1], strides = [1, 1]} : vector<512x3xf32> to vector<512x1xf32>
    %21 = arith.maximumf %18, %19 : vector<512x1xf32>
    %22 = arith.maximumf %21, %20 : vector<512x1xf32>
    %23 = arith.subf %18, %22 : vector<512x1xf32>
    %24 = math.exp %23 : vector<512x1xf32>
    %25 = arith.subf %19, %22 : vector<512x1xf32>
    %26 = math.exp %25 : vector<512x1xf32>
    %27 = arith.subf %20, %22 : vector<512x1xf32>
    %28 = math.exp %27 : vector<512x1xf32>
    %29 = arith.addf %24, %26 : vector<512x1xf32>
    %30 = arith.addf %29, %28 : vector<512x1xf32>
    %31 = tpu.reciprocal %30 {approx = true} : vector<512x1xf32> -> vector<512x1xf32>
    %32 = arith.mulf %24, %31 : vector<512x1xf32>
    %c0_14 = arith.constant 0 : index
    %c0_15 = arith.constant 0 : index
    %33 = vector.load %arg1[%c0_14, %c0_15] : memref<512x128xf32, #tpu.memory_space<vmem>>, vector<512x128xf32>
    %34 = vector.broadcast %32 : vector<512x1xf32> to vector<512x128xf32>
    %35 = arith.mulf %34, %33 : vector<512x128xf32>
    %36 = arith.mulf %26, %31 : vector<512x1xf32>
    %c0_16 = arith.constant 0 : index
    %c0_17 = arith.constant 0 : index
    %37 = vector.load %arg2[%c0_16, %c0_17] : memref<512x128xf32, #tpu.memory_space<vmem>>, vector<512x128xf32>
    %38 = vector.broadcast %36 : vector<512x1xf32> to vector<512x128xf32>
    %39 = arith.mulf %38, %37 : vector<512x128xf32>
    %40 = arith.addf %35, %39 : vector<512x128xf32>
    %41 = arith.mulf %28, %31 : vector<512x1xf32>
    %c0_18 = arith.constant 0 : index
    %c0_19 = arith.constant 0 : index
    %42 = vector.load %arg3[%c0_18, %c0_19] : memref<512x128xf32, #tpu.memory_space<vmem>>, vector<512x128xf32>
    %43 = vector.broadcast %41 : vector<512x1xf32> to vector<512x128xf32>
    %44 = arith.mulf %43, %42 : vector<512x128xf32>
    %45 = arith.addf %40, %44 : vector<512x128xf32>
    %c0_20 = arith.constant 0 : index
    %c0_21 = arith.constant 0 : index
    %46 = vector.load %arg5[%c0_20, %c0_21] : memref<512x128xf32, #tpu.memory_space<vmem>>, vector<512x128xf32>
    tpu.vector_store %arg5[%c0_20, %c0_21], %45 {strides = array<i32>} : memref<512x128xf32, #tpu.memory_space<vmem>>, vector<512x128xf32>,
    return
  }
  func.func @transform_0(%arg0: i32) -> (i32, i32) {
    %c0_i32 = arith.constant 0 : i32
    %c0_i32_0 = arith.constant 0 : i32
    return %arg0, %c0_i32 : i32, i32
  }
  func.func @transform_1(%arg0: i32) -> (i32, i32) {
    %c0_i32 = arith.constant 0 : i32
    %c0_i32_0 = arith.constant 0 : i32
    return %arg0, %c0_i32 : i32, i32
  }
  func.func @transform_2(%arg0: i32) -> (i32, i32) {
    %c0_i32 = arith.constant 0 : i32
    %c0_i32_0 = arith.constant 0 : i32
    return %arg0, %c0_i32 : i32, i32
  }
  func.func @transform_3(%arg0: i32) -> (i32, i32, i32) {
    %c0_i32 = arith.constant 0 : i32
    %c0_i32_0 = arith.constant 0 : i32
    %c0_i32_1 = arith.constant 0 : i32
    %c0_i32_2 = arith.constant 0 : i32
    return %c0_i32, %c0_i32_0, %c0_i32_1 : i32, i32, i32
  }
  func.func @transform_4(%arg0: i32) -> (i32, i32) {
    %c0_i32 = arith.constant 0 : i32
    %c0_i32_0 = arith.constant 0 : i32
    return %arg0, %c0_i32 : i32, i32
  }
}

</mosaic_0001>

<bundles_post_ra>
// kernel: tpu_custom_call.1
= control target key start
LH: loop header
LB: loop body
LE: loop exit
PB: predicated region body
PF: predicated region fallthrough
CT: control target
= control target key end

     0   :  { %s11968_s0 = inlined_call_operand.hbm [shape: f32[4096,128], index: 0, kind: input, shape index: {}]   ;;  %s11969_s1 = inlined_call_operand.hbm [shape: f32[4096,128], index: 1, kind: input, shape index: {}]   ;;  %s11970_s2 = inlined_call_operand.hbm [shape: f32[4096,128], index: 2, kind: input, shape index: {}]   ;;  %s11971_s3 = inlined_call_operand.vmem [shape: bf16[3,128,3], index: 3, kind: input, shape index: {}]   ;;  %s11972_s4 = inlined_call_operand.hbm [shape: f32[4096,128], index: 4, kind: output, shape index: {}]  }
   0x1   :  { %12360 = sst [smem:[#allocation306_spill]] %s11968_s0 }
   0x2   :  { %12361 = sst [smem:[#allocation307_spill]] %s11969_s1 }
   0x3   :  { %9 = vsyncpa [#allocation3], 0 }
   0x4   :  { %11 = vsyncpa [#allocation3 + $0x1], 0 }
   0x5   :  { %12 = vsyncpa [#allocation6], 0 }
   0x6   :  { %14 = vsyncpa [#allocation6 + $0x1], 0 }
   0x7   :  { %15 = vsyncpa [#allocation4], 0 }
   0x8   :  { %17 = vsyncpa [#allocation4 + $0x1], 0  ;;  %s7020_s15 = smov 0   ;;  %s7022_s16 = smov 0  }
   0x9   :  { %s7024_s17 = smov 0   ;;  %s7026_s18 = smov 0  }
   0xa LB: > { %12362 = sst [smem:[#allocation12_spill]] %s6978_s17  ;;  %s7041_s19 = sadd.s32 4294967295, %s6982_s18   ;;  %s6982_s18 = sphi %s7026_s18, %s13572_s18   ;;  %s6978_s17 = sphi %s7024_s17, %s13569_s17   ;;  %s6974_s16 = sphi %s7022_s16, %s13571_s16   ;;  %s6970_s15 = sphi %s7020_s15, %s13570_s15  }
   0xb   : > { %s5840_s20 = sadd.s32 4294967294, %s6982_s18   ;;  %s7045_s21 = sadd.s32 1, %s6982_s18  }
   0xc   : > { %s30_s22 = sadd.s32 1, %s6978_s17  ;;  %s27_s23 = ssub.s32 %s6982_s18, %s7045_s21 }
   0xd   : > { %p37_p0 = scmp.ne.s32.totalorder %s6978_s17, %s6974_s16  ;;  %p28_p1 = scmp.eq.s32.totalorder %s27_s23, 0 }
   0xe   : > { %p38_p2 = scmp.eq.s32.totalorder %s6982_s18, 0  ;;  %p43_p3 = scmp.ne.s32.totalorder %s6974_s16, %s6970_s15 }
   0xf   : > { %p44_p4 = scmp.eq.s32.totalorder %s7041_s19, 0  ;;  %p140_p7 = scmp.eq.s32.totalorder %s7041_s19, 7 }
  0x10   : > { %s7057_s24 = scalar_select %p28_p1, %s6978_s17, %s30_s22  }
  0x11   : > { %p39_p5 = por %p38_p2, %p37_p0  ;;  %p7059_p6 = por %p44_p4, %p43_p3 }
  0x12   : > { %12363 = sst [smem:[#allocation13_spill]] %s7057_s24  ;;  %p146_p8 = scmp.eq.s32.totalorder %s5840_s20, 7 }
  0x13   : > { %p6064_p9 = scmp.lt.s32.totalorder %s6982_s18, 8  ;;  %p7065_p10 = por %p140_p7, %p37_p0 }
  0x14   : > { %p7069_p11 = por %p146_p8, %p43_p3  ;;  %s169_s28 = sand.u32 1, %s6978_s17  }
  0x15   : > { %s7075_s29 = sshll.u32 %s6982_s18, 9  ;;  %s7079_s30 = sshll.u32 %s169_s28, 9 }
  0x16   : > { %p7081_p12 = pnand %p6064_p9, %p39_p5  ;;  %s191_s6 = sand.u32 1, %s6982_s18  }
  0x17   : > { %s12368_s1 = sld [smem:[#allocation307_spill]]  ;;  %s195_s10 = scalar_lea.vmem [#allocation5], %s7079_s30 }
  0x18   : > { %s203_s11 = sshll.u32 %s195_s10, 4  ;;  %p5852_p13 = scmp.ge.s32.totalorder %s6982_s18, 1  ;;  %s204_s11 = int_to_ptr.vmem [resolvable:$true] %s203_s11 }
  0x19   : > { %s7092_s13 = scalar_lea.sflag [#allocation6], %s191_s6  ;;  %p6826_p1 = pneg %p7081_p12 }
  0x1d   : > { %s200_s9 = scalar_lea.hbm %s12368_s1, %s7075_s29  ;;  %s6829_s7 = scalar_lea.hbm %s12368_s1, 4096 }
  0x1e   : > { %s201_s12 = sshll.u32 %s200_s9, 4  ;;  %s202_s12 = int_to_ptr.hbm [resolvable:$true] %s201_s12 }
  0x1f   : > { %s6822_s14 = sshra.s32 %s202_s12, 4  ;;  %s6823_s14 = int_to_ptr.hbm [resolvable:$true] %s6822_s14 }
  0x20   : > { %s6824_s20 = scalar_lea.hbm %s6823_s14, 512  ;;  %p6830_p4 = scmp.lt.s32.totalorder %s6823_s14, %s12368_s1 }
  0x21   : > { %p6825_p0 = scmp.ne.s32.totalorder %s6823_s14, %s6824_s20  ;;  %p6831_p5 = scmp.lt.s32.totalorder %s6829_s7, %s6824_s20 }
  0x23   : > { %p6827_p2 = pnand %p6826_p1, %p6825_p0  ;;  %p6832_p7 = por %p6831_p5, %p6830_p4 }
  0x25   : > { %p6828_p3 = pneg %p6827_p2 }
  0x27   : > { %p6833_p8 = pnand %p6832_p7, %p6828_p3 }
  0x29   : > { %6836 = shalt.err (!%p6833_p8)
}
  0x2a   : > { %s11973_s6 = smov 128   ;;  %s6985_s10 = smov 8  }
  0x2b   : > { %6056 = dma.hbm_to_vmem [thread:$0]  (!%p7081_p12), %s202_s12, 8192, %s204_s11, %s7092_s13, %s11973_s6, %s11973_s6, %s6985_s10  }
  0x2c   : > { %p233_p9 = scmp.lt.s32.totalorder %s6982_s18, 9  ;;  %s12369_s0 = sld [smem:[#allocation306_spill]] }
  0x2d   : > { %s173_s8 = scalar_lea.vmem [#allocation2], %s7079_s30  ;;  %s170_s1 = scalar_lea.sflag [#allocation3], %s169_s28 }
  0x2e   : > { %p7118_p0 = pnand %p5852_p13, %p233_p9  ;;  %s181_s9 = sshll.u32 %s173_s8, 4  ;;  %s182_s9 = int_to_ptr.vmem [resolvable:$true] %s181_s9 }
  0x32   : > { %s178_s22 = scalar_lea.hbm %s12369_s0, %s7075_s29  ;;  %s6859_s20 = scalar_lea.hbm %s12369_s0, 4096 }
  0x33   : > { %s179_s7 = sshll.u32 %s178_s22, 4  ;;  %s180_s7 = int_to_ptr.hbm [resolvable:$true] %s179_s7 }
  0x34   : > { %s6852_s24 = sshra.s32 %s180_s7, 4  ;;  %s6853_s24 = int_to_ptr.hbm [resolvable:$true] %s6852_s24 }
  0x35   : > { %s6854_s11 = scalar_lea.hbm %s6853_s24, 512  ;;  %p6860_p13 = scmp.lt.s32.totalorder %s6853_s24, %s12369_s0 }
  0x36   : > { %p6855_p2 = scmp.ne.s32.totalorder %s6853_s24, %s6854_s11  ;;  %p6861_p5 = scmp.lt.s32.totalorder %s6859_s20, %s6854_s11 }
  0x38   : > { %p6857_p3 = pnand %p6855_p2, %p6826_p1  ;;  %p6862_p7 = por %p6861_p5, %p6860_p13 }
  0x3a   : > { %p6858_p4 = pneg %p6857_p3 }
  0x3c   : > { %p6863_p8 = pnand %p6862_p7, %p6858_p4 }
  0x3e   : > { %6866 = shalt.err (!%p6863_p8)
}
  0x3f   : > { %s12371_s28 = smov 128   ;;  %s222_s14 = scalar_lea.hbm %s11970_s2, %s7075_s29 }
  0x40   : > { %6053 = dma.hbm_to_vmem [thread:$0]  (!%p7081_p12), %s180_s7, 8192, %s182_s9, %s170_s1, %s12371_s28, %s12371_s28, %s6985_s10  }
  0x41   : > { %s217_s17 = scalar_lea.vmem [#allocation7], %s7079_s30  ;;  %s223_s24 = sshll.u32 %s222_s14, 4  ;;  %s224_s24 = int_to_ptr.hbm [resolvable:$true] %s223_s24 }
  0x42   : > { %s225_s6 = sshll.u32 %s217_s17, 4  ;;  %s6882_s11 = sshra.s32 %s224_s24, 4  ;;  %s226_s6 = int_to_ptr.vmem [resolvable:$true] %s225_s6  ;;  %s6883_s11 = int_to_ptr.hbm [resolvable:$true] %s6882_s11 }
  0x43   : > { %s6884_s20 = scalar_lea.hbm %s6883_s11, 512  ;;  %s6889_s1 = scalar_lea.hbm %s11970_s2, 4096 }
  0x44   : > { %p6885_p9 = scmp.ne.s32.totalorder %s6883_s11, %s6884_s20  ;;  %p6890_p4 = scmp.lt.s32.totalorder %s6883_s11, %s11970_s2 }
  0x45   : > { %p6891_p13 = scmp.lt.s32.totalorder %s6889_s1, %s6884_s20 }
  0x46   : > { %p6887_p2 = pnand %p6885_p9, %p6826_p1 }
  0x47   : > { %p6892_p5 = por %p6891_p13, %p6890_p4 }
  0x48   : > { %p6888_p3 = pneg %p6887_p2 }
  0x4a   : > { %p6893_p7 = pnand %p6892_p5, %p6888_p3 }
  0x4c   : > { %6896 = shalt.err (!%p6893_p7)
}
  0x4d   : > { %6059 = dma.hbm_to_vmem [thread:$0]  (!%p7081_p12), %s224_s24, 8192, %s226_s6, %s7092_s13, %s12371_s28, %s12371_s28, %s6985_s10  }
  0x4e   : > { %237 = sbr.rel (%p7118_p0) target bundleno = 2303 (0x8ff), region = 36 }
  0x53   : > { %s7162_s0 = sand.u32 1, %s6974_s16  }
  0x54   : > { %s7165_s17 = sshll.u32 %s7162_s0, 9  ;;  %s240_s29 = scalar_lea.sflag [#allocation3], %s7162_s0 }
  0x55   : > { %s7169_s30 = scalar_lea.vmem [#allocation2], %s7165_s17 }
  0x56   : > { %6957 = dma.done.wait (%p7059_p6), %s240_s29, 8192  }
  0x57   : > { %6959 = vsyncadd (%p7059_p6), %s240_s29, 4294959104  ;;  %s249_s5 = sand.u32 1, %s7041_s19   ;;  %s7177_s10 = scalar_lea.vmem [#allocation5], %s7165_s17 }
  0x58   : > { %s250_s13 = scalar_lea.sflag [#allocation6], %s249_s5 }
  0x59   : > { %6961 = dma.done.wait (%p7059_p6), %s250_s13, 16384  }
  0x5a   : > { %6963 = vsyncadd (%p7059_p6), %s250_s13, 4294950912  ;;  %v6008_v0 = vld [vmem:[%s11971_s3 + $0x78] sm:$0xff]  ;;  %v6007_v3 = vld [vmem:[%s11971_s3 + $0x70] sm:$0xff]  ;;  %s7291_s29 = scalar_lea.vmem [#allocation7], %s7165_s17  ;;  %s6986_s5 = smov 126  }
  0x5b   : > { %v7189_v1 = vld [vmem:[%s11971_s3 + $0x38] sm:$0xff]  ;;  %576 = vmatpush.bf16.msra.mxu0 %v6008_v0  ;;  %6018 = vmatpush.bf16.msra.mxu3 %v6008_v0  ;;  %v7204_v4 = vld [vmem:[%s11971_s3 + $0x30] sm:$0xff]  ;;  %v6006_v6 = vld [vmem:[%s11971_s3 + $0x68] sm:$0xff]  ;;  %s6987_s13 = smov 127   ;;  %s6988_s23 = smov 2  }
  0x5c   : > { %v7194_v2 = vld [vmem:[%s11971_s3 + $0xb8] sm:$0xff]  ;;  %793 = vmatpush.bf16.msra.mxu1 %v7189_v1  ;;  %v7209_v5 = vld [vmem:[%s11971_s3 + $0xb0] sm:$0xff]  ;;  %v5998_v7 = vld [vmem:[%s11971_s3 + $0x28] sm:$0xff]  ;;  %s6989_s28 = smov 1   ;;  %s11508_s8 = scalar_lea.vmem [#allocation8], %s7165_s17 }
  0x5d   : > { %1123 = vmatpush.bf16.msra.mxu2 %v7194_v2  ;;  %v7222_v8 = vld [vmem:[%s11971_s3 + $0xa8] sm:$0xff]  ;;  %v6005_v9 = vld [vmem:[%s11971_s3 + $0x60] sm:$0xff]  ;;  %v6004_v12 = vld [vmem:[%s11971_s3 + $0x58] sm:$0xff]  ;;  %s6017_s17 = sshll.u32 %s7041_s19, 9  ;;  %s5721_s24 = sshll.u32 %s11508_s8, 4  ;;  %s5722_s24 = int_to_ptr.vmem [resolvable:$true] %s5721_s24 }
  0x5e   : > { %v5997_v10 = vld [vmem:[%s11971_s3 + $0x20] sm:$0xff]  ;;  %v5996_v13 = vld [vmem:[%s11971_s3 + $0x18] sm:$0xff]  ;;  %v6003_v15 = vld [vmem:[%s11971_s3 + $0x50] sm:$0xff]  ;;  %s5720_s6 = scalar_lea.hbm %s11972_s4, %s6017_s17  ;;  %s5709_s19 = scalar_lea.sflag [#allocation4], %s7162_s0 }
  0x5f   : > { %577 = vmatpush.bf16.msra.mxu0 %v6007_v3  ;;  %6019 = vmatpush.bf16.msra.mxu3 %v6007_v3  ;;  %v7234_v11 = vld [vmem:[%s11971_s3 + $0xa0] sm:$0xff]  ;;  %v7246_v14 = vld [vmem:[%s11971_s3 + $0x98] sm:$0xff]  ;;  %v5995_v16 = vld [vmem:[%s11971_s3 + $0x10] sm:$0xff]  ;;  %s5723_s11 = sshll.u32 %s5720_s6, 4  ;;  %s6932_s22 = scalar_lea.hbm %s11972_s4, 4096  ;;  %s5724_s11 = int_to_ptr.hbm [resolvable:$true] %s5723_s11 }
  0x60   : > { %794 = vmatpush.bf16.msra.mxu1 %v7204_v4  ;;  %v7258_v17 = vld [vmem:[%s11971_s3 + $0x90] sm:$0xff]  ;;  %v6002_v18 = vld [vmem:[%s11971_s3 + $0x48] sm:$0xff]  ;;  %v6001_v21 = vld [vmem:[%s11971_s3 + $0x40] sm:$0xff]  ;;  %s6926_s25 = sshra.s32 %s5724_s11, 4  ;;  %s6927_s25 = int_to_ptr.hbm [resolvable:$true] %s6926_s25 }
  0x61   : > { %1124 = vmatpush.bf16.msra.mxu2 %v7209_v5  ;;  %v5994_v19 = vld [vmem:[%s11971_s3 + $0x8] sm:$0xff]  ;;  %v5993_v22 = vld [vmem:[%s11971_s3] sm:$0xff]  ;;  %v417_v36 = vld [vmem:[%s7177_s10 + $0x10] sm:$0xff]  ;;  %p6933_p0 = scmp.lt.s32.totalorder %s6927_s25, %s11972_s4 }
  0x62   : > { %v7270_v20 = vld [vmem:[%s11971_s3 + $0x88] sm:$0xff]  ;;  %v7281_v23 = vld [vmem:[%s11971_s3 + $0x80] sm:$0xff]  ;;  %v418_v37 = vld [vmem:[%s7177_s10 + $0x18] sm:$0xff] }
  0x63   : > { %578 = vmatpush.bf16.msra.mxu0 %v6006_v6  ;;  %6020 = vmatpush.bf16.msra.mxu3 %v6006_v6  ;;  %v415_v24 = vld [vmem:[%s7177_s10] sm:$0xff]  ;;  %v416_v25 = vld [vmem:[%s7177_s10 + $0x8] sm:$0xff]  ;;  %v465_v38 = vld [vmem:[%s7177_s10 + $0x190] sm:$0xff]  ;;  %v480_v44 = vpack.c.bf16 %v418_v37, %v417_v36 }
  0x64   : > { %795 = vmatpush.bf16.msra.mxu1 %v5998_v7  ;;  %v463_v26 = vld [vmem:[%s7177_s10 + $0x180] sm:$0xff]  ;;  %v464_v27 = vld [vmem:[%s7177_s10 + $0x188] sm:$0xff]  ;;  %v479_v32 = vpack.c.bf16 %v416_v25, %v415_v24  ;;  %v466_v39 = vld [vmem:[%s7177_s10 + $0x198] sm:$0xff] }
  0x65   : > { %1125 = vmatpush.bf16.msra.mxu2 %v7222_v8  ;;  %v303_v28 = vld [vmem:[%s7169_s30] sm:$0xff]  ;;  %v304_v29 = vld [vmem:[%s7169_s30 + $0x8] sm:$0xff]  ;;  %v503_v33 = vpack.c.bf16 %v464_v27, %v463_v26  ;;  %v305_v40 = vld [vmem:[%s7169_s30 + $0x10] sm:$0xff]  ;;  %v504_v45 = vpack.c.bf16 %v466_v39, %v465_v38 }
  0x66   : > { %v962_v30 = vld [vmem:[%s7291_s29] sm:$0xff]  ;;  %v963_v31 = vld [vmem:[%s7291_s29 + $0x8] sm:$0xff]  ;;  %v367_v34 = vpack.c.bf16 %v304_v29, %v303_v28  ;;  %v306_v41 = vld [vmem:[%s7169_s30 + $0x18] sm:$0xff] }
  0x67   : > { %579 = vmatpush.bf16.msra.mxu0 %v6005_v9  ;;  %6021 = vmatpush.bf16.msra.mxu3 %v6005_v9  ;;  %v1026_v35 = vpack.c.bf16 %v963_v31, %v962_v30  ;;  %v964_v42 = vld [vmem:[%s7291_s29 + $0x10] sm:$0xff]  ;;  %v965_v43 = vld [vmem:[%s7291_s29 + $0x18] sm:$0xff]  ;;  %v368_v46 = vpack.c.bf16 %v306_v41, %v305_v40  ;;  %v419_v48 = vld [vmem:[%s7177_s10 + $0x20] sm:$0xff] }
  0x68   : > { %796 = vmatpush.bf16.msra.mxu1 %v5997_v10  ;;  %v1027_v47 = vpack.c.bf16 %v965_v43, %v964_v42  ;;  %v420_v49 = vld [vmem:[%s7177_s10 + $0x28] sm:$0xff]  ;;  %v467_v50 = vld [vmem:[%s7177_s10 + $0x1a0] sm:$0xff]  ;;  %v421_v60 = vld [vmem:[%s7177_s10 + $0x30] sm:$0xff] }
  0x69   : > { %1126 = vmatpush.bf16.msra.mxu2 %v7234_v11  ;;  %v468_v51 = vld [vmem:[%s7177_s10 + $0x1a8] sm:$0xff]  ;;  %v307_v52 = vld [vmem:[%s7169_s30 + $0x20] sm:$0xff]  ;;  %v481_v56 = vpack.c.bf16 %v420_v49, %v419_v48  ;;  %v422_v61 = vld [vmem:[%s7177_s10 + $0x38] sm:$0xff] }
  0x6a   : > { %v308_v53 = vld [vmem:[%s7169_s30 + $0x28] sm:$0xff]  ;;  %v966_v54 = vld [vmem:[%s7291_s29 + $0x20] sm:$0xff]  ;;  %v505_v57 = vpack.c.bf16 %v468_v51, %v467_v50  ;;  %v469_v62 = vld [vmem:[%s7177_s10 + $0x1b0] sm:$0xff] }
  0x6b   : > { %580 = vmatpush.bf16.msra.mxu0 %v6004_v12  ;;  %6022 = vmatpush.bf16.msra.mxu3 %v6004_v12  ;;  %v967_v55 = vld [vmem:[%s7291_s29 + $0x28] sm:$0xff]  ;;  %v369_v58 = vpack.c.bf16 %v308_v53, %v307_v52  ;;  %v470_v63 = vld [vmem:[%s7177_s10 + $0x1b8] sm:$0xff]  ;;  %v309_v0 = vld [vmem:[%s7169_s30 + $0x30] sm:$0xff] }
  0x6c   : > { %797 = vmatpush.bf16.msra.mxu1 %v5996_v13  ;;  %v1028_v59 = vpack.c.bf16 %v967_v55, %v966_v54  ;;  %v969_v3 = vld [vmem:[%s7291_s29 + $0x38] sm:$0xff]  ;;  %v424_v9 = vld [vmem:[%s7177_s10 + $0x48] sm:$0xff]  ;;  %v311_v12 = vld [vmem:[%s7169_s30 + $0x40] sm:$0xff] }
  0x6d   : > { %1127 = vmatpush.bf16.msra.mxu2 %v7246_v14  ;;  %v474_v24 = vld [vmem:[%s7177_s10 + $0x1d8] sm:$0xff]  ;;  %v313_v25 = vld [vmem:[%s7169_s30 + $0x50] sm:$0xff]  ;;  %v315_v36 = vld [vmem:[%s7169_s30 + $0x60] sm:$0xff] }
  0x6e   : > { %v972_v26 = vld [vmem:[%s7291_s29 + $0x50] sm:$0xff]  ;;  %v973_v27 = vld [vmem:[%s7291_s29 + $0x58] sm:$0xff]  ;;  %v316_v37 = vld [vmem:[%s7169_s30 + $0x68] sm:$0xff] }
  0x6f   : > { %581 = vmatpush.bf16.msra.mxu0 %v6003_v15  ;;  %6023 = vmatpush.bf16.msra.mxu3 %v6003_v15  ;;  %v971_v15 = vld [vmem:[%s7291_s29 + $0x48] sm:$0xff]  ;;  %v1031_v31 = vpack.c.bf16 %v973_v27, %v972_v26  ;;  %v974_v38 = vld [vmem:[%s7291_s29 + $0x60] sm:$0xff]  ;;  %v373_v42 = vpack.c.bf16 %v316_v37, %v315_v36  ;;  %v317_v48 = vld [vmem:[%s7169_s30 + $0x70] sm:$0xff] }
  0x70   : > { %798 = vmatpush.bf16.msra.mxu1 %v5995_v16  ;;  %v975_v39 = vld [vmem:[%s7291_s29 + $0x68] sm:$0xff]  ;;  %v318_v49 = vld [vmem:[%s7169_s30 + $0x78] sm:$0xff]  ;;  %v976_v50 = vld [vmem:[%s7291_s29 + $0x70] sm:$0xff] }
  0x71   : > { %1128 = vmatpush.bf16.msra.mxu2 %v7258_v17  ;;  %v1032_v43 = vpack.c.bf16 %v975_v39, %v974_v38  ;;  %v977_v51 = vld [vmem:[%s7291_s29 + $0x78] sm:$0xff]  ;;  %v374_v54 = vpack.c.bf16 %v318_v49, %v317_v48  ;;  %v355_v39 = vld [vmem:[%s7169_s30 + $0x1a0] sm:$0xff]  ;;  %v324_v48 = vld [vmem:[%s7169_s30 + $0xa8] sm:$0xff] }
  0x72   : > { %v1033_v55 = vpack.c.bf16 %v977_v51, %v976_v50 }
  0x73   : > { %582 = vmatpush.bf16.msra.mxu0 %v6002_v18  ;;  %6024 = vmatpush.bf16.msra.mxu3 %v6002_v18 }
  0x74   : > { %799 = vmatpush.bf16.msra.mxu1 %v5994_v19 }
  0x75   : > { %1129 = vmatpush.bf16.msra.mxu2 %v7270_v20 }
  0x77   : > { %583 = vmatpush.bf16.msra.mxu0 %v6001_v21  ;;  %6025 = vmatpush.bf16.msra.mxu3 %v6001_v21  ;;  %v426_v21 = vld [vmem:[%s7177_s10 + $0x58] sm:$0xff] }
  0x78   : > { %800 = vmatpush.bf16.msra.mxu1 %v5993_v22 }
  0x79   : > { %1130 = vmatpush.bf16.msra.mxu2 %v7281_v23 }
  0x7a   : > { %584 = vmatmul.bf16.vlgmr.msra.gmra.mxu0 %v479_v32  ;;  %704 = vmatmul.bf16.vlgmr.msra.gmra.mxu3 %v503_v33  ;;  %v427_v32 = vld [vmem:[%s7177_s10 + $0x60] sm:$0xff]  ;;  %v428_v33 = vld [vmem:[%s7177_s10 + $0x68] sm:$0xff] }
  0x7b   : > { %6026 = vmatpush.bf16.msrb.mxu3 %v7189_v1  ;;  %801 = vmatmul.bf16.vlgmr.msra.gmra.mxu1 %v367_v34  ;;  %v310_v1 = vld [vmem:[%s7169_s30 + $0x38] sm:$0xff]  ;;  %v475_v34 = vld [vmem:[%s7177_s10 + $0x1e0] sm:$0xff]  ;;  %v485_v40 = vpack.c.bf16 %v428_v33, %v427_v32 }
  0x7c   : > { %1131 = vmatmul.bf16.vlgmr.msra.gmra.mxu2 %v1026_v35  ;;  %v370_v6 = vpack.c.bf16 %v310_v1, %v309_v0  ;;  %v476_v35 = vld [vmem:[%s7177_s10 + $0x1e8] sm:$0xff] }
  0x7d   : > { %v509_v41 = vpack.c.bf16 %v476_v35, %v475_v34 }
  0x7f   : > { %6027 = vmatpush.bf16.msrb.mxu3 %v7204_v4  ;;  %v482_v4 = vpack.c.bf16 %v422_v61, %v421_v60  ;;  %v432_v60 = vld [vmem:[%s7177_s10 + $0x88] sm:$0xff] }
  0x80   : > { %v979_v61 = vld [vmem:[%s7291_s29 + $0x88] sm:$0xff] }
  0x83   : > { %6028 = vmatpush.bf16.msrb.mxu3 %v5998_v7 }
  0x87   : > { %6029 = vmatpush.bf16.msrb.mxu3 %v5997_v10  ;;  %v471_v10 = vld [vmem:[%s7177_s10 + $0x1c0] sm:$0xff] }
  0x8a   : > { %589 = vmatmul.bf16.gmra.mxu0 %v480_v44  ;;  %709 = vmatmul.bf16.gmra.mxu3 %v504_v45  ;;  %v429_v44 = vld [vmem:[%s7177_s10 + $0x70] sm:$0xff]  ;;  %v430_v45 = vld [vmem:[%s7177_s10 + $0x78] sm:$0xff] }
  0x8b   : > { %6030 = vmatpush.bf16.msrb.mxu3 %v5996_v13  ;;  %806 = vmatmul.bf16.gmra.mxu1 %v368_v46  ;;  %v312_v13 = vld [vmem:[%s7169_s30 + $0x48] sm:$0xff]  ;;  %v477_v46 = vld [vmem:[%s7177_s10 + $0x1f0] sm:$0xff]  ;;  %v486_v52 = vpack.c.bf16 %v430_v45, %v429_v44 }
  0x8c   : > { %1136 = vmatmul.bf16.gmra.mxu2 %v1027_v47  ;;  %v371_v18 = vpack.c.bf16 %v312_v13, %v311_v12  ;;  %v478_v47 = vld [vmem:[%s7177_s10 + $0x1f8] sm:$0xff]  ;;  %v353_v13 = vld [vmem:[%s7169_s30 + $0x190] sm:$0xff]  ;;  %v983_v44 = vld [vmem:[%s7291_s29 + $0xa8] sm:$0xff] }
  0x8d   : > { %v510_v53 = vpack.c.bf16 %v478_v47, %v477_v46  ;;  %v323_v47 = vld [vmem:[%s7169_s30 + $0xa0] sm:$0xff] }
  0x8f   : > { %6031 = vmatpush.bf16.msrb.mxu3 %v5995_v16 }
  0x93   : > { %6032 = vmatpush.bf16.msrb.mxu3 %v5994_v19 }
  0x97   : > { %6033 = vmatpush.bf16.msrb.mxu3 %v5993_v22  ;;  %v473_v22 = vld [vmem:[%s7177_s10 + $0x1d0] sm:$0xff] }
  0x98   : > { %v508_v29 = vpack.c.bf16 %v474_v24, %v473_v22  ;;  %v322_v22 = vld [vmem:[%s7169_s30 + $0x98] sm:$0xff] }
  0x9a   : > { %594 = vmatmul.bf16.gmra.mxu0 %v481_v56  ;;  %714 = vmatmul.bf16.gmra.mxu3 %v505_v57  ;;  %v351_v56 = vld [vmem:[%s7169_s30 + $0x180] sm:$0xff]  ;;  %v352_v57 = vld [vmem:[%s7169_s30 + $0x188] sm:$0xff] }
  0x9b   : > { %6034 = vmatpush.bf16.msra.mxu3 %v7194_v2  ;;  %811 = vmatmul.bf16.gmra.mxu1 %v369_v58  ;;  %v968_v2 = vld [vmem:[%s7291_s29 + $0x30] sm:$0xff]  ;;  %v978_v58 = vld [vmem:[%s7291_s29 + $0x80] sm:$0xff]  ;;  %v391_v0 = vpack.c.bf16 %v352_v57, %v351_v56  ;;  %v377_v56 = vpack.c.bf16 %v324_v48, %v323_v47 }
  0x9c   : > { %1141 = vmatmul.bf16.gmra.mxu2 %v1028_v59  ;;  %v1029_v7 = vpack.c.bf16 %v969_v3, %v968_v2  ;;  %v431_v59 = vld [vmem:[%s7177_s10 + $0x80] sm:$0xff]  ;;  %v1034_v3 = vpack.c.bf16 %v979_v61, %v978_v58 }
  0x9d   : > { %v487_v1 = vpack.c.bf16 %v432_v60, %v431_v59 }
  0x9f   : > { %6035 = vmatpush.bf16.msra.mxu3 %v7209_v5  ;;  %v506_v5 = vpack.c.bf16 %v470_v63, %v469_v62  ;;  %v319_v62 = vld [vmem:[%s7169_s30 + $0x80] sm:$0xff]  ;;  %v320_v63 = vld [vmem:[%s7169_s30 + $0x88] sm:$0xff] }
  0xa3   : > { %6036 = vmatpush.bf16.msra.mxu3 %v7222_v8  ;;  %v423_v8 = vld [vmem:[%s7177_s10 + $0x40] sm:$0xff] }
  0xa4   : > { %v483_v16 = vpack.c.bf16 %v424_v9, %v423_v8 }
  0xa7   : > { %6037 = vmatpush.bf16.msra.mxu3 %v7234_v11  ;;  %v472_v11 = vld [vmem:[%s7177_s10 + $0x1c8] sm:$0xff] }
  0xaa   : > { %599 = vmatmul.bf16.gmra.mxu0 %v482_v4  ;;  %719 = vmatmul.bf16.gmra.mxu3 %v506_v5  ;;  %v375_v4 = vpack.c.bf16 %v320_v63, %v319_v62 }
  0xab   : > { %6038 = vmatpush.bf16.msra.mxu3 %v7246_v14  ;;  %816 = vmatmul.bf16.gmra.mxu1 %v370_v6  ;;  %v970_v14 = vld [vmem:[%s7291_s29 + $0x40] sm:$0xff] }
  0xac   : > { %1146 = vmatmul.bf16.gmra.mxu2 %v1029_v7  ;;  %v1030_v19 = vpack.c.bf16 %v971_v15, %v970_v14  ;;  %v354_v14 = vld [vmem:[%s7169_s30 + $0x198] sm:$0xff]  ;;  %v433_v15 = vld [vmem:[%s7177_s10 + $0x90] sm:$0xff] }
  0xaf   : > { %6039 = vmatpush.bf16.msra.mxu3 %v7258_v17  ;;  %v507_v17 = vpack.c.bf16 %v472_v11, %v471_v10 }
  0xb3   : > { %6040 = vmatpush.bf16.msra.mxu3 %v7270_v20  ;;  %v425_v20 = vld [vmem:[%s7177_s10 + $0x50] sm:$0xff] }
  0xb4   : > { %v484_v28 = vpack.c.bf16 %v426_v21, %v425_v20  ;;  %v321_v21 = vld [vmem:[%s7169_s30 + $0x90] sm:$0xff] }
  0xb7   : > { %6041 = vmatpush.bf16.msra.mxu3 %v7281_v23  ;;  %v314_v23 = vld [vmem:[%s7169_s30 + $0x58] sm:$0xff] }
  0xb8   : > { %v372_v30 = vpack.c.bf16 %v314_v23, %v313_v25  ;;  %v392_v25 = vpack.c.bf16 %v354_v14, %v353_v13 }
  0xba   : > { %604 = vmatmul.bf16.gmra.mxu0 %v483_v16  ;;  %724 = vmatmul.bf16.gmra.mxu3 %v507_v17  ;;  %v434_v16 = vld [vmem:[%s7177_s10 + $0x98] sm:$0xff]  ;;  %v980_v17 = vld [vmem:[%s7291_s29 + $0x90] sm:$0xff] }
  0xbb   : > { %821 = vmatmul.bf16.gmra.mxu1 %v371_v18  ;;  %v981_v18 = vld [vmem:[%s7291_s29 + $0x98] sm:$0xff]  ;;  %v488_v23 = vpack.c.bf16 %v434_v16, %v433_v15 }
  0xbc   : > { %1151 = vmatmul.bf16.gmra.mxu2 %v1030_v19 }
  0xca   : > { %609 = vmatmul.bf16.gmra.mxu0 %v484_v28  ;;  %729 = vmatmul.bf16.gmra.mxu3 %v508_v29  ;;  %v1035_v28 = vpack.c.bf16 %v981_v18, %v980_v17 }
  0xcb   : > { %826 = vmatmul.bf16.gmra.mxu1 %v372_v30  ;;  %v376_v30 = vpack.c.bf16 %v322_v22, %v321_v21 }
  0xcc   : > { %1156 = vmatmul.bf16.gmra.mxu2 %v1031_v31 }
  0xda   : > { %614 = vmatmul.bf16.gmra.mxu0 %v485_v40  ;;  %734 = vmatmul.bf16.gmra.mxu3 %v509_v41  ;;  %v356_v40 = vld [vmem:[%s7169_s30 + $0x1a8] sm:$0xff]  ;;  %v435_v41 = vld [vmem:[%s7177_s10 + $0xa0] sm:$0xff] }
  0xdb   : > { %831 = vmatmul.bf16.gmra.mxu1 %v373_v42  ;;  %v436_v42 = vld [vmem:[%s7177_s10 + $0xa8] sm:$0xff]  ;;  %v393_v50 = vpack.c.bf16 %v356_v40, %v355_v39 }
  0xdc   : > { %1161 = vmatmul.bf16.gmra.mxu2 %v1032_v43  ;;  %v982_v43 = vld [vmem:[%s7291_s29 + $0xa0] sm:$0xff]  ;;  %v489_v51 = vpack.c.bf16 %v436_v42, %v435_v41  ;;  %v987_v40 = vld [vmem:[%s7291_s29 + $0xc8] sm:$0xff] }
  0xdd   : > { %v327_v41 = vld [vmem:[%s7169_s30 + $0xc0] sm:$0xff]  ;;  %v328_v42 = vld [vmem:[%s7169_s30 + $0xc8] sm:$0xff] }
  0xea   : > { %619 = vmatmul.bf16.gmra.mxu0 %v486_v52  ;;  %739 = vmatmul.bf16.gmra.mxu3 %v510_v53 }
  0xeb   : > { %836 = vmatmul.bf16.gmra.mxu1 %v374_v54  ;;  %v1036_v54 = vpack.c.bf16 %v983_v44, %v982_v43 }
  0xec   : > { %1166 = vmatmul.bf16.gmra.mxu2 %v1033_v55 }
  0xf7   : > { %v585_v2 = vpop.f32.mrf.mxu0 }
  0xf8   : > { %v802_v5 = vpop.f32.mrf.mxu1 }
  0xf9   : > { %v803_v6 = vadd.f32 %v802_v5, %v585_v2  ;;  %v358_v2 = vld [vmem:[%s7169_s30 + $0x1b8] sm:$0xff]  ;;  %v984_v5 = vld [vmem:[%s7291_s29 + $0xb0] sm:$0xff] }
  0xfa   : > { %921 = vmatmul.bf16.vlgmr.msrb.gmra.mxu3 %v391_v0  ;;  %624 = vmatmul.bf16.gmra.mxu0 %v487_v1  ;;  %v357_v1 = vld [vmem:[%s7169_s30 + $0x1b0] sm:$0xff] }
  0xfb   : > { %841 = vmatmul.bf16.gmra.mxu1 %v375_v4  ;;  %v438_v4 = vld [vmem:[%s7177_s10 + $0xb8] sm:$0xff]  ;;  %v394_v14 = vpack.c.bf16 %v358_v2, %v357_v1  ;;  %v988_v1 = vld [vmem:[%s7291_s29 + $0xd0] sm:$0xff] }
  0xfc   : > { %1171 = vmatmul.bf16.gmra.mxu2 %v1034_v3  ;;  %v437_v3 = vld [vmem:[%s7177_s10 + $0xb0] sm:$0xff]  ;;  %v989_v2 = vld [vmem:[%s7291_s29 + $0xd8] sm:$0xff] }
  0xfd   : > { %v7370_v7 = vpop.f32.mrf.mxu3  ;;  %v490_v15 = vpack.c.bf16 %v438_v4, %v437_v3 }
  0xff   : > { %v1132_v8 = vpop.f32.mrf.mxu2  ;;  %v587_v10 = vpop.f32.mrf.mxu0 }
 0x100   : > { %v1292_v9 = vadd.f32 %v1132_v8, %v803_v6  ;;  %v804_v11 = vpop.f32.mrf.mxu1 }
 0x101   : > { %v805_v19 = vadd.f32 %v804_v11, %v587_v10  ;;  %v325_v10 = vld [vmem:[%s7169_s30 + $0xb0] sm:$0xff]  ;;  %v326_v11 = vld [vmem:[%s7169_s30 + $0xb8] sm:$0xff] }
 0x102   : > { %v7372_v12 = vand.u32 2147483647, %v1292_v9  ;;  %v985_v9 = vld [vmem:[%s7291_s29 + $0xb8] sm:$0xff]  ;;  %v378_v21 = vpack.c.bf16 %v326_v11, %v325_v10 }
 0x104   : > { %12372 = vst [vmem:[#allocation14_spill] sm:$0xff] %v7372_v12  ;;  %1740 = vrot.lane.b32.xlu1 %v7372_v12, %s6986_s5  ;;  %1484 = vrot.lane.b32.xlu0 %v7372_v12, %s6987_s13 }
 0x105   : > { %v7384_v20 = vpop.f32.mrf.mxu3 }
 0x107   : > { %v1134_v24 = vpop.f32.mrf.mxu2  ;;  %v590_v27 = vpop.f32.mrf.mxu0 }
 0x108   : > { %v1293_v26 = vadd.f32 %v1134_v24, %v805_v19  ;;  %v807_v29 = vpop.f32.mrf.mxu1  ;;  %v1037_v19 = vpack.c.bf16 %v985_v9, %v984_v5  ;;  %v441_v5 = vld [vmem:[%s7177_s10 + $0xd0] sm:$0xff] }
 0x109   : > { %v808_v32 = vadd.f32 %v807_v29, %v590_v27  ;;  %v329_v9 = vld [vmem:[%s7169_s30 + $0xd0] sm:$0xff] }
 0x10a   : > { %v7388_v31 = vand.u32 2147483647, %v1293_v26  ;;  %926 = vmatmul.bf16.gmra.mxu3 %v392_v25  ;;  %629 = vmatmul.bf16.gmra.mxu0 %v488_v23 }
 0x10b   : > { %846 = vmatmul.bf16.gmra.mxu1 %v376_v30  ;;  %v359_v30 = vld [vmem:[%s7169_s30 + $0x1c0] sm:$0xff] }
 0x10c   : > { %12373 = vst [vmem:[#allocation15_spill] sm:$0xff] %v7388_v31  ;;  %1176 = vmatmul.bf16.gmra.mxu2 %v1035_v28  ;;  %1742 = vrot.lane.b32.xlu2 %v7388_v31, %s6986_s5 }
 0x10d   : > { %1486 = vrot.lane.b32.xlu0 %v7388_v31, %s6987_s13  ;;  %v7394_v33 = vpop.f32.mrf.mxu3 }
 0x10f   : > { %v1137_v34 = vpop.f32.mrf.mxu2  ;;  %v592_v36 = vpop.f32.mrf.mxu0 }
 0x110   : > { %v1294_v35 = vadd.f32 %v1137_v34, %v808_v32  ;;  %v809_v37 = vpop.f32.mrf.mxu1  ;;  %v360_v32 = vld [vmem:[%s7169_s30 + $0x1c8] sm:$0xff]  ;;  %v439_v34 = vld [vmem:[%s7177_s10 + $0xc0] sm:$0xff] }
 0x111   : > { %v810_v45 = vadd.f32 %v809_v37, %v592_v36  ;;  %v986_v36 = vld [vmem:[%s7291_s29 + $0xc0] sm:$0xff]  ;;  %v395_v44 = vpack.c.bf16 %v360_v32, %v359_v30 }
 0x112   : > { %v7396_v38 = vand.u32 2147483647, %v1294_v35  ;;  %v440_v35 = vld [vmem:[%s7177_s10 + $0xc8] sm:$0xff] }
 0x114   : > { %12374 = vst [vmem:[#allocation16_spill] sm:$0xff] %v7396_v38  ;;  %1488 = vrot.lane.b32.xlu1 %v7396_v38, %s6987_s13 }
 0x115   : > { %1744 = vrot.lane.b32.xlu0 %v7396_v38, %s6986_s5  ;;  %v7408_v46 = vpop.f32.mrf.mxu3 }
 0x117   : > { %v1139_v49 = vpop.f32.mrf.mxu2  ;;  %v595_v53 = vpop.f32.mrf.mxu0 }
 0x118   : > { %v1295_v52 = vadd.f32 %v1139_v49, %v810_v45  ;;  %v812_v55 = vpop.f32.mrf.mxu1  ;;  %v491_v45 = vpack.c.bf16 %v440_v35, %v439_v34  ;;  %v363_v34 = vld [vmem:[%s7169_s30 + $0x1e0] sm:$0xff]  ;;  %v364_v35 = vld [vmem:[%s7169_s30 + $0x1e8] sm:$0xff] }
 0x119   : > { %v813_v58 = vadd.f32 %v812_v55, %v595_v53 }
 0x11a   : > { %v7412_v57 = vand.u32 2147483647, %v1295_v52  ;;  %931 = vmatmul.bf16.gmra.mxu3 %v393_v50  ;;  %634 = vmatmul.bf16.gmra.mxu0 %v489_v51  ;;  %v1038_v50 = vpack.c.bf16 %v987_v40, %v986_v36  ;;  %v379_v51 = vpack.c.bf16 %v328_v42, %v327_v41  ;;  %v397_v41 = vpack.c.bf16 %v364_v35, %v363_v34  ;;  %v333_v34 = vld [vmem:[%s7169_s30 + $0xf0] sm:$0xff] }
 0x11b   : > { %851 = vmatmul.bf16.gmra.mxu1 %v377_v56 }
 0x11c   : > { %12375 = vst [vmem:[#allocation17_spill] sm:$0xff] %v7412_v57  ;;  %1490 = vrot.lane.b32.xlu1 %v7412_v57, %s6987_s13  ;;  %1181 = vmatmul.bf16.gmra.mxu2 %v1036_v54 }
 0x11d   : > { %v7416_v59 = vpop.f32.mrf.mxu3 }
 0x11f   : > { %v1142_v60 = vpop.f32.mrf.mxu2  ;;  %v597_v62 = vpop.f32.mrf.mxu0 }
 0x120   : > { %v1296_v61 = vadd.f32 %v1142_v60, %v813_v58  ;;  %v814_v63 = vpop.f32.mrf.mxu1 }
 0x121   : > { %v815_v6 = vadd.f32 %v814_v63, %v597_v62  ;;  %v361_v62 = vld [vmem:[%s7169_s30 + $0x1d0] sm:$0xff]  ;;  %v362_v63 = vld [vmem:[%s7169_s30 + $0x1d8] sm:$0xff] }
 0x122   : > { %v7418_v0 = vand.u32 2147483647, %v1296_v61  ;;  %v396_v11 = vpack.c.bf16 %v362_v63, %v361_v62  ;;  %v332_v62 = vld [vmem:[%s7169_s30 + $0xe8] sm:$0xff] }
 0x124   : > { %12376 = vst [vmem:[#allocation18_spill] sm:$0xff] %v7418_v0  ;;  %1492 = vrot.lane.b32.xlu2 %v7418_v0, %s6987_s13  ;;  %1746 = vrot.lane.b32.xlu1 %v7412_v57, %s6986_s5 }
 0x125   : > { %v7429_v8 = vpop.f32.mrf.mxu3 }
 0x127   : > { %v1144_v13 = vpop.f32.mrf.mxu2  ;;  %v600_v17 = vpop.f32.mrf.mxu0 }
 0x128   : > { %v1297_v16 = vadd.f32 %v1144_v13, %v815_v6  ;;  %v817_v18 = vpop.f32.mrf.mxu1  ;;  %v442_v6 = vld [vmem:[%s7177_s10 + $0xd8] sm:$0xff] }
 0x129   : > { %v818_v24 = vadd.f32 %v817_v18, %v600_v17  ;;  %v492_v13 = vpack.c.bf16 %v442_v6, %v441_v5  ;;  %v1039_v18 = vpack.c.bf16 %v989_v2, %v988_v1  ;;  %v365_v6 = vld [vmem:[%s7169_s30 + $0x1f0] sm:$0xff] }
 0x12a   : > { %v7434_v22 = vand.u32 2147483647, %v1297_v16  ;;  %936 = vmatmul.bf16.gmra.mxu3 %v394_v14  ;;  %639 = vmatmul.bf16.gmra.mxu0 %v490_v15  ;;  %v330_v14 = vld [vmem:[%s7169_s30 + $0xd8] sm:$0xff] }
 0x12b   : > { %856 = vmatmul.bf16.gmra.mxu1 %v378_v21 }
 0x12c   : > { %12377 = vst [vmem:[#allocation19_spill] sm:$0xff] %v7434_v22  ;;  %1748 = vrot.lane.b32.xlu2 %v7418_v0, %s6986_s5  ;;  %1750 = vrot.lane.b32.xlu0 %v7434_v22, %s6986_s5 }
 0x12d   : > { %1186 = vmatmul.bf16.gmra.mxu2 %v1037_v19  ;;  %v7440_v25 = vpop.f32.mrf.mxu3  ;;  %v380_v19 = vpack.c.bf16 %v330_v14, %v329_v9  ;;  %v366_v9 = vld [vmem:[%s7169_s30 + $0x1f8] sm:$0xff] }
 0x12f   : > { %v1147_v23 = vpop.f32.mrf.mxu2  ;;  %v602_v27 = vpop.f32.mrf.mxu0 }
 0x130   : > { %v1298_v26 = vadd.f32 %v1147_v23, %v818_v24  ;;  %v819_v28 = vpop.f32.mrf.mxu1 }
 0x131   : > { %v820_v37 = vadd.f32 %v819_v28, %v602_v27 }
 0x132   : > { %v7442_v29 = vand.u32 2147483647, %v1298_v26 }
 0x134   : > { %12378 = vst [vmem:[#allocation20_spill] sm:$0xff] %v7442_v29  ;;  %1494 = vrot.lane.b32.xlu2 %v7434_v22, %s6987_s13  ;;  %1752 = vrot.lane.b32.xlu1 %v7442_v29, %s6986_s5 }
 0x135   : > { %1496 = vrot.lane.b32.xlu0 %v7442_v29, %s6987_s13  ;;  %v7455_v39 = vpop.f32.mrf.mxu3 }
 0x137   : > { %v1149_v43 = vpop.f32.mrf.mxu2  ;;  %v605_v48 = vpop.f32.mrf.mxu0 }
 0x138   : > { %v1299_v47 = vadd.f32 %v1149_v43, %v820_v37  ;;  %v822_v49 = vpop.f32.mrf.mxu1 }
 0x139   : > { %v823_v53 = vadd.f32 %v822_v49, %v605_v48  ;;  %v991_v48 = vld [vmem:[%s7291_s29 + $0xe8] sm:$0xff] }
 0x13a   : > { %v7460_v52 = vand.u32 2147483647, %v1299_v47  ;;  %941 = vmatmul.bf16.gmra.mxu3 %v395_v44  ;;  %644 = vmatmul.bf16.gmra.mxu0 %v491_v45  ;;  %v990_v47 = vld [vmem:[%s7291_s29 + $0xe0] sm:$0xff] }
 0x13b   : > { %861 = vmatmul.bf16.gmra.mxu1 %v379_v51  ;;  %v1040_v49 = vpack.c.bf16 %v991_v48, %v990_v47  ;;  %v443_v51 = vld [vmem:[%s7177_s10 + $0xe0] sm:$0xff] }
 0x13c   : > { %12379 = vst [vmem:[#allocation21_spill] sm:$0xff] %v7460_v52  ;;  %1754 = vrot.lane.b32.xlu2 %v7460_v52, %s6986_s5  ;;  %1498 = vrot.lane.b32.xlu1 %v7460_v52, %s6987_s13 }
 0x13d   : > { %1191 = vmatmul.bf16.gmra.mxu2 %v1038_v50  ;;  %v7466_v54 = vpop.f32.mrf.mxu3 }
 0x13f   : > { %v1152_v55 = vpop.f32.mrf.mxu2  ;;  %v607_v58 = vpop.f32.mrf.mxu0 }
 0x140   : > { %v1300_v56 = vadd.f32 %v1152_v55, %v823_v53  ;;  %v824_v60 = vpop.f32.mrf.mxu1  ;;  %v444_v53 = vld [vmem:[%s7177_s10 + $0xe8] sm:$0xff]  ;;  %v331_v55 = vld [vmem:[%s7169_s30 + $0xe0] sm:$0xff] }
 0x141   : > { %v825_v3 = vadd.f32 %v824_v60, %v607_v58  ;;  %v493_v60 = vpack.c.bf16 %v444_v53, %v443_v51  ;;  %v381_v2 = vpack.c.bf16 %v332_v62, %v331_v55 }
 0x142   : > { %v7468_v61 = vand.u32 2147483647, %v1300_v56 }
 0x144   : > { %12380 = vst [vmem:[#allocation22_spill] sm:$0xff] %v7468_v61  ;;  %1500 = vrot.lane.b32.xlu2 %v7468_v61, %s6987_s13  ;;  %1756 = vrot.lane.b32.xlu0 %v7468_v61, %s6986_s5 }
 0x145   : > { %v7478_v4 = vpop.f32.mrf.mxu3 }
 0x147   : > { %v1154_v10 = vpop.f32.mrf.mxu2  ;;  %v610_v16 = vpop.f32.mrf.mxu0 }
 0x148   : > { %v1301_v15 = vadd.f32 %v1154_v10, %v825_v3  ;;  %v827_v17 = vpop.f32.mrf.mxu1 }
 0x149   : > { %v828_v24 = vadd.f32 %v827_v17, %v610_v16 }
 0x14a   : > { %v7484_v21 = vand.u32 2147483647, %v1301_v15  ;;  %946 = vmatmul.bf16.gmra.mxu3 %v396_v11  ;;  %649 = vmatmul.bf16.gmra.mxu0 %v492_v13  ;;  %v398_v13 = vpack.c.bf16 %v366_v9, %v365_v6 }
 0x14b   : > { %866 = vmatmul.bf16.gmra.mxu1 %v380_v19  ;;  %v992_v19 = vld [vmem:[%s7291_s29 + $0xf0] sm:$0xff] }
 0x14c   : > { %12381 = vst [vmem:[#allocation23_spill] sm:$0xff] %v7484_v21  ;;  %1758 = vrot.lane.b32.xlu1 %v7484_v21, %s6986_s5  ;;  %1502 = vrot.lane.b32.xlu0 %v7484_v21, %s6987_s13 }
 0x14d   : > { %1196 = vmatmul.bf16.gmra.mxu2 %v1039_v18  ;;  %v7490_v23 = vpop.f32.mrf.mxu3 }
 0x14f   : > { %v1157_v26 = vpop.f32.mrf.mxu2  ;;  %v612_v28 = vpop.f32.mrf.mxu0 }
 0x150   : > { %v1302_v27 = vadd.f32 %v1157_v26, %v828_v24  ;;  %v829_v30 = vpop.f32.mrf.mxu1  ;;  %v993_v24 = vld [vmem:[%s7291_s29 + $0xf8] sm:$0xff] }
 0x151   : > { %v830_v36 = vadd.f32 %v829_v30, %v612_v28  ;;  %v1041_v26 = vpack.c.bf16 %v993_v24, %v992_v19  ;;  %v445_v28 = vld [vmem:[%s7177_s10 + $0xf0] sm:$0xff]  ;;  %v446_v30 = vld [vmem:[%s7177_s10 + $0xf8] sm:$0xff] }
 0x152   : > { %v7492_v32 = vand.u32 2147483647, %v1302_v27 }
 0x154   : > { %12382 = vst [vmem:[#allocation24_spill] sm:$0xff] %v7492_v32  ;;  %1760 = vrot.lane.b32.xlu2 %v7492_v32, %s6986_s5  ;;  %1504 = vrot.lane.b32.xlu1 %v7492_v32, %s6987_s13 }
 0x155   : > { %v7500_v37 = vpop.f32.mrf.mxu3 }
 0x157   : > { %v1159_v40 = vpop.f32.mrf.mxu2  ;;  %v615_v43 = vpop.f32.mrf.mxu0 }
 0x158   : > { %v1303_v42 = vadd.f32 %v1159_v40, %v830_v36  ;;  %v832_v44 = vpop.f32.mrf.mxu1  ;;  %v494_v36 = vpack.c.bf16 %v446_v30, %v445_v28  ;;  %v334_v40 = vld [vmem:[%s7169_s30 + $0xf8] sm:$0xff]  ;;  %v1012_v30 = vld [vmem:[%s7291_s29 + $0x190] sm:$0xff] }
 0x159   : > { %v833_v50 = vadd.f32 %v832_v44, %v615_v43 }
 0x15a   : > { %v7502_v45 = vand.u32 2147483647, %v1303_v42  ;;  %951 = vmatmul.bf16.gmra.mxu3 %v397_v41  ;;  %654 = vmatmul.bf16.gmra.mxu0 %v493_v60  ;;  %v382_v42 = vpack.c.bf16 %v334_v40, %v333_v34  ;;  %v1013_v34 = vld [vmem:[%s7291_s29 + $0x198] sm:$0xff] }
 0x15b   : > { %871 = vmatmul.bf16.gmra.mxu1 %v381_v2 }
 0x15c   : > { %12383 = vst [vmem:[#allocation25_spill] sm:$0xff] %v7502_v45  ;;  %1506 = vrot.lane.b32.xlu2 %v7502_v45, %s6987_s13  ;;  %1762 = vrot.lane.b32.xlu0 %v7502_v45, %s6986_s5 }
 0x15d   : > { %1201 = vmatmul.bf16.gmra.mxu2 %v1040_v49  ;;  %v7513_v56 = vpop.f32.mrf.mxu3  ;;  %v1010_v49 = vld [vmem:[%s7291_s29 + $0x180] sm:$0xff] }
 0x15e   : > { %12384 = vst [vmem:[#allocation26_spill] sm:$0xff] %v7513_v56 }
 0x15f   : > { %v1162_v58 = vpop.f32.mrf.mxu2  ;;  %v617_v1 = vpop.f32.mrf.mxu0 }
 0x160   : > { %v1304_v63 = vadd.f32 %v1162_v58, %v833_v50  ;;  %v834_v3 = vpop.f32.mrf.mxu1  ;;  %v1011_v50 = vld [vmem:[%s7291_s29 + $0x188] sm:$0xff] }
 0x161   : > { %v835_v10 = vadd.f32 %v834_v3, %v617_v1  ;;  %v1050_v60 = vpack.c.bf16 %v1011_v50, %v1010_v49  ;;  %v994_v50 = vld [vmem:[%s7291_s29 + $0x100] sm:$0xff] }
 0x162   : > { %v7516_v5 = vand.u32 2147483647, %v1304_v63 }
 0x164   : > { %12385 = vst [vmem:[#allocation27_spill] sm:$0xff] %v7516_v5  ;;  %1764 = vrot.lane.b32.xlu1 %v7516_v5, %s6986_s5  ;;  %1508 = vrot.lane.b32.xlu0 %v7516_v5, %s6987_s13 }
 0x165   : > { %v7524_v16 = vpop.f32.mrf.mxu3 }
 0x166   : > { %12386 = vst [vmem:[#allocation28_spill] sm:$0xff] %v7524_v16  ;;  %v1743_v9 = vpop.permute.xlu2 %1742 }
 0x167   : > { %v1164_v11 = vpop.f32.mrf.mxu2  ;;  %v620_v15 = vpop.f32.mrf.mxu0 }
 0x168   : > { %v1305_v14 = vadd.f32 %v1164_v11, %v835_v10  ;;  %v837_v17 = vpop.f32.mrf.mxu1 }
 0x169   : > { %v838_v27 = vadd.f32 %v837_v17, %v620_v15 }
 0x16a   : > { %v7526_v18 = vand.u32 2147483647, %v1305_v14  ;;  %956 = vmatmul.bf16.gmra.mxu3 %v398_v13  ;;  %659 = vmatmul.bf16.gmra.mxu0 %v494_v36 }
 0x16b   : > { %876 = vmatmul.bf16.gmra.mxu1 %v382_v42 }
 0x16c   : > { %12387 = vst [vmem:[#allocation29_spill] sm:$0xff] %v7526_v18  ;;  %1766 = vrot.lane.b32.xlu2 %v7526_v18, %s6986_s5  ;;  %1510 = vrot.lane.b32.xlu1 %v7526_v18, %s6987_s13 }
 0x16d   : > { %1206 = vmatmul.bf16.gmra.mxu2 %v1041_v26  ;;  %v7540_v48 = vpop.f32.mrf.mxu3 }
 0x16e   : > { %12389 = vst [vmem:[#allocation31_spill] sm:$0xff] %v7540_v48 }
 0x16f   : > { %v1167_v35 = vpop.f32.mrf.mxu2  ;;  %v622_v43 = vpop.f32.mrf.mxu0 }
 0x170   : > { %v1306_v41 = vadd.f32 %v1167_v35, %v838_v27  ;;  %v839_v47 = vpop.f32.mrf.mxu1 }
 0x171   : > { %v840_v51 = vadd.f32 %v839_v47, %v622_v43 }
 0x172   : > { %v7538_v44 = vand.u32 2147483647, %v1306_v41  ;;  %v1051_v41 = vpack.c.bf16 %v1013_v34, %v1012_v30  ;;  %v1014_v34 = vld [vmem:[%s7291_s29 + $0x1a0] sm:$0xff] }
 0x174   : > { %12388 = vst [vmem:[#allocation30_spill] sm:$0xff] %v7538_v44  ;;  %1512 = vrot.lane.b32.xlu2 %v7538_v44, %s6987_s13  ;;  %1768 = vrot.lane.b32.xlu0 %v7538_v44, %s6986_s5 }
 0x175   : > { %v7557_v10 = vpop.f32.mrf.mxu3 }
 0x176   : > { %v1485_v53 = vpop.permute.xlu0 %1484  ;;  %v1741_v62 = vpop.permute.xlu1 %1740  ;;  %12392 = vst [vmem:[#allocation34_spill] sm:$0xff] %v7557_v10 }
 0x177   : > { %v1676_v55 = vmax.f32 %v7372_v12, %v1485_v53  ;;  %v1169_v58 = vpop.f32.mrf.mxu2  ;;  %v625_v2 = vpop.f32.mrf.mxu0 }
 0x178   : > { %v1307_v63 = vadd.f32 %v1169_v58, %v840_v51  ;;  %v842_v6 = vpop.f32.mrf.mxu1  ;;  %v995_v51 = vld [vmem:[%s7291_s29 + $0x108] sm:$0xff] }
 0x179   : > { %v7549_v1 = vmax.f32 %v1676_v55, %v1741_v62  ;;  %v843_v11 = vadd.f32 %v842_v6, %v625_v2  ;;  %v1042_v53 = vpack.c.bf16 %v995_v51, %v994_v50  ;;  %v447_v2 = vld [vmem:[%s7177_s10 + $0x100] sm:$0xff]  ;;  %v448_v6 = vld [vmem:[%s7177_s10 + $0x108] sm:$0xff] }
 0x17a   : > { %v7551_v3 = vand.u32 2147483647, %v1307_v63  ;;  %1251 = vmatmul.bf16.vlgmr.msra.gmra.mxu3 %v1050_v60 }
 0x17b   : > { %12390 = vst [vmem:[#allocation32_spill] sm:$0xff] %v7549_v1 }
 0x17c   : > { %12391 = vst [vmem:[#allocation33_spill] sm:$0xff] %v7551_v3  ;;  %1770 = vrot.lane.b32.xlu1 %v7551_v3, %s6986_s5  ;;  %2636 = vrot.lane.b32.xlu0 %v7549_v1, %s6988_s23 }
 0x17d   : > { %2252 = vrot.lane.b32.xlu2 %v7549_v1, %s6989_s28  ;;  %v7576_v36 = vpop.f32.mrf.mxu3  ;;  %1211 = vmatmul.bf16.gmra.mxu2 %v1042_v53 }
 0x17e   : > { %v7564_v24 = vpop.permute.xlu2 %1492 }
 0x17f   : > { %v1487_v13 = vpop.permute.xlu0 %1486  ;;  %v1172_v15 = vpop.f32.mrf.mxu2 }
 0x180   : > { %v1677_v14 = vmax.f32 %v7388_v31, %v1487_v13  ;;  %v1308_v17 = vadd.f32 %v1172_v15, %v843_v11  ;;  %v627_v27 = vpop.f32.mrf.mxu0  ;;  %v844_v28 = vpop.f32.mrf.mxu1  ;;  %v495_v11 = vpack.c.bf16 %v448_v6, %v447_v2  ;;  %v336_v13 = vld [vmem:[%s7169_s30 + $0x108] sm:$0xff]  ;;  %v1680_v2 = vmax.f32 %v7418_v0, %v7564_v24  ;;  %v1001_v31 = vld [vmem:[%s7291_s29 + $0x138] sm:$0xff] }
 0x181   : > { %v845_v49 = vadd.f32 %v844_v28, %v627_v27 }
 0x182   : > { %v7562_v19 = vmax.f32 %v1677_v14, %v1743_v9  ;;  %v7566_v26 = vand.u32 2147483647, %v1308_v17  ;;  %v335_v9 = vld [vmem:[%s7169_s30 + $0x100] sm:$0xff]  ;;  %664 = vmatmul.bf16.gmra.mxu0 %v495_v11 }
 0x183   : > { %v383_v15 = vpack.c.bf16 %v336_v13, %v335_v9 }
 0x184   : > { %12393 = vst [vmem:[#allocation35_spill] sm:$0xff] %v7562_v19  ;;  %1514 = vrot.lane.b32.xlu0 %v7551_v3, %s6987_s13  ;;  %2638 = vrot.lane.b32.xlu1 %v7562_v19, %s6988_s23 }
 0x185   : > { %12394 = vst [vmem:[#allocation36_spill] sm:$0xff] %v7566_v26  ;;  %1772 = vrot.lane.b32.xlu2 %v7566_v26, %s6986_s5  ;;  %v7593_v17 = vpop.f32.mrf.mxu3  ;;  %881 = vmatmul.bf16.gmra.mxu1 %v383_v15  ;;  %v1016_v15 = vld [vmem:[%s7291_s29 + $0x1b0] sm:$0xff] }
 0x186   : > { %v1489_v35 = vpop.permute.xlu1 %1488  ;;  %v1749_v55 = vpop.permute.xlu2 %1748 }
 0x187   : > { %v1678_v40 = vmax.f32 %v7396_v38, %v1489_v35  ;;  %v1745_v42 = vpop.permute.xlu0 %1744  ;;  %v1174_v43 = vpop.f32.mrf.mxu2  ;;  %v1015_v35 = vld [vmem:[%s7291_s29 + $0x1a8] sm:$0xff]  ;;  %v7620_v6 = vmax.f32 %v1680_v2, %v1749_v55  ;;  %v449_v2 = vld [vmem:[%s7177_s10 + $0x110] sm:$0xff] }
 0x188   : > { %v630_v58 = vpop.f32.mrf.mxu0  ;;  %v1309_v60 = vadd.f32 %v1174_v43, %v845_v49  ;;  %v847_v62 = vpop.f32.mrf.mxu1 }
 0x189   : > { %v7579_v47 = vmax.f32 %v1678_v40, %v1745_v42  ;;  %v848_v14 = vadd.f32 %v847_v62, %v630_v58  ;;  %v1052_v42 = vpack.c.bf16 %v1015_v35, %v1014_v34  ;;  %12399 = vst [vmem:[#allocation41_spill] sm:$0xff] %v7620_v6 }
 0x18a   : > { %1256 = vmatmul.bf16.gmra.mxu3 %v1051_v41  ;;  %v7595_v27 = vand.u32 2147483647, %v1309_v60 }
 0x18b   : > { %12395 = vst [vmem:[#allocation37_spill] sm:$0xff] %v7579_v47 }
 0x18c   : > { %1516 = vrot.lane.b32.xlu1 %v7566_v26, %s6987_s13  ;;  %2254 = vrot.lane.b32.xlu0 %v7562_v19, %s6989_s28  ;;  %12396 = vst [vmem:[#allocation38_spill] sm:$0xff] %v7595_v27  ;;  %v999_v19 = vld [vmem:[%s7291_s29 + $0x128] sm:$0xff] }
 0x18d   : > { %2640 = vrot.lane.b32.xlu2 %v7579_v47, %s6988_s23  ;;  %v7610_v58 = vpop.f32.mrf.mxu3 }
 0x18e   : > { %v1491_v63 = vpop.permute.xlu1 %1490  ;;  %v1495_v40 = vpop.permute.xlu2 %1494 }
 0x18f   : > { %v1177_v28 = vpop.f32.mrf.mxu2  ;;  %v1679_v43 = vmax.f32 %v7412_v57, %v1491_v63  ;;  %v1023_v57 = vld [vmem:[%s7291_s29 + $0x1e8] sm:$0xff] }
 0x190   : > { %v1310_v30 = vadd.f32 %v1177_v28, %v848_v14  ;;  %v632_v50 = vpop.f32.mrf.mxu0  ;;  %v849_v51 = vpop.f32.mrf.mxu1  ;;  %v1017_v28 = vld [vmem:[%s7291_s29 + $0x1b8] sm:$0xff] }
 0x191   : > { %v850_v60 = vadd.f32 %v849_v51, %v632_v50  ;;  %v1053_v24 = vpack.c.bf16 %v1017_v28, %v1016_v15 }
 0x192   : > { %v7606_v49 = vand.u32 2147483647, %v1310_v30 }
 0x194   : > { %1774 = vrot.lane.b32.xlu0 %v7595_v27, %s6986_s5  ;;  %2256 = vrot.lane.b32.xlu1 %v7579_v47, %s6989_s28  ;;  %12397 = vst [vmem:[#allocation39_spill] sm:$0xff] %v7606_v49 }
 0x195   : > { %1518 = vrot.lane.b32.xlu2 %v7595_v27, %s6987_s13  ;;  %v7632_v30 = vpop.f32.mrf.mxu3 }
 0x196   : > { %v1747_v41 = vpop.permute.xlu1 %1746  ;;  %v7622_v9 = vpop.permute.xlu2 %1754 }
 0x197   : > { %v7608_v53 = vmax.f32 %v1679_v43, %v1747_v41  ;;  %v1179_v62 = vpop.f32.mrf.mxu2  ;;  %v1681_v41 = vmax.f32 %v7434_v22, %v1495_v40  ;;  %v997_v43 = vld [vmem:[%s7291_s29 + $0x118] sm:$0xff] }
 0x198   : > { %v1311_v63 = vadd.f32 %v1179_v62, %v850_v60  ;;  %v635_v13 = vpop.f32.mrf.mxu0  ;;  %v852_v14 = vpop.f32.mrf.mxu1 }
 0x199   : > { %12398 = vst [vmem:[#allocation40_spill] sm:$0xff] %v7608_v53  ;;  %v853_v34 = vadd.f32 %v852_v14, %v635_v13  ;;  %v450_v13 = vld [vmem:[%s7177_s10 + $0x118] sm:$0xff]  ;;  %v337_v14 = vld [vmem:[%s7169_s30 + $0x110] sm:$0xff] }
 0x19a   : > { %1261 = vmatmul.bf16.gmra.mxu3 %v1052_v42  ;;  %v7624_v11 = vand.u32 2147483647, %v1311_v63  ;;  %v996_v42 = vld [vmem:[%s7291_s29 + $0x110] sm:$0xff]  ;;  %v496_v28 = vpack.c.bf16 %v450_v13, %v449_v2  ;;  %v1019_v2 = vld [vmem:[%s7291_s29 + $0x1c8] sm:$0xff] }
 0x19b   : > { %v1043_v51 = vpack.c.bf16 %v997_v43, %v996_v42 }
 0x19c   : > { %2642 = vrot.lane.b32.xlu0 %v7608_v53, %s6988_s23  ;;  %1776 = vrot.lane.b32.xlu1 %v7606_v49, %s6986_s5  ;;  %12400 = vst [vmem:[#allocation42_spill] sm:$0xff] %v7624_v11 }
 0x19d   : > { %2258 = vrot.lane.b32.xlu2 %v7608_v53, %s6989_s28  ;;  %1216 = vmatmul.bf16.gmra.mxu2 %v1043_v51  ;;  %v7652_v15 = vpop.f32.mrf.mxu3  ;;  %v1018_v53 = vld [vmem:[%s7291_s29 + $0x1c0] sm:$0xff] }
 0x19e   : > { %v1751_v55 = vpop.permute.xlu0 %1750  ;;  %v7641_v60 = vpop.permute.xlu2 %1500  ;;  %669 = vmatmul.bf16.gmra.mxu0 %v496_v28 }
 0x19f   : > { %v1182_v35 = vpop.f32.mrf.mxu2  ;;  %v7639_v50 = vmax.f32 %v1681_v41, %v1751_v55 }
 0x1a0   : > { %v1312_v62 = vadd.f32 %v1182_v35, %v853_v34  ;;  %v637_v40 = vpop.f32.mrf.mxu0  ;;  %v854_v63 = vpop.f32.mrf.mxu1 }
 0x1a1   : > { %12401 = vst [vmem:[#allocation43_spill] sm:$0xff] %v7639_v50  ;;  %v855_v41 = vadd.f32 %v854_v63, %v637_v40 }
 0x1a2   : > { %v7655_v55 = vand.u32 2147483647, %v1312_v62 }
 0x1a4   : > { %1520 = vrot.lane.b32.xlu0 %v7606_v49, %s6987_s13  ;;  %2644 = vrot.lane.b32.xlu1 %v7620_v6, %s6988_s23  ;;  %12402 = vst [vmem:[#allocation44_spill] sm:$0xff] %v7655_v55 }
 0x1a5   : > { %1778 = vrot.lane.b32.xlu2 %v7624_v11, %s6986_s5  ;;  %v7668_v28 = vpop.f32.mrf.mxu3 }
 0x1a6   : > { %v1753_v35 = vpop.permute.xlu1 %1752 }
 0x1a7   : > { %v1184_v42 = vpop.f32.mrf.mxu2  ;;  %v1497_v43 = vpop.permute.xlu0 %1496 }
 0x1a8   : > { %v1682_v62 = vmax.f32 %v7442_v29, %v1497_v43  ;;  %v1313_v13 = vadd.f32 %v1184_v42, %v855_v41  ;;  %v640_v40 = vpop.f32.mrf.mxu0  ;;  %v857_v63 = vpop.f32.mrf.mxu1 }
 0x1aa   : > { %1266 = vmatmul.bf16.gmra.mxu3 %v1053_v24  ;;  %v338_v24 = vld [vmem:[%s7169_s30 + $0x118] sm:$0xff] }
 0x1ab   : > { %v384_v34 = vpack.c.bf16 %v338_v24, %v337_v14  ;;  %v1054_v14 = vpack.c.bf16 %v1019_v2, %v1018_v53  ;;  %v858_v24 = vadd.f32 %v857_v63, %v640_v40  ;;  %v1021_v40 = vld [vmem:[%s7291_s29 + $0x1d8] sm:$0xff] }
 0x1ac   : > { %2260 = vrot.lane.b32.xlu0 %v7620_v6, %s6989_s28  ;;  %1522 = vrot.lane.b32.xlu1 %v7624_v11, %s6987_s13  ;;  %v7672_v6 = vand.u32 2147483647, %v1313_v13 }
 0x1ad   : > { %2646 = vrot.lane.b32.xlu2 %v7639_v50, %s6988_s23  ;;  %886 = vmatmul.bf16.gmra.mxu1 %v384_v34  ;;  %v7670_v34 = vmax.f32 %v1682_v62, %v1753_v35  ;;  %v7688_v62 = vpop.f32.mrf.mxu3 }
 0x1ae   : > { %v7657_v51 = vpop.permute.xlu2 %1760  ;;  %12404 = vst [vmem:[#allocation46_spill] sm:$0xff] %v7672_v6 }
 0x1af   : > { %12403 = vst [vmem:[#allocation45_spill] sm:$0xff] %v7670_v34 }
 0x1b0   : > { %v1187_v47 = vpop.f32.mrf.mxu2  ;;  %v642_v13 = vpop.f32.mrf.mxu0 }
 0x1b1   : > { %v1314_v53 = vadd.f32 %v1187_v47, %v858_v24  ;;  %v859_v47 = vpop.f32.mrf.mxu1  ;;  %v1684_v24 = vmax.f32 %v7468_v61, %v7641_v60 }
 0x1b3   : > { %v7683_v42 = vand.u32 2147483647, %v1314_v53 }
 0x1b4   : > { %1780 = vrot.lane.b32.xlu0 %v7655_v55, %s6986_s5  ;;  %2262 = vrot.lane.b32.xlu1 %v7639_v50, %s6989_s28  ;;  %v1499_v50 = vpop.permute.xlu1 %1498 }
 0x1b5   : > { %1524 = vrot.lane.b32.xlu2 %v7655_v55, %s6987_s13  ;;  %v1683_v35 = vmax.f32 %v7460_v52, %v1499_v50  ;;  %12405 = vst [vmem:[#allocation47_spill] sm:$0xff] %v7683_v42  ;;  %v1020_v50 = vld [vmem:[%s7291_s29 + $0x1d0] sm:$0xff]  ;;  %v7710_v60 = vpop.f32.mrf.mxu3 }
 0x1b6   : > { %v7681_v41 = vpop.permute.xlu2 %1506  ;;  %v1757_v2 = vpop.permute.xlu0 %1756  ;;  %v1055_v63 = vpack.c.bf16 %v1021_v40, %v1020_v50  ;;  %v451_v40 = vld [vmem:[%s7177_s10 + $0x120] sm:$0xff] }
 0x1b7   : > { %v7686_v43 = vmax.f32 %v1683_v35, %v7622_v9  ;;  %v860_v35 = vadd.f32 %v859_v47, %v642_v13  ;;  %v7704_v1 = vmax.f32 %v1684_v24, %v1757_v2  ;;  %v340_v24 = vld [vmem:[%s7169_s30 + $0x128] sm:$0xff] }
 0x1b8   : > { %v645_v13 = vpop.f32.mrf.mxu0 }
 0x1b9   : > { %12406 = vst [vmem:[#allocation48_spill] sm:$0xff] %v7686_v43  ;;  %v862_v2 = vpop.f32.mrf.mxu1 }
 0x1ba   : > { %1271 = vmatmul.bf16.gmra.mxu3 %v1054_v14  ;;  %v1189_v14 = vpop.f32.mrf.mxu2  ;;  %12407 = vst [vmem:[#allocation49_spill] sm:$0xff] %v7704_v1  ;;  %v863_v61 = vadd.f32 %v862_v2, %v645_v13 }
 0x1bb   : > { %v1315_v47 = vadd.f32 %v1189_v14, %v860_v35  ;;  %v1022_v35 = vld [vmem:[%s7291_s29 + $0x1e0] sm:$0xff] }
 0x1bc   : > { %1782 = vrot.lane.b32.xlu1 %v7672_v6, %s6986_s5  ;;  %2648 = vrot.lane.b32.xlu0 %v7670_v34, %s6988_s23 }
 0x1bd   : > { %2264 = vrot.lane.b32.xlu2 %v7670_v34, %s6989_s28  ;;  %v998_v34 = vld [vmem:[%s7291_s29 + $0x120] sm:$0xff]  ;;  %v7720_v29 = vand.u32 2147483647, %v1315_v47  ;;  %v7731_v47 = vpop.f32.mrf.mxu3 }
 0x1be   : > { %v1759_v53 = vpop.permute.xlu1 %1758  ;;  %v1044_v52 = vpack.c.bf16 %v999_v19, %v998_v34  ;;  %v1503_v22 = vpop.permute.xlu0 %1502  ;;  %v452_v19 = vld [vmem:[%s7177_s10 + $0x128] sm:$0xff]  ;;  %v339_v34 = vld [vmem:[%s7169_s30 + $0x120] sm:$0xff] }
 0x1bf   : > { %12408 = vst [vmem:[#allocation50_spill] sm:$0xff] %v7720_v29  ;;  %v1685_v13 = vmax.f32 %v7484_v21, %v1503_v22  ;;  %v1000_v21 = vld [vmem:[%s7291_s29 + $0x130] sm:$0xff] }
 0x1c0   : > { %1221 = vmatmul.bf16.gmra.mxu2 %v1044_v52 }
 0x1c2   : > { %v1192_v0 = vpop.f32.mrf.mxu2 }
 0x1c3   : > { %v1316_v14 = vadd.f32 %v1192_v0, %v863_v61  ;;  %v647_v0 = vpop.f32.mrf.mxu0  ;;  %v864_v61 = vpop.f32.mrf.mxu1 }
 0x1c4   : > { %2650 = vrot.lane.b32.xlu1 %v7686_v43, %s6988_s23  ;;  %1526 = vrot.lane.b32.xlu0 %v7672_v6, %s6987_s13 }
 0x1c5   : > { %1784 = vrot.lane.b32.xlu2 %v7683_v42, %s6986_s5 }
 0x1c6   : > { %v7698_v9 = vpop.permute.xlu2 %1766  ;;  %v1505_v38 = vpop.permute.xlu1 %1504 }
 0x1ca   : > { %1276 = vmatmul.bf16.gmra.mxu3 %v1055_v63  ;;  %v497_v63 = vpack.c.bf16 %v452_v19, %v451_v40  ;;  %v7735_v40 = vand.u32 2147483647, %v1316_v14  ;;  %v7737_v19 = vmax.f32 %v1685_v13, %v1759_v53  ;;  %v7753_v13 = vpop.f32.mrf.mxu3 }
 0x1cc   : > { %1528 = vrot.lane.b32.xlu1 %v7683_v42, %s6987_s13  ;;  %2266 = vrot.lane.b32.xlu0 %v7686_v43, %s6989_s28  ;;  %v385_v43 = vpack.c.bf16 %v340_v24, %v339_v34  ;;  %12410 = vst [vmem:[#allocation52_spill] sm:$0xff] %v7735_v40  ;;  %v865_v34 = vadd.f32 %v864_v61, %v647_v0  ;;  %v1194_v24 = vpop.f32.mrf.mxu2  ;;  %v650_v0 = vpop.f32.mrf.mxu0 }
 0x1cd   : > { %2652 = vrot.lane.b32.xlu2 %v7704_v1, %s6988_s23  ;;  %674 = vmatmul.bf16.gmra.mxu0 %v497_v63  ;;  %12411 = vst [vmem:[#allocation53_spill] sm:$0xff] %v7737_v19  ;;  %v867_v61 = vpop.f32.mrf.mxu1 }
 0x1ce   : > { %v7714_v50 = vpop.permute.xlu2 %1512  ;;  %891 = vmatmul.bf16.gmra.mxu1 %v385_v43  ;;  %v1763_v52 = vpop.permute.xlu0 %1762  ;;  %v1056_v43 = vpack.c.bf16 %v1023_v57, %v1022_v35  ;;  %v1686_v57 = vmax.f32 %v7492_v32, %v1505_v38  ;;  %v1317_v53 = vadd.f32 %v1194_v24, %v865_v34  ;;  %v1024_v38 = vld [vmem:[%s7291_s29 + $0x1f0] sm:$0xff]  ;;  %v1025_v34 = vld [vmem:[%s7291_s29 + $0x1f8] sm:$0xff]  ;;  %v1687_v32 = vmax.f32 %v7502_v45, %v7681_v41  ;;  %v1003_v45 = vld [vmem:[%s7291_s29 + $0x148] sm:$0xff] }
 0x1d0   : > { %v7751_v35 = vmax.f32 %v1686_v57, %v7657_v51  ;;  %v7773_v12 = vmax.f32 %v1687_v32, %v1763_v52 }
 0x1d2   : > { %12412 = vst [vmem:[#allocation54_spill] sm:$0xff] %v7751_v35  ;;  %v7775_v10 = vpop.f32.mrf.mxu3 }
 0x1d3   : > { %12415 = vst [vmem:[#allocation57_spill] sm:$0xff] %v7773_v12 }
 0x1d4   : > { %1786 = vrot.lane.b32.xlu0 %v7720_v29, %s6986_s5  ;;  %2268 = vrot.lane.b32.xlu1 %v7704_v1, %s6989_s28  ;;  %v1197_v1 = vpop.f32.mrf.mxu2  ;;  %v652_v41 = vpop.f32.mrf.mxu0 }
 0x1d5   : > { %1530 = vrot.lane.b32.xlu2 %v7720_v29, %s6987_s13 }
 0x1d6   : > { %v7739_v63 = vpop.permute.xlu1 %1764  ;;  %v1509_v22 = vpop.permute.xlu0 %1508 }
 0x1d7   : > { %v7733_v2 = vpop.permute.xlu2 %2252 }
 0x1d8   : > { %12409 = vst [vmem:[#allocation51_spill] sm:$0xff] %v7733_v2  ;;  %v1045_v2 = vpack.c.bf16 %v1001_v31, %v1000_v21  ;;  %v453_v31 = vld [vmem:[%s7177_s10 + $0x130] sm:$0xff]  ;;  %v454_v21 = vld [vmem:[%s7177_s10 + $0x138] sm:$0xff] }
 0x1da   : > { %1281 = vmatmul.bf16.gmra.mxu3 %v1056_v43  ;;  %v7755_v43 = vand.u32 2147483647, %v1317_v53  ;;  %v1057_v53 = vpack.c.bf16 %v1025_v34, %v1024_v38  ;;  %1226 = vmatmul.bf16.gmra.mxu2 %v1045_v2  ;;  %v342_v38 = vld [vmem:[%s7169_s30 + $0x138] sm:$0xff] }
 0x1dc   : > { %1788 = vrot.lane.b32.xlu1 %v7735_v40, %s6986_s5  ;;  %2654 = vrot.lane.b32.xlu0 %v7737_v19, %s6988_s23  ;;  %12413 = vst [vmem:[#allocation55_spill] sm:$0xff] %v7755_v43  ;;  %v655_v2 = vpop.f32.mrf.mxu0 }
 0x1dd   : > { %2270 = vrot.lane.b32.xlu2 %v7737_v19, %s6989_s28  ;;  %v868_v19 = vadd.f32 %v867_v61, %v650_v0  ;;  %v869_v0 = vpop.f32.mrf.mxu1  ;;  %v341_v61 = vld [vmem:[%s7169_s30 + $0x130] sm:$0xff] }
 0x1de   : > { %v1511_v51 = vpop.permute.xlu1 %1510 }
 0x1df   : > { %v7748_v14 = vpop.permute.xlu2 %1772  ;;  %v1318_v48 = vadd.f32 %v1197_v1, %v868_v19  ;;  %v498_v19 = vpack.c.bf16 %v454_v21, %v453_v31  ;;  %v1688_v31 = vmax.f32 %v7516_v5, %v1509_v22 }
 0x1e1   : > { %v7793_v34 = vand.u32 2147483647, %v1318_v48  ;;  %679 = vmatmul.bf16.gmra.mxu0 %v498_v19 }
 0x1e3   : > { %12417 = vst [vmem:[#allocation59_spill] sm:$0xff] %v7793_v34 }
 0x1e4   : > { %2656 = vrot.lane.b32.xlu1 %v7751_v35, %s6988_s23  ;;  %1532 = vrot.lane.b32.xlu0 %v7735_v40, %s6987_s13 }
 0x1e5   : > { %1790 = vrot.lane.b32.xlu2 %v7755_v43, %s6986_s5 }
 0x1e6   : > { %v7765_v24 = vpop.permute.xlu0 %1768 }
 0x1e7   : > { %v7767_v57 = vpop.permute.xlu2 %2640 }
 0x1e8   : > { %12414 = vst [vmem:[#allocation56_spill] sm:$0xff] %v7767_v57  ;;  %v1199_v57 = vpop.f32.mrf.mxu2 }
 0x1ea   : > { %1286 = vmatmul.bf16.gmra.mxu3 %v1057_v53  ;;  %v386_v53 = vpack.c.bf16 %v342_v38, %v341_v61  ;;  %v7811_v38 = vmax.f32 %v1688_v31, %v7739_v63 }
 0x1ec   : > { %1534 = vrot.lane.b32.xlu1 %v7755_v43, %s6987_s13  ;;  %2272 = vrot.lane.b32.xlu0 %v7751_v35, %s6989_s28  ;;  %v870_v35 = vadd.f32 %v869_v0, %v652_v41  ;;  %v7808_v0 = vpop.f32.mrf.mxu3  ;;  %12420 = vst [vmem:[#allocation62_spill] sm:$0xff] %v7811_v38 }
 0x1ed   : > { %2658 = vrot.lane.b32.xlu2 %v7773_v12, %s6988_s23  ;;  %896 = vmatmul.bf16.gmra.mxu1 %v386_v53 }
 0x1ee   : > { %v7783_v32 = vpop.permute.xlu1 %1770  ;;  %v7785_v52 = vpop.permute.xlu0 %2636  ;;  %v1319_v48 = vadd.f32 %v1199_v57, %v870_v35  ;;  %v1689_v35 = vmax.f32 %v7526_v18, %v1511_v51  ;;  %v1002_v18 = vld [vmem:[%s7291_s29 + $0x140] sm:$0xff] }
 0x1ef   : > { %12416 = vst [vmem:[#allocation58_spill] sm:$0xff] %v7785_v52  ;;  %v7790_v1 = vpop.permute.xlu2 %1518  ;;  %v872_v52 = vpop.f32.mrf.mxu1 }
 0x1f0   : > { %v873_v19 = vadd.f32 %v872_v52, %v655_v2  ;;  %v7813_v53 = vand.u32 2147483647, %v1319_v48  ;;  %v7831_v31 = vmax.f32 %v1689_v35, %v7698_v9 }
 0x1f2   : > { %12421 = vst [vmem:[#allocation63_spill] sm:$0xff] %v7813_v53 }
 0x1f3   : > { %12424 = vst [vmem:[#allocation66_spill] sm:$0xff] %v7831_v31 }
 0x1f4   : > { %1792 = vrot.lane.b32.xlu0 %v7793_v34, %s6986_s5  ;;  %2274 = vrot.lane.b32.xlu1 %v7773_v12, %s6989_s28  ;;  %v1202_v12 = vpop.f32.mrf.mxu2  ;;  %v7833_v48 = vpop.f32.mrf.mxu3 }
 0x1f5   : > { %1536 = vrot.lane.b32.xlu2 %v7793_v34, %s6987_s13  ;;  %v1320_v22 = vadd.f32 %v1202_v12, %v873_v19  ;;  %12425 = vst [vmem:[#allocation67_spill] sm:$0xff] %v7833_v48 }
 0x1f6   : > { %v7802_v21 = vpop.permute.xlu1 %2638  ;;  %v7804_v61 = vpop.permute.xlu0 %1514 }
 0x1f7   : > { %12418 = vst [vmem:[#allocation60_spill] sm:$0xff] %v7802_v21  ;;  %v7806_v41 = vpop.permute.xlu2 %2258  ;;  %v7828_v2 = vand.u32 2147483647, %v1320_v22  ;;  %v657_v21 = vpop.f32.mrf.mxu0  ;;  %v1690_v22 = vmax.f32 %v7538_v44, %v7714_v50 }
 0x1f8   : > { %12419 = vst [vmem:[#allocation61_spill] sm:$0xff] %v7806_v41  ;;  %v1046_v41 = vpack.c.bf16 %v1003_v45, %v1002_v18  ;;  %v455_v45 = vld [vmem:[%s7177_s10 + $0x140] sm:$0xff]  ;;  %v456_v18 = vld [vmem:[%s7177_s10 + $0x148] sm:$0xff] }
 0x1f9   : > { %12423 = vst [vmem:[#allocation65_spill] sm:$0xff] %v7828_v2  ;;  %v7852_v5 = vmax.f32 %v1690_v22, %v7765_v24  ;;  %v343_v22 = vld [vmem:[%s7169_s30 + $0x140] sm:$0xff] }
 0x1fa   : > { %1231 = vmatmul.bf16.gmra.mxu2 %v1046_v41 }
 0x1fb   : > { %12428 = vst [vmem:[#allocation70_spill] sm:$0xff] %v7852_v5 }
 0x1fc   : > { %1794 = vrot.lane.b32.xlu1 %v7813_v53, %s6986_s5  ;;  %2660 = vrot.lane.b32.xlu0 %v7811_v38, %s6988_s23  ;;  %v1204_v9 = vpop.f32.mrf.mxu2 }
 0x1fd   : > { %2276 = vrot.lane.b32.xlu2 %v7811_v38, %s6989_s28  ;;  %v874_v38 = vpop.f32.mrf.mxu1 }
 0x1fe   : > { %v7822_v57 = vpop.permute.xlu1 %1516  ;;  %v7824_v52 = vpop.permute.xlu0 %2254  ;;  %v875_v35 = vadd.f32 %v874_v38, %v657_v21 }
 0x1ff   : > { %12422 = vst [vmem:[#allocation64_spill] sm:$0xff] %v7824_v52  ;;  %v7826_v63 = vpop.permute.xlu2 %1778  ;;  %v660_v50 = vpop.f32.mrf.mxu0  ;;  %v499_v52 = vpack.c.bf16 %v456_v18, %v455_v45 }
 0x200   : > { %v1321_v38 = vadd.f32 %v1204_v9, %v875_v35  ;;  %v1691_v9 = vmax.f32 %v7551_v3, %v7804_v61  ;;  %v1692_v61 = vmax.f32 %v7566_v26, %v7822_v57 }
 0x201   : > { %684 = vmatmul.bf16.gmra.mxu0 %v499_v52 }
 0x202   : > { %v7872_v48 = vand.u32 2147483647, %v1321_v38 }
 0x204   : > { %2662 = vrot.lane.b32.xlu1 %v7831_v31, %s6988_s23  ;;  %1538 = vrot.lane.b32.xlu0 %v7813_v53, %s6987_s13  ;;  %12431 = vst [vmem:[#allocation73_spill] sm:$0xff] %v7872_v48  ;;  %v1207_v56 = vpop.f32.mrf.mxu2 }
 0x205   : > { %1796 = vrot.lane.b32.xlu2 %v7828_v2, %s6986_s5  ;;  %v877_v21 = vpop.f32.mrf.mxu1 }
 0x206   : > { %v7841_v12 = vpop.permute.xlu1 %2256  ;;  %v7843_v51 = vpop.permute.xlu0 %1774  ;;  %v878_v16 = vadd.f32 %v877_v21, %v660_v50  ;;  %v7893_v21 = vmax.f32 %v1691_v9, %v7783_v32 }
 0x207   : > { %12426 = vst [vmem:[#allocation68_spill] sm:$0xff] %v7841_v12  ;;  %v7845_v19 = vpop.permute.xlu2 %2646  ;;  %v7854_v12 = vpop.f32.mrf.mxu3 }
 0x208   : > { %12427 = vst [vmem:[#allocation69_spill] sm:$0xff] %v7845_v19  ;;  %v1322_v41 = vadd.f32 %v1207_v56, %v878_v16  ;;  %v662_v16 = vpop.f32.mrf.mxu0 }
 0x209   : > { %12429 = vst [vmem:[#allocation71_spill] sm:$0xff] %v7854_v12  ;;  %v344_v12 = vld [vmem:[%s7169_s30 + $0x148] sm:$0xff] }
 0x20a   : > { %v7890_v56 = vand.u32 2147483647, %v1322_v41  ;;  %12435 = vst [vmem:[#allocation77_spill] sm:$0xff] %v7893_v21 }
 0x20c   : > { %1540 = vrot.lane.b32.xlu1 %v7828_v2, %s6987_s13  ;;  %2278 = vrot.lane.b32.xlu0 %v7831_v31, %s6989_s28  ;;  %v387_v31 = vpack.c.bf16 %v344_v12, %v343_v22  ;;  %12434 = vst [vmem:[#allocation76_spill] sm:$0xff] %v7890_v56  ;;  %v1209_v45 = vpop.f32.mrf.mxu2 }
 0x20d   : > { %2664 = vrot.lane.b32.xlu2 %v7852_v5, %s6988_s23  ;;  %v879_v50 = vpop.f32.mrf.mxu1 }
 0x20e   : > { %v7862_v19 = vpop.permute.xlu1 %1776  ;;  %v7864_v24 = vpop.permute.xlu0 %2642  ;;  %901 = vmatmul.bf16.gmra.mxu1 %v387_v31  ;;  %v880_v38 = vadd.f32 %v879_v50, %v662_v16  ;;  %v7912_v16 = vmax.f32 %v1692_v61, %v7748_v14  ;;  %v1693_v14 = vmax.f32 %v7595_v27, %v7790_v1 }
 0x20f   : > { %12430 = vst [vmem:[#allocation72_spill] sm:$0xff] %v7864_v24  ;;  %v7869_v44 = vpop.permute.xlu2 %1524  ;;  %v7886_v12 = vpop.f32.mrf.mxu3  ;;  %v1005_v24 = vld [vmem:[%s7291_s29 + $0x158] sm:$0xff] }
 0x210   : > { %v1323_v32 = vadd.f32 %v1209_v45, %v880_v38  ;;  %12437 = vst [vmem:[#allocation79_spill] sm:$0xff] %v7912_v16  ;;  %v665_v57 = vpop.f32.mrf.mxu0  ;;  %v7933_v3 = vmax.f32 %v1693_v14, %v7843_v51  ;;  %v345_v14 = vld [vmem:[%s7169_s30 + $0x150] sm:$0xff] }
 0x212   : > { %v7914_v50 = vand.u32 2147483647, %v1323_v32  ;;  %12441 = vst [vmem:[#allocation83_spill] sm:$0xff] %v7933_v3 }
 0x214   : > { %1798 = vrot.lane.b32.xlu0 %v7872_v48, %s6986_s5  ;;  %2280 = vrot.lane.b32.xlu1 %v7852_v5, %s6989_s28  ;;  %12438 = vst [vmem:[#allocation80_spill] sm:$0xff] %v7914_v50  ;;  %v1212_v32 = vpop.f32.mrf.mxu2 }
 0x215   : > { %1542 = vrot.lane.b32.xlu2 %v7872_v48, %s6987_s13  ;;  %v882_v38 = vpop.f32.mrf.mxu1 }
 0x216   : > { %v7882_v35 = vpop.permute.xlu1 %2644  ;;  %v7884_v52 = vpop.permute.xlu0 %1520  ;;  %v883_v61 = vadd.f32 %v882_v38, %v665_v57 }
 0x217   : > { %12432 = vst [vmem:[#allocation74_spill] sm:$0xff] %v7882_v35  ;;  %v7888_v31 = vpop.permute.xlu2 %2264  ;;  %v7909_v9 = vpop.f32.mrf.mxu3  ;;  %v1004_v35 = vld [vmem:[%s7291_s29 + $0x150] sm:$0xff] }
 0x218   : > { %12433 = vst [vmem:[#allocation75_spill] sm:$0xff] %v7888_v31  ;;  %v923_v31 = vadd.f32 %v7576_v36, %v7370_v7  ;;  %v1324_v1 = vadd.f32 %v1212_v32, %v883_v61  ;;  %v925_v32 = vadd.f32 %v7593_v17, %v7384_v20 }
 0x21c   : > { %1800 = vrot.lane.b32.xlu1 %v7890_v56, %s6986_s5  ;;  %2666 = vrot.lane.b32.xlu0 %v7893_v21, %s6988_s23  ;;  %v1214_v17 = vpop.f32.mrf.mxu2 }
 0x21d   : > { %2282 = vrot.lane.b32.xlu2 %v7893_v21, %s6989_s28 }
 0x21e   : > { %v7903_v18 = vpop.permute.xlu1 %1522  ;;  %v7905_v22 = vpop.permute.xlu0 %2260 }
 0x21f   : > { %12436 = vst [vmem:[#allocation78_spill] sm:$0xff] %v7905_v22  ;;  %v7907_v41 = vpop.permute.xlu2 %1784  ;;  %v1252_v26 = vpop.f32.mrf.mxu3  ;;  %v7953_v22 = vand.u32 2147483647, %v1324_v1 }
 0x220   : > { %v1340_v57 = vadd.f32 %v1252_v26, %v923_v31  ;;  %v667_v1 = vpop.f32.mrf.mxu0 }
 0x221   : > { %12443 = vst [vmem:[#allocation85_spill] sm:$0xff] %v7953_v22 }
 0x224   : > { %2668 = vrot.lane.b32.xlu1 %v7912_v16, %s6988_s23  ;;  %1544 = vrot.lane.b32.xlu0 %v7890_v56, %s6987_s13 }
 0x225   : > { %1802 = vrot.lane.b32.xlu2 %v7914_v50, %s6986_s5 }
 0x226   : > { %v7922_v45 = vpop.permute.xlu1 %2262  ;;  %v7924_v21 = vpop.permute.xlu0 %1780 }
 0x227   : > { %12439 = vst [vmem:[#allocation81_spill] sm:$0xff] %v7922_v45  ;;  %v7926_v5 = vpop.permute.xlu2 %2652  ;;  %v1047_v45 = vpack.c.bf16 %v1005_v24, %v1004_v35  ;;  %v457_v24 = vld [vmem:[%s7177_s10 + $0x150] sm:$0xff]  ;;  %v458_v35 = vld [vmem:[%s7177_s10 + $0x158] sm:$0xff]  ;;  %v1254_v61 = vpop.f32.mrf.mxu3 }
 0x228   : > { %12440 = vst [vmem:[#allocation82_spill] sm:$0xff] %v7926_v5  ;;  %v500_v36 = vpack.c.bf16 %v458_v35, %v457_v24  ;;  %v346_v5 = vld [vmem:[%s7169_s30 + $0x158] sm:$0xff] }
 0x229   : > { %1236 = vmatmul.bf16.gmra.mxu2 %v1047_v45  ;;  %v388_v27 = vpack.c.bf16 %v346_v5, %v345_v14  ;;  %v1694_v5 = vmax.f32 %v7606_v49, %v7884_v52  ;;  %v884_v52 = vpop.f32.mrf.mxu1  ;;  %v1007_v49 = vld [vmem:[%s7291_s29 + $0x168] sm:$0xff] }
 0x22a   : > { %689 = vmatmul.bf16.gmra.mxu0 %v500_v36  ;;  %v885_v20 = vadd.f32 %v884_v52, %v667_v1 }
 0x22b   : > { %906 = vmatmul.bf16.gmra.mxu1 %v388_v27  ;;  %v7972_v27 = vmax.f32 %v1694_v5, %v7862_v19  ;;  %v928_v5 = vadd.f32 %v7610_v58, %v7394_v33  ;;  %v1217_v33 = vpop.f32.mrf.mxu2  ;;  %v1006_v58 = vld [vmem:[%s7291_s29 + $0x160] sm:$0xff] }
 0x22c   : > { %1546 = vrot.lane.b32.xlu1 %v7914_v50, %s6987_s13  ;;  %2284 = vrot.lane.b32.xlu0 %v7912_v16, %s6989_s28  ;;  %v7955_v16 = vand.u32 2147483647, %v1340_v57  ;;  %v1341_v57 = vadd.f32 %v1254_v61, %v925_v32  ;;  %v670_v61 = vpop.f32.mrf.mxu0 }
 0x22d   : > { %2670 = vrot.lane.b32.xlu2 %v7933_v3, %s6988_s23  ;;  %12447 = vst [vmem:[#allocation89_spill] sm:$0xff] %v7972_v27 }
 0x22e   : > { %v7943_v38 = vpop.permute.xlu1 %1782  ;;  %v7945_v51 = vpop.permute.xlu0 %2648  ;;  %12444 = vst [vmem:[#allocation86_spill] sm:$0xff] %v7955_v16  ;;  %v7988_v14 = vand.u32 2147483647, %v1341_v57  ;;  %v1325_v57 = vadd.f32 %v1214_v17, %v885_v20  ;;  %v1048_v20 = vpack.c.bf16 %v1007_v49, %v1006_v58  ;;  %v460_v49 = vld [vmem:[%s7177_s10 + $0x168] sm:$0xff] }
 0x22f   : > { %12442 = vst [vmem:[#allocation84_spill] sm:$0xff] %v7945_v51  ;;  %v7950_v7 = vpop.permute.xlu2 %1530  ;;  %v1257_v36 = vpop.f32.mrf.mxu3 }
 0x230   : > { %12449 = vst [vmem:[#allocation91_spill] sm:$0xff] %v7988_v14 }
 0x231   : > { %v887_v32 = vpop.f32.mrf.mxu1 }
 0x232   : > { %v888_v51 = vadd.f32 %v887_v32, %v670_v61  ;;  %v347_v32 = vld [vmem:[%s7169_s30 + $0x160] sm:$0xff] }
 0x234   : > { %1580 = vrot.lane.b32.xlu0 %v7955_v16, %s6987_s13  ;;  %2286 = vrot.lane.b32.xlu1 %v7933_v3, %s6989_s28  ;;  %v1342_v3 = vadd.f32 %v1257_v36, %v928_v5  ;;  %v1326_v17 = vadd.f32 %v1217_v33, %v888_v51  ;;  %v1695_v36 = vmax.f32 %v7624_v11, %v7903_v18 }
 0x235   : > { %1548 = vrot.lane.b32.xlu2 %v7953_v22, %s6987_s13 }
 0x236   : > { %v7963_v26 = vpop.permute.xlu1 %2650  ;;  %v7965_v31 = vpop.permute.xlu0 %1526  ;;  %v8031_v51 = vmax.f32 %v1695_v36, %v7826_v63  ;;  %v1696_v63 = vmax.f32 %v7655_v55, %v7869_v44 }
 0x237   : > { %12445 = vst [vmem:[#allocation87_spill] sm:$0xff] %v7963_v26  ;;  %v7969_v45 = vpop.permute.xlu2 %2270 }
 0x238   : > { %12446 = vst [vmem:[#allocation88_spill] sm:$0xff] %v7969_v45  ;;  %v8008_v45 = vand.u32 2147483647, %v1342_v3  ;;  %v459_v3 = vld [vmem:[%s7177_s10 + $0x160] sm:$0xff]  ;;  %v8048_v36 = vmax.f32 %v1696_v63, %v7924_v21 }
 0x239   : > { %1241 = vmatmul.bf16.gmra.mxu2 %v1048_v20  ;;  %v501_v58 = vpack.c.bf16 %v460_v49, %v459_v3  ;;  %12454 = vst [vmem:[#allocation96_spill] sm:$0xff] %v8031_v51  ;;  %v672_v20 = vpop.f32.mrf.mxu0  ;;  %v930_v49 = vadd.f32 %v7632_v30, %v7408_v46 }
 0x23a   : > { %12452 = vst [vmem:[#allocation94_spill] sm:$0xff] %v8008_v45 }
 0x23b   : > { %694 = vmatmul.bf16.gmra.mxu0 %v501_v58  ;;  %12457 = vst [vmem:[#allocation99_spill] sm:$0xff] %v8048_v36 }
 0x23c   : > { %1804 = vrot.lane.b32.xlu0 %v7953_v22, %s6986_s5  ;;  %1836 = vrot.lane.b32.xlu1 %v7955_v16, %s6986_s5 }
 0x23d   : > { %2288 = vrot.lane.b32.xlu2 %v7972_v27, %s6989_s28 }
 0x23e   : > { %v7982_v24 = vpop.permute.xlu1 %1528  ;;  %v7984_v35 = vpop.permute.xlu0 %2266 }
 0x23f   : > { %12448 = vst [vmem:[#allocation90_spill] sm:$0xff] %v7984_v35  ;;  %v7986_v19 = vpop.permute.xlu2 %1790  ;;  %v8028_v35 = vand.u32 2147483647, %v1326_v17  ;;  %v889_v17 = vpop.f32.mrf.mxu1 }
 0x240   : > { %v890_v3 = vadd.f32 %v889_v17, %v672_v20 }
 0x244   : > { %1582 = vrot.lane.b32.xlu1 %v7988_v14, %s6987_s13  ;;  %2672 = vrot.lane.b32.xlu0 %v7972_v27, %s6988_s23  ;;  %v8004_v27 = vand.u32 2147483647, %v1325_v57 }
 0x245   : > { %1838 = vrot.lane.b32.xlu2 %v7988_v14, %s6986_s5 }
 0x246   : > { %v7998_v1 = vpop.permute.xlu1 %2268  ;;  %v8000_v52 = vpop.permute.xlu0 %1786 }
 0x247   : > { %12450 = vst [vmem:[#allocation92_spill] sm:$0xff] %v7998_v1  ;;  %v8002_v26 = vpop.permute.xlu2 %2658 }
 0x248   : > { %12451 = vst [vmem:[#allocation93_spill] sm:$0xff] %v8002_v26  ;;  %v348_v26 = vld [vmem:[%s7169_s30 + $0x168] sm:$0xff] }
 0x249   : > { %v389_v1 = vpack.c.bf16 %v348_v26, %v347_v32  ;;  %v1219_v32 = vpop.f32.mrf.mxu2 }
 0x24a   : > { %v1327_v20 = vadd.f32 %v1219_v32, %v890_v3  ;;  %v1697_v3 = vmax.f32 %v7672_v6, %v7965_v31  ;;  %v675_v31 = vpop.f32.mrf.mxu0  ;;  %v350_v6 = vld [vmem:[%s7169_s30 + $0x178] sm:$0xff] }
 0x24b   : > { %911 = vmatmul.bf16.gmra.mxu1 %v389_v1  ;;  %v1259_v1 = vpop.f32.mrf.mxu3 }
 0x24c   : > { %1806 = vrot.lane.b32.xlu1 %v8004_v27, %s6986_s5  ;;  %1550 = vrot.lane.b32.xlu0 %v8004_v27, %s6987_s13  ;;  %v1343_v44 = vadd.f32 %v1259_v1, %v930_v49  ;;  %v8066_v30 = vand.u32 2147483647, %v1327_v20  ;;  %v1009_v20 = vld [vmem:[%s7291_s29 + $0x178] sm:$0xff] }
 0x24d   : > { %1584 = vrot.lane.b32.xlu2 %v8008_v45, %s6987_s13 }
 0x24e   : > { %v8018_v5 = vpop.permute.xlu1 %1788  ;;  %v8020_v61 = vpop.permute.xlu0 %2654  ;;  %v8064_v46 = vand.u32 2147483647, %v1343_v44  ;;  %v1008_v44 = vld [vmem:[%s7291_s29 + $0x170] sm:$0xff] }
 0x24f   : > { %12453 = vst [vmem:[#allocation95_spill] sm:$0xff] %v8020_v61  ;;  %v8025_v57 = vpop.permute.xlu2 %1536 }
 0x250   : > { %12459 = vst [vmem:[#allocation101_spill] sm:$0xff] %v8064_v46 }
 0x253   : > { %v1262_v32 = vpop.f32.mrf.mxu3 }
 0x254   : > { %2674 = vrot.lane.b32.xlu1 %v8031_v51, %s6988_s23  ;;  %2290 = vrot.lane.b32.xlu0 %v8031_v51, %s6989_s28  ;;  %v8085_v51 = vmax.f32 %v1697_v3, %v7943_v38 }
 0x255   : > { %1808 = vrot.lane.b32.xlu2 %v8028_v35, %s6986_s5 }
 0x256   : > { %v8039_v18 = vpop.permute.xlu1 %2656  ;;  %v8041_v33 = vpop.permute.xlu0 %1532  ;;  %12462 = vst [vmem:[#allocation104_spill] sm:$0xff] %v8085_v51 }
 0x257   : > { %12455 = vst [vmem:[#allocation97_spill] sm:$0xff] %v8039_v18  ;;  %v8043_v26 = vpop.permute.xlu2 %2276  ;;  %v933_v18 = vadd.f32 %v7652_v15, %v7416_v59  ;;  %v349_v59 = vld [vmem:[%s7169_s30 + $0x170] sm:$0xff] }
 0x258   : > { %12456 = vst [vmem:[#allocation98_spill] sm:$0xff] %v8043_v26 }
 0x259   : > { %v1344_v61 = vadd.f32 %v1262_v32, %v933_v18  ;;  %v935_v32 = vadd.f32 %v7668_v28, %v7429_v8  ;;  %v1698_v8 = vmax.f32 %v7683_v42, %v7982_v24 }
 0x25b   : > { %v8105_v26 = vand.u32 2147483647, %v1344_v61 }
 0x25c   : > { %1552 = vrot.lane.b32.xlu1 %v8028_v35, %s6987_s13  ;;  %1840 = vrot.lane.b32.xlu0 %v8008_v45, %s6986_s5 }
 0x25d   : > { %2676 = vrot.lane.b32.xlu2 %v8048_v36, %s6988_s23  ;;  %12464 = vst [vmem:[#allocation106_spill] sm:$0xff] %v8105_v26 }
 0x25e   : > { %v8058_v58 = vpop.permute.xlu1 %1534  ;;  %v8060_v21 = vpop.permute.xlu0 %2272 }
 0x25f   : > { %12458 = vst [vmem:[#allocation100_spill] sm:$0xff] %v8060_v21  ;;  %v8062_v17 = vpop.permute.xlu2 %1796  ;;  %v1222_v21 = vpop.f32.mrf.mxu2 }
 0x264   : > { %1586 = vrot.lane.b32.xlu0 %v8064_v46, %s6987_s13  ;;  %2292 = vrot.lane.b32.xlu1 %v8048_v36, %s6989_s28  ;;  %v1049_v36 = vpack.c.bf16 %v1009_v20, %v1008_v44  ;;  %v461_v44 = vld [vmem:[%s7177_s10 + $0x170] sm:$0xff]  ;;  %v462_v20 = vld [vmem:[%s7177_s10 + $0x178] sm:$0xff] }
 0x265   : > { %1554 = vrot.lane.b32.xlu2 %v8066_v30, %s6987_s13  ;;  %v502_v55 = vpack.c.bf16 %v462_v20, %v461_v44 }
 0x266   : > { %v8074_v63 = vpop.permute.xlu1 %2274  ;;  %v8076_v1 = vpop.permute.xlu0 %1792  ;;  %1246 = vmatmul.bf16.gmra.mxu2 %v1049_v36 }
 0x267   : > { %12460 = vst [vmem:[#allocation102_spill] sm:$0xff] %v8074_v63  ;;  %v8080_v49 = vpop.permute.xlu2 %2664  ;;  %v390_v63 = vpack.c.bf16 %v350_v6, %v349_v59  ;;  %699 = vmatmul.bf16.gmra.mxu0 %v502_v55  ;;  %v1264_v36 = vpop.f32.mrf.mxu3 }
 0x268   : > { %12461 = vst [vmem:[#allocation103_spill] sm:$0xff] %v8080_v49  ;;  %v892_v49 = vpop.f32.mrf.mxu1  ;;  %v1345_v61 = vadd.f32 %v1264_v36, %v935_v32  ;;  %v1224_v20 = vpop.f32.mrf.mxu2  ;;  %v8140_v32 = vmax.f32 %v1698_v8, %v7907_v41  ;;  %v1699_v41 = vmax.f32 %v7720_v29, %v7950_v7 }
 0x269   : > { %v893_v11 = vadd.f32 %v892_v49, %v675_v31  ;;  %916 = vmatmul.bf16.gmra.mxu1 %v390_v63 }
 0x26a   : > { %v8123_v31 = vand.u32 2147483647, %v1345_v61  ;;  %12469 = vst [vmem:[#allocation111_spill] sm:$0xff] %v8140_v32 }
 0x26b   : > { %v1328_v18 = vadd.f32 %v1222_v21, %v893_v11  ;;  %v677_v21 = vpop.f32.mrf.mxu0 }
 0x26c   : > { %1810 = vrot.lane.b32.xlu0 %v8066_v30, %s6986_s5  ;;  %1842 = vrot.lane.b32.xlu1 %v8064_v46, %s6986_s5  ;;  %12467 = vst [vmem:[#allocation109_spill] sm:$0xff] %v8123_v31 }
 0x26d   : > { %2294 = vrot.lane.b32.xlu2 %v8085_v51, %s6989_s28  ;;  %v8121_v11 = vand.u32 2147483647, %v1328_v18 }
 0x26e   : > { %v8095_v38 = vpop.permute.xlu1 %1794  ;;  %v8097_v3 = vpop.permute.xlu0 %2660 }
 0x26f   : > { %12463 = vst [vmem:[#allocation105_spill] sm:$0xff] %v8097_v3  ;;  %v8102_v15 = vpop.permute.xlu2 %1542 }
 0x270   : > { %v894_v49 = vpop.f32.mrf.mxu1 }
 0x271   : > { %v895_v44 = vadd.f32 %v894_v49, %v677_v21 }
 0x273   : > { %v1329_v36 = vadd.f32 %v1224_v20, %v895_v44  ;;  %v680_v24 = vpop.f32.mrf.mxu0 }
 0x274   : > { %1588 = vrot.lane.b32.xlu1 %v8105_v26, %s6987_s13  ;;  %2678 = vrot.lane.b32.xlu0 %v8085_v51, %s6988_s23  ;;  %v1267_v51 = vpop.f32.mrf.mxu3 }
 0x275   : > { %1844 = vrot.lane.b32.xlu2 %v8105_v26, %s6986_s5  ;;  %v8142_v61 = vand.u32 2147483647, %v1329_v36  ;;  %v1227_v36 = vpop.f32.mrf.mxu2 }
 0x276   : > { %v8115_v6 = vpop.permute.xlu1 %2662  ;;  %v8117_v55 = vpop.permute.xlu0 %1538 }
 0x277   : > { %12465 = vst [vmem:[#allocation107_spill] sm:$0xff] %v8115_v6  ;;  %v8119_v63 = vpop.permute.xlu2 %2282  ;;  %v8159_v6 = vmax.f32 %v1699_v41, %v8000_v52 }
 0x278   : > { %12466 = vst [vmem:[#allocation108_spill] sm:$0xff] %v8119_v63  ;;  %v897_v21 = vpop.f32.mrf.mxu1 }
 0x279   : > { %v898_v8 = vadd.f32 %v897_v21, %v680_v24  ;;  %12472 = vst [vmem:[#allocation114_spill] sm:$0xff] %v8159_v6 }
 0x27c   : > { %1812 = vrot.lane.b32.xlu1 %v8121_v11, %s6986_s5  ;;  %1556 = vrot.lane.b32.xlu0 %v8121_v11, %s6987_s13 }
 0x27d   : > { %1590 = vrot.lane.b32.xlu2 %v8123_v31, %s6987_s13 }
 0x27e   : > { %v8133_v28 = vpop.permute.xlu1 %1540  ;;  %v8135_v59 = vpop.permute.xlu0 %2278 }
 0x27f   : > { %12468 = vst [vmem:[#allocation110_spill] sm:$0xff] %v8135_v59  ;;  %v8137_v18 = vpop.permute.xlu2 %1802 }
 0x284   : > { %2680 = vrot.lane.b32.xlu1 %v8140_v32, %s6988_s23  ;;  %2296 = vrot.lane.b32.xlu0 %v8140_v32, %s6989_s28  ;;  %v938_v32 = vadd.f32 %v7688_v62, %v7440_v25 }
 0x285   : > { %1814 = vrot.lane.b32.xlu2 %v8142_v61, %s6986_s5 }
 0x286   : > { %v8150_v49 = vpop.permute.xlu1 %2280  ;;  %v8152_v44 = vpop.permute.xlu0 %1798  ;;  %v1346_v7 = vadd.f32 %v1267_v51, %v938_v32  ;;  %v1700_v32 = vmax.f32 %v7735_v40, %v8041_v33 }
 0x287   : > { %12470 = vst [vmem:[#allocation112_spill] sm:$0xff] %v8150_v49  ;;  %v8154_v20 = vpop.permute.xlu2 %2670  ;;  %v899_v33 = vpop.f32.mrf.mxu1 }
 0x288   : > { %12471 = vst [vmem:[#allocation113_spill] sm:$0xff] %v8154_v20  ;;  %v1330_v20 = vadd.f32 %v1227_v36, %v898_v8  ;;  %v8177_v25 = vand.u32 2147483647, %v1346_v7  ;;  %v1269_v8 = vpop.f32.mrf.mxu3  ;;  %v8194_v36 = vmax.f32 %v1700_v32, %v8018_v5  ;;  %v940_v7 = vadd.f32 %v7710_v60, %v7455_v39  ;;  %v1229_v60 = vpop.f32.mrf.mxu2 }
 0x28a   : > { %v8175_v41 = vand.u32 2147483647, %v1330_v20  ;;  %12474 = vst [vmem:[#allocation116_spill] sm:$0xff] %v8177_v25 }
 0x28b   : > { %12477 = vst [vmem:[#allocation119_spill] sm:$0xff] %v8194_v36 }
 0x28c   : > { %1558 = vrot.lane.b32.xlu1 %v8142_v61, %s6987_s13  ;;  %1846 = vrot.lane.b32.xlu0 %v8123_v31, %s6986_s5 }
 0x28d   : > { %2682 = vrot.lane.b32.xlu2 %v8159_v6, %s6988_s23 }
 0x28e   : > { %v8169_v24 = vpop.permute.xlu1 %1800  ;;  %v8171_v21 = vpop.permute.xlu0 %2666 }
 0x28f   : > { %12473 = vst [vmem:[#allocation115_spill] sm:$0xff] %v8171_v21  ;;  %v8173_v52 = vpop.permute.xlu2 %1548  ;;  %v902_v40 = vpop.f32.mrf.mxu1 }
 0x290   : > { %v1272_v29 = vpop.f32.mrf.mxu3 }
 0x294   : > { %1592 = vrot.lane.b32.xlu0 %v8177_v25, %s6987_s13  ;;  %2298 = vrot.lane.b32.xlu1 %v8159_v6, %s6989_s28  ;;  %v682_v6 = vpop.f32.mrf.mxu0 }
 0x295   : > { %1560 = vrot.lane.b32.xlu2 %v8175_v41, %s6987_s13  ;;  %v900_v39 = vadd.f32 %v899_v33, %v682_v6 }
 0x296   : > { %v8185_v62 = vpop.permute.xlu1 %2668  ;;  %v8187_v51 = vpop.permute.xlu0 %1544 }
 0x297   : > { %12475 = vst [vmem:[#allocation117_spill] sm:$0xff] %v8185_v62  ;;  %v8191_v20 = vpop.permute.xlu2 %2288  ;;  %v1347_v62 = vadd.f32 %v1269_v8, %v940_v7  ;;  %v943_v8 = vadd.f32 %v7731_v47, %v7466_v54  ;;  %v1331_v42 = vadd.f32 %v1229_v60, %v900_v39 }
 0x298   : > { %12476 = vst [vmem:[#allocation118_spill] sm:$0xff] %v8191_v20 }
 0x299   : > { %v8210_v32 = vand.u32 2147483647, %v1347_v62  ;;  %v1348_v33 = vadd.f32 %v1272_v29, %v943_v8  ;;  %v8226_v49 = vand.u32 2147483647, %v1331_v42  ;;  %v1701_v29 = vmax.f32 %v7755_v43, %v8058_v58 }
 0x29b   : > { %12479 = vst [vmem:[#allocation121_spill] sm:$0xff] %v8210_v32  ;;  %v8228_v63 = vand.u32 2147483647, %v1348_v33  ;;  %v8247_v60 = vmax.f32 %v1701_v29, %v7986_v19  ;;  %v1702_v19 = vmax.f32 %v7793_v34, %v8025_v57  ;;  %v1274_v33 = vpop.f32.mrf.mxu3 }
 0x29c   : > { %1816 = vrot.lane.b32.xlu0 %v8175_v41, %s6986_s5  ;;  %1848 = vrot.lane.b32.xlu1 %v8177_v25, %s6986_s5  ;;  %v685_v7 = vpop.f32.mrf.mxu0 }
 0x29d   : > { %2300 = vrot.lane.b32.xlu2 %v8194_v36, %s6989_s28  ;;  %12481 = vst [vmem:[#allocation123_spill] sm:$0xff] %v8228_v63 }
 0x29e   : > { %v8204_v21 = vpop.permute.xlu1 %1546  ;;  %v8206_v3 = vpop.permute.xlu0 %2284  ;;  %12483 = vst [vmem:[#allocation125_spill] sm:$0xff] %v8247_v60 }
 0x29f   : > { %12478 = vst [vmem:[#allocation120_spill] sm:$0xff] %v8206_v3  ;;  %v8208_v5 = vpop.permute.xlu2 %1838  ;;  %v903_v3 = vadd.f32 %v902_v40, %v685_v7  ;;  %v904_v7 = vpop.f32.mrf.mxu1 }
 0x2a4   : > { %1594 = vrot.lane.b32.xlu1 %v8210_v32, %s6987_s13  ;;  %2684 = vrot.lane.b32.xlu0 %v8194_v36, %s6988_s23  ;;  %v1232_v36 = vpop.f32.mrf.mxu2  ;;  %v687_v8 = vpop.f32.mrf.mxu0 }
 0x2a5   : > { %1850 = vrot.lane.b32.xlu2 %v8210_v32, %s6986_s5  ;;  %v1332_v54 = vadd.f32 %v1232_v36, %v903_v3  ;;  %v905_v29 = vadd.f32 %v904_v7, %v687_v8 }
 0x2a6   : > { %v8220_v62 = vpop.permute.xlu1 %2286  ;;  %v8222_v6 = vpop.permute.xlu0 %1580 }
 0x2a7   : > { %12480 = vst [vmem:[#allocation122_spill] sm:$0xff] %v8220_v62  ;;  %v8224_v20 = vpop.permute.xlu2 %1584  ;;  %v8244_v39 = vand.u32 2147483647, %v1332_v54  ;;  %v8264_v54 = vmax.f32 %v1702_v19, %v8076_v1  ;;  %v1277_v19 = vpop.f32.mrf.mxu3 }
 0x2a9   : > { %12482 = vst [vmem:[#allocation124_spill] sm:$0xff] %v8244_v39 }
 0x2aa   : > { %12486 = vst [vmem:[#allocation128_spill] sm:$0xff] %v8264_v54 }
 0x2ac   : > { %1818 = vrot.lane.b32.xlu1 %v8226_v49, %s6986_s5  ;;  %1562 = vrot.lane.b32.xlu0 %v8226_v49, %s6987_s13  ;;  %v1234_v43 = vpop.f32.mrf.mxu2 }
 0x2ad   : > { %1596 = vrot.lane.b32.xlu2 %v8228_v63, %s6987_s13  ;;  %v1333_v1 = vadd.f32 %v1234_v43, %v905_v29  ;;  %v1703_v43 = vmax.f32 %v7813_v53, %v8117_v55  ;;  %v948_v29 = vadd.f32 %v7775_v10, %v7490_v23  ;;  %v907_v55 = vpop.f32.mrf.mxu1 }
 0x2ae   : > { %v8238_v47 = vpop.permute.xlu1 %1836  ;;  %v8240_v42 = vpop.permute.xlu0 %1804 }
 0x2af   : > { %v8242_v40 = vpop.permute.xlu2 %1808  ;;  %v1279_v53 = vpop.f32.mrf.mxu3 }
 0x2b4   : > { %2686 = vrot.lane.b32.xlu1 %v8247_v60, %s6988_s23  ;;  %2302 = vrot.lane.b32.xlu0 %v8247_v60, %s6989_s28  ;;  %v945_v60 = vadd.f32 %v7753_v13, %v7478_v4  ;;  %v8282_v4 = vand.u32 2147483647, %v1333_v1  ;;  %v690_v1 = vpop.f32.mrf.mxu0  ;;  %v1237_v10 = vpop.f32.mrf.mxu2 }
 0x2b5   : > { %1820 = vrot.lane.b32.xlu2 %v8244_v39, %s6986_s5 }
 0x2b6   : > { %v8255_v58 = vpop.permute.xlu1 %1582  ;;  %v8257_v3 = vpop.permute.xlu0 %2672  ;;  %12488 = vst [vmem:[#allocation130_spill] sm:$0xff] %v8282_v4 }
 0x2b7   : > { %12484 = vst [vmem:[#allocation126_spill] sm:$0xff] %v8257_v3  ;;  %v8259_v36 = vpop.permute.xlu2 %2676 }
 0x2b8   : > { %12485 = vst [vmem:[#allocation127_spill] sm:$0xff] %v8259_v36  ;;  %v1349_v36 = vadd.f32 %v1274_v33, %v945_v60  ;;  %v8299_v33 = vmax.f32 %v1703_v43, %v8095_v38  ;;  %v908_v43 = vadd.f32 %v907_v55, %v690_v1 }
 0x2ba   : > { %v8280_v7 = vand.u32 2147483647, %v1349_v36  ;;  %12492 = vst [vmem:[#allocation134_spill] sm:$0xff] %v8299_v33 }
 0x2bc   : > { %1564 = vrot.lane.b32.xlu1 %v8244_v39, %s6987_s13  ;;  %1852 = vrot.lane.b32.xlu0 %v8228_v63, %s6986_s5  ;;  %12487 = vst [vmem:[#allocation129_spill] sm:$0xff] %v8280_v7  ;;  %v1239_v59 = vpop.f32.mrf.mxu2 }
 0x2bd   : > { %2688 = vrot.lane.b32.xlu2 %v8264_v54, %s6988_s23 }
 0x2be   : > { %v8274_v57 = vpop.permute.xlu1 %1806  ;;  %v8276_v3 = vpop.permute.xlu0 %1550 }
 0x2bf   : > { %v8278_v8 = vpop.permute.xlu2 %1554 }
 0x2c4   : > { %1598 = vrot.lane.b32.xlu0 %v8280_v7, %s6987_s13  ;;  %2304 = vrot.lane.b32.xlu1 %v8264_v54, %s6989_s28  ;;  %v1350_v54 = vadd.f32 %v1277_v19, %v948_v29  ;;  %v950_v19 = vadd.f32 %v7808_v0, %v7500_v37  ;;  %v1704_v37 = vmax.f32 %v7828_v2, %v8133_v28 }
 0x2c5   : > { %1566 = vrot.lane.b32.xlu2 %v8282_v4, %s6987_s13 }
 0x2c6   : > { %v8290_v13 = vpop.permute.xlu1 %2674  ;;  %v8292_v60 = vpop.permute.xlu0 %2290  ;;  %v8315_v23 = vand.u32 2147483647, %v1350_v54  ;;  %v1351_v54 = vadd.f32 %v1279_v53, %v950_v19 }
 0x2c7   : > { %12489 = vst [vmem:[#allocation131_spill] sm:$0xff] %v8290_v13  ;;  %v8296_v36 = vpop.permute.xlu2 %2294 }
 0x2c8   : > { %12490 = vst [vmem:[#allocation132_spill] sm:$0xff] %v8292_v60  ;;  %v909_v60 = vpop.f32.mrf.mxu1  ;;  %v8333_v62 = vand.u32 2147483647, %v1351_v54 }
 0x2c9   : > { %12491 = vst [vmem:[#allocation133_spill] sm:$0xff] %v8296_v36  ;;  %v1334_v36 = vadd.f32 %v1237_v10, %v908_v43  ;;  %v692_v10 = vpop.f32.mrf.mxu0 }
 0x2ca   : > { %12493 = vst [vmem:[#allocation135_spill] sm:$0xff] %v8315_v23 }
 0x2cb   : > { %v8331_v43 = vand.u32 2147483647, %v1334_v36  ;;  %12496 = vst [vmem:[#allocation138_spill] sm:$0xff] %v8333_v62 }
 0x2cc   : > { %1822 = vrot.lane.b32.xlu0 %v8282_v4, %s6986_s5  ;;  %1854 = vrot.lane.b32.xlu1 %v8280_v7, %s6986_s5 }
 0x2cd   : > { %2306 = vrot.lane.b32.xlu2 %v8299_v33, %s6989_s28  ;;  %12495 = vst [vmem:[#allocation137_spill] sm:$0xff] %v8331_v43 }
 0x2ce   : > { %v8309_v13 = vpop.permute.xlu1 %1552  ;;  %v8311_v34 = vpop.permute.xlu0 %1840 }
 0x2cf   : > { %v8313_v38 = vpop.permute.xlu2 %1844 }
 0x2d1   : > { %v695_v28 = vpop.f32.mrf.mxu0 }
 0x2d4   : > { %1600 = vrot.lane.b32.xlu1 %v8315_v23, %s6987_s13  ;;  %2690 = vrot.lane.b32.xlu0 %v8299_v33, %s6988_s23  ;;  %v910_v33 = vadd.f32 %v909_v60, %v692_v10  ;;  %v8350_v60 = vmax.f32 %v1704_v37, %v8062_v17  ;;  %v912_v10 = vpop.f32.mrf.mxu1  ;;  %v1705_v17 = vmax.f32 %v7872_v48, %v8102_v15 }
 0x2d5   : > { %1856 = vrot.lane.b32.xlu2 %v8315_v23, %s6986_s5  ;;  %v913_v37 = vadd.f32 %v912_v10, %v695_v28  ;;  %v12503_v23 = vld [vmem:[#allocation67_spill] sm:$0xff] }
 0x2d6   : > { %v8325_v29 = vpop.permute.xlu1 %2292  ;;  %v8327_v1 = vpop.permute.xlu0 %1586  ;;  %v1335_v36 = vadd.f32 %v1239_v59, %v910_v33  ;;  %12497 = vst [vmem:[#allocation139_spill] sm:$0xff] %v8350_v60 }
 0x2d7   : > { %12494 = vst [vmem:[#allocation136_spill] sm:$0xff] %v8325_v29  ;;  %v8329_v55 = vpop.permute.xlu2 %1590  ;;  %v1282_v29 = vpop.f32.mrf.mxu3 }
 0x2d8   : > { %v8352_v54 = vand.u32 2147483647, %v1335_v36  ;;  %v1242_v36 = vpop.f32.mrf.mxu2 }
 0x2da   : > { %12498 = vst [vmem:[#allocation140_spill] sm:$0xff] %v8352_v54 }
 0x2dc   : > { %1824 = vrot.lane.b32.xlu1 %v8331_v43, %s6986_s5  ;;  %1568 = vrot.lane.b32.xlu0 %v8331_v43, %s6987_s13  ;;  %v8369_v43 = vmax.f32 %v1705_v17, %v8152_v44 }
 0x2dd   : > { %1602 = vrot.lane.b32.xlu2 %v8333_v62, %s6987_s13 }
 0x2de   : > { %v8343_v0 = vpop.permute.xlu1 %1842  ;;  %v8345_v53 = vpop.permute.xlu0 %1810  ;;  %12501 = vst [vmem:[#allocation143_spill] sm:$0xff] %v8369_v43 }
 0x2df   : > { %v8347_v19 = vpop.permute.xlu2 %1814 }
 0x2e4   : > { %2692 = vrot.lane.b32.xlu1 %v8350_v60, %s6988_s23  ;;  %2308 = vrot.lane.b32.xlu0 %v8350_v60, %s6989_s28  ;;  %v12502_v60 = vld [vmem:[#allocation26_spill] sm:$0xff] }
 0x2e5   : > { %1826 = vrot.lane.b32.xlu2 %v8352_v54, %s6986_s5  ;;  %v953_v4 = vadd.f32 %v12503_v23, %v12502_v60  ;;  %v1706_v60 = vmax.f32 %v7890_v56, %v8187_v51  ;;  %v914_v51 = vpop.f32.mrf.mxu1 }
 0x2e6   : > { %v8360_v2 = vpop.permute.xlu1 %1588  ;;  %v8362_v59 = vpop.permute.xlu0 %2678 }
 0x2e7   : > { %12499 = vst [vmem:[#allocation141_spill] sm:$0xff] %v8362_v59  ;;  %v8364_v33 = vpop.permute.xlu2 %2682  ;;  %v1352_v15 = vadd.f32 %v1282_v29, %v953_v4  ;;  %v12511_v59 = vld [vmem:[#allocation71_spill] sm:$0xff] }
 0x2e8   : > { %12500 = vst [vmem:[#allocation142_spill] sm:$0xff] %v8364_v33  ;;  %v1336_v33 = vadd.f32 %v1242_v36, %v913_v37  ;;  %v1284_v37 = vpop.f32.mrf.mxu3  ;;  %v8404_v36 = vmax.f32 %v1706_v60, %v8169_v24 }
 0x2e9   : > { %v8387_v23 = vand.u32 2147483647, %v1352_v15  ;;  %v12510_v15 = vld [vmem:[#allocation28_spill] sm:$0xff] }
 0x2ea   : > { %v8385_v17 = vand.u32 2147483647, %v1336_v33  ;;  %12509 = vst [vmem:[#allocation147_spill] sm:$0xff] %v8404_v36  ;;  %v955_v48 = vadd.f32 %v12511_v59, %v12510_v15  ;;  %v1244_v15 = vpop.f32.mrf.mxu2 }
 0x2eb   : > { %12505 = vst [vmem:[#allocation67_spill] sm:$0xff] %v8387_v23 }
 0x2ec   : > { %1570 = vrot.lane.b32.xlu1 %v8352_v54, %s6987_s13  ;;  %1858 = vrot.lane.b32.xlu0 %v8333_v62, %s6986_s5  ;;  %12504 = vst [vmem:[#allocation26_spill] sm:$0xff] %v8385_v17 }
 0x2ed   : > { %2694 = vrot.lane.b32.xlu2 %v8369_v43, %s6988_s23 }
 0x2ee   : > { %v8379_v28 = vpop.permute.xlu1 %1812  ;;  %v8381_v10 = vpop.permute.xlu0 %1556 }
 0x2ef   : > { %v8383_v44 = vpop.permute.xlu2 %1560 }
 0x2f4   : > { %1604 = vrot.lane.b32.xlu0 %v8387_v23, %s6987_s13  ;;  %2310 = vrot.lane.b32.xlu1 %v8369_v43, %s6989_s28  ;;  %v697_v43 = vpop.f32.mrf.mxu0 }
 0x2f5   : > { %1572 = vrot.lane.b32.xlu2 %v8385_v17, %s6987_s13  ;;  %v915_v59 = vadd.f32 %v914_v51, %v697_v43 }
 0x2f6   : > { %v8395_v4 = vpop.permute.xlu1 %2680  ;;  %v8397_v29 = vpop.permute.xlu0 %2296 }
 0x2f7   : > { %12506 = vst [vmem:[#allocation144_spill] sm:$0xff] %v8395_v4  ;;  %v8401_v33 = vpop.permute.xlu2 %2300  ;;  %v1353_v4 = vadd.f32 %v1284_v37, %v955_v48  ;;  %v1337_v54 = vadd.f32 %v1244_v15, %v915_v59 }
 0x2f8   : > { %12507 = vst [vmem:[#allocation145_spill] sm:$0xff] %v8397_v29  ;;  %v1287_v29 = vpop.f32.mrf.mxu3 }
 0x2f9   : > { %12508 = vst [vmem:[#allocation146_spill] sm:$0xff] %v8401_v33  ;;  %v8420_v60 = vand.u32 2147483647, %v1353_v4  ;;  %v8436_v39 = vand.u32 2147483647, %v1337_v54 }
 0x2fb   : > { %12512 = vst [vmem:[#allocation28_spill] sm:$0xff] %v8420_v60 }
 0x2fc   : > { %1828 = vrot.lane.b32.xlu0 %v8385_v17, %s6986_s5  ;;  %1860 = vrot.lane.b32.xlu1 %v8387_v23, %s6986_s5  ;;  %v12513_v17 = vld [vmem:[#allocation31_spill] sm:$0xff]  ;;  %v700_v37 = vpop.f32.mrf.mxu0  ;;  %v917_v23 = vpop.f32.mrf.mxu1  ;;  %12514 = vst [vmem:[#allocation71_spill] sm:$0xff] %v8436_v39 }
 0x2fd   : > { %2312 = vrot.lane.b32.xlu2 %v8404_v36, %s6989_s28  ;;  %v958_v48 = vadd.f32 %v7886_v12, %v12513_v17  ;;  %v918_v7 = vadd.f32 %v917_v23, %v700_v37  ;;  %v1707_v17 = vmax.f32 %v7914_v50, %v8204_v21 }
 0x2fe   : > { %v8414_v56 = vpop.permute.xlu1 %1558  ;;  %v8416_v33 = vpop.permute.xlu0 %1846 }
 0x2ff   : > { %v8418_v24 = vpop.permute.xlu2 %1850  ;;  %v1354_v51 = vadd.f32 %v1287_v29, %v958_v48  ;;  %v8457_v15 = vmax.f32 %v1707_v17, %v8137_v18  ;;  %v1724_v48 = vmax.f32 %v7955_v16, %v8222_v6  ;;  %v1708_v6 = vmax.f32 %v7953_v22, %v8173_v52 }
 0x301   : > { %v8438_v63 = vand.u32 2147483647, %v1354_v51  ;;  %12517 = vst [vmem:[#allocation149_spill] sm:$0xff] %v8457_v15  ;;  %v8474_v18 = vmax.f32 %v1724_v48, %v8238_v47  ;;  %v8491_v48 = vmax.f32 %v1708_v6, %v8240_v42 }
 0x303   : > { %12515 = vst [vmem:[#allocation31_spill] sm:$0xff] %v8438_v63 }
 0x304   : > { %1606 = vrot.lane.b32.xlu1 %v8420_v60, %s6987_s13  ;;  %2696 = vrot.lane.b32.xlu0 %v8404_v36, %s6988_s23  ;;  %v1247_v36 = vpop.f32.mrf.mxu2  ;;  %12520 = vst [vmem:[#allocation152_spill] sm:$0xff] %v8474_v18  ;;  %v702_v47 = vpop.f32.mrf.mxu0 }
 0x305   : > { %1862 = vrot.lane.b32.xlu2 %v8420_v60, %s6986_s5  ;;  %v1338_v12 = vadd.f32 %v1247_v36, %v918_v7  ;;  %v919_v17 = vpop.f32.mrf.mxu1  ;;  %12521 = vst [vmem:[#allocation153_spill] sm:$0xff] %v8491_v48 }
 0x306   : > { %v8430_v4 = vpop.permute.xlu1 %2298  ;;  %v8432_v43 = vpop.permute.xlu0 %1592 }
 0x307   : > { %v8434_v62 = vpop.permute.xlu2 %1596  ;;  %v8454_v59 = vand.u32 2147483647, %v1338_v12 }
 0x309   : > { %12516 = vst [vmem:[#allocation148_spill] sm:$0xff] %v8454_v59 }
 0x30c   : > { %1830 = vrot.lane.b32.xlu1 %v8436_v39, %s6986_s5  ;;  %1574 = vrot.lane.b32.xlu0 %v8436_v39, %s6987_s13  ;;  %v1249_v50 = vpop.f32.mrf.mxu2 }
 0x30d   : > { %1608 = vrot.lane.b32.xlu2 %v8438_v63, %s6987_s13 }
 0x30e   : > { %v8448_v29 = vpop.permute.xlu1 %1848  ;;  %v8450_v54 = vpop.permute.xlu0 %1816 }
 0x30f   : > { %v8452_v23 = vpop.permute.xlu2 %1820 }
 0x314   : > { %2698 = vrot.lane.b32.xlu1 %v8457_v15, %s6988_s23  ;;  %2314 = vrot.lane.b32.xlu0 %v8457_v15, %s6989_s28  ;;  %v1289_v15 = vpop.f32.mrf.mxu3 }
 0x315   : > { %1832 = vrot.lane.b32.xlu2 %v8454_v59, %s6986_s5 }
 0x316   : > { %v8465_v21 = vpop.permute.xlu1 %1594  ;;  %v8467_v7 = vpop.permute.xlu0 %2684 }
 0x317   : > { %12518 = vst [vmem:[#allocation150_spill] sm:$0xff] %v8467_v7  ;;  %v8469_v36 = vpop.permute.xlu2 %2688  ;;  %v12522_v7 = vld [vmem:[#allocation34_spill] sm:$0xff] }
 0x318   : > { %12519 = vst [vmem:[#allocation151_spill] sm:$0xff] %v8469_v36  ;;  %v920_v36 = vadd.f32 %v919_v17, %v702_v47  ;;  %v960_v16 = vadd.f32 %v7909_v9, %v12522_v7  ;;  %v1709_v7 = vmax.f32 %v8004_v27, %v8276_v3 }
 0x31a   : > { %v1355_v52 = vadd.f32 %v1289_v15, %v960_v16  ;;  %v1339_v6 = vadd.f32 %v1249_v50, %v920_v36  ;;  %v1725_v16 = vmax.f32 %v7988_v14, %v8255_v58 }
 0x31c   : > { %1576 = vrot.lane.b32.xlu1 %v8454_v59, %s6987_s13  ;;  %1864 = vrot.lane.b32.xlu0 %v8438_v63, %s6986_s5  ;;  %v8507_v17 = vand.u32 2147483647, %v1355_v52  ;;  %v8509_v9 = vand.u32 2147483647, %v1339_v6  ;;  %v8528_v52 = vmax.f32 %v1725_v16, %v8208_v5  ;;  %v8531_v6 = vmax.f32 %v1709_v7, %v8274_v57 }
 0x31d   : > { %2348 = vrot.lane.b32.xlu2 %v8474_v18, %s6989_s28  ;;  %v1726_v5 = vmax.f32 %v8008_v45, %v8224_v20  ;;  %v1710_v16 = vmax.f32 %v8028_v35, %v8309_v13 }
 0x31e   : > { %v8482_v37 = vpop.permute.xlu1 %1818  ;;  %v8484_v51 = vpop.permute.xlu0 %1562  ;;  %12524 = vst [vmem:[#allocation154_spill] sm:$0xff] %v8507_v17 }
 0x31f   : > { %v8486_v12 = vpop.permute.xlu2 %1566  ;;  %12525 = vst [vmem:[#allocation155_spill] sm:$0xff] %v8509_v9  ;;  %v8548_v57 = vmax.f32 %v1726_v5, %v8311_v34  ;;  %v1727_v34 = vmax.f32 %v8064_v46, %v8327_v1  ;;  %v8567_v5 = vmax.f32 %v1710_v16, %v8242_v40  ;;  %v1711_v40 = vmax.f32 %v8066_v30, %v8278_v8 }
 0x320   : > { %12526 = vst [vmem:[#allocation156_spill] sm:$0xff] %v8528_v52  ;;  %v1728_v16 = vmax.f32 %v8105_v26, %v8360_v2  ;;  %v1712_v8 = vmax.f32 %v8121_v11, %v8381_v10 }
 0x321   : > { %12527 = vst [vmem:[#allocation157_spill] sm:$0xff] %v8531_v6 }
 0x322   : > { %12528 = vst [vmem:[#allocation158_spill] sm:$0xff] %v8548_v57 }
 0x323   : > { %12529 = vst [vmem:[#allocation159_spill] sm:$0xff] %v8567_v5 }
 0x324   : > { %2732 = vrot.lane.b32.xlu0 %v8474_v18, %s6988_s23  ;;  %2316 = vrot.lane.b32.xlu1 %v8491_v48, %s6989_s28 }
 0x325   : > { %2700 = vrot.lane.b32.xlu2 %v8491_v48, %s6988_s23 }
 0x326   : > { %v8501_v22 = vpop.permute.xlu1 %2686  ;;  %v8503_v42 = vpop.permute.xlu0 %2302 }
 0x327   : > { %12523 = vst [vmem:[#allocation34_spill] sm:$0xff] %v8501_v22  ;;  %v8505_v47 = vpop.permute.xlu2 %2306 }
 0x32c   : > { %1610 = vrot.lane.b32.xlu0 %v8507_v17, %s6987_s13  ;;  %1866 = vrot.lane.b32.xlu1 %v8507_v17, %s6986_s5 }
 0x32d   : > { %1578 = vrot.lane.b32.xlu2 %v8509_v9, %s6987_s13 }
 0x32e   : > { %v8519_v15 = vpop.permute.xlu1 %1564  ;;  %v8521_v50 = vpop.permute.xlu0 %1852 }
 0x32f   : > { %v8525_v36 = vpop.permute.xlu2 %1856 }
 0x334   : > { %1834 = vrot.lane.b32.xlu0 %v8509_v9, %s6986_s5  ;;  %2734 = vrot.lane.b32.xlu1 %v8528_v52, %s6988_s23 }
 0x335   : > { %2318 = vrot.lane.b32.xlu2 %v8531_v6, %s6989_s28 }
 0x336   : > { %v8539_v58 = vpop.permute.xlu1 %2304  ;;  %v8541_v3 = vpop.permute.xlu0 %1598 }
 0x337   : > { %v8543_v18 = vpop.permute.xlu2 %1602 }
 0x33c   : > { %2350 = vrot.lane.b32.xlu0 %v8528_v52, %s6989_s28  ;;  %2352 = vrot.lane.b32.xlu1 %v8548_v57, %s6989_s28  ;;  %v8570_v52 = vmax.f32 %v1727_v34, %v8343_v0  ;;  %v8587_v0 = vmax.f32 %v1711_v40, %v8345_v53  ;;  %v8606_v40 = vmax.f32 %v1728_v16, %v8313_v38 }
 0x33d   : > { %2736 = vrot.lane.b32.xlu2 %v8548_v57, %s6988_s23  ;;  %v1729_v38 = vmax.f32 %v8123_v31, %v8329_v55  ;;  %v1713_v16 = vmax.f32 %v8142_v61, %v8414_v56 }
 0x33e   : > { %v8558_v7 = vpop.permute.xlu1 %1854  ;;  %v8560_v48 = vpop.permute.xlu0 %1822  ;;  %12530 = vst [vmem:[#allocation160_spill] sm:$0xff] %v8570_v52 }
 0x33f   : > { %v8562_v20 = vpop.permute.xlu2 %1826  ;;  %12533 = vst [vmem:[#allocation163_spill] sm:$0xff] %v8587_v0 }
 0x340   : > { %12534 = vst [vmem:[#allocation164_spill] sm:$0xff] %v8606_v40 }
 0x344   : > { %2702 = vrot.lane.b32.xlu0 %v8531_v6, %s6988_s23  ;;  %2704 = vrot.lane.b32.xlu1 %v8567_v5, %s6988_s23 }
 0x345   : > { %2354 = vrot.lane.b32.xlu2 %v8570_v52, %s6989_s28 }
 0x346   : > { %v8578_v13 = vpop.permute.xlu1 %1600  ;;  %v8580_v57 = vpop.permute.xlu0 %2690 }
 0x347   : > { %12531 = vst [vmem:[#allocation161_spill] sm:$0xff] %v8580_v57  ;;  %v8582_v1 = vpop.permute.xlu2 %2694  ;;  %v12555_v57 = vld [vmem:[#allocation137_spill] sm:$0xff] }
 0x348   : > { %12532 = vst [vmem:[#allocation162_spill] sm:$0xff] %v8582_v1 }
 0x34c   : > { %2320 = vrot.lane.b32.xlu0 %v8567_v5, %s6989_s28  ;;  %2322 = vrot.lane.b32.xlu1 %v8587_v0, %s6989_s28  ;;  %v8609_v5 = vmax.f32 %v1712_v8, %v8379_v28  ;;  %v8626_v28 = vmax.f32 %v1729_v38, %v8416_v33  ;;  %v1730_v33 = vmax.f32 %v8177_v25, %v8432_v43 }
 0x34d   : > { %2706 = vrot.lane.b32.xlu2 %v8587_v0, %s6988_s23  ;;  %v8645_v38 = vmax.f32 %v1713_v16, %v8347_v19  ;;  %v1714_v19 = vmax.f32 %v8175_v41, %v8383_v44  ;;  %v1731_v16 = vmax.f32 %v8210_v32, %v8465_v21  ;;  %v1715_v44 = vmax.f32 %v8226_v49, %v8484_v51 }
 0x34e   : > { %v8597_v34 = vpop.permute.xlu1 %1824  ;;  %v8599_v6 = vpop.permute.xlu0 %1568  ;;  %12535 = vst [vmem:[#allocation165_spill] sm:$0xff] %v8609_v5 }
 0x34f   : > { %v8603_v53 = vpop.permute.xlu2 %1572  ;;  %12537 = vst [vmem:[#allocation167_spill] sm:$0xff] %v8626_v28 }
 0x350   : > { %12538 = vst [vmem:[#allocation168_spill] sm:$0xff] %v8645_v38 }
 0x354   : > { %2738 = vrot.lane.b32.xlu0 %v8570_v52, %s6988_s23  ;;  %2740 = vrot.lane.b32.xlu1 %v8606_v40, %s6988_s23 }
 0x355   : > { %2324 = vrot.lane.b32.xlu2 %v8609_v5, %s6989_s28 }
 0x356   : > { %v8617_v2 = vpop.permute.xlu1 %2692  ;;  %v8619_v10 = vpop.permute.xlu0 %2308 }
 0x357   : > { %12536 = vst [vmem:[#allocation166_spill] sm:$0xff] %v8617_v2  ;;  %v8621_v0 = vpop.permute.xlu2 %2312 }
 0x35c   : > { %2356 = vrot.lane.b32.xlu0 %v8606_v40, %s6989_s28  ;;  %2358 = vrot.lane.b32.xlu1 %v8626_v28, %s6989_s28  ;;  %v8648_v40 = vmax.f32 %v1730_v33, %v8448_v29  ;;  %v8665_v29 = vmax.f32 %v1714_v19, %v8450_v54  ;;  %v8682_v19 = vmax.f32 %v1731_v16, %v8418_v24  ;;  %v12544_v24 = vld [vmem:[#allocation123_spill] sm:$0xff] }
 0x35d   : > { %2742 = vrot.lane.b32.xlu2 %v8626_v28, %s6988_s23  ;;  %v1732_v16 = vmax.f32 %v12544_v24, %v8434_v62  ;;  %v12548_v62 = vld [vmem:[#allocation129_spill] sm:$0xff] }
 0x35e   : > { %v8636_v8 = vpop.permute.xlu1 %1570  ;;  %v8638_v52 = vpop.permute.xlu0 %1858  ;;  %12539 = vst [vmem:[#allocation169_spill] sm:$0xff] %v8648_v40 }
 0x35f   : > { %v8640_v55 = vpop.permute.xlu2 %1862  ;;  %12540 = vst [vmem:[#allocation170_spill] sm:$0xff] %v8665_v29 }
 0x360   : > { %12541 = vst [vmem:[#allocation171_spill] sm:$0xff] %v8682_v19 }
 0x364   : > { %2708 = vrot.lane.b32.xlu0 %v8609_v5, %s6988_s23  ;;  %2710 = vrot.lane.b32.xlu1 %v8645_v38, %s6988_s23 }
 0x365   : > { %2360 = vrot.lane.b32.xlu2 %v8648_v40, %s6989_s28 }
 0x366   : > { %v8656_v56 = vpop.permute.xlu1 %2310  ;;  %v8658_v28 = vpop.permute.xlu0 %1604 }
 0x367   : > { %v8660_v43 = vpop.permute.xlu2 %1608 }
 0x36c   : > { %2326 = vrot.lane.b32.xlu0 %v8645_v38, %s6989_s28  ;;  %2328 = vrot.lane.b32.xlu1 %v8665_v29, %s6989_s28  ;;  %v8685_v38 = vmax.f32 %v1715_v44, %v8482_v37  ;;  %v8702_v37 = vmax.f32 %v1732_v16, %v8521_v50  ;;  %v12546_v44 = vld [vmem:[#allocation124_spill] sm:$0xff]  ;;  %v1733_v50 = vmax.f32 %v12548_v62, %v8541_v3 }
 0x36d   : > { %2712 = vrot.lane.b32.xlu2 %v8665_v29, %s6988_s23 }
 0x36e   : > { %v1861_v33 = vpop.permute.xlu1 %1860  ;;  %v8675_v5 = vpop.permute.xlu0 %1828  ;;  %12542 = vst [vmem:[#allocation172_spill] sm:$0xff] %v8685_v38 }
 0x36f   : > { %v8679_v54 = vpop.permute.xlu2 %1832  ;;  %12545 = vst [vmem:[#allocation174_spill] sm:$0xff] %v8702_v37 }
 0x374   : > { %2744 = vrot.lane.b32.xlu0 %v8648_v40, %s6988_s23  ;;  %2746 = vrot.lane.b32.xlu1 %v8682_v19, %s6988_s23  ;;  %v1716_v40 = vmax.f32 %v12546_v44, %v8519_v15 }
 0x375   : > { %2330 = vrot.lane.b32.xlu2 %v8685_v38, %s6989_s28 }
 0x376   : > { %v8693_v21 = vpop.permute.xlu1 %1606  ;;  %v8695_v51 = vpop.permute.xlu0 %2696  ;;  %v8717_v16 = vmax.f32 %v1716_v40, %v8452_v23  ;;  %v12552_v23 = vld [vmem:[#allocation130_spill] sm:$0xff] }
 0x377   : > { %12543 = vst [vmem:[#allocation173_spill] sm:$0xff] %v8695_v51  ;;  %v8697_v29 = vpop.permute.xlu2 %2348  ;;  %v1717_v40 = vmax.f32 %v12552_v23, %v8486_v12  ;;  %v1718_v12 = vmax.f32 %v12555_v57, %v8599_v6 }
 0x378   : > { %12549 = vst [vmem:[#allocation175_spill] sm:$0xff] %v8717_v16 }
 0x37c   : > { %2362 = vrot.lane.b32.xlu0 %v8682_v19, %s6989_s28  ;;  %2364 = vrot.lane.b32.xlu1 %v8702_v37, %s6989_s28  ;;  %v8720_v19 = vmax.f32 %v1733_v50, %v8558_v7  ;;  %v8737_v7 = vmax.f32 %v1717_v40, %v8560_v48  ;;  %v12554_v50 = vld [vmem:[#allocation135_spill] sm:$0xff]  ;;  %v8755_v40 = vmax.f32 %v1718_v12, %v8597_v34  ;;  %v12562_v12 = vld [vmem:[#allocation140_spill] sm:$0xff] }
 0x37d   : > { %2748 = vrot.lane.b32.xlu2 %v8702_v37, %s6988_s23 }
 0x37e   : > { %v1831_v51 = vpop.permute.xlu1 %1830  ;;  %v1575_v2 = vpop.permute.xlu0 %1574  ;;  %12550 = vst [vmem:[#allocation176_spill] sm:$0xff] %v8720_v19 }
 0x37f   : > { %v8712_v1 = vpop.permute.xlu2 %2700  ;;  %12553 = vst [vmem:[#allocation130_spill] sm:$0xff] %v8737_v7 }
 0x380   : > { %12547 = vst [vmem:[#allocation124_spill] sm:$0xff] %v8712_v1 }
 0x381   : > { %12557 = vst [vmem:[#allocation178_spill] sm:$0xff] %v8755_v40 }
 0x384   : > { %2714 = vrot.lane.b32.xlu0 %v8685_v38, %s6988_s23  ;;  %2716 = vrot.lane.b32.xlu1 %v8717_v16, %s6988_s23  ;;  %v1734_v38 = vmax.f32 %v12554_v50, %v8578_v13 }
 0x385   : > { %2366 = vrot.lane.b32.xlu2 %v8720_v19, %s6989_s28 }
 0x386   : > { %v8728_v15 = vpop.permute.xlu1 %2698  ;;  %v8730_v37 = vpop.permute.xlu0 %2314  ;;  %v8752_v48 = vmax.f32 %v1734_v38, %v8525_v36  ;;  %v12560_v36 = vld [vmem:[#allocation138_spill] sm:$0xff] }
 0x387   : > { %12551 = vst [vmem:[#allocation177_spill] sm:$0xff] %v8728_v15  ;;  %v8732_v3 = vpop.permute.xlu2 %1578  ;;  %v1735_v38 = vmax.f32 %v12560_v36, %v8543_v18  ;;  %v12563_v18 = vld [vmem:[#allocation67_spill] sm:$0xff] }
 0x388   : > { %12556 = vst [vmem:[#allocation137_spill] sm:$0xff] %v8752_v48 }
 0x389   : > { %v8772_v34 = vmax.f32 %v1735_v38, %v8638_v52  ;;  %v1736_v52 = vmax.f32 %v12563_v18, %v8658_v28  ;;  %v12568_v28 = vld [vmem:[#allocation26_spill] sm:$0xff] }
 0x38b   : > { %12561 = vst [vmem:[#allocation181_spill] sm:$0xff] %v8772_v34 }
 0x38c   : > { %2332 = vrot.lane.b32.xlu0 %v8717_v16, %s6989_s28  ;;  %2334 = vrot.lane.b32.xlu1 %v8737_v7, %s6989_s28 }
 0x38d   : > { %2718 = vrot.lane.b32.xlu2 %v8737_v7, %s6988_s23 }
 0x38e   : > { %v1577_v15 = vpop.permute.xlu1 %1576  ;;  %v1865_v1 = vpop.permute.xlu0 %1864 }
 0x38f   : > { %v8749_v22 = vpop.permute.xlu2 %2318 }
 0x394   : > { %2750 = vrot.lane.b32.xlu0 %v8720_v19, %s6988_s23  ;;  %2752 = vrot.lane.b32.xlu1 %v8752_v48, %s6988_s23  ;;  %v1719_v19 = vmax.f32 %v12562_v12, %v8636_v8 }
 0x395   : > { %2336 = vrot.lane.b32.xlu2 %v8755_v40, %s6989_s28 }
 0x396   : > { %v8763_v13 = vpop.permute.xlu1 %2316  ;;  %v8765_v6 = vpop.permute.xlu0 %2732  ;;  %v8787_v38 = vmax.f32 %v1719_v19, %v8562_v20  ;;  %v1720_v20 = vmax.f32 %v12568_v28, %v8603_v53  ;;  %v1737_v19 = vmax.f32 %v8420_v60, %v8693_v21  ;;  %v1721_v53 = vmax.f32 %v8436_v39, %v1575_v2 }
 0x397   : > { %12558 = vst [vmem:[#allocation179_spill] sm:$0xff] %v8765_v6  ;;  %v8767_v16 = vpop.permute.xlu2 %2736 }
 0x398   : > { %12559 = vst [vmem:[#allocation180_spill] sm:$0xff] %v8767_v16 }
 0x399   : > { %12564 = vst [vmem:[#allocation182_spill] sm:$0xff] %v8787_v38 }
 0x39c   : > { %2368 = vrot.lane.b32.xlu0 %v8752_v48, %s6989_s28  ;;  %2370 = vrot.lane.b32.xlu1 %v8772_v34, %s6989_s28  ;;  %v8789_v48 = vmax.f32 %v1736_v52, %v1861_v33  ;;  %v8804_v33 = vmax.f32 %v1720_v20, %v8675_v5  ;;  %v8822_v20 = vmax.f32 %v1737_v19, %v8640_v55 }
 0x39d   : > { %2754 = vrot.lane.b32.xlu2 %v8772_v34, %s6988_s23  ;;  %v1738_v55 = vmax.f32 %v8438_v63, %v8660_v43  ;;  %v1722_v19 = vmax.f32 %v8454_v59, %v1577_v15  ;;  %v12578_v15 = vld [vmem:[#allocation51_spill] sm:$0xff] }
 0x39e   : > { %v1867_v7 = vpop.permute.xlu1 %1866  ;;  %v1611_v16 = vpop.permute.xlu0 %1610  ;;  %12565 = vst [vmem:[#allocation183_spill] sm:$0xff] %v8789_v48 }
 0x39f   : > { %v8782_v6 = vpop.permute.xlu2 %2354  ;;  %12569 = vst [vmem:[#allocation186_spill] sm:$0xff] %v8804_v33 }
 0x3a0   : > { %12570 = vst [vmem:[#allocation187_spill] sm:$0xff] %v8822_v20 }
 0x3a4   : > { %2720 = vrot.lane.b32.xlu0 %v8755_v40, %s6988_s23  ;;  %2722 = vrot.lane.b32.xlu1 %v8787_v38, %s6988_s23 }
 0x3a5   : > { %2372 = vrot.lane.b32.xlu2 %v8789_v48, %s6989_s28 }
 0x3a6   : > { %v8797_v8 = vpop.permute.xlu1 %2734  ;;  %v1835_v34 = vpop.permute.xlu0 %1834 }
 0x3a7   : > { %12566 = vst [vmem:[#allocation184_spill] sm:$0xff] %v8797_v8  ;;  %v8799_v36 = vpop.permute.xlu2 %2706  ;;  %v12581_v8 = vld [vmem:[#allocation15_spill] sm:$0xff] }
 0x3a8   : > { %12567 = vst [vmem:[#allocation185_spill] sm:$0xff] %v8799_v36 }
 0x3ac   : > { %2338 = vrot.lane.b32.xlu0 %v8787_v38, %s6989_s28  ;;  %2340 = vrot.lane.b32.xlu1 %v8804_v33, %s6989_s28  ;;  %v8824_v38 = vmax.f32 %v1721_v53, %v1831_v51  ;;  %v8840_v51 = vmax.f32 %v1738_v55, %v1865_v1  ;;  %v8857_v1 = vmax.f32 %v1722_v19, %v8679_v54 }
 0x3ad   : > { %2724 = vrot.lane.b32.xlu2 %v8804_v33, %s6988_s23 }
 0x3ae   : > { %v8814_v52 = vpop.permute.xlu1 %2352  ;;  %v8816_v40 = vpop.permute.xlu0 %2350  ;;  %12571 = vst [vmem:[#allocation188_spill] sm:$0xff] %v8824_v38 }
 0x3af   : > { %v8819_v5 = vpop.permute.xlu2 %2324  ;;  %12575 = vst [vmem:[#allocation192_spill] sm:$0xff] %v8840_v51 }
 0x3b0   : > { %12576 = vst [vmem:[#allocation193_spill] sm:$0xff] %v8857_v1 }
 0x3b4   : > { %2374 = vrot.lane.b32.xlu0 %v8822_v20, %s6989_s28  ;;  %2758 = vrot.lane.b32.xlu1 %v8822_v20, %s6988_s23 }
 0x3b5   : > { %2342 = vrot.lane.b32.xlu2 %v8824_v38, %s6989_s28 }
 0x3b6   : > { %v8832_v21 = vpop.permute.xlu1 %2704  ;;  %v8834_v33 = vpop.permute.xlu0 %2702 }
 0x3b7   : > { %12572 = vst [vmem:[#allocation189_spill] sm:$0xff] %v8832_v21  ;;  %v8836_v2 = vpop.permute.xlu2 %2742 }
 0x3b8   : > { %12573 = vst [vmem:[#allocation190_spill] sm:$0xff] %v8834_v33 }
 0x3b9   : > { %12574 = vst [vmem:[#allocation191_spill] sm:$0xff] %v8836_v2  ;;  %v1739_v2 = vmax.f32 %v8507_v17, %v1611_v16  ;;  %v12580_v16 = vld [vmem:[#allocation64_spill] sm:$0xff] }
 0x3ba   : > { %v2445_v21 = vsub.f32 %v12581_v8, %v12580_v16  ;;  %v12588_v16 = vld [vmem:[#allocation68_spill] sm:$0xff] }
 0x3bb   : > { %v8859_v55 = vmax.f32 %v1739_v2, %v1867_v7  ;;  %v1723_v2 = vmax.f32 %v8509_v9, %v8732_v3  ;;  %v12590_v3 = vld [vmem:[#allocation78_spill] sm:$0xff] }
 0x3bc   : > { %2726 = vrot.lane.b32.xlu0 %v8824_v38, %s6988_s23  ;;  %2376 = vrot.lane.b32.xlu1 %v8840_v51, %s6989_s28 }
 0x3bd   : > { %2760 = vrot.lane.b32.xlu2 %v8840_v51, %s6988_s23  ;;  %12577 = vst [vmem:[#allocation194_spill] sm:$0xff] %v8859_v55  ;;  %v12579_v51 = vld [vmem:[#allocation14_spill] sm:$0xff]  ;;  %v8879_v33 = vmax.f32 %v1723_v2, %v1835_v34 }
 0x3be   : > { %v8849_v53 = vpop.permute.xlu1 %2322  ;;  %v8851_v20 = vpop.permute.xlu0 %2320  ;;  %v2444_v38 = vsub.f32 %v12579_v51, %v12578_v15  ;;  %v12586_v15 = vld [vmem:[#allocation61_spill] sm:$0xff]  ;;  %v12591_v34 = vld [vmem:[#allocation18_spill] sm:$0xff] }
 0x3bf   : > { %v8854_v43 = vpop.permute.xlu2 %2360  ;;  %12585 = vst [vmem:[#allocation196_spill] sm:$0xff] %v8879_v33  ;;  %v12587_v51 = vld [vmem:[#allocation17_spill] sm:$0xff] }
 0x3c0   : > { %v2508_v19 = vmul.f32 1.442695, %v2444_v38  ;;  %v2447_v63 = vsub.f32 %v12587_v51, %v12586_v15  ;;  %v2448_v38 = vsub.f32 %v12591_v34, %v12590_v3  ;;  %v12596_v3 = vld [vmem:[#allocation81_spill] sm:$0xff]  ;;  %v12597_v34 = vld [vmem:[#allocation19_spill] sm:$0xff] }
 0x3c2   : > { %6118 = vpow2.f32 %v2508_v19  ;;  %v2516_v51 = vmul.f32 1.442695, %v2448_v38  ;;  %v12599_v38 = vld [vmem:[#allocation21_spill] sm:$0xff] }
 0x3c4   : > { %2344 = vrot.lane.b32.xlu0 %v8857_v1, %s6989_s28  ;;  %2728 = vrot.lane.b32.xlu1 %v8857_v1, %s6988_s23  ;;  %v2510_v1 = vmul.f32 1.442695, %v2445_v21 }
 0x3c5   : > { %2378 = vrot.lane.b32.xlu2 %v8859_v55, %s6989_s28 }
 0x3c6   : > { %v8871_v36 = vpop.permute.xlu1 %2740  ;;  %v8873_v54 = vpop.permute.xlu0 %2738  ;;  %6120 = vpow2.f32 %v2510_v1 }
 0x3c7   : > { %12582 = vst [vmem:[#allocation51_spill] sm:$0xff] %v8871_v36  ;;  %v8875_v7 = vpop.permute.xlu2 %2712  ;;  %v12589_v36 = vld [vmem:[#allocation16_spill] sm:$0xff] }
 0x3c8   : > { %12583 = vst [vmem:[#allocation64_spill] sm:$0xff] %v8873_v54  ;;  %v2446_v54 = vsub.f32 %v12589_v36, %v12588_v16  ;;  %v8899_v19 = vpop.eup %6118  ;;  %v12594_v16 = vld [vmem:[#allocation75_spill] sm:$0xff] }
 0x3c9   : > { %12584 = vst [vmem:[#allocation195_spill] sm:$0xff] %v8875_v7 }
 0x3ca   : > { %v2512_v7 = vmul.f32 1.442695, %v2446_v54  ;;  %12592 = vst [vmem:[#allocation61_spill] sm:$0xff] %v8899_v19  ;;  %v12598_v54 = vld [vmem:[#allocation90_spill] sm:$0xff] }
 0x3cc   : > { %2756 = vrot.lane.b32.xlu0 %v8789_v48, %s6988_s23  ;;  %2346 = vrot.lane.b32.xlu1 %v8879_v33, %s6989_s28  ;;  %v2514_v48 = vmul.f32 1.442695, %v2447_v63  ;;  %v8901_v8 = vpop.eup %6120  ;;  %v2449_v63 = vsub.f32 %v12597_v34, %v12596_v3 }
 0x3cd   : > { %2730 = vrot.lane.b32.xlu2 %v8879_v33, %s6988_s23  ;;  %12593 = vst [vmem:[#allocation68_spill] sm:$0xff] %v8901_v8  ;;  %v12595_v33 = vld [vmem:[#allocation20_spill] sm:$0xff] }
 0x3ce   : > { %v8893_v21 = vpop.permute.xlu1 %2358  ;;  %v8895_v2 = vpop.permute.xlu0 %2356  ;;  %6122 = vpow2.f32 %v2514_v48  ;;  %v2450_v1 = vsub.f32 %v12595_v33, %v12594_v16  ;;  %v2451_v48 = vsub.f32 %v12599_v38, %v12598_v54  ;;  %v2518_v17 = vmul.f32 1.442695, %v2449_v63  ;;  %v12609_v63 = vld [vmem:[#allocation22_spill] sm:$0xff] }
 0x3cf   : > { %v8897_v15 = vpop.permute.xlu2 %2330  ;;  %6124 = vpow2.f32 %v2512_v7 }
 0x3d0   : > { %6126 = vpow2.f32 %v2516_v51  ;;  %v2522_v7 = vmul.f32 1.442695, %v2451_v48  ;;  %v12606_v51 = vld [vmem:[#allocation88_spill] sm:$0xff] }
 0x3d1   : > { %v12610_v48 = vld [vmem:[#allocation100_spill] sm:$0xff] }
 0x3d4   : > { %2762 = vrot.lane.b32.xlu0 %v8859_v55, %s6988_s23  ;;  %3084 = vrot.lane.b32.xlu1 %v8899_v19, %s6987_s13  ;;  %v2520_v55 = vmul.f32 1.442695, %v2450_v1  ;;  %v8921_v19 = vpop.eup %6122  ;;  %v12608_v1 = vld [vmem:[#allocation92_spill] sm:$0xff] }
 0x3d5   : > { %3086 = vrot.lane.b32.xlu2 %v8901_v8, %s6987_s13  ;;  %12603 = vst [vmem:[#allocation90_spill] sm:$0xff] %v8921_v19  ;;  %v8923_v60 = vpop.eup %6124  ;;  %v12607_v8 = vld [vmem:[#allocation23_spill] sm:$0xff]  ;;  %v2452_v54 = vsub.f32 %v12609_v63, %v12608_v1 }
 0x3d6   : > { %v8915_v36 = vpop.permute.xlu1 %2710  ;;  %v8917_v16 = vpop.permute.xlu0 %2708  ;;  %12604 = vst [vmem:[#allocation197_spill] sm:$0xff] %v8923_v60  ;;  %6128 = vpow2.f32 %v2520_v55  ;;  %v2453_v34 = vsub.f32 %v12607_v8, %v12606_v51 }
 0x3d7   : > { %12600 = vst [vmem:[#allocation78_spill] sm:$0xff] %v8915_v36  ;;  %v8919_v33 = vpop.permute.xlu2 %2748  ;;  %v8925_v3 = vpop.eup %6126  ;;  %6130 = vpow2.f32 %v2518_v17  ;;  %v2524_v8 = vmul.f32 1.442695, %v2452_v54  ;;  %v12619_v54 = vld [vmem:[#allocation25_spill] sm:$0xff] }
 0x3d8   : > { %12601 = vst [vmem:[#allocation75_spill] sm:$0xff] %v8917_v16  ;;  %6132 = vpow2.f32 %v2522_v7  ;;  %v12616_v7 = vld [vmem:[#allocation98_spill] sm:$0xff] }
 0x3d9   : > { %12602 = vst [vmem:[#allocation81_spill] sm:$0xff] %v8919_v33  ;;  %v12611_v33 = vld [vmem:[#allocation24_spill] sm:$0xff] }
 0x3da   : > { %12605 = vst [vmem:[#allocation198_spill] sm:$0xff] %v8925_v3  ;;  %v2454_v55 = vsub.f32 %v12611_v33, %v12610_v48  ;;  %v12621_v33 = vld [vmem:[#allocation29_spill] sm:$0xff] }
 0x3dc   : > { %3088 = vrot.lane.b32.xlu0 %v8923_v60, %s6987_s13  ;;  %3090 = vrot.lane.b32.xlu1 %v8921_v19, %s6987_s13  ;;  %v2526_v60 = vmul.f32 1.442695, %v2453_v34  ;;  %v8945_v19 = vpop.eup %6128  ;;  %v2528_v17 = vmul.f32 1.442695, %v2454_v55  ;;  %v12618_v34 = vld [vmem:[#allocation102_spill] sm:$0xff] }
 0x3dd   : > { %3092 = vrot.lane.b32.xlu2 %v8925_v3, %s6987_s13  ;;  %12613 = vst [vmem:[#allocation92_spill] sm:$0xff] %v8945_v19  ;;  %v8947_v38 = vpop.eup %6130  ;;  %v12617_v3 = vld [vmem:[#allocation27_spill] sm:$0xff]  ;;  %v2455_v48 = vsub.f32 %v12619_v54, %v12618_v34  ;;  %v12620_v55 = vld [vmem:[#allocation110_spill] sm:$0xff] }
 0x3de   : > { %v8939_v36 = vpop.permute.xlu1 %2328  ;;  %v8941_v51 = vpop.permute.xlu0 %2326  ;;  %12614 = vst [vmem:[#allocation100_spill] sm:$0xff] %v8947_v38  ;;  %6134 = vpow2.f32 %v2526_v60  ;;  %v2456_v63 = vsub.f32 %v12617_v3, %v12616_v7  ;;  %v2457_v60 = vsub.f32 %v12621_v33, %v12620_v55 }
 0x3df   : > { %v8943_v16 = vpop.permute.xlu2 %2366  ;;  %v8949_v1 = vpop.eup %6132  ;;  %6136 = vpow2.f32 %v2524_v8  ;;  %v2530_v50 = vmul.f32 1.442695, %v2455_v48  ;;  %v12631_v48 = vld [vmem:[#allocation30_spill] sm:$0xff] }
 0x3e0   : > { %12612 = vst [vmem:[#allocation88_spill] sm:$0xff] %v8943_v16  ;;  %6138 = vpow2.f32 %v2528_v17  ;;  %v2534_v8 = vmul.f32 1.442695, %v2457_v60  ;;  %v12628_v17 = vld [vmem:[#allocation108_spill] sm:$0xff] }
 0x3e1   : > { %12615 = vst [vmem:[#allocation199_spill] sm:$0xff] %v8949_v1  ;;  %v12632_v60 = vld [vmem:[#allocation120_spill] sm:$0xff] }
 0x3e4   : > { %3094 = vrot.lane.b32.xlu0 %v8947_v38, %s6987_s13  ;;  %3096 = vrot.lane.b32.xlu1 %v8945_v19, %s6987_s13  ;;  %v2532_v38 = vmul.f32 1.442695, %v2456_v63  ;;  %v8969_v19 = vpop.eup %6134  ;;  %v12630_v63 = vld [vmem:[#allocation112_spill] sm:$0xff] }
 0x3e5   : > { %3098 = vrot.lane.b32.xlu2 %v8949_v1, %s6987_s13  ;;  %12625 = vst [vmem:[#allocation200_spill] sm:$0xff] %v8969_v19  ;;  %v8971_v24 = vpop.eup %6136  ;;  %v12629_v1 = vld [vmem:[#allocation33_spill] sm:$0xff]  ;;  %v2458_v55 = vsub.f32 %v12631_v48, %v12630_v63 }
 0x3e6   : > { %v8963_v18 = vpop.permute.xlu1 %2746  ;;  %v8965_v7 = vpop.permute.xlu0 %2744  ;;  %12626 = vst [vmem:[#allocation201_spill] sm:$0xff] %v8971_v24  ;;  %6140 = vpow2.f32 %v2532_v38  ;;  %v2459_v54 = vsub.f32 %v12629_v1, %v12628_v17 }
 0x3e7   : > { %12622 = vst [vmem:[#allocation98_spill] sm:$0xff] %v8963_v18  ;;  %v8967_v3 = vpop.permute.xlu2 %2718  ;;  %v8973_v34 = vpop.eup %6138  ;;  %6142 = vpow2.f32 %v2530_v50  ;;  %v12633_v18 = vld [vmem:[#allocation36_spill] sm:$0xff]  ;;  %v2536_v1 = vmul.f32 1.442695, %v2458_v55  ;;  %v12641_v55 = vld [vmem:[#allocation38_spill] sm:$0xff] }
 0x3e8   : > { %12623 = vst [vmem:[#allocation102_spill] sm:$0xff] %v8965_v7  ;;  %6144 = vpow2.f32 %v2534_v8  ;;  %v2460_v38 = vsub.f32 %v12633_v18, %v12632_v60  ;;  %v12638_v8 = vld [vmem:[#allocation118_spill] sm:$0xff] }
 0x3e9   : > { %12624 = vst [vmem:[#allocation110_spill] sm:$0xff] %v8967_v3  ;;  %v12643_v18 = vld [vmem:[#allocation42_spill] sm:$0xff] }
 0x3ea   : > { %12627 = vst [vmem:[#allocation202_spill] sm:$0xff] %v8973_v34  ;;  %v2540_v50 = vmul.f32 1.442695, %v2460_v38  ;;  %v12642_v38 = vld [vmem:[#allocation132_spill] sm:$0xff] }
 0x3ec   : > { %3100 = vrot.lane.b32.xlu0 %v8971_v24, %s6987_s13  ;;  %3102 = vrot.lane.b32.xlu1 %v8969_v19, %s6987_s13  ;;  %v2538_v24 = vmul.f32 1.442695, %v2459_v54  ;;  %v8993_v19 = vpop.eup %6140  ;;  %v12640_v54 = vld [vmem:[#allocation122_spill] sm:$0xff] }
 0x3ed   : > { %3104 = vrot.lane.b32.xlu2 %v8973_v34, %s6987_s13  ;;  %12635 = vst [vmem:[#allocation112_spill] sm:$0xff] %v8993_v19  ;;  %v8995_v33 = vpop.eup %6142  ;;  %v12639_v34 = vld [vmem:[#allocation39_spill] sm:$0xff]  ;;  %v2461_v60 = vsub.f32 %v12641_v55, %v12640_v54 }
 0x3ee   : > { %v8987_v7 = vpop.permute.xlu1 %2364  ;;  %v8989_v17 = vpop.permute.xlu0 %2362  ;;  %12636 = vst [vmem:[#allocation120_spill] sm:$0xff] %v8995_v33  ;;  %6146 = vpow2.f32 %v2538_v24  ;;  %v2462_v48 = vsub.f32 %v12639_v34, %v12638_v8  ;;  %v2463_v24 = vsub.f32 %v12643_v18, %v12642_v38 }
 0x3ef   : > { %12634 = vst [vmem:[#allocation108_spill] sm:$0xff] %v8987_v7  ;;  %v8991_v3 = vpop.permute.xlu2 %2336  ;;  %v8997_v63 = vpop.eup %6144  ;;  %6148 = vpow2.f32 %v2536_v1  ;;  %v2542_v62 = vmul.f32 1.442695, %v2461_v60  ;;  %v12653_v60 = vld [vmem:[#allocation44_spill] sm:$0xff] }
 0x3f0   : > { %12637 = vst [vmem:[#allocation203_spill] sm:$0xff] %v8997_v63  ;;  %6150 = vpow2.f32 %v2540_v50  ;;  %v2546_v1 = vmul.f32 1.442695, %v2463_v24  ;;  %v12650_v50 = vld [vmem:[#allocation133_spill] sm:$0xff] }
 0x3f1   : > { %v12654_v24 = vld [vmem:[#allocation145_spill] sm:$0xff] }
 0x3f4   : > { %3106 = vrot.lane.b32.xlu0 %v8995_v33, %s6987_s13  ;;  %3108 = vrot.lane.b32.xlu1 %v8993_v19, %s6987_s13  ;;  %v2544_v33 = vmul.f32 1.442695, %v2462_v48  ;;  %v9017_v19 = vpop.eup %6146  ;;  %v12652_v48 = vld [vmem:[#allocation136_spill] sm:$0xff] }
 0x3f5   : > { %3110 = vrot.lane.b32.xlu2 %v8997_v63, %s6987_s13  ;;  %12647 = vst [vmem:[#allocation204_spill] sm:$0xff] %v9017_v19  ;;  %v9019_v16 = vpop.eup %6148  ;;  %v12651_v63 = vld [vmem:[#allocation46_spill] sm:$0xff]  ;;  %v2464_v38 = vsub.f32 %v12653_v60, %v12652_v48 }
 0x3f6   : > { %v9011_v7 = vpop.permute.xlu1 %2716  ;;  %v9013_v8 = vpop.permute.xlu0 %2714  ;;  %12648 = vst [vmem:[#allocation205_spill] sm:$0xff] %v9019_v16  ;;  %6152 = vpow2.f32 %v2544_v33  ;;  %v2465_v55 = vsub.f32 %v12651_v63, %v12650_v50 }
 0x3f7   : > { %12644 = vst [vmem:[#allocation118_spill] sm:$0xff] %v9011_v7  ;;  %v9015_v34 = vpop.permute.xlu2 %2754  ;;  %v9021_v54 = vpop.eup %6150  ;;  %6154 = vpow2.f32 %v2542_v62  ;;  %v2548_v63 = vmul.f32 1.442695, %v2464_v38 }
 0x3f8   : > { %12645 = vst [vmem:[#allocation122_spill] sm:$0xff] %v9013_v8  ;;  %6156 = vpow2.f32 %v2546_v1  ;;  %v12660_v1 = vld [vmem:[#allocation146_spill] sm:$0xff] }
 0x3f9   : > { %12646 = vst [vmem:[#allocation132_spill] sm:$0xff] %v9015_v34  ;;  %v12655_v34 = vld [vmem:[#allocation47_spill] sm:$0xff] }
 0x3fa   : > { %12649 = vst [vmem:[#allocation206_spill] sm:$0xff] %v9021_v54  ;;  %v2466_v33 = vsub.f32 %v12655_v34, %v12654_v24  ;;  %v12663_v24 = vld [vmem:[#allocation55_spill] sm:$0xff] }
 0x3fc   : > { %3112 = vrot.lane.b32.xlu0 %v9019_v16, %s6987_s13  ;;  %3114 = vrot.lane.b32.xlu1 %v9017_v19, %s6987_s13  ;;  %v2550_v16 = vmul.f32 1.442695, %v2465_v55  ;;  %v9041_v19 = vpop.eup %6152  ;;  %v2552_v62 = vmul.f32 1.442695, %v2466_v33  ;;  %v12662_v55 = vld [vmem:[#allocation50_spill] sm:$0xff] }
 0x3fd   : > { %3116 = vrot.lane.b32.xlu2 %v9021_v54, %s6987_s13  ;;  %12657 = vst [vmem:[#allocation136_spill] sm:$0xff] %v9041_v19  ;;  %v9043_v18 = vpop.eup %6154  ;;  %v12661_v54 = vld [vmem:[#allocation52_spill] sm:$0xff]  ;;  %v2467_v38 = vsub.f32 %v12662_v55, %v8430_v4 }
 0x3fe   : > { %v9035_v7 = vpop.permute.xlu1 %2334  ;;  %v9037_v50 = vpop.permute.xlu0 %2332  ;;  %12658 = vst [vmem:[#allocation145_spill] sm:$0xff] %v9043_v18  ;;  %6158 = vpow2.f32 %v2550_v16  ;;  %v2468_v60 = vsub.f32 %v12661_v54, %v12660_v1  ;;  %v2469_v16 = vsub.f32 %v12663_v24, %v8503_v42  ;;  %v12671_v42 = vld [vmem:[#allocation59_spill] sm:$0xff] }
 0x3ff   : > { %v9039_v8 = vpop.permute.xlu2 %2372  ;;  %v9045_v48 = vpop.eup %6156  ;;  %6160 = vpow2.f32 %v2548_v63  ;;  %v2554_v34 = vmul.f32 1.442695, %v2467_v38  ;;  %v12672_v38 = vld [vmem:[#allocation65_spill] sm:$0xff] }
 0x400   : > { %12656 = vst [vmem:[#allocation133_spill] sm:$0xff] %v9039_v8  ;;  %6162 = vpow2.f32 %v2552_v62  ;;  %v2558_v63 = vmul.f32 1.442695, %v2469_v16  ;;  %v12670_v62 = vld [vmem:[#allocation63_spill] sm:$0xff] }
 0x401   : > { %12659 = vst [vmem:[#allocation207_spill] sm:$0xff] %v9045_v48 }
 0x404   : > { %3118 = vrot.lane.b32.xlu0 %v9043_v18, %s6987_s13  ;;  %3120 = vrot.lane.b32.xlu1 %v9041_v19, %s6987_s13  ;;  %v2556_v18 = vmul.f32 1.442695, %v2468_v60  ;;  %v9065_v19 = vpop.eup %6158  ;;  %v2470_v60 = vsub.f32 %v12671_v42, %v8539_v58 }
 0x405   : > { %3122 = vrot.lane.b32.xlu2 %v9045_v48, %s6987_s13  ;;  %12667 = vst [vmem:[#allocation209_spill] sm:$0xff] %v9065_v19  ;;  %v9067_v8 = vpop.eup %6160  ;;  %v2471_v48 = vsub.f32 %v12670_v62, %v8505_v47 }
 0x406   : > { %v9059_v33 = vpop.permute.xlu1 %2752  ;;  %v9061_v1 = vpop.permute.xlu0 %2750  ;;  %12668 = vst [vmem:[#allocation210_spill] sm:$0xff] %v9067_v8  ;;  %6164 = vpow2.f32 %v2556_v18  ;;  %v2472_v18 = vsub.f32 %v12672_v38, %v8619_v10  ;;  %v12677_v10 = vld [vmem:[#allocation73_spill] sm:$0xff] }
 0x407   : > { %12664 = vst [vmem:[#allocation146_spill] sm:$0xff] %v9059_v33  ;;  %v9063_v54 = vpop.permute.xlu2 %2724  ;;  %v9069_v4 = vpop.eup %6162  ;;  %6166 = vpow2.f32 %v2554_v34 }
 0x408   : > { %12665 = vst [vmem:[#allocation55_spill] sm:$0xff] %v9061_v1  ;;  %6168 = vpow2.f32 %v2558_v63  ;;  %v2560_v1 = vmul.f32 1.442695, %v2470_v60  ;;  %v2564_v34 = vmul.f32 1.442695, %v2472_v18  ;;  %v12676_v63 = vld [vmem:[#allocation76_spill] sm:$0xff] }
 0x409   : > { %12666 = vst [vmem:[#allocation208_spill] sm:$0xff] %v9063_v54  ;;  %v12678_v60 = vld [vmem:[#allocation80_spill] sm:$0xff] }
 0x40a   : > { %12669 = vst [vmem:[#allocation211_spill] sm:$0xff] %v9069_v4 }
 0x40c   : > { %3124 = vrot.lane.b32.xlu0 %v9067_v8, %s6987_s13  ;;  %3126 = vrot.lane.b32.xlu1 %v9065_v19, %s6987_s13  ;;  %v2562_v8 = vmul.f32 1.442695, %v2471_v48  ;;  %v9089_v19 = vpop.eup %6164  ;;  %v2473_v48 = vsub.f32 %v12677_v10, %v8656_v56 }
 0x40d   : > { %3128 = vrot.lane.b32.xlu2 %v9069_v4, %s6987_s13  ;;  %12673 = vst [vmem:[#allocation212_spill] sm:$0xff] %v9089_v19  ;;  %v9091_v54 = vpop.eup %6166  ;;  %v2474_v4 = vsub.f32 %v12676_v63, %v8621_v0 }
 0x40e   : > { %v9083_v16 = vpop.permute.xlu1 %2370  ;;  %v9085_v47 = vpop.permute.xlu0 %2368  ;;  %12674 = vst [vmem:[#allocation213_spill] sm:$0xff] %v9091_v54  ;;  %6170 = vpow2.f32 %v2562_v8  ;;  %v2475_v8 = vsub.f32 %v12678_v60, %v8730_v37  ;;  %v2566_v38 = vmul.f32 1.442695, %v2473_v48  ;;  %v12683_v37 = vld [vmem:[#allocation85_spill] sm:$0xff] }
 0x40f   : > { %v9087_v33 = vpop.permute.xlu2 %2342  ;;  %v9093_v58 = vpop.eup %6168  ;;  %6172 = vpow2.f32 %v2560_v1 }
 0x410   : > { %12675 = vst [vmem:[#allocation214_spill] sm:$0xff] %v9093_v58  ;;  %6174 = vpow2.f32 %v2564_v34  ;;  %v2570_v1 = vmul.f32 1.442695, %v2475_v8  ;;  %v2477_v34 = vsub.f32 %v8004_v27, %v8749_v22 }
 0x414   : > { %3130 = vrot.lane.b32.xlu0 %v9091_v54, %s6987_s13  ;;  %3132 = vrot.lane.b32.xlu1 %v9089_v19, %s6987_s13  ;;  %v2568_v54 = vmul.f32 1.442695, %v2474_v4  ;;  %v9113_v19 = vpop.eup %6170  ;;  %v2476_v4 = vsub.f32 %v12683_v37, %v8763_v13 }
 0x415   : > { %3134 = vrot.lane.b32.xlu2 %v9093_v58, %s6987_s13  ;;  %12680 = vst [vmem:[#allocation215_spill] sm:$0xff] %v9113_v19  ;;  %v9115_v62 = vpop.eup %6172  ;;  %v2574_v58 = vmul.f32 1.442695, %v2477_v34 }
 0x416   : > { %v9107_v18 = vpop.permute.xlu1 %2722  ;;  %v9109_v0 = vpop.permute.xlu0 %2720  ;;  %12681 = vst [vmem:[#allocation216_spill] sm:$0xff] %v9115_v62  ;;  %6176 = vpow2.f32 %v2568_v54  ;;  %v2478_v54 = vsub.f32 %v8028_v35, %v8851_v20  ;;  %v2479_v20 = vsub.f32 %v8066_v30, %v8849_v53 }
 0x417   : > { %v9111_v63 = vpop.permute.xlu2 %2760  ;;  %v9117_v56 = vpop.eup %6174  ;;  %6178 = vpow2.f32 %v2566_v38 }
 0x418   : > { %12679 = vst [vmem:[#allocation80_spill] sm:$0xff] %v9111_v63  ;;  %6180 = vpow2.f32 %v2570_v1  ;;  %v2576_v38 = vmul.f32 1.442695, %v2478_v54  ;;  %v2480_v1 = vsub.f32 %v8121_v11, %v8819_v5 }
 0x419   : > { %12682 = vst [vmem:[#allocation217_spill] sm:$0xff] %v9117_v56  ;;  %6182 = vpow2.f32 %v2574_v58  ;;  %v2481_v58 = vsub.f32 %v8142_v61, %v8941_v51  ;;  %v2482_v51 = vsub.f32 %v8175_v41, %v8939_v36 }
 0x41a   : > { %v2580_v54 = vmul.f32 1.442695, %v2480_v1  ;;  %v2484_v1 = vsub.f32 %v12546_v44, %v9037_v50  ;;  %v2485_v50 = vsub.f32 %v12552_v23, %v9035_v7  ;;  %v2489_v7 = vsub.f32 %v8436_v39, %v9087_v33 }
 0x41c   : > { %3136 = vrot.lane.b32.xlu0 %v9115_v62, %s6987_s13  ;;  %3138 = vrot.lane.b32.xlu1 %v9113_v19, %s6987_s13  ;;  %v2572_v62 = vmul.f32 1.442695, %v2476_v4  ;;  %v9135_v63 = vpop.eup %6176 }
 0x41d   : > { %3140 = vrot.lane.b32.xlu2 %v9117_v56, %s6987_s13  ;;  %12684 = vst [vmem:[#allocation85_spill] sm:$0xff] %v9135_v63  ;;  %v9137_v19 = vpop.eup %6178  ;;  %v2578_v56 = vmul.f32 1.442695, %v2479_v20 }
 0x41e   : > { %v9131_v48 = vpop.permute.xlu1 %2340  ;;  %v2339_v22 = vpop.permute.xlu0 %2338  ;;  %12685 = vst [vmem:[#allocation218_spill] sm:$0xff] %v9137_v19  ;;  %6184 = vpow2.f32 %v2572_v62  ;;  %v2582_v62 = vmul.f32 1.442695, %v2481_v58 }
 0x41f   : > { %v9133_v8 = vpop.permute.xlu2 %2378  ;;  %v9139_v13 = vpop.eup %6180  ;;  %6186 = vpow2.f32 %v2576_v38  ;;  %v2483_v38 = vsub.f32 %v8226_v49, %v8897_v15 }
 0x420   : > { %12686 = vst [vmem:[#allocation219_spill] sm:$0xff] %v9139_v13  ;;  %6188 = vpow2.f32 %v2580_v54 }
 0x421   : > { %6190 = vpow2.f32 %v2578_v56  ;;  %v2586_v54 = vmul.f32 1.442695, %v2483_v38  ;;  %v2588_v56 = vmul.f32 1.442695, %v2484_v1  ;;  %v2487_v38 = vsub.f32 %v12562_v12, %v2339_v22 }
 0x422   : > { %6192 = vpow2.f32 %v2582_v62  ;;  %v2486_v62 = vsub.f32 %v12555_v57, %v8991_v3  ;;  %v2488_v22 = vsub.f32 %v12568_v28, %v9131_v48  ;;  %v12703_v48 = vld [vmem:[#allocation86_spill] sm:$0xff] }
 0x423   : > { %6194 = vpow2.f32 %v2586_v54 }
 0x424   : > { %3142 = vrot.lane.b32.xlu0 %v9137_v19, %s6987_s13  ;;  %3144 = vrot.lane.b32.xlu1 %v9135_v63, %s6987_s13  ;;  %v9159_v63 = vpop.eup %6182  ;;  %v2592_v54 = vmul.f32 1.442695, %v2486_v62 }
 0x425   : > { %3146 = vrot.lane.b32.xlu2 %v9139_v13, %s6987_s13  ;;  %12688 = vst [vmem:[#allocation221_spill] sm:$0xff] %v9159_v63  ;;  %v9161_v19 = vpop.eup %6184  ;;  %v2584_v13 = vmul.f32 1.442695, %v2482_v51 }
 0x426   : > { %v9153_v34 = vpop.permute.xlu1 %2758  ;;  %v9155_v5 = vpop.permute.xlu0 %2374  ;;  %12689 = vst [vmem:[#allocation222_spill] sm:$0xff] %v9161_v19 }
 0x427   : > { %12687 = vst [vmem:[#allocation220_spill] sm:$0xff] %v9153_v34  ;;  %v9157_v4 = vpop.permute.xlu2 %2730  ;;  %v9163_v53 = vpop.eup %6186  ;;  %6196 = vpow2.f32 %v2584_v13 }
 0x428   : > { %12690 = vst [vmem:[#allocation223_spill] sm:$0xff] %v9163_v53  ;;  %6198 = vpow2.f32 %v2588_v56 }
 0x429   : > { %6200 = vpow2.f32 %v2592_v54  ;;  %v2596_v54 = vmul.f32 1.442695, %v2488_v22 }
 0x42c   : > { %3148 = vrot.lane.b32.xlu0 %v9161_v19, %s6987_s13  ;;  %3150 = vrot.lane.b32.xlu1 %v9159_v63, %s6987_s13  ;;  %v9183_v63 = vpop.eup %6188 }
 0x42d   : > { %3152 = vrot.lane.b32.xlu2 %v9163_v53, %s6987_s13  ;;  %12692 = vst [vmem:[#allocation225_spill] sm:$0xff] %v9183_v63  ;;  %v9185_v19 = vpop.eup %6190  ;;  %v2590_v53 = vmul.f32 1.442695, %v2485_v50 }
 0x42e   : > { %v9177_v20 = vpop.permute.xlu1 %2376  ;;  %v9179_v15 = vpop.permute.xlu0 %2726  ;;  %12693 = vst [vmem:[#allocation226_spill] sm:$0xff] %v9185_v19 }
 0x42f   : > { %v9181_v58 = vpop.permute.xlu2 %3086  ;;  %v9187_v36 = vpop.eup %6192  ;;  %6202 = vpow2.f32 %v2590_v53 }
 0x430   : > { %12691 = vst [vmem:[#allocation224_spill] sm:$0xff] %v9181_v58 }
 0x431   : > { %12694 = vst [vmem:[#allocation227_spill] sm:$0xff] %v9187_v36 }
 0x434   : > { %3154 = vrot.lane.b32.xlu0 %v9185_v19, %s6987_s13  ;;  %3156 = vrot.lane.b32.xlu1 %v9183_v63, %s6987_s13  ;;  %v9204_v19 = vpop.eup %6194  ;;  %v2594_v63 = vmul.f32 1.442695, %v2487_v38  ;;  %v2598_v38 = vmul.f32 1.442695, %v2489_v7 }
 0x435   : > { %3158 = vrot.lane.b32.xlu2 %v9187_v36, %s6987_s13  ;;  %12696 = vst [vmem:[#allocation229_spill] sm:$0xff] %v9204_v19  ;;  %v9206_v13 = vpop.eup %6196 }
 0x436   : > { %v9200_v51 = vpop.permute.xlu1 %2728  ;;  %v2345_v1 = vpop.permute.xlu0 %2344  ;;  %12697 = vst [vmem:[#allocation230_spill] sm:$0xff] %v9206_v13  ;;  %6204 = vpow2.f32 %v2594_v63 }
 0x437   : > { %v9202_v3 = vpop.permute.xlu2 %3092  ;;  %v9208_v58 = vpop.eup %6198  ;;  %v2490_v56 = vsub.f32 %v8454_v59, %v2345_v1  ;;  %6206 = vpow2.f32 %v2598_v38  ;;  %v2493_v1 = vsub.f32 %v7988_v14, %v8816_v40  ;;  %v2495_v40 = vsub.f32 %v8064_v46, %v8782_v6 }
 0x438   : > { %12695 = vst [vmem:[#allocation228_spill] sm:$0xff] %v9202_v3  ;;  %v9225_v36 = vpop.eup %6200  ;;  %6208 = vpow2.f32 %v2596_v54 }
 0x439   : > { %12698 = vst [vmem:[#allocation231_spill] sm:$0xff] %v9208_v58  ;;  %v9227_v53 = vpop.eup %6202  ;;  %v2606_v54 = vmul.f32 1.442695, %v2493_v1 }
 0x43a   : > { %12700 = vst [vmem:[#allocation233_spill] sm:$0xff] %v9225_v36 }
 0x43b   : > { %12701 = vst [vmem:[#allocation234_spill] sm:$0xff] %v9227_v53 }
 0x43c   : > { %3160 = vrot.lane.b32.xlu0 %v9206_v13, %s6987_s13  ;;  %3162 = vrot.lane.b32.xlu1 %v9204_v19, %s6987_s13  ;;  %v2600_v19 = vmul.f32 1.442695, %v2490_v56  ;;  %v9229_v13 = vpop.eup %6204 }
 0x43d   : > { %3164 = vrot.lane.b32.xlu2 %v9208_v58, %s6987_s13  ;;  %12702 = vst [vmem:[#allocation235_spill] sm:$0xff] %v9229_v13  ;;  %v2492_v58 = vsub.f32 %v12703_v48, %v8697_v29 }
 0x43e   : > { %v2347_v62 = vpop.permute.xlu1 %2346  ;;  %v9221_v50 = vpop.permute.xlu0 %2756  ;;  %6210 = vpow2.f32 %v2600_v19  ;;  %v2494_v19 = vsub.f32 %v8008_v45, %v8814_v52 }
 0x43f   : > { %v9223_v33 = vpop.permute.xlu2 %3098  ;;  %v2491_v63 = vsub.f32 %v8509_v9, %v2347_v62  ;;  %v2604_v56 = vmul.f32 1.442695, %v2492_v58  ;;  %v2496_v58 = vsub.f32 %v8105_v26, %v8895_v2  ;;  %v2497_v2 = vsub.f32 %v8123_v31, %v8893_v21 }
 0x440   : > { %12699 = vst [vmem:[#allocation232_spill] sm:$0xff] %v9223_v33 }
 0x441   : > { %v2602_v38 = vmul.f32 1.442695, %v2491_v63  ;;  %6212 = vpow2.f32 %v2604_v56  ;;  %v2610_v56 = vmul.f32 1.442695, %v2495_v40  ;;  %v2499_v40 = vsub.f32 %v8210_v32, %v8989_v17  ;;  %v12724_v17 = vld [vmem:[#allocation108_spill] sm:$0xff] }
 0x443   : > { %6214 = vpow2.f32 %v2602_v38 }
 0x444   : > { %3166 = vrot.lane.b32.xlu0 %v9227_v53, %s6987_s13  ;;  %3168 = vrot.lane.b32.xlu1 %v9225_v36, %s6987_s13  ;;  %v9248_v53 = vpop.eup %6206  ;;  %6216 = vpow2.f32 %v2606_v54  ;;  %v2498_v54 = vsub.f32 %v8177_v25, %v8854_v43 }
 0x445   : > { %3170 = vrot.lane.b32.xlu2 %v9229_v13, %s6987_s13  ;;  %12707 = vst [vmem:[#allocation239_spill] sm:$0xff] %v9248_v53  ;;  %v9250_v36 = vpop.eup %6208  ;;  %v2608_v13 = vmul.f32 1.442695, %v2494_v19  ;;  %6218 = vpow2.f32 %v2610_v56 }
 0x446   : > { %v9242_v7 = vpop.permute.xlu1 %3084  ;;  %v9244_v29 = vpop.permute.xlu0 %2762  ;;  %12708 = vst [vmem:[#allocation240_spill] sm:$0xff] %v9250_v36  ;;  %v2616_v56 = vmul.f32 1.442695, %v2498_v54  ;;  %v12725_v54 = vld [vmem:[#allocation123_spill] sm:$0xff] }
 0x447   : > { %12704 = vst [vmem:[#allocation236_spill] sm:$0xff] %v9242_v7  ;;  %v9246_v22 = vpop.permute.xlu2 %3104  ;;  %v9252_v62 = vpop.eup %6210  ;;  %6220 = vpow2.f32 %v2608_v13  ;;  %v2618_v13 = vmul.f32 1.442695, %v2499_v40  ;;  %v12726_v40 = vld [vmem:[#allocation135_spill] sm:$0xff] }
 0x448   : > { %12705 = vst [vmem:[#allocation237_spill] sm:$0xff] %v9244_v29 }
 0x449   : > { %12706 = vst [vmem:[#allocation238_spill] sm:$0xff] %v9246_v22 }
 0x44a   : > { %12709 = vst [vmem:[#allocation241_spill] sm:$0xff] %v9252_v62 }
 0x44c   : > { %3172 = vrot.lane.b32.xlu0 %v9250_v36, %s6987_s13  ;;  %3174 = vrot.lane.b32.xlu1 %v9248_v53, %s6987_s13  ;;  %v9272_v53 = vpop.eup %6212  ;;  %v2612_v36 = vmul.f32 1.442695, %v2496_v58 }
 0x44d   : > { %3176 = vrot.lane.b32.xlu2 %v9252_v62, %s6987_s13  ;;  %12713 = vst [vmem:[#allocation245_spill] sm:$0xff] %v9272_v53  ;;  %v9274_v52 = vpop.eup %6214 }
 0x44e   : > { %v9266_v63 = vpop.permute.xlu1 %3090  ;;  %v9268_v6 = vpop.permute.xlu0 %3088  ;;  %12714 = vst [vmem:[#allocation246_spill] sm:$0xff] %v9274_v52  ;;  %6222 = vpow2.f32 %v2612_v36  ;;  %v12722_v36 = vld [vmem:[#allocation88_spill] sm:$0xff] }
 0x44f   : > { %12710 = vst [vmem:[#allocation242_spill] sm:$0xff] %v9266_v63  ;;  %v9270_v1 = vpop.permute.xlu2 %3110  ;;  %v9276_v38 = vpop.eup %6216  ;;  %6224 = vpow2.f32 %v2616_v56  ;;  %v2502_v56 = vsub.f32 %v12726_v40, %v9085_v47  ;;  %v12735_v47 = vld [vmem:[#allocation138_spill] sm:$0xff]  ;;  %v12754_v63 = vld [vmem:[#allocation16_spill] sm:$0xff] }
 0x450   : > { %12711 = vst [vmem:[#allocation243_spill] sm:$0xff] %v9268_v6  ;;  %v9296_v62 = vpop.eup %6218 }
 0x451   : > { %12712 = vst [vmem:[#allocation244_spill] sm:$0xff] %v9270_v1 }
 0x452   : > { %12715 = vst [vmem:[#allocation247_spill] sm:$0xff] %v9276_v38 }
 0x453   : > { %12719 = vst [vmem:[#allocation251_spill] sm:$0xff] %v9296_v62 }
 0x454   : > { %3180 = vrot.lane.b32.xlu1 %v9272_v53, %s6987_s13  ;;  %3178 = vrot.lane.b32.xlu0 %v9274_v52, %s6987_s13  ;;  %v2614_v53 = vmul.f32 1.442695, %v2497_v2  ;;  %v9298_v52 = vpop.eup %6220  ;;  %v2500_v2 = vsub.f32 %v12725_v54, %v12724_v17 }
 0x455   : > { %3182 = vrot.lane.b32.xlu2 %v9276_v38, %s6987_s13  ;;  %12720 = vst [vmem:[#allocation252_spill] sm:$0xff] %v9298_v52  ;;  %v9300_v21 = vpop.eup %6222  ;;  %v12723_v38 = vld [vmem:[#allocation129_spill] sm:$0xff] }
 0x456   : > { %v9290_v19 = vpop.permute.xlu1 %3096  ;;  %v9292_v43 = vpop.permute.xlu0 %3094  ;;  %12721 = vst [vmem:[#allocation253_spill] sm:$0xff] %v9300_v21  ;;  %v2501_v1 = vsub.f32 %v12723_v38, %v12722_v36  ;;  %6226 = vpow2.f32 %v2614_v53  ;;  %v2620_v33 = vmul.f32 1.442695, %v2500_v2  ;;  %v2624_v53 = vmul.f32 1.442695, %v2502_v56  ;;  %v12736_v2 = vld [vmem:[#allocation28_spill] sm:$0xff] }
 0x457   : > { %12716 = vst [vmem:[#allocation248_spill] sm:$0xff] %v9290_v19  ;;  %v9294_v58 = vpop.permute.xlu2 %3116  ;;  %6228 = vpow2.f32 %v2618_v13  ;;  %v12733_v13 = vld [vmem:[#allocation133_spill] sm:$0xff] }
 0x458   : > { %12717 = vst [vmem:[#allocation249_spill] sm:$0xff] %v9292_v43 }
 0x459   : > { %12718 = vst [vmem:[#allocation250_spill] sm:$0xff] %v9294_v58 }
 0x45c   : > { %3186 = vrot.lane.b32.xlu1 %v9296_v62, %s6987_s13  ;;  %3184 = vrot.lane.b32.xlu0 %v9298_v52, %s6987_s13  ;;  %v2622_v62 = vmul.f32 1.442695, %v2501_v1  ;;  %v9320_v52 = vpop.eup %6224  ;;  %v2503_v1 = vsub.f32 %v12735_v47, %v9083_v16 }
 0x45d   : > { %3188 = vrot.lane.b32.xlu2 %v9300_v21, %s6987_s13  ;;  %12730 = vst [vmem:[#allocation255_spill] sm:$0xff] %v9320_v52  ;;  %v9322_v19 = vpop.eup %6226  ;;  %v12734_v21 = vld [vmem:[#allocation67_spill] sm:$0xff] }
 0x45e   : > { %v9314_v58 = vpop.permute.xlu1 %3102  ;;  %v9316_v36 = vpop.permute.xlu0 %3100  ;;  %12731 = vst [vmem:[#allocation256_spill] sm:$0xff] %v9322_v19  ;;  %6230 = vpow2.f32 %v2622_v62  ;;  %v2504_v3 = vsub.f32 %v12734_v21, %v12733_v13  ;;  %v2505_v62 = vsub.f32 %v12736_v2, %v9155_v5  ;;  %v12744_v5 = vld [vmem:[#allocation31_spill] sm:$0xff] }
 0x45f   : > { %12727 = vst [vmem:[#allocation88_spill] sm:$0xff] %v9314_v58  ;;  %v9318_v22 = vpop.permute.xlu2 %3122  ;;  %v9324_v17 = vpop.eup %6228  ;;  %6232 = vpow2.f32 %v2620_v33  ;;  %v2626_v58 = vmul.f32 1.442695, %v2503_v1  ;;  %v12745_v1 = vld [vmem:[#allocation58_spill] sm:$0xff] }
 0x460   : > { %12728 = vst [vmem:[#allocation108_spill] sm:$0xff] %v9316_v36  ;;  %6234 = vpow2.f32 %v2624_v53  ;;  %v2630_v33 = vmul.f32 1.442695, %v2505_v62  ;;  %v12743_v53 = vld [vmem:[#allocation154_spill] sm:$0xff] }
 0x461   : > { %12729 = vst [vmem:[#allocation254_spill] sm:$0xff] %v9318_v22  ;;  %v12746_v62 = vld [vmem:[#allocation14_spill] sm:$0xff] }
 0x462   : > { %12732 = vst [vmem:[#allocation257_spill] sm:$0xff] %v9324_v17 }
 0x464   : > { %3192 = vrot.lane.b32.xlu1 %v9320_v52, %s6987_s13  ;;  %3190 = vrot.lane.b32.xlu0 %v9322_v19, %s6987_s13  ;;  %v2628_v52 = vmul.f32 1.442695, %v2504_v3  ;;  %v9344_v19 = vpop.eup %6230  ;;  %v2506_v3 = vsub.f32 %v12744_v5, %v9177_v20 }
 0x465   : > { %3194 = vrot.lane.b32.xlu2 %v9324_v17, %s6987_s13  ;;  %12740 = vst [vmem:[#allocation260_spill] sm:$0xff] %v9344_v19  ;;  %v9346_v36 = vpop.eup %6232  ;;  %v2507_v17 = vsub.f32 %v12743_v53, %v9133_v8 }
 0x466   : > { %v9338_v56 = vpop.permute.xlu1 %3108  ;;  %v9340_v13 = vpop.permute.xlu0 %3106  ;;  %12741 = vst [vmem:[#allocation261_spill] sm:$0xff] %v9346_v36  ;;  %6236 = vpow2.f32 %v2628_v52 }
 0x467   : > { %12737 = vst [vmem:[#allocation133_spill] sm:$0xff] %v9338_v56  ;;  %v9342_v22 = vpop.permute.xlu2 %3128  ;;  %v9348_v16 = vpop.eup %6234  ;;  %6238 = vpow2.f32 %v2626_v58 }
 0x468   : > { %12738 = vst [vmem:[#allocation258_spill] sm:$0xff] %v9340_v13  ;;  %6240 = vpow2.f32 %v2630_v33  ;;  %v2632_v13 = vmul.f32 1.442695, %v2506_v3  ;;  %v12755_v33 = vld [vmem:[#allocation60_spill] sm:$0xff] }
 0x469   : > { %12739 = vst [vmem:[#allocation259_spill] sm:$0xff] %v9342_v22  ;;  %v2828_v22 = vsub.f32 %v12746_v62, %v12745_v1  ;;  %v12758_v1 = vld [vmem:[#allocation17_spill] sm:$0xff] }
 0x46a   : > { %12742 = vst [vmem:[#allocation262_spill] sm:$0xff] %v9348_v16 }
 0x46b   : > { %v2892_v58 = vmul.f32 1.442695, %v2828_v22  ;;  %v12757_v22 = vld [vmem:[#allocation72_spill] sm:$0xff] }
 0x46c   : > { %3198 = vrot.lane.b32.xlu1 %v9344_v19, %s6987_s13  ;;  %3196 = vrot.lane.b32.xlu0 %v9346_v36, %s6987_s13  ;;  %v2634_v19 = vmul.f32 1.442695, %v2507_v17  ;;  %v9368_v36 = vpop.eup %6236  ;;  %v12756_v17 = vld [vmem:[#allocation15_spill] sm:$0xff] }
 0x46d   : > { %3200 = vrot.lane.b32.xlu2 %v9348_v16, %s6987_s13  ;;  %12750 = vst [vmem:[#allocation264_spill] sm:$0xff] %v9368_v36  ;;  %v9370_v43 = vpop.eup %6238  ;;  %v12753_v16 = vld [vmem:[#allocation56_spill] sm:$0xff]  ;;  %v2829_v3 = vsub.f32 %v12756_v17, %v12755_v33 }
 0x46e   : > { %v9362_v52 = vpop.permute.xlu1 %3114  ;;  %v9364_v8 = vpop.permute.xlu0 %3112  ;;  %12751 = vst [vmem:[#allocation265_spill] sm:$0xff] %v9370_v43  ;;  %v2830_v6 = vsub.f32 %v12754_v63, %v12753_v16  ;;  %6242 = vpow2.f32 %v2634_v19 }
 0x46f   : > { %12747 = vst [vmem:[#allocation58_spill] sm:$0xff] %v9362_v52  ;;  %v9366_v56 = vpop.permute.xlu2 %3134  ;;  %v9372_v20 = vpop.eup %6240  ;;  %6244 = vpow2.f32 %v2632_v13 }
 0x470   : > { %12748 = vst [vmem:[#allocation14_spill] sm:$0xff] %v9364_v8  ;;  %6246 = vpow2.f32 %v2892_v58  ;;  %v2894_v8 = vmul.f32 1.442695, %v2829_v3  ;;  %v12765_v58 = vld [vmem:[#allocation69_spill] sm:$0xff]  ;;  %v12768_v3 = vld [vmem:[#allocation18_spill] sm:$0xff] }
 0x471   : > { %12749 = vst [vmem:[#allocation263_spill] sm:$0xff] %v9366_v56  ;;  %v2831_v56 = vsub.f32 %v12758_v1, %v12757_v22 }
 0x472   : > { %12752 = vst [vmem:[#allocation266_spill] sm:$0xff] %v9372_v20 }
 0x473   : > { %v2898_v7 = vmul.f32 1.442695, %v2831_v56  ;;  %v12769_v56 = vld [vmem:[#allocation84_spill] sm:$0xff] }
 0x474   : > { %3204 = vrot.lane.b32.xlu1 %v9368_v36, %s6987_s13  ;;  %3202 = vrot.lane.b32.xlu0 %v9370_v43, %s6987_s13  ;;  %v2896_v36 = vmul.f32 1.442695, %v2830_v6  ;;  %v9392_v43 = vpop.eup %6242  ;;  %v12767_v6 = vld [vmem:[#allocation74_spill] sm:$0xff] }
 0x475   : > { %3206 = vrot.lane.b32.xlu2 %v9372_v20, %s6987_s13  ;;  %12762 = vst [vmem:[#allocation15_spill] sm:$0xff] %v9392_v43  ;;  %v9394_v33 = vpop.eup %6244  ;;  %v12766_v20 = vld [vmem:[#allocation19_spill] sm:$0xff]  ;;  %v2832_v22 = vsub.f32 %v12768_v3, %v12767_v6 }
 0x476   : > { %v9386_v52 = vpop.permute.xlu1 %3120  ;;  %v9388_v19 = vpop.permute.xlu0 %3118  ;;  %12763 = vst [vmem:[#allocation72_spill] sm:$0xff] %v9394_v33  ;;  %6248 = vpow2.f32 %v2896_v36  ;;  %v2833_v53 = vsub.f32 %v12766_v20, %v12765_v58 }
 0x477   : > { %12759 = vst [vmem:[#allocation56_spill] sm:$0xff] %v9386_v52  ;;  %v9390_v16 = vpop.permute.xlu2 %3140  ;;  %v9396_v13 = vpop.eup %6246  ;;  %6250 = vpow2.f32 %v2894_v8  ;;  %v2900_v29 = vmul.f32 1.442695, %v2832_v22  ;;  %v12780_v22 = vld [vmem:[#allocation21_spill] sm:$0xff] }
 0x478   : > { %12760 = vst [vmem:[#allocation16_spill] sm:$0xff] %v9388_v19  ;;  %6252 = vpow2.f32 %v2898_v7  ;;  %v12777_v7 = vld [vmem:[#allocation82_spill] sm:$0xff] }
 0x479   : > { %12761 = vst [vmem:[#allocation60_spill] sm:$0xff] %v9390_v16  ;;  %v12770_v16 = vld [vmem:[#allocation20_spill] sm:$0xff] }
 0x47a   : > { %12764 = vst [vmem:[#allocation17_spill] sm:$0xff] %v9396_v13  ;;  %v2834_v36 = vsub.f32 %v12770_v16, %v12769_v56 }
 0x47c   : > { %3210 = vrot.lane.b32.xlu1 %v9392_v43, %s6987_s13  ;;  %3208 = vrot.lane.b32.xlu0 %v9394_v33, %s6987_s13  ;;  %v2902_v43 = vmul.f32 1.442695, %v2833_v53  ;;  %v9416_v33 = vpop.eup %6248  ;;  %v2904_v8 = vmul.f32 1.442695, %v2834_v36  ;;  %v12779_v53 = vld [vmem:[#allocation87_spill] sm:$0xff] }
 0x47d   : > { %3404 = vrot.lane.b32.xlu2 %v9396_v13, %s6986_s5  ;;  %12774 = vst [vmem:[#allocation18_spill] sm:$0xff] %v9416_v33  ;;  %v9418_v2 = vpop.eup %6250  ;;  %v12778_v13 = vld [vmem:[#allocation22_spill] sm:$0xff]  ;;  %v2835_v56 = vsub.f32 %v12780_v22, %v12779_v53  ;;  %v12781_v36 = vld [vmem:[#allocation95_spill] sm:$0xff] }
 0x47e   : > { %v9410_v52 = vpop.permute.xlu1 %3126  ;;  %v9412_v58 = vpop.permute.xlu0 %3124  ;;  %12775 = vst [vmem:[#allocation84_spill] sm:$0xff] %v9418_v2  ;;  %6254 = vpow2.f32 %v2902_v43  ;;  %v2836_v34 = vsub.f32 %v12778_v13, %v12777_v7 }
 0x47f   : > { %12771 = vst [vmem:[#allocation69_spill] sm:$0xff] %v9410_v52  ;;  %v9414_v19 = vpop.permute.xlu2 %3146  ;;  %v9420_v6 = vpop.eup %6252  ;;  %6256 = vpow2.f32 %v2900_v29  ;;  %v2906_v13 = vmul.f32 1.442695, %v2835_v56  ;;  %v12792_v56 = vld [vmem:[#allocation24_spill] sm:$0xff] }
 0x480   : > { %12772 = vst [vmem:[#allocation19_spill] sm:$0xff] %v9412_v58  ;;  %6258 = vpow2.f32 %v2904_v8  ;;  %v12789_v8 = vld [vmem:[#allocation93_spill] sm:$0xff] }
 0x481   : > { %12773 = vst [vmem:[#allocation74_spill] sm:$0xff] %v9414_v19  ;;  %v12782_v19 = vld [vmem:[#allocation23_spill] sm:$0xff] }
 0x482   : > { %12776 = vst [vmem:[#allocation267_spill] sm:$0xff] %v9420_v6  ;;  %v2837_v43 = vsub.f32 %v12782_v19, %v12781_v36 }
 0x484   : > { %3408 = vrot.lane.b32.xlu1 %v9416_v33, %s6986_s5  ;;  %3406 = vrot.lane.b32.xlu0 %v9418_v2, %s6986_s5  ;;  %v2908_v33 = vmul.f32 1.442695, %v2836_v34  ;;  %v9440_v2 = vpop.eup %6254  ;;  %v2910_v29 = vmul.f32 1.442695, %v2837_v43  ;;  %v12791_v34 = vld [vmem:[#allocation97_spill] sm:$0xff] }
 0x485   : > { %3410 = vrot.lane.b32.xlu2 %v9420_v6, %s6986_s5  ;;  %12786 = vst [vmem:[#allocation268_spill] sm:$0xff] %v9440_v2  ;;  %v9442_v16 = vpop.eup %6256  ;;  %v12790_v6 = vld [vmem:[#allocation25_spill] sm:$0xff]  ;;  %v2838_v36 = vsub.f32 %v12792_v56, %v12791_v34 }
 0x486   : > { %v9434_v52 = vpop.permute.xlu1 %3132  ;;  %v9436_v7 = vpop.permute.xlu0 %3130  ;;  %12787 = vst [vmem:[#allocation269_spill] sm:$0xff] %v9442_v16  ;;  %6260 = vpow2.f32 %v2908_v33  ;;  %v2839_v22 = vsub.f32 %v12790_v6, %v12789_v8  ;;  %v12793_v43 = vld [vmem:[#allocation105_spill] sm:$0xff] }
 0x487   : > { %12783 = vst [vmem:[#allocation82_spill] sm:$0xff] %v9434_v52  ;;  %v9438_v58 = vpop.permute.xlu2 %3152  ;;  %v9444_v53 = vpop.eup %6258  ;;  %6262 = vpow2.f32 %v2906_v13  ;;  %v2912_v6 = vmul.f32 1.442695, %v2838_v36  ;;  %v12804_v36 = vld [vmem:[#allocation29_spill] sm:$0xff] }
 0x488   : > { %12784 = vst [vmem:[#allocation87_spill] sm:$0xff] %v9436_v7  ;;  %6264 = vpow2.f32 %v2910_v29  ;;  %v12801_v29 = vld [vmem:[#allocation103_spill] sm:$0xff] }
 0x489   : > { %12785 = vst [vmem:[#allocation95_spill] sm:$0xff] %v9438_v58  ;;  %v12794_v58 = vld [vmem:[#allocation27_spill] sm:$0xff] }
 0x48a   : > { %12788 = vst [vmem:[#allocation270_spill] sm:$0xff] %v9444_v53  ;;  %v2840_v33 = vsub.f32 %v12794_v58, %v12793_v43 }
 0x48c   : > { %3414 = vrot.lane.b32.xlu1 %v9440_v2, %s6986_s5  ;;  %3412 = vrot.lane.b32.xlu0 %v9442_v16, %s6986_s5  ;;  %v2914_v2 = vmul.f32 1.442695, %v2839_v22  ;;  %v9464_v16 = vpop.eup %6260  ;;  %v2916_v13 = vmul.f32 1.442695, %v2840_v33  ;;  %v12803_v22 = vld [vmem:[#allocation107_spill] sm:$0xff] }
 0x48d   : > { %3416 = vrot.lane.b32.xlu2 %v9444_v53, %s6986_s5  ;;  %12798 = vst [vmem:[#allocation271_spill] sm:$0xff] %v9464_v16  ;;  %v9466_v19 = vpop.eup %6262  ;;  %v12802_v53 = vld [vmem:[#allocation30_spill] sm:$0xff]  ;;  %v2841_v43 = vsub.f32 %v12804_v36, %v12803_v22  ;;  %v12805_v33 = vld [vmem:[#allocation115_spill] sm:$0xff] }
 0x48e   : > { %v9458_v52 = vpop.permute.xlu1 %3138  ;;  %v9460_v8 = vpop.permute.xlu0 %3136  ;;  %12799 = vst [vmem:[#allocation272_spill] sm:$0xff] %v9466_v19  ;;  %6266 = vpow2.f32 %v2914_v2  ;;  %v2842_v56 = vsub.f32 %v12802_v53, %v12801_v29 }
 0x48f   : > { %12795 = vst [vmem:[#allocation93_spill] sm:$0xff] %v9458_v52  ;;  %v9462_v7 = vpop.permute.xlu2 %3158  ;;  %v9468_v34 = vpop.eup %6264  ;;  %6268 = vpow2.f32 %v2912_v6  ;;  %v2918_v53 = vmul.f32 1.442695, %v2841_v43  ;;  %v12816_v43 = vld [vmem:[#allocation36_spill] sm:$0xff] }
 0x490   : > { %12796 = vst [vmem:[#allocation97_spill] sm:$0xff] %v9460_v8  ;;  %6270 = vpow2.f32 %v2916_v13  ;;  %v12813_v13 = vld [vmem:[#allocation113_spill] sm:$0xff] }
 0x491   : > { %12797 = vst [vmem:[#allocation105_spill] sm:$0xff] %v9462_v7  ;;  %v12806_v7 = vld [vmem:[#allocation33_spill] sm:$0xff] }
 0x492   : > { %12800 = vst [vmem:[#allocation273_spill] sm:$0xff] %v9468_v34  ;;  %v2843_v2 = vsub.f32 %v12806_v7, %v12805_v33 }
 0x494   : > { %3420 = vrot.lane.b32.xlu1 %v9464_v16, %s6986_s5  ;;  %3418 = vrot.lane.b32.xlu0 %v9466_v19, %s6986_s5  ;;  %v2920_v16 = vmul.f32 1.442695, %v2842_v56  ;;  %v9488_v19 = vpop.eup %6266  ;;  %v2922_v6 = vmul.f32 1.442695, %v2843_v2  ;;  %v12815_v56 = vld [vmem:[#allocation117_spill] sm:$0xff]  ;;  %v12817_v2 = vld [vmem:[#allocation126_spill] sm:$0xff] }
 0x495   : > { %3422 = vrot.lane.b32.xlu2 %v9468_v34, %s6986_s5  ;;  %12810 = vst [vmem:[#allocation274_spill] sm:$0xff] %v9488_v19  ;;  %v9490_v58 = vpop.eup %6268  ;;  %v12814_v34 = vld [vmem:[#allocation38_spill] sm:$0xff]  ;;  %v2844_v33 = vsub.f32 %v12816_v43, %v12815_v56 }
 0x496   : > { %v9482_v52 = vpop.permute.xlu1 %3144  ;;  %v9484_v29 = vpop.permute.xlu0 %3142  ;;  %12811 = vst [vmem:[#allocation275_spill] sm:$0xff] %v9490_v58  ;;  %6272 = vpow2.f32 %v2920_v16  ;;  %v2845_v36 = vsub.f32 %v12814_v34, %v12813_v13 }
 0x497   : > { %12807 = vst [vmem:[#allocation103_spill] sm:$0xff] %v9482_v52  ;;  %v9486_v8 = vpop.permute.xlu2 %3164  ;;  %v9492_v22 = vpop.eup %6270  ;;  %6274 = vpow2.f32 %v2918_v53  ;;  %v2924_v34 = vmul.f32 1.442695, %v2844_v33  ;;  %v12828_v33 = vld [vmem:[#allocation42_spill] sm:$0xff] }
 0x498   : > { %12808 = vst [vmem:[#allocation107_spill] sm:$0xff] %v9484_v29  ;;  %6276 = vpow2.f32 %v2922_v6  ;;  %v12825_v6 = vld [vmem:[#allocation127_spill] sm:$0xff] }
 0x499   : > { %12809 = vst [vmem:[#allocation115_spill] sm:$0xff] %v9486_v8  ;;  %v12818_v8 = vld [vmem:[#allocation39_spill] sm:$0xff] }
 0x49a   : > { %12812 = vst [vmem:[#allocation276_spill] sm:$0xff] %v9492_v22  ;;  %v2846_v16 = vsub.f32 %v12818_v8, %v12817_v2 }
 0x49c   : > { %3426 = vrot.lane.b32.xlu1 %v9488_v19, %s6986_s5  ;;  %3424 = vrot.lane.b32.xlu0 %v9490_v58, %s6986_s5  ;;  %v2926_v19 = vmul.f32 1.442695, %v2845_v36  ;;  %v9512_v58 = vpop.eup %6272  ;;  %v2928_v53 = vmul.f32 1.442695, %v2846_v16  ;;  %v12827_v36 = vld [vmem:[#allocation131_spill] sm:$0xff]  ;;  %v12829_v16 = vld [vmem:[#allocation141_spill] sm:$0xff] }
 0x49d   : > { %3428 = vrot.lane.b32.xlu2 %v9492_v22, %s6986_s5  ;;  %12822 = vst [vmem:[#allocation277_spill] sm:$0xff] %v9512_v58  ;;  %v9514_v7 = vpop.eup %6274  ;;  %v12826_v22 = vld [vmem:[#allocation44_spill] sm:$0xff]  ;;  %v2847_v2 = vsub.f32 %v12828_v33, %v12827_v36 }
 0x49e   : > { %v9506_v52 = vpop.permute.xlu1 %3150  ;;  %v9508_v13 = vpop.permute.xlu0 %3148  ;;  %12823 = vst [vmem:[#allocation278_spill] sm:$0xff] %v9514_v7  ;;  %6278 = vpow2.f32 %v2926_v19  ;;  %v2848_v43 = vsub.f32 %v12826_v22, %v12825_v6 }
 0x49f   : > { %12819 = vst [vmem:[#allocation113_spill] sm:$0xff] %v9506_v52  ;;  %v9510_v29 = vpop.permute.xlu2 %3170  ;;  %v9516_v56 = vpop.eup %6276  ;;  %6280 = vpow2.f32 %v2924_v34  ;;  %v2930_v22 = vmul.f32 1.442695, %v2847_v2  ;;  %v12839_v2 = vld [vmem:[#allocation47_spill] sm:$0xff] }
 0x4a0   : > { %12820 = vst [vmem:[#allocation117_spill] sm:$0xff] %v9508_v13  ;;  %6282 = vpow2.f32 %v2928_v53  ;;  %v12837_v53 = vld [vmem:[#allocation142_spill] sm:$0xff] }
 0x4a1   : > { %12821 = vst [vmem:[#allocation126_spill] sm:$0xff] %v9510_v29  ;;  %v12830_v29 = vld [vmem:[#allocation46_spill] sm:$0xff] }
 0x4a2   : > { %12824 = vst [vmem:[#allocation279_spill] sm:$0xff] %v9516_v56  ;;  %v2849_v19 = vsub.f32 %v12830_v29, %v12829_v16 }
 0x4a4   : > { %3432 = vrot.lane.b32.xlu1 %v9512_v58, %s6986_s5  ;;  %3430 = vrot.lane.b32.xlu0 %v9514_v7, %s6986_s5  ;;  %v2932_v58 = vmul.f32 1.442695, %v2848_v43  ;;  %v9536_v7 = vpop.eup %6278  ;;  %v2934_v34 = vmul.f32 1.442695, %v2849_v19  ;;  %v12838_v43 = vld [vmem:[#allocation144_spill] sm:$0xff]  ;;  %v12840_v19 = vld [vmem:[#allocation150_spill] sm:$0xff] }
 0x4a5   : > { %3434 = vrot.lane.b32.xlu2 %v9516_v56, %s6986_s5  ;;  %12834 = vst [vmem:[#allocation141_spill] sm:$0xff] %v9536_v7  ;;  %v9538_v8 = vpop.eup %6280  ;;  %v2851_v56 = vsub.f32 %v12662_v55, %v12837_v53  ;;  %v2850_v16 = vsub.f32 %v12839_v2, %v12838_v43 }
 0x4a6   : > { %v9530_v52 = vpop.permute.xlu1 %3156  ;;  %v9532_v6 = vpop.permute.xlu0 %3154  ;;  %12835 = vst [vmem:[#allocation280_spill] sm:$0xff] %v9538_v8  ;;  %6284 = vpow2.f32 %v2932_v58 }
 0x4a7   : > { %12831 = vst [vmem:[#allocation127_spill] sm:$0xff] %v9530_v52  ;;  %v9534_v13 = vpop.permute.xlu2 %3176  ;;  %v9540_v36 = vpop.eup %6282  ;;  %6286 = vpow2.f32 %v2930_v22  ;;  %v2936_v55 = vmul.f32 1.442695, %v2850_v16 }
 0x4a8   : > { %12832 = vst [vmem:[#allocation131_spill] sm:$0xff] %v9532_v6  ;;  %6288 = vpow2.f32 %v2934_v34  ;;  %v12848_v34 = vld [vmem:[#allocation151_spill] sm:$0xff] }
 0x4a9   : > { %12833 = vst [vmem:[#allocation42_spill] sm:$0xff] %v9534_v13  ;;  %v12841_v13 = vld [vmem:[#allocation52_spill] sm:$0xff] }
 0x4aa   : > { %12836 = vst [vmem:[#allocation281_spill] sm:$0xff] %v9540_v36  ;;  %v2852_v58 = vsub.f32 %v12841_v13, %v12840_v19  ;;  %v12850_v19 = vld [vmem:[#allocation161_spill] sm:$0xff] }
 0x4ac   : > { %3438 = vrot.lane.b32.xlu1 %v9536_v7, %s6986_s5  ;;  %3436 = vrot.lane.b32.xlu0 %v9538_v8, %s6986_s5  ;;  %v2938_v7 = vmul.f32 1.442695, %v2851_v56  ;;  %v9560_v8 = vpop.eup %6284  ;;  %v2940_v22 = vmul.f32 1.442695, %v2852_v58  ;;  %v12849_v56 = vld [vmem:[#allocation34_spill] sm:$0xff]  ;;  %v12851_v58 = vld [vmem:[#allocation63_spill] sm:$0xff] }
 0x4ad   : > { %3440 = vrot.lane.b32.xlu2 %v9540_v36, %s6986_s5  ;;  %12845 = vst [vmem:[#allocation150_spill] sm:$0xff] %v9560_v8  ;;  %v9562_v29 = vpop.eup %6286  ;;  %v2854_v36 = vsub.f32 %v12671_v42, %v12848_v34  ;;  %v2853_v16 = vsub.f32 %v12663_v24, %v12849_v56 }
 0x4ae   : > { %v9554_v52 = vpop.permute.xlu1 %3162  ;;  %v9556_v53 = vpop.permute.xlu0 %3160  ;;  %12846 = vst [vmem:[#allocation52_spill] sm:$0xff] %v9562_v29  ;;  %6290 = vpow2.f32 %v2938_v7  ;;  %v2855_v7 = vsub.f32 %v12851_v58, %v12850_v19 }
 0x4af   : > { %12842 = vst [vmem:[#allocation142_spill] sm:$0xff] %v9554_v52  ;;  %v9558_v6 = vpop.permute.xlu2 %3182  ;;  %v9564_v43 = vpop.eup %6288  ;;  %6292 = vpow2.f32 %v2936_v55 }
 0x4b0   : > { %12843 = vst [vmem:[#allocation144_spill] sm:$0xff] %v9556_v53  ;;  %6294 = vpow2.f32 %v2940_v22  ;;  %v2942_v53 = vmul.f32 1.442695, %v2853_v16  ;;  %v2946_v55 = vmul.f32 1.442695, %v2855_v7  ;;  %v12858_v22 = vld [vmem:[#allocation162_spill] sm:$0xff] }
 0x4b1   : > { %12844 = vst [vmem:[#allocation47_spill] sm:$0xff] %v9558_v6  ;;  %v12860_v16 = vld [vmem:[#allocation65_spill] sm:$0xff] }
 0x4b2   : > { %12847 = vst [vmem:[#allocation282_spill] sm:$0xff] %v9564_v43  ;;  %v12861_v7 = vld [vmem:[#allocation173_spill] sm:$0xff] }
 0x4b4   : > { %3444 = vrot.lane.b32.xlu1 %v9560_v8, %s6986_s5  ;;  %3442 = vrot.lane.b32.xlu0 %v9562_v29, %s6986_s5  ;;  %v2944_v8 = vmul.f32 1.442695, %v2854_v36  ;;  %v9584_v29 = vpop.eup %6290  ;;  %v12859_v36 = vld [vmem:[#allocation166_spill] sm:$0xff] }
 0x4b5   : > { %3446 = vrot.lane.b32.xlu2 %v9564_v43, %s6986_s5  ;;  %12855 = vst [vmem:[#allocation283_spill] sm:$0xff] %v9584_v29  ;;  %v9586_v42 = vpop.eup %6292  ;;  %v2857_v43 = vsub.f32 %v12677_v10, %v12858_v22  ;;  %v2856_v19 = vsub.f32 %v12860_v16, %v12859_v36 }
 0x4b6   : > { %v9578_v6 = vpop.permute.xlu1 %3168  ;;  %v9580_v34 = vpop.permute.xlu0 %3166  ;;  %12856 = vst [vmem:[#allocation284_spill] sm:$0xff] %v9586_v42  ;;  %6296 = vpow2.f32 %v2944_v8 }
 0x4b7   : > { %12852 = vst [vmem:[#allocation151_spill] sm:$0xff] %v9578_v6  ;;  %v9582_v52 = vpop.permute.xlu2 %3188  ;;  %v9588_v56 = vpop.eup %6294  ;;  %6298 = vpow2.f32 %v2942_v53  ;;  %v2948_v10 = vmul.f32 1.442695, %v2856_v19 }
 0x4b8   : > { %12853 = vst [vmem:[#allocation34_spill] sm:$0xff] %v9580_v34  ;;  %6300 = vpow2.f32 %v2946_v55  ;;  %v12869_v55 = vld [vmem:[#allocation124_spill] sm:$0xff] }
 0x4b9   : > { %12854 = vst [vmem:[#allocation161_spill] sm:$0xff] %v9582_v52  ;;  %v12862_v52 = vld [vmem:[#allocation76_spill] sm:$0xff] }
 0x4ba   : > { %12857 = vst [vmem:[#allocation285_spill] sm:$0xff] %v9588_v56  ;;  %v2858_v8 = vsub.f32 %v12862_v52, %v12861_v7  ;;  %v12871_v7 = vld [vmem:[#allocation190_spill] sm:$0xff] }
 0x4bc   : > { %3450 = vrot.lane.b32.xlu1 %v9584_v29, %s6986_s5  ;;  %3448 = vrot.lane.b32.xlu0 %v9586_v42, %s6986_s5  ;;  %v2950_v29 = vmul.f32 1.442695, %v2857_v43  ;;  %v9608_v42 = vpop.eup %6296  ;;  %v2952_v53 = vmul.f32 1.442695, %v2858_v8  ;;  %v12870_v43 = vld [vmem:[#allocation177_spill] sm:$0xff] }
 0x4bd   : > { %3452 = vrot.lane.b32.xlu2 %v9588_v56, %s6986_s5  ;;  %12866 = vst [vmem:[#allocation173_spill] sm:$0xff] %v9608_v42  ;;  %v9610_v58 = vpop.eup %6298  ;;  %v2860_v56 = vsub.f32 %v12683_v37, %v12869_v55  ;;  %v2859_v19 = vsub.f32 %v12678_v60, %v12870_v43 }
 0x4be   : > { %v9602_v6 = vpop.permute.xlu1 %3174  ;;  %v9604_v22 = vpop.permute.xlu0 %3172  ;;  %12867 = vst [vmem:[#allocation76_spill] sm:$0xff] %v9610_v58  ;;  %6302 = vpow2.f32 %v2950_v29  ;;  %v2861_v29 = vsub.f32 %v8004_v27, %v12871_v7  ;;  %v12880_v7 = vld [vmem:[#allocation75_spill] sm:$0xff] }
 0x4bf   : > { %12863 = vst [vmem:[#allocation162_spill] sm:$0xff] %v9602_v6  ;;  %v9606_v34 = vpop.permute.xlu2 %3194  ;;  %v9612_v36 = vpop.eup %6300  ;;  %6304 = vpow2.f32 %v2948_v10  ;;  %v2954_v6 = vmul.f32 1.442695, %v2859_v19 }
 0x4c0   : > { %12864 = vst [vmem:[#allocation166_spill] sm:$0xff] %v9604_v22  ;;  %6306 = vpow2.f32 %v2952_v53  ;;  %v2958_v10 = vmul.f32 1.442695, %v2861_v29  ;;  %v12878_v53 = vld [vmem:[#allocation185_spill] sm:$0xff] }
 0x4c1   : > { %12865 = vst [vmem:[#allocation65_spill] sm:$0xff] %v9606_v34 }
 0x4c2   : > { %12868 = vst [vmem:[#allocation286_spill] sm:$0xff] %v9612_v36 }
 0x4c4   : > { %3456 = vrot.lane.b32.xlu1 %v9608_v42, %s6986_s5  ;;  %3454 = vrot.lane.b32.xlu0 %v9610_v58, %s6986_s5  ;;  %v2956_v42 = vmul.f32 1.442695, %v2860_v56  ;;  %v9632_v58 = vpop.eup %6302  ;;  %v12879_v56 = vld [vmem:[#allocation189_spill] sm:$0xff] }
 0x4c5   : > { %3458 = vrot.lane.b32.xlu2 %v9612_v36, %s6986_s5  ;;  %12875 = vst [vmem:[#allocation287_spill] sm:$0xff] %v9632_v58  ;;  %v9634_v22 = vpop.eup %6304  ;;  %v2863_v36 = vsub.f32 %v8066_v30, %v12878_v53  ;;  %v2862_v19 = vsub.f32 %v8028_v35, %v12879_v56 }
 0x4c6   : > { %v9626_v8 = vpop.permute.xlu1 %3180  ;;  %v9628_v55 = vpop.permute.xlu0 %3178  ;;  %12876 = vst [vmem:[#allocation288_spill] sm:$0xff] %v9634_v22  ;;  %6308 = vpow2.f32 %v2956_v42  ;;  %v2864_v42 = vsub.f32 %v8121_v11, %v12880_v7  ;;  %v12889_v7 = vld [vmem:[#allocation122_spill] sm:$0xff] }
 0x4c7   : > { %12872 = vst [vmem:[#allocation124_spill] sm:$0xff] %v9626_v8  ;;  %v9630_v34 = vpop.permute.xlu2 %3200  ;;  %v9636_v43 = vpop.eup %6306  ;;  %6310 = vpow2.f32 %v2954_v6  ;;  %v2960_v8 = vmul.f32 1.442695, %v2862_v19 }
 0x4c8   : > { %12873 = vst [vmem:[#allocation177_spill] sm:$0xff] %v9628_v55  ;;  %6312 = vpow2.f32 %v2958_v10  ;;  %v2964_v6 = vmul.f32 1.442695, %v2864_v42  ;;  %v12887_v10 = vld [vmem:[#allocation195_spill] sm:$0xff] }
 0x4c9   : > { %12874 = vst [vmem:[#allocation190_spill] sm:$0xff] %v9630_v34 }
 0x4ca   : > { %12877 = vst [vmem:[#allocation289_spill] sm:$0xff] %v9636_v43 }
 0x4cc   : > { %3462 = vrot.lane.b32.xlu1 %v9632_v58, %s6986_s5  ;;  %3460 = vrot.lane.b32.xlu0 %v9634_v22, %s6986_s5  ;;  %v2962_v58 = vmul.f32 1.442695, %v2863_v36  ;;  %v9656_v22 = vpop.eup %6308  ;;  %v12888_v36 = vld [vmem:[#allocation78_spill] sm:$0xff] }
 0x4cd   : > { %3464 = vrot.lane.b32.xlu2 %v9636_v43, %s6986_s5  ;;  %12884 = vst [vmem:[#allocation290_spill] sm:$0xff] %v9656_v22  ;;  %v9658_v55 = vpop.eup %6310  ;;  %v2866_v43 = vsub.f32 %v8175_v41, %v12887_v10  ;;  %v2865_v19 = vsub.f32 %v8142_v61, %v12888_v36 }
 0x4ce   : > { %v9650_v29 = vpop.permute.xlu1 %3186  ;;  %v9652_v53 = vpop.permute.xlu0 %3184  ;;  %12885 = vst [vmem:[#allocation291_spill] sm:$0xff] %v9658_v55  ;;  %6314 = vpow2.f32 %v2962_v58  ;;  %v2867_v58 = vsub.f32 %v8226_v49, %v12889_v7 }
 0x4cf   : > { %12881 = vst [vmem:[#allocation185_spill] sm:$0xff] %v9650_v29  ;;  %v9654_v34 = vpop.permute.xlu2 %3206  ;;  %v9660_v56 = vpop.eup %6312  ;;  %6316 = vpow2.f32 %v2960_v8  ;;  %v2966_v29 = vmul.f32 1.442695, %v2865_v19 }
 0x4d0   : > { %12882 = vst [vmem:[#allocation189_spill] sm:$0xff] %v9652_v53  ;;  %6318 = vpow2.f32 %v2964_v6  ;;  %v2970_v8 = vmul.f32 1.442695, %v2867_v58  ;;  %v12895_v6 = vld [vmem:[#allocation110_spill] sm:$0xff] }
 0x4d1   : > { %12883 = vst [vmem:[#allocation75_spill] sm:$0xff] %v9654_v34 }
 0x4d2   : > { %12886 = vst [vmem:[#allocation292_spill] sm:$0xff] %v9660_v56 }
 0x4d4   : > { %3468 = vrot.lane.b32.xlu1 %v9656_v22, %s6986_s5  ;;  %3466 = vrot.lane.b32.xlu0 %v9658_v55, %s6986_s5  ;;  %v2968_v22 = vmul.f32 1.442695, %v2866_v43  ;;  %v9680_v55 = vpop.eup %6314  ;;  %v12896_v43 = vld [vmem:[#allocation118_spill] sm:$0xff] }
 0x4d5   : > { %3470 = vrot.lane.b32.xlu2 %v9660_v56, %s6986_s5  ;;  %12892 = vst [vmem:[#allocation122_spill] sm:$0xff] %v9680_v55  ;;  %v9682_v53 = vpop.eup %6316  ;;  %v2869_v56 = vsub.f32 %v12552_v23, %v12895_v6  ;;  %v2868_v19 = vsub.f32 %v12546_v44, %v12896_v43 }
 0x4d6   : > { %v9674_v42 = vpop.permute.xlu1 %3192  ;;  %v9676_v10 = vpop.permute.xlu0 %3190  ;;  %12893 = vst [vmem:[#allocation293_spill] sm:$0xff] %v9682_v53  ;;  %6320 = vpow2.f32 %v2968_v22  ;;  %v2870_v22 = vsub.f32 %v12555_v57, %v9109_v0  ;;  %v2871_v0 = vsub.f32 %v12562_v12, %v9107_v18 }
 0x4d7   : > { %12890 = vst [vmem:[#allocation195_spill] sm:$0xff] %v9674_v42  ;;  %v9678_v34 = vpop.permute.xlu2 %3404  ;;  %v9684_v36 = vpop.eup %6318  ;;  %6322 = vpow2.f32 %v2966_v29  ;;  %v2972_v42 = vmul.f32 1.442695, %v2868_v19 }
 0x4d8   : > { %12891 = vst [vmem:[#allocation78_spill] sm:$0xff] %v9676_v10  ;;  %6324 = vpow2.f32 %v2970_v8  ;;  %v2976_v29 = vmul.f32 1.442695, %v2870_v22  ;;  %v12902_v8 = vld [vmem:[#allocation208_spill] sm:$0xff] }
 0x4d9   : > { %12894 = vst [vmem:[#allocation294_spill] sm:$0xff] %v9684_v36 }
 0x4dc   : > { %3474 = vrot.lane.b32.xlu1 %v9680_v55, %s6986_s5  ;;  %3472 = vrot.lane.b32.xlu0 %v9682_v53, %s6986_s5  ;;  %v2974_v55 = vmul.f32 1.442695, %v2869_v56  ;;  %v9704_v53 = vpop.eup %6320 }
 0x4dd   : > { %3476 = vrot.lane.b32.xlu2 %v9684_v36, %s6986_s5  ;;  %12899 = vst [vmem:[#allocation295_spill] sm:$0xff] %v9704_v53  ;;  %v9706_v10 = vpop.eup %6322  ;;  %v2872_v36 = vsub.f32 %v12568_v28, %v12902_v8 }
 0x4de   : > { %v9698_v7 = vpop.permute.xlu1 %3198  ;;  %v9700_v58 = vpop.permute.xlu0 %3196  ;;  %12900 = vst [vmem:[#allocation296_spill] sm:$0xff] %v9706_v10  ;;  %6326 = vpow2.f32 %v2974_v55  ;;  %v2873_v55 = vsub.f32 %v8436_v39, %v9179_v15  ;;  %v2874_v15 = vsub.f32 %v8454_v59, %v9200_v51 }
 0x4df   : > { %12897 = vst [vmem:[#allocation110_spill] sm:$0xff] %v9698_v7  ;;  %v9702_v6 = vpop.permute.xlu2 %3410  ;;  %v9708_v43 = vpop.eup %6324  ;;  %6328 = vpow2.f32 %v2972_v42  ;;  %v2980_v8 = vmul.f32 1.442695, %v2872_v36  ;;  %v12908_v36 = vld [vmem:[#allocation179_spill] sm:$0xff] }
 0x4e0   : > { %12898 = vst [vmem:[#allocation118_spill] sm:$0xff] %v9700_v58  ;;  %6330 = vpow2.f32 %v2976_v29  ;;  %v2982_v42 = vmul.f32 1.442695, %v2873_v55  ;;  %v2875_v29 = vsub.f32 %v8509_v9, %v9157_v4  ;;  %v12969_v9 = vld [vmem:[#allocation228_spill] sm:$0xff] }
 0x4e1   : > { %12901 = vst [vmem:[#allocation297_spill] sm:$0xff] %v9708_v43  ;;  %6332 = vpow2.f32 %v2980_v8 }
 0x4e4   : > { %3480 = vrot.lane.b32.xlu1 %v9704_v53, %s6986_s5  ;;  %3478 = vrot.lane.b32.xlu0 %v9706_v10, %s6986_s5  ;;  %v2978_v53 = vmul.f32 1.442695, %v2871_v0  ;;  %v9728_v10 = vpop.eup %6326  ;;  %v2876_v0 = vsub.f32 %v12703_v48, %v12908_v36 }
 0x4e5   : > { %3482 = vrot.lane.b32.xlu2 %v9708_v43, %s6986_s5  ;;  %12905 = vst [vmem:[#allocation299_spill] sm:$0xff] %v9728_v10  ;;  %v9730_v7 = vpop.eup %6328  ;;  %v2986_v43 = vmul.f32 1.442695, %v2875_v29 }
 0x4e6   : > { %v9722_v56 = vpop.permute.xlu1 %3204  ;;  %v9724_v19 = vpop.permute.xlu0 %3202  ;;  %12906 = vst [vmem:[#allocation300_spill] sm:$0xff] %v9730_v7  ;;  %6334 = vpow2.f32 %v2978_v53  ;;  %v2988_v53 = vmul.f32 1.442695, %v2876_v0 }
 0x4e7   : > { %12903 = vst [vmem:[#allocation208_spill] sm:$0xff] %v9722_v56  ;;  %v9726_v22 = vpop.permute.xlu2 %3416  ;;  %v9732_v18 = vpop.eup %6330  ;;  %6336 = vpow2.f32 %v2982_v42  ;;  %v12915_v42 = vld [vmem:[#allocation184_spill] sm:$0xff] }
 0x4e8   : > { %12904 = vst [vmem:[#allocation298_spill] sm:$0xff] %v9724_v19  ;;  %6338 = vpow2.f32 %v2986_v43  ;;  %v2877_v29 = vsub.f32 %v7988_v14, %v12915_v42 }
 0x4e9   : > { %12907 = vst [vmem:[#allocation301_spill] sm:$0xff] %v9732_v18 }
 0x4ec   : > { %3486 = vrot.lane.b32.xlu1 %v9728_v10, %s6986_s5  ;;  %3484 = vrot.lane.b32.xlu0 %v9730_v7, %s6986_s5  ;;  %v2984_v10 = vmul.f32 1.442695, %v2874_v15  ;;  %v9752_v7 = vpop.eup %6332  ;;  %v12916_v15 = vld [vmem:[#allocation64_spill] sm:$0xff] }
 0x4ed   : > { %3488 = vrot.lane.b32.xlu2 %v9732_v18, %s6986_s5  ;;  %12911 = vst [vmem:[#allocation303_spill] sm:$0xff] %v9752_v7  ;;  %v9754_v56 = vpop.eup %6334  ;;  %v12914_v18 = vld [vmem:[#allocation180_spill] sm:$0xff]  ;;  %v2879_v36 = vsub.f32 %v8064_v46, %v12916_v15  ;;  %v12922_v15 = vld [vmem:[#allocation102_spill] sm:$0xff] }
 0x4ee   : > { %v9746_v55 = vpop.permute.xlu1 %3210  ;;  %v9748_v4 = vpop.permute.xlu0 %3208  ;;  %12912 = vst [vmem:[#allocation304_spill] sm:$0xff] %v9754_v56  ;;  %v2878_v19 = vsub.f32 %v8008_v45, %v12914_v18  ;;  %6340 = vpow2.f32 %v2984_v10  ;;  %v12935_v45 = vld [vmem:[#allocation132_spill] sm:$0xff] }
 0x4ef   : > { %12909 = vst [vmem:[#allocation179_spill] sm:$0xff] %v9746_v55  ;;  %v9750_v8 = vpop.permute.xlu2 %3422  ;;  %v9756_v51 = vpop.eup %6336  ;;  %6342 = vpow2.f32 %v2988_v53  ;;  %v2990_v55 = vmul.f32 1.442695, %v2877_v29  ;;  %v12920_v53 = vld [vmem:[#allocation191_spill] sm:$0xff] }
 0x4f0   : > { %12910 = vst [vmem:[#allocation302_spill] sm:$0xff] %v9748_v4  ;;  %v2994_v4 = vmul.f32 1.442695, %v2879_v36 }
 0x4f1   : > { %12913 = vst [vmem:[#allocation305_spill] sm:$0xff] %v9756_v51 }
 0x4f4   : > { %3492 = vrot.lane.b32.xlu1 %v9752_v7, %s6986_s5  ;;  %3490 = vrot.lane.b32.xlu0 %v9754_v56, %s6986_s5  ;;  %v2992_v7 = vmul.f32 1.442695, %v2878_v19  ;;  %v9776_v56 = vpop.eup %6338  ;;  %v12921_v19 = vld [vmem:[#allocation51_spill] sm:$0xff] }
 0x4f5   : > { %3494 = vrot.lane.b32.xlu2 %v9756_v51, %s6986_s5  ;;  %12917 = vst [vmem:[#allocation180_spill] sm:$0xff] %v9776_v56  ;;  %v9778_v42 = vpop.eup %6340  ;;  %v2881_v51 = vsub.f32 %v8123_v31, %v12920_v53  ;;  %v2880_v29 = vsub.f32 %v8105_v26, %v12921_v19 }
 0x4f6   : > { %v9770_v0 = vpop.permute.xlu1 %3408  ;;  %v9772_v43 = vpop.permute.xlu0 %3406  ;;  %12918 = vst [vmem:[#allocation184_spill] sm:$0xff] %v9778_v42  ;;  %6344 = vpow2.f32 %v2992_v7  ;;  %v2882_v7 = vsub.f32 %v8177_v25, %v12922_v15  ;;  %v12928_v15 = vld [vmem:[#allocation55_spill] sm:$0xff]  ;;  %v12929_v25 = vld [vmem:[#allocation32_spill] sm:$0xff] }
 0x4f7   : > { %v9774_v18 = vpop.permute.xlu2 %3428  ;;  %v9780_v10 = vpop.eup %6342  ;;  %6346 = vpow2.f32 %v2990_v55  ;;  %v2996_v31 = vmul.f32 1.442695, %v2880_v29 }
 0x4f8   : > { %12919 = vst [vmem:[#allocation64_spill] sm:$0xff] %v9780_v10  ;;  %6348 = vpow2.f32 %v2994_v4  ;;  %v3000_v55 = vmul.f32 1.442695, %v2882_v7  ;;  %v12926_v4 = vld [vmem:[#allocation81_spill] sm:$0xff] }
 0x4fc   : > { %3498 = vrot.lane.b32.xlu1 %v9776_v56, %s6986_s5  ;;  %3496 = vrot.lane.b32.xlu0 %v9778_v42, %s6986_s5  ;;  %v2998_v56 = vmul.f32 1.442695, %v2881_v51  ;;  %v9800_v42 = vpop.eup %6344  ;;  %v12927_v51 = vld [vmem:[#allocation98_spill] sm:$0xff] }
 0x4fd   : > { %3500 = vrot.lane.b32.xlu2 %v9780_v10, %s6986_s5  ;;  %12923 = vst [vmem:[#allocation191_spill] sm:$0xff] %v9800_v42  ;;  %v9802_v46 = vpop.eup %6346  ;;  %v2884_v10 = vsub.f32 %v12725_v54, %v12926_v4  ;;  %v2883_v29 = vsub.f32 %v8210_v32, %v12927_v51  ;;  %v12931_v51 = vld [vmem:[#allocation35_spill] sm:$0xff] }
 0x4fe   : > { %v9794_v36 = vpop.permute.xlu1 %3414  ;;  %v9796_v53 = vpop.permute.xlu0 %3412  ;;  %12924 = vst [vmem:[#allocation51_spill] sm:$0xff] %v9802_v46  ;;  %6350 = vpow2.f32 %v2998_v56  ;;  %v2885_v56 = vsub.f32 %v12723_v38, %v12928_v15  ;;  %v12933_v15 = vld [vmem:[#allocation37_spill] sm:$0xff] }
 0x4ff   : > { %v9798_v58 = vpop.permute.xlu2 %3434  ;;  %v9804_v19 = vpop.eup %6348  ;;  %6352 = vpow2.f32 %v2996_v31  ;;  %v1996_v31 = vsub.f32 %v12746_v62, %v12929_v25  ;;  %v1998_v38 = vsub.f32 %v12754_v63, %v12933_v15  ;;  %v12936_v62 = vld [vmem:[#allocation146_spill] sm:$0xff]  ;;  %v6990_v63 = vmov 0   ;;  %v12937_v15 = vld [vmem:[#allocation41_spill] sm:$0xff] }
 0x500   : > { %12925 = vst [vmem:[#allocation102_spill] sm:$0xff] %v9804_v19  ;;  %6354 = vpow2.f32 %v3000_v55  ;;  %v3006_v55 = vmul.f32 1.442695, %v2885_v56  ;;  %6110 = vset.pattern.permute.xlu1 %v6990_v63  ;;  %6111 = vset.pattern.permute.xlu2 %v6990_v63 }
 0x501   : > { %v2060_v25 = vmul.f32 1.442695, %v1996_v31  ;;  %6109 = vset.pattern.permute.xlu0 %v6990_v63  ;;  %v12941_v63 = vld [vmem:[#allocation43_spill] sm:$0xff] }
 0x504   : > { %3504 = vrot.lane.b32.xlu1 %v9800_v42, %s6986_s5  ;;  %3502 = vrot.lane.b32.xlu0 %v9802_v46, %s6986_s5  ;;  %v3004_v42 = vmul.f32 1.442695, %v2884_v10  ;;  %v3002_v46 = vmul.f32 1.442695, %v2883_v29  ;;  %v9826_v26 = vpop.eup %6350  ;;  %v2887_v10 = vsub.f32 %v12735_v47, %v12935_v45  ;;  %v2888_v45 = vsub.f32 %v12734_v21, %v9221_v50 }
 0x505   : > { %3506 = vrot.lane.b32.xlu2 %v9804_v19, %s6986_s5  ;;  %12930 = vst [vmem:[#allocation81_spill] sm:$0xff] %v9826_v26  ;;  %v1997_v19 = vsub.f32 %v12756_v17, %v12931_v51  ;;  %v9830_v32 = vpop.eup %6352  ;;  %v2886_v17 = vsub.f32 %v12726_v40, %v12936_v62  ;;  %v2000_v62 = vsub.f32 %v12768_v3, %v12937_v15  ;;  %v12953_v40 = vld [vmem:[#allocation224_spill] sm:$0xff] }
 0x506   : > { %v9818_v7 = vpop.permute.xlu1 %3420  ;;  %v9820_v4 = vpop.permute.xlu0 %3418  ;;  %12932 = vst [vmem:[#allocation98_spill] sm:$0xff] %v9830_v32  ;;  %6356 = vpow2.f32 %v3004_v42  ;;  %v3010_v51 = vmul.f32 1.442695, %v2887_v10  ;;  %v12943_v10 = vld [vmem:[#allocation80_spill] sm:$0xff] }
 0x507   : > { %v9822_v54 = vpop.permute.xlu2 %3440  ;;  %v9834_v14 = vpop.eup %6354  ;;  %6358 = vpow2.f32 %v3002_v46  ;;  %v2062_v42 = vmul.f32 1.442695, %v1997_v19  ;;  %v2064_v46 = vmul.f32 1.442695, %v1998_v38  ;;  %v2001_v38 = vsub.f32 %v12766_v20, %v12941_v63 }
 0x508   : > { %12934 = vst [vmem:[#allocation55_spill] sm:$0xff] %v9834_v14  ;;  %6360 = vpow2.f32 %v3006_v55  ;;  %v12939_v55 = vld [vmem:[#allocation40_spill] sm:$0xff]  ;;  %v2890_v3 = vsub.f32 %v12744_v5, %v12943_v10 }
 0x509   : > { %6362 = vpow2.f32 %v2060_v25  ;;  %v1999_v50 = vsub.f32 %v12758_v1, %v12939_v55  ;;  %v2068_v1 = vmul.f32 1.442695, %v2000_v62  ;;  %v12944_v25 = vld [vmem:[#allocation220_spill] sm:$0xff]  ;;  %v2070_v10 = vmul.f32 1.442695, %v2001_v38  ;;  %v12951_v38 = vld [vmem:[#allocation45_spill] sm:$0xff] }
 0x50a   : > { %6364 = vpow2.f32 %v2062_v42 }
 0x50b   : > { %6366 = vpow2.f32 %v2064_v46  ;;  %v2066_v20 = vmul.f32 1.442695, %v1999_v50  ;;  %v12947_v46 = vld [vmem:[#allocation154_spill] sm:$0xff] }
 0x50c   : > { %3510 = vrot.lane.b32.xlu1 %v9826_v26, %s6986_s5  ;;  %3508 = vrot.lane.b32.xlu0 %v9830_v32, %s6986_s5  ;;  %v9856_v19 = vpop.eup %6356  ;;  %v3012_v32 = vmul.f32 1.442695, %v2888_v45  ;;  %6368 = vpow2.f32 %v3010_v51  ;;  %v12946_v45 = vld [vmem:[#allocation237_spill] sm:$0xff] }
 0x50d   : > { %3512 = vrot.lane.b32.xlu2 %v9834_v14, %s6986_s5  ;;  %v3008_v14 = vmul.f32 1.442695, %v2886_v17  ;;  %12938 = vst [vmem:[#allocation32_spill] sm:$0xff] %v9856_v19  ;;  %v9860_v26 = vpop.eup %6358  ;;  %v12945_v17 = vld [vmem:[#allocation28_spill] sm:$0xff]  ;;  %v2891_v51 = vsub.f32 %v12947_v46, %v12946_v45 }
 0x50e   : > { %v9848_v29 = vpop.permute.xlu1 %3426  ;;  %v9850_v56 = vpop.permute.xlu0 %3424  ;;  %12940 = vst [vmem:[#allocation35_spill] sm:$0xff] %v9860_v26  ;;  %v2889_v42 = vsub.f32 %v12945_v17, %v12944_v25  ;;  %v3016_v25 = vmul.f32 1.442695, %v2890_v3  ;;  %v12949_v45 = vld [vmem:[#allocation236_spill] sm:$0xff] }
 0x50f   : > { %v9852_v31 = vpop.permute.xlu2 %3446  ;;  %v9864_v21 = vpop.eup %6360  ;;  %6370 = vpow2.f32 %v3008_v14  ;;  %v12952_v17 = vld [vmem:[#allocation20_spill] sm:$0xff] }
 0x510   : > { %12942 = vst [vmem:[#allocation37_spill] sm:$0xff] %v9864_v21  ;;  %6372 = vpow2.f32 %v3012_v32  ;;  %v9882_v63 = vpop.eup %6362  ;;  %v3014_v50 = vmul.f32 1.442695, %v2889_v42  ;;  %v2002_v5 = vsub.f32 %v12952_v17, %v12951_v38  ;;  %v12956_v42 = vld [vmem:[#allocation22_spill] sm:$0xff]  ;;  %v12958_v17 = vld [vmem:[#allocation48_spill] sm:$0xff] }
 0x511   : > { %v9886_v14 = vpop.eup %6364  ;;  %6374 = vpow2.f32 %v2068_v1  ;;  %v12955_v1 = vld [vmem:[#allocation49_spill] sm:$0xff] }
 0x512   : > { %6376 = vpow2.f32 %v2066_v20  ;;  %v3277_v3 = vadd.f32 %v9886_v14, %v12953_v40  ;;  %v2004_v48 = vsub.f32 %v12956_v42, %v12955_v1  ;;  %v12957_v20 = vld [vmem:[#allocation243_spill] sm:$0xff]  ;;  %v2072_v1 = vmul.f32 1.442695, %v2002_v5 }
 0x513   : > { %6378 = vpow2.f32 %v2070_v10  ;;  %v12959_v10 = vld [vmem:[#allocation21_spill] sm:$0xff]  ;;  %v12964_v5 = vld [vmem:[#allocation23_spill] sm:$0xff] }
 0x514   : > { %3516 = vrot.lane.b32.xlu1 %v9856_v19, %s6986_s5  ;;  %3514 = vrot.lane.b32.xlu0 %v9860_v26, %s6986_s5  ;;  %v9888_v26 = vpop.eup %6366  ;;  %v3018_v19 = vmul.f32 1.442695, %v2891_v51  ;;  %6380 = vpow2.f32 %v3016_v25  ;;  %v2003_v40 = vsub.f32 %v12959_v10, %v12958_v17  ;;  %v12963_v10 = vld [vmem:[#allocation53_spill] sm:$0xff] }
 0x515   : > { %3518 = vrot.lane.b32.xlu2 %v9864_v21, %s6986_s5  ;;  %v9890_v32 = vpop.eup %6368  ;;  %v3276_v21 = vadd.f32 %v9882_v63, %v12949_v45  ;;  %v3278_v59 = vadd.f32 %v9888_v26, %v12957_v20  ;;  %6382 = vpow2.f32 %v3014_v50  ;;  %v3597_v45 = vadd.f32 %v9772_v43, %v3277_v3 }
 0x516   : > { %v9878_v15 = vpop.permute.xlu1 %3432  ;;  %v9880_v55 = vpop.permute.xlu0 %3430  ;;  %12948 = vst [vmem:[#allocation132_spill] sm:$0xff] %v9890_v32  ;;  %6384 = vpow2.f32 %v3018_v19  ;;  %v2076_v50 = vmul.f32 1.442695, %v2004_v48  ;;  %v2074_v3 = vmul.f32 1.442695, %v2003_v40  ;;  %v12967_v40 = vld [vmem:[#allocation57_spill] sm:$0xff] }
 0x517   : > { %v9884_v62 = vpop.permute.xlu2 %3452  ;;  %v9894_v46 = vpop.eup %6370  ;;  %v3596_v51 = vadd.f32 %v9678_v34, %v3276_v21  ;;  %v3598_v25 = vadd.f32 %v9770_v0, %v3278_v59  ;;  %v12961_v59 = vld [vmem:[#allocation242_spill] sm:$0xff] }
 0x518   : > { %12950 = vst [vmem:[#allocation146_spill] sm:$0xff] %v9894_v46  ;;  %v9900_v47 = vpop.eup %6372 }
 0x519   : > { %12954 = vst [vmem:[#allocation41_spill] sm:$0xff] %v9900_v47  ;;  %v9921_v34 = vpop.eup %6374  ;;  %6386 = vrcp.f32 %v3596_v51 }
 0x51a   : > { %v9925_v20 = vpop.eup %6376  ;;  %6388 = vrcp.f32 %v3597_v45  ;;  %v12968_v45 = vld [vmem:[#allocation25_spill] sm:$0xff]  ;;  %v3280_v39 = vadd.f32 %v9921_v34, %v12969_v9 }
 0x51b   : > { %v9927_v43 = vpop.eup %6378  ;;  %v3279_v0 = vadd.f32 %v9925_v20, %v12961_v59  ;;  %6390 = vrcp.f32 %v3598_v25  ;;  %v12971_v59 = vld [vmem:[#allocation24_spill] sm:$0xff] }
 0x51c   : > { %3522 = vrot.lane.b32.xlu1 %v9890_v32, %s6986_s5  ;;  %3520 = vrot.lane.b32.xlu0 %v9894_v46, %s6986_s5  ;;  %v9929_v19 = vpop.eup %6380  ;;  %6392 = vpow2.f32 %v2072_v1  ;;  %v12965_v46 = vld [vmem:[#allocation249_spill] sm:$0xff]  ;;  %v2007_v32 = vsub.f32 %v12968_v45, %v12967_v40  ;;  %v12970_v1 = vld [vmem:[#allocation54_spill] sm:$0xff]  ;;  %v3600_v9 = vadd.f32 %v9796_v53, %v3280_v39  ;;  %v12975_v39 = vld [vmem:[#allocation248_spill] sm:$0xff] }
 0x51d   : > { %3524 = vrot.lane.b32.xlu2 %v9900_v47, %s6986_s5  ;;  %12960 = vst [vmem:[#allocation40_spill] sm:$0xff] %v9929_v19  ;;  %v9933_v17 = vpop.eup %6382  ;;  %v2005_v47 = vsub.f32 %v12964_v5, %v12963_v10  ;;  %v3281_v48 = vadd.f32 %v9927_v43, %v12965_v46  ;;  %6394 = vpow2.f32 %v2076_v50  ;;  %v3599_v25 = vadd.f32 %v9702_v6, %v3279_v0 }
 0x51e   : > { %v9917_v38 = vpop.permute.xlu1 %3438  ;;  %v9919_v21 = vpop.permute.xlu0 %3436  ;;  %12962 = vst [vmem:[#allocation43_spill] sm:$0xff] %v9933_v17  ;;  %v2006_v46 = vsub.f32 %v12971_v59, %v12970_v1  ;;  %6396 = vpow2.f32 %v2074_v3  ;;  %v2082_v3 = vmul.f32 1.442695, %v2007_v32  ;;  %v12976_v32 = vld [vmem:[#allocation62_spill] sm:$0xff] }
 0x51f   : > { %v9923_v42 = vpop.permute.xlu2 %3458  ;;  %v9939_v51 = vpop.eup %6384  ;;  %v3601_v50 = vadd.f32 %v9794_v36, %v3281_v48  ;;  %v2078_v40 = vmul.f32 1.442695, %v2005_v47  ;;  %6398 = vrcp.f32 %v3599_v25  ;;  %v12977_v25 = vld [vmem:[#allocation27_spill] sm:$0xff] }
 0x520   : > { %12966 = vst [vmem:[#allocation80_spill] sm:$0xff] %v9939_v51  ;;  %v9955_v10 = vpop.eup %6386  ;;  %v2080_v48 = vmul.f32 1.442695, %v2006_v46  ;;  %v12978_v46 = vld [vmem:[#allocation108_spill] sm:$0xff] }
 0x521   : > { %12972 = vst [vmem:[#allocation220_spill] sm:$0xff] %v9955_v10  ;;  %v9962_v5 = vpop.eup %6388  ;;  %6400 = vrcp.f32 %v3601_v50 }
 0x522   : > { %12973 = vst [vmem:[#allocation237_spill] sm:$0xff] %v9962_v5  ;;  %v9966_v1 = vpop.eup %6390  ;;  %6402 = vrcp.f32 %v3600_v9  ;;  %v3725_v47 = vmul.f32 %v9962_v5, %v9886_v14  ;;  %v12979_v9 = vld [vmem:[#allocation70_spill] sm:$0xff] }
 0x523   : > { %12974 = vst [vmem:[#allocation236_spill] sm:$0xff] %v9966_v1  ;;  %v9968_v36 = vpop.eup %6392  ;;  %6404 = vpow2.f32 %v2078_v40  ;;  %v3726_v12 = vmul.f32 %v9966_v1, %v9888_v26  ;;  %v12982_v5 = vld [vmem:[#allocation66_spill] sm:$0xff] }
 0x524   : > { %3528 = vrot.lane.b32.xlu1 %v9929_v19, %s6986_s5  ;;  %3526 = vrot.lane.b32.xlu0 %v9933_v17, %s6986_s5  ;;  %v9970_v59 = vpop.eup %6394  ;;  %v3282_v53 = vadd.f32 %v9968_v36, %v12975_v39  ;;  %v2008_v19 = vsub.f32 %v12977_v25, %v12976_v32  ;;  %6406 = vpow2.f32 %v2082_v3  ;;  %v12980_v39 = vld [vmem:[#allocation30_spill] sm:$0xff]  ;;  %v12983_v32 = vld [vmem:[#allocation29_spill] sm:$0xff] }
 0x525   : > { %3530 = vrot.lane.b32.xlu2 %v9939_v51, %s6986_s5  ;;  %v3724_v51 = vmul.f32 %v9955_v10, %v9882_v63  ;;  %v9978_v17 = vpop.eup %6396  ;;  %v3284_v50 = vadd.f32 %v9970_v59, %v12978_v46  ;;  %v2010_v28 = vsub.f32 %v12980_v39, %v12979_v9  ;;  %v12981_v63 = vld [vmem:[#allocation232_spill] sm:$0xff]  ;;  %v2009_v40 = vsub.f32 %v12983_v32, %v12982_v5  ;;  %v12990_v32 = vld [vmem:[#allocation258_spill] sm:$0xff] }
 0x526   : > { %v9958_v6 = vpop.permute.xlu1 %3444  ;;  %v9960_v0 = vpop.permute.xlu0 %3442  ;;  %v3283_v10 = vadd.f32 %v9978_v17, %v12981_v63  ;;  %v3602_v14 = vadd.f32 %v9726_v22, %v3282_v53  ;;  %6408 = vpow2.f32 %v2080_v48  ;;  %v2084_v22 = vmul.f32 1.442695, %v2008_v19  ;;  %v12989_v63 = vld [vmem:[#allocation33_spill] sm:$0xff] }
 0x527   : > { %v9964_v45 = vpop.permute.xlu2 %3464  ;;  %v3604_v25 = vadd.f32 %v9818_v7, %v3284_v50  ;;  %v9994_v46 = vpop.eup %6398  ;;  %v2088_v5 = vmul.f32 1.442695, %v2010_v28  ;;  %v12988_v28 = vld [vmem:[#allocation77_spill] sm:$0xff] }
 0x528   : > { %12984 = vst [vmem:[#allocation45_spill] sm:$0xff] %v9994_v46  ;;  %v3603_v26 = vadd.f32 %v9820_v4, %v3283_v10  ;;  %v10001_v39 = vpop.eup %6400  ;;  %6410 = vrcp.f32 %v3602_v14  ;;  %v12987_v4 = vld [vmem:[#allocation88_spill] sm:$0xff]  ;;  %v3727_v19 = vmul.f32 %v9994_v46, %v9925_v20  ;;  %v2011_v14 = vsub.f32 %v12989_v63, %v12988_v28  ;;  %v12994_v46 = vld [vmem:[#allocation79_spill] sm:$0xff] }
 0x529   : > { %12985 = vst [vmem:[#allocation20_spill] sm:$0xff] %v10001_v39  ;;  %v10005_v53 = vpop.eup %6402  ;;  %6412 = vrcp.f32 %v3604_v25  ;;  %v12995_v28 = vld [vmem:[#allocation36_spill] sm:$0xff] }
 0x52a   : > { %12986 = vst [vmem:[#allocation224_spill] sm:$0xff] %v10005_v53  ;;  %v10007_v48 = vpop.eup %6404  ;;  %6414 = vrcp.f32 %v3603_v26  ;;  %v3728_v25 = vmul.f32 %v10005_v53, %v9921_v34  ;;  %v12991_v26 = vld [vmem:[#allocation83_spill] sm:$0xff] }
 0x52b   : > { %v10009_v7 = vpop.eup %6406  ;;  %v3285_v10 = vadd.f32 %v10007_v48, %v12987_v4  ;;  %6416 = vpow2.f32 %v2084_v22  ;;  %v12992_v4 = vld [vmem:[#allocation38_spill] sm:$0xff]  ;;  %v2012_v22 = vsub.f32 %v12995_v28, %v12994_v46 }
 0x52c   : > { %3790 = vperm.xlu0 %6109, %v3724_v51   ;;  %3795 = vperm.xlu1 %6110, %v3725_v47   ;;  %v3729_v47 = vmul.f32 %v10001_v39, %v9927_v43  ;;  %v10017_v50 = vpop.eup %6408  ;;  %6418 = vpow2.f32 %v2088_v5  ;;  %v2013_v1 = vsub.f32 %v12992_v4, %v12991_v26  ;;  %v12993_v43 = vld [vmem:[#allocation238_spill] sm:$0xff] }
 0x52d   : > { %3800 = vperm.xlu2 %6111, %v3726_v12   ;;  %v2086_v12 = vmul.f32 1.442695, %v2009_v40  ;;  %v3287_v40 = vadd.f32 %v10009_v7, %v12990_v32  ;;  %v3286_v39 = vadd.f32 %v10017_v50, %v12993_v43  ;;  %v3605_v20 = vadd.f32 %v9750_v8, %v3285_v10  ;;  %v13000_v43 = vld [vmem:[#allocation39_spill] sm:$0xff]  ;;  %v13001_v28 = vld [vmem:[#allocation14_spill] sm:$0xff] }
 0x52e   : > { %v9997_v3 = vpop.permute.xlu1 %3450  ;;  %v9999_v9 = vpop.permute.xlu0 %3448  ;;  %v2090_v8 = vmul.f32 1.442695, %v2011_v14  ;;  %v2094_v46 = vmul.f32 1.442695, %v2013_v1  ;;  %v12999_v1 = vld [vmem:[#allocation89_spill] sm:$0xff] }
 0x52f   : > { %v10003_v51 = vpop.permute.xlu2 %3470  ;;  %6420 = vpow2.f32 %v2086_v12  ;;  %v3607_v63 = vadd.f32 %v9848_v29, %v3287_v40  ;;  %v10033_v32 = vpop.eup %6410  ;;  %v3606_v34 = vadd.f32 %v9850_v56, %v3286_v39  ;;  %v2092_v29 = vmul.f32 1.442695, %v2012_v22  ;;  %v12998_v56 = vld [vmem:[#allocation133_spill] sm:$0xff] }
 0x530   : > { %12996 = vst [vmem:[#allocation49_spill] sm:$0xff] %v10033_v32  ;;  %v10040_v4 = vpop.eup %6412  ;;  %6422 = vrcp.f32 %v3605_v20  ;;  %v3730_v14 = vmul.f32 %v10033_v32, %v9968_v36  ;;  %v2014_v20 = vsub.f32 %v13000_v43, %v12999_v1  ;;  %v13005_v32 = vld [vmem:[#allocation96_spill] sm:$0xff] }
 0x531   : > { %12997 = vst [vmem:[#allocation22_spill] sm:$0xff] %v10040_v4  ;;  %6424 = vrcp.f32 %v3607_v63  ;;  %v3732_v40 = vmul.f32 %v10040_v4, %v9970_v59  ;;  %v13004_v59 = vld [vmem:[#allocation244_spill] sm:$0xff] }
 0x532   : > { %6426 = vrcp.f32 %v3606_v34  ;;  %v13002_v34 = vld [vmem:[#allocation99_spill] sm:$0xff] }
 0x533   : > { %6428 = vpow2.f32 %v2090_v8  ;;  %v2015_v8 = vsub.f32 %v12828_v33, %v13005_v32 }
 0x534   : > { %3815 = vperm.xlu0 %6109, %v3729_v47   ;;  %3805 = vperm.xlu1 %6110, %v3727_v19   ;;  %v10044_v47 = vpop.eup %6414  ;;  %6430 = vpow2.f32 %v2094_v46 }
 0x535   : > { %3810 = vperm.xlu2 %6111, %v3728_v25   ;;  %v10046_v12 = vpop.eup %6416  ;;  %v3731_v63 = vmul.f32 %v10044_v47, %v9978_v17  ;;  %6432 = vpow2.f32 %v2092_v29 }
 0x536   : > { %v10036_v5 = vpop.permute.xlu1 %3456  ;;  %v10038_v26 = vpop.permute.xlu0 %3454  ;;  %v3288_v39 = vadd.f32 %v10046_v12, %v12998_v56  ;;  %v13003_v56 = vld [vmem:[#allocation44_spill] sm:$0xff] }
 0x537   : > { %v10042_v10 = vpop.permute.xlu2 %3476  ;;  %v10048_v19 = vpop.eup %6418  ;;  %v2016_v53 = vsub.f32 %v13003_v56, %v13002_v34 }
 0x538   : > { %v10056_v25 = vpop.eup %6420  ;;  %v3290_v22 = vadd.f32 %v10048_v19, %v13001_v28  ;;  %v3608_v36 = vadd.f32 %v9774_v18, %v3288_v39  ;;  %v2096_v18 = vmul.f32 1.442695, %v2014_v20 }
 0x539   : > { %v3289_v4 = vadd.f32 %v10056_v25, %v13004_v59  ;;  %v10072_v43 = vpop.eup %6422  ;;  %v2100_v33 = vmul.f32 1.442695, %v2016_v53  ;;  %v13009_v53 = vld [vmem:[#allocation104_spill] sm:$0xff] }
 0x53a   : > { %v3610_v1 = vadd.f32 %v9878_v15, %v3290_v22  ;;  %13006 = vst [vmem:[#allocation243_spill] sm:$0xff] %v10072_v43  ;;  %v10079_v34 = vpop.eup %6424  ;;  %6434 = vrcp.f32 %v3608_v36  ;;  %v2098_v15 = vmul.f32 1.442695, %v2015_v8  ;;  %v3733_v20 = vmul.f32 %v10072_v43, %v10007_v48  ;;  %v13011_v59 = vld [vmem:[#allocation16_spill] sm:$0xff]  ;;  %v13015_v43 = vld [vmem:[#allocation111_spill] sm:$0xff] }
 0x53b   : > { %v3609_v17 = vadd.f32 %v9880_v55, %v3289_v4  ;;  %13007 = vst [vmem:[#allocation48_spill] sm:$0xff] %v10079_v34  ;;  %v13008_v55 = vld [vmem:[#allocation58_spill] sm:$0xff] }
 0x53c   : > { %3830 = vperm.xlu0 %6109, %v3732_v40   ;;  %3820 = vperm.xlu1 %6110, %v3730_v14   ;;  %v10083_v40 = vpop.eup %6426  ;;  %6436 = vrcp.f32 %v3610_v1  ;;  %v3735_v14 = vmul.f32 %v10079_v34, %v10009_v7  ;;  %v13012_v1 = vld [vmem:[#allocation114_spill] sm:$0xff] }
 0x53d   : > { %3825 = vperm.xlu2 %6111, %v3731_v63   ;;  %v10085_v32 = vpop.eup %6428  ;;  %6438 = vrcp.f32 %v3609_v17  ;;  %v13010_v63 = vld [vmem:[#allocation46_spill] sm:$0xff]  ;;  %v3734_v8 = vmul.f32 %v10083_v40, %v10017_v50 }
 0x53e   : > { %v10075_v46 = vpop.permute.xlu1 %3462  ;;  %v10077_v28 = vpop.permute.xlu0 %3460  ;;  %v3291_v4 = vadd.f32 %v10085_v32, %v13008_v55  ;;  %v2017_v56 = vsub.f32 %v13010_v63, %v13009_v53  ;;  %6440 = vpow2.f32 %v2096_v18  ;;  %v13013_v17 = vld [vmem:[#allocation50_spill] sm:$0xff]  ;;  %v2018_v18 = vsub.f32 %v12839_v2, %v13015_v43 }
 0x53f   : > { %v10081_v39 = vpop.permute.xlu2 %3482  ;;  %v10087_v29 = vpop.eup %6430  ;;  %6442 = vpow2.f32 %v2100_v33  ;;  %v2019_v55 = vsub.f32 %v13013_v17, %v13012_v1  ;;  %v13014_v7 = vld [vmem:[#allocation250_spill] sm:$0xff] }
 0x540   : > { %v10095_v22 = vpop.eup %6432  ;;  %v3293_v36 = vadd.f32 %v10087_v29, %v13011_v59  ;;  %v3611_v48 = vadd.f32 %v9798_v58, %v3291_v4  ;;  %6444 = vpow2.f32 %v2098_v15  ;;  %v2102_v58 = vmul.f32 1.442695, %v2017_v56 }
 0x541   : > { %v3292_v34 = vadd.f32 %v10095_v22, %v13014_v7  ;;  %v10111_v63 = vpop.eup %6434  ;;  %v2106_v2 = vmul.f32 1.442695, %v2019_v55  ;;  %v13019_v55 = vld [vmem:[#allocation19_spill] sm:$0xff] }
 0x542   : > { %v3613_v53 = vadd.f32 %v9917_v38, %v3293_v36  ;;  %v10118_v1 = vpop.eup %6436  ;;  %6446 = vrcp.f32 %v3611_v48  ;;  %v2104_v38 = vmul.f32 1.442695, %v2018_v18  ;;  %v3736_v56 = vmul.f32 %v10111_v63, %v10046_v12  ;;  %v13020_v18 = vld [vmem:[#allocation128_spill] sm:$0xff] }
 0x543   : > { %v3612_v50 = vadd.f32 %v9919_v21, %v3292_v34  ;;  %13016 = vst [vmem:[#allocation21_spill] sm:$0xff] %v10118_v1  ;;  %v13017_v21 = vld [vmem:[#allocation56_spill] sm:$0xff] }
 0x544   : > { %3845 = vperm.xlu0 %6109, %v3735_v14   ;;  %3835 = vperm.xlu1 %6110, %v3733_v20   ;;  %v10122_v14 = vpop.eup %6438  ;;  %6448 = vrcp.f32 %v3613_v53  ;;  %v3738_v20 = vmul.f32 %v10118_v1, %v10048_v19  ;;  %v13021_v53 = vld [vmem:[#allocation59_spill] sm:$0xff]  ;;  %v13022_v19 = vld [vmem:[#allocation254_spill] sm:$0xff]  ;;  %v13023_v1 = vld [vmem:[#allocation125_spill] sm:$0xff] }
 0x545   : > { %3840 = vperm.xlu2 %6111, %v3734_v8   ;;  %v10124_v43 = vpop.eup %6440  ;;  %6450 = vrcp.f32 %v3612_v50  ;;  %v13018_v8 = vld [vmem:[#allocation119_spill] sm:$0xff]  ;;  %v3737_v48 = vmul.f32 %v10122_v14, %v10056_v25  ;;  %v2022_v50 = vsub.f32 %v13021_v53, %v13020_v18  ;;  %v13027_v53 = vld [vmem:[#allocation134_spill] sm:$0xff] }
 0x546   : > { %v10114_v33 = vpop.permute.xlu1 %3468  ;;  %v10116_v59 = vpop.permute.xlu0 %3466  ;;  %v3294_v34 = vadd.f32 %v10124_v43, %v13017_v21  ;;  %v2020_v17 = vsub.f32 %v12841_v13, %v13018_v8  ;;  %6452 = vpow2.f32 %v2102_v58  ;;  %v2021_v13 = vsub.f32 %v12663_v24, %v13023_v1 }
 0x547   : > { %v10120_v4 = vpop.permute.xlu2 %3488  ;;  %v10126_v15 = vpop.eup %6442  ;;  %6454 = vpow2.f32 %v2106_v2  ;;  %v2112_v24 = vmul.f32 1.442695, %v2022_v50  ;;  %v13028_v50 = vld [vmem:[#allocation63_spill] sm:$0xff] }
 0x548   : > { %v10134_v36 = vpop.eup %6444  ;;  %v3296_v7 = vadd.f32 %v10126_v15, %v13019_v55  ;;  %v3614_v12 = vadd.f32 %v9822_v54, %v3294_v34  ;;  %6456 = vpow2.f32 %v2104_v38  ;;  %v2108_v54 = vmul.f32 1.442695, %v2020_v17 }
 0x549   : > { %v3295_v21 = vadd.f32 %v10134_v36, %v13022_v19  ;;  %v10150_v8 = vpop.eup %6446  ;;  %v2023_v19 = vsub.f32 %v13028_v50, %v13027_v53 }
 0x54a   : > { %v3616_v58 = vadd.f32 %v9958_v6, %v3296_v7  ;;  %13024 = vst [vmem:[#allocation242_spill] sm:$0xff] %v10150_v8  ;;  %v10157_v18 = vpop.eup %6448  ;;  %6458 = vrcp.f32 %v3614_v12  ;;  %v2110_v6 = vmul.f32 1.442695, %v2021_v13  ;;  %v3739_v17 = vmul.f32 %v10150_v8, %v10085_v32  ;;  %v13033_v8 = vld [vmem:[#allocation139_spill] sm:$0xff] }
 0x54b   : > { %v3615_v25 = vadd.f32 %v9960_v0, %v3295_v21  ;;  %13025 = vst [vmem:[#allocation53_spill] sm:$0xff] %v10157_v18  ;;  %v13026_v0 = vld [vmem:[#allocation69_spill] sm:$0xff]  ;;  %v3741_v7 = vmul.f32 %v10157_v18, %v10087_v29  ;;  %v13029_v21 = vld [vmem:[#allocation87_spill] sm:$0xff] }
 0x54c   : > { %3860 = vperm.xlu0 %6109, %v3738_v20   ;;  %3850 = vperm.xlu1 %6110, %v3736_v56   ;;  %v10161_v20 = vpop.eup %6450  ;;  %6460 = vrcp.f32 %v3616_v58  ;;  %v13030_v58 = vld [vmem:[#allocation143_spill] sm:$0xff] }
 0x54d   : > { %3855 = vperm.xlu2 %6111, %v3737_v48   ;;  %v10163_v1 = vpop.eup %6452  ;;  %6462 = vrcp.f32 %v3615_v25  ;;  %v3740_v13 = vmul.f32 %v10161_v20, %v10095_v22  ;;  %v13031_v25 = vld [vmem:[#allocation73_spill] sm:$0xff]  ;;  %v13032_v29 = vld [vmem:[#allocation259_spill] sm:$0xff] }
 0x54e   : > { %v10153_v2 = vpop.permute.xlu1 %3474  ;;  %v10155_v55 = vpop.permute.xlu0 %3472  ;;  %v3297_v56 = vadd.f32 %v10163_v1, %v13026_v0  ;;  %6464 = vpow2.f32 %v2108_v54  ;;  %v2025_v0 = vsub.f32 %v13031_v25, %v13030_v58  ;;  %v2024_v54 = vsub.f32 %v12860_v16, %v13033_v8 }
 0x54f   : > { %v10159_v34 = vpop.permute.xlu2 %3494  ;;  %v10165_v38 = vpop.eup %6454  ;;  %6466 = vpow2.f32 %v2112_v24 }
 0x550   : > { %v10173_v48 = vpop.eup %6456  ;;  %v3299_v12 = vadd.f32 %v10165_v38, %v13029_v21  ;;  %v3617_v32 = vadd.f32 %v9852_v31, %v3297_v56  ;;  %6468 = vpow2.f32 %v2110_v6  ;;  %v2114_v31 = vmul.f32 1.442695, %v2023_v19 }
 0x551   : > { %v3298_v18 = vadd.f32 %v10173_v48, %v13032_v29  ;;  %v10189_v50 = vpop.eup %6458  ;;  %v2118_v16 = vmul.f32 1.442695, %v2025_v0  ;;  %v13036_v0 = vld [vmem:[#allocation97_spill] sm:$0xff] }
 0x552   : > { %v3619_v53 = vadd.f32 %v9997_v3, %v3299_v12  ;;  %v10196_v58 = vpop.eup %6460  ;;  %6470 = vrcp.f32 %v3617_v32  ;;  %v2116_v3 = vmul.f32 1.442695, %v2024_v54  ;;  %v3742_v19 = vmul.f32 %v10189_v50, %v10124_v43  ;;  %v13037_v54 = vld [vmem:[#allocation153_spill] sm:$0xff] }
 0x553   : > { %v3618_v22 = vadd.f32 %v9999_v9, %v3298_v18  ;;  %v13034_v9 = vld [vmem:[#allocation82_spill] sm:$0xff] }
 0x554   : > { %3875 = vperm.xlu0 %6109, %v3741_v7   ;;  %3865 = vperm.xlu1 %6110, %v3739_v17   ;;  %v10200_v7 = vpop.eup %6462  ;;  %6472 = vrcp.f32 %v3619_v53  ;;  %v3744_v17 = vmul.f32 %v10196_v58, %v10126_v15  ;;  %v2028_v53 = vsub.f32 %v12683_v37, %v13037_v54  ;;  %v13038_v15 = vld [vmem:[#allocation263_spill] sm:$0xff] }
 0x555   : > { %3870 = vperm.xlu2 %6111, %v3740_v13   ;;  %v10202_v8 = vpop.eup %6464  ;;  %6474 = vrcp.f32 %v3618_v22  ;;  %v13035_v13 = vld [vmem:[#allocation147_spill] sm:$0xff]  ;;  %v3743_v32 = vmul.f32 %v10200_v7, %v10134_v36 }
 0x556   : > { %v10192_v24 = vpop.permute.xlu1 %3480  ;;  %v10194_v21 = vpop.permute.xlu0 %3478  ;;  %v3300_v18 = vadd.f32 %v10202_v8, %v13034_v9  ;;  %v2026_v25 = vsub.f32 %v12862_v52, %v13035_v13  ;;  %6476 = vpow2.f32 %v2114_v31  ;;  %v13039_v9 = vld [vmem:[#allocation149_spill] sm:$0xff] }
 0x557   : > { %v10198_v56 = vpop.permute.xlu2 %3500  ;;  %v10204_v6 = vpop.eup %6466  ;;  %6478 = vpow2.f32 %v2118_v16  ;;  %v2027_v52 = vsub.f32 %v12678_v60, %v13039_v9  ;;  %v2124_v60 = vmul.f32 1.442695, %v2028_v53  ;;  %v13042_v53 = vld [vmem:[#allocation157_spill] sm:$0xff] }
 0x558   : > { %v10212_v12 = vpop.eup %6468  ;;  %v3302_v29 = vadd.f32 %v10204_v6, %v13036_v0  ;;  %v3620_v43 = vadd.f32 %v9884_v62, %v3300_v18  ;;  %6480 = vpow2.f32 %v2116_v3  ;;  %v2120_v62 = vmul.f32 1.442695, %v2026_v25 }
 0x559   : > { %v3301_v22 = vadd.f32 %v10212_v12, %v13038_v15  ;;  %v10228_v13 = vpop.eup %6470  ;;  %v2029_v15 = vsub.f32 %v8004_v27, %v13042_v53 }
 0x55a   : > { %v3622_v31 = vadd.f32 %v10036_v5, %v3302_v29  ;;  %v10235_v0 = vpop.eup %6472  ;;  %6482 = vrcp.f32 %v3620_v43  ;;  %v2122_v5 = vmul.f32 1.442695, %v2027_v52  ;;  %v3745_v25 = vmul.f32 %v10228_v13, %v10163_v1  ;;  %v13044_v52 = vld [vmem:[#allocation163_spill] sm:$0xff] }
 0x55b   : > { %v3621_v36 = vadd.f32 %v10038_v26, %v3301_v22  ;;  %13040 = vst [vmem:[#allocation23_spill] sm:$0xff] %v10235_v0  ;;  %v13041_v26 = vld [vmem:[#allocation93_spill] sm:$0xff]  ;;  %v13043_v22 = vld [vmem:[#allocation107_spill] sm:$0xff] }
 0x55c   : > { %3890 = vperm.xlu0 %6109, %v3744_v17   ;;  %3880 = vperm.xlu1 %6110, %v3742_v19   ;;  %v10239_v17 = vpop.eup %6474  ;;  %6484 = vrcp.f32 %v3622_v31  ;;  %v2031_v31 = vsub.f32 %v8066_v30, %v13044_v52 }
 0x55d   : > { %3885 = vperm.xlu2 %6111, %v3743_v32   ;;  %v10241_v3 = vpop.eup %6476  ;;  %6486 = vrcp.f32 %v3621_v36  ;;  %v3747_v32 = vmul.f32 %v10235_v0, %v10165_v38  ;;  %v3746_v9 = vmul.f32 %v10239_v17, %v10173_v48  ;;  %v13045_v38 = vld [vmem:[#allocation60_spill] sm:$0xff] }
 0x55e   : > { %v10231_v16 = vpop.permute.xlu1 %3486  ;;  %v10233_v37 = vpop.permute.xlu0 %3484  ;;  %v3303_v29 = vadd.f32 %v10241_v3, %v13041_v26  ;;  %6488 = vpow2.f32 %v2120_v62  ;;  %v13046_v26 = vld [vmem:[#allocation159_spill] sm:$0xff] }
 0x55f   : > { %v10237_v18 = vpop.permute.xlu2 %3506  ;;  %v10243_v19 = vpop.eup %6478  ;;  %6490 = vpow2.f32 %v2124_v60  ;;  %v2030_v27 = vsub.f32 %v8028_v35, %v13046_v26  ;;  %v2130_v35 = vmul.f32 1.442695, %v2031_v31  ;;  %v13050_v31 = vld [vmem:[#allocation165_spill] sm:$0xff] }
 0x560   : > { %v10251_v54 = vpop.eup %6480  ;;  %v3305_v43 = vadd.f32 %v10243_v19, %v13043_v22  ;;  %v3623_v1 = vadd.f32 %v9923_v42, %v3303_v29  ;;  %6492 = vpow2.f32 %v2122_v5  ;;  %v2126_v42 = vmul.f32 1.442695, %v2029_v15 }
 0x561   : > { %v3304_v36 = vadd.f32 %v10251_v54, %v13045_v38  ;;  %v10267_v53 = vpop.eup %6482  ;;  %v2032_v38 = vsub.f32 %v8121_v11, %v13050_v31 }
 0x562   : > { %v3625_v62 = vadd.f32 %v10075_v46, %v3305_v43  ;;  %13047 = vst [vmem:[#allocation249_spill] sm:$0xff] %v10267_v53  ;;  %v10274_v22 = vpop.eup %6484  ;;  %6494 = vrcp.f32 %v3623_v1  ;;  %v2128_v46 = vmul.f32 1.442695, %v2030_v27  ;;  %v3748_v15 = vmul.f32 %v10267_v53, %v10202_v8  ;;  %v13052_v27 = vld [vmem:[#allocation170_spill] sm:$0xff] }
 0x563   : > { %v3624_v48 = vadd.f32 %v10077_v28, %v3304_v36  ;;  %13048 = vst [vmem:[#allocation57_spill] sm:$0xff] %v10274_v22  ;;  %v13049_v28 = vld [vmem:[#allocation103_spill] sm:$0xff]  ;;  %v13051_v36 = vld [vmem:[#allocation117_spill] sm:$0xff] }
 0x564   : > { %3905 = vperm.xlu0 %6109, %v3747_v32   ;;  %3895 = vperm.xlu1 %6110, %v3745_v25   ;;  %v10278_v32 = vpop.eup %6486  ;;  %6496 = vrcp.f32 %v3625_v62  ;;  %v2034_v62 = vsub.f32 %v8175_v41, %v13052_v27 }
 0x565   : > { %3900 = vperm.xlu2 %6111, %v3746_v9   ;;  %v10280_v5 = vpop.eup %6488  ;;  %6498 = vrcp.f32 %v3624_v48  ;;  %v3750_v9 = vmul.f32 %v10274_v22, %v10204_v6  ;;  %v3749_v26 = vmul.f32 %v10278_v32, %v10212_v12  ;;  %v13053_v6 = vld [vmem:[#allocation74_spill] sm:$0xff] }
 0x566   : > { %v10270_v60 = vpop.permute.xlu1 %3492  ;;  %v10272_v30 = vpop.permute.xlu0 %3490  ;;  %v3306_v43 = vadd.f32 %v10280_v5, %v13049_v28  ;;  %6500 = vpow2.f32 %v2126_v42  ;;  %v13054_v28 = vld [vmem:[#allocation168_spill] sm:$0xff] }
 0x567   : > { %v10276_v29 = vpop.permute.xlu2 %3512  ;;  %v10282_v25 = vpop.eup %6490  ;;  %6502 = vpow2.f32 %v2130_v35  ;;  %v2033_v11 = vsub.f32 %v8142_v61, %v13054_v28  ;;  %v2136_v61 = vmul.f32 1.442695, %v2034_v62  ;;  %v13059_v62 = vld [vmem:[#allocation172_spill] sm:$0xff] }
 0x568   : > { %v10290_v52 = vpop.eup %6492  ;;  %v3308_v1 = vadd.f32 %v10282_v25, %v13051_v36  ;;  %v3626_v8 = vadd.f32 %v9964_v45, %v3306_v43  ;;  %6504 = vpow2.f32 %v2128_v46  ;;  %v2132_v45 = vmul.f32 1.442695, %v2032_v38 }
 0x569   : > { %v3307_v48 = vadd.f32 %v10290_v52, %v13053_v6  ;;  %v10306_v31 = vpop.eup %6494  ;;  %v2035_v6 = vsub.f32 %v8226_v49, %v13059_v62 }
 0x56a   : > { %v3628_v42 = vadd.f32 %v10114_v33, %v3308_v1  ;;  %13055 = vst [vmem:[#allocation25_spill] sm:$0xff] %v10306_v31  ;;  %v10313_v36 = vpop.eup %6496  ;;  %6506 = vrcp.f32 %v3626_v8  ;;  %v2134_v33 = vmul.f32 1.442695, %v2033_v11  ;;  %v3751_v38 = vmul.f32 %v10306_v31, %v10241_v3  ;;  %v13061_v11 = vld [vmem:[#allocation130_spill] sm:$0xff] }
 0x56b   : > { %v3627_v12 = vadd.f32 %v10116_v59, %v3307_v48  ;;  %13056 = vst [vmem:[#allocation228_spill] sm:$0xff] %v10313_v36  ;;  %v13058_v59 = vld [vmem:[#allocation113_spill] sm:$0xff]  ;;  %v13060_v48 = vld [vmem:[#allocation131_spill] sm:$0xff] }
 0x56c   : > { %3920 = vperm.xlu0 %6109, %v3750_v9   ;;  %3910 = vperm.xlu1 %6110, %v3748_v15   ;;  %v10317_v9 = vpop.eup %6498  ;;  %6508 = vrcp.f32 %v3628_v42  ;;  %v2037_v42 = vsub.f32 %v12552_v23, %v13061_v11 }
 0x56d   : > { %3915 = vperm.xlu2 %6111, %v3749_v26   ;;  %13057 = vst [vmem:[#allocation54_spill] sm:$0xff] %v10317_v9  ;;  %v10319_v46 = vpop.eup %6500  ;;  %6510 = vrcp.f32 %v3627_v12  ;;  %v3753_v26 = vmul.f32 %v10313_v36, %v10243_v19  ;;  %v3752_v28 = vmul.f32 %v10317_v9, %v10251_v54  ;;  %v13062_v19 = vld [vmem:[#allocation95_spill] sm:$0xff] }
 0x56e   : > { %v10309_v35 = vpop.permute.xlu1 %3498  ;;  %v10311_v41 = vpop.permute.xlu0 %3496  ;;  %v3309_v1 = vadd.f32 %v10319_v46, %v13058_v59  ;;  %6512 = vpow2.f32 %v2132_v45  ;;  %v13063_v59 = vld [vmem:[#allocation175_spill] sm:$0xff] }
 0x56f   : > { %v10315_v43 = vpop.permute.xlu2 %3518  ;;  %v10321_v15 = vpop.eup %6502  ;;  %6514 = vpow2.f32 %v2136_v61  ;;  %v2036_v49 = vsub.f32 %v12546_v44, %v13063_v59  ;;  %v2142_v44 = vmul.f32 1.442695, %v2037_v42  ;;  %v13068_v42 = vld [vmem:[#allocation178_spill] sm:$0xff] }
 0x570   : > { %v10329_v27 = vpop.eup %6504  ;;  %v3311_v8 = vadd.f32 %v10321_v15, %v13060_v48  ;;  %v3629_v3 = vadd.f32 %v10003_v51, %v3309_v1  ;;  %6516 = vpow2.f32 %v2134_v33  ;;  %v2138_v51 = vmul.f32 1.442695, %v2035_v6 }
 0x571   : > { %v3310_v12 = vadd.f32 %v10329_v27, %v13062_v19  ;;  %v10345_v62 = vpop.eup %6506  ;;  %v2038_v19 = vsub.f32 %v12555_v57, %v13068_v42  ;;  %v13074_v57 = vld [vmem:[#allocation140_spill] sm:$0xff] }
 0x572   : > { %v3631_v45 = vadd.f32 %v10153_v2, %v3311_v8  ;;  %13064 = vst [vmem:[#allocation24_spill] sm:$0xff] %v10345_v62  ;;  %v10352_v48 = vpop.eup %6508  ;;  %6518 = vrcp.f32 %v3629_v3  ;;  %v2140_v2 = vmul.f32 1.442695, %v2036_v49  ;;  %v3754_v6 = vmul.f32 %v10345_v62, %v10280_v5  ;;  %v13070_v49 = vld [vmem:[#allocation186_spill] sm:$0xff] }
 0x573   : > { %v3630_v54 = vadd.f32 %v10155_v55, %v3310_v12  ;;  %13065 = vst [vmem:[#allocation248_spill] sm:$0xff] %v10352_v48  ;;  %v13067_v55 = vld [vmem:[#allocation127_spill] sm:$0xff]  ;;  %v13069_v12 = vld [vmem:[#allocation144_spill] sm:$0xff] }
 0x574   : > { %3935 = vperm.xlu0 %6109, %v3753_v26   ;;  %3925 = vperm.xlu1 %6110, %v3751_v38   ;;  %v10356_v26 = vpop.eup %6510  ;;  %6520 = vrcp.f32 %v3631_v45  ;;  %v13071_v45 = vld [vmem:[#allocation26_spill] sm:$0xff] }
 0x575   : > { %3930 = vperm.xlu2 %6111, %v3752_v28   ;;  %13066 = vst [vmem:[#allocation62_spill] sm:$0xff] %v10356_v26  ;;  %v10358_v33 = vpop.eup %6512  ;;  %6522 = vrcp.f32 %v3630_v54  ;;  %v3756_v28 = vmul.f32 %v10352_v48, %v10282_v25  ;;  %v3755_v59 = vmul.f32 %v10356_v26, %v10290_v52  ;;  %v2040_v54 = vsub.f32 %v13071_v45, %v13070_v49  ;;  %v13072_v25 = vld [vmem:[#allocation105_spill] sm:$0xff]  ;;  %v13073_v48 = vld [vmem:[#allocation182_spill] sm:$0xff] }
 0x576   : > { %v10348_v61 = vpop.permute.xlu1 %3504  ;;  %v10350_v23 = vpop.permute.xlu0 %3502  ;;  %v3312_v8 = vadd.f32 %v10358_v33, %v13067_v55  ;;  %6524 = vpow2.f32 %v2138_v51  ;;  %v2039_v51 = vsub.f32 %v13074_v57, %v13073_v48  ;;  %v13081_v57 = vld [vmem:[#allocation34_spill] sm:$0xff] }
 0x577   : > { %v10354_v1 = vpop.permute.xlu2 %3524  ;;  %v10360_v38 = vpop.eup %6514  ;;  %6526 = vpow2.f32 %v2142_v44  ;;  %v2148_v48 = vmul.f32 1.442695, %v2040_v54  ;;  %v13079_v54 = vld [vmem:[#allocation188_spill] sm:$0xff] }
 0x578   : > { %v10368_v11 = vpop.eup %6516  ;;  %v3314_v3 = vadd.f32 %v10360_v38, %v13069_v12  ;;  %v3632_v5 = vadd.f32 %v10042_v10, %v3312_v8  ;;  %6528 = vpow2.f32 %v2140_v2  ;;  %v2144_v10 = vmul.f32 1.442695, %v2038_v19 }
 0x579   : > { %v3313_v55 = vadd.f32 %v10368_v11, %v13072_v25  ;;  %v10384_v12 = vpop.eup %6518 }
 0x57a   : > { %v3634_v42 = vadd.f32 %v10192_v24, %v3314_v3  ;;  %13075 = vst [vmem:[#allocation27_spill] sm:$0xff] %v10384_v12  ;;  %v10391_v45 = vpop.eup %6520  ;;  %6530 = vrcp.f32 %v3632_v5  ;;  %v2146_v24 = vmul.f32 1.442695, %v2039_v51  ;;  %v3757_v19 = vmul.f32 %v10384_v12, %v10319_v46  ;;  %v13085_v12 = vld [vmem:[#allocation193_spill] sm:$0xff] }
 0x57b   : > { %v3633_v52 = vadd.f32 %v10194_v21, %v3313_v55  ;;  %13076 = vst [vmem:[#allocation108_spill] sm:$0xff] %v10391_v45  ;;  %v13078_v21 = vld [vmem:[#allocation142_spill] sm:$0xff]  ;;  %v13080_v55 = vld [vmem:[#allocation71_spill] sm:$0xff] }
 0x57c   : > { %3950 = vperm.xlu0 %6109, %v3756_v28   ;;  %3940 = vperm.xlu1 %6110, %v3754_v6   ;;  %v10395_v28 = vpop.eup %6522  ;;  %6532 = vrcp.f32 %v3634_v42  ;;  %v2041_v5 = vsub.f32 %v13080_v55, %v13079_v54  ;;  %v13086_v54 = vld [vmem:[#allocation148_spill] sm:$0xff] }
 0x57d   : > { %3945 = vperm.xlu2 %6111, %v3755_v59   ;;  %13077 = vst [vmem:[#allocation70_spill] sm:$0xff] %v10395_v28  ;;  %v10397_v2 = vpop.eup %6524  ;;  %6534 = vrcp.f32 %v3633_v52  ;;  %v3759_v59 = vmul.f32 %v10391_v45, %v10321_v15  ;;  %v3758_v42 = vmul.f32 %v10395_v28, %v10329_v27  ;;  %v13082_v52 = vld [vmem:[#allocation196_spill] sm:$0xff]  ;;  %v13084_v15 = vld [vmem:[#allocation115_spill] sm:$0xff] }
 0x57e   : > { %v10387_v44 = vpop.permute.xlu1 %3510  ;;  %v10389_v49 = vpop.permute.xlu0 %3508  ;;  %v3315_v3 = vadd.f32 %v10397_v2, %v13078_v21  ;;  %6536 = vpow2.f32 %v2144_v10  ;;  %v13083_v21 = vld [vmem:[#allocation155_spill] sm:$0xff]  ;;  %v2042_v10 = vsub.f32 %v13086_v54, %v13085_v12  ;;  %v13094_v54 = vld [vmem:[#allocation166_spill] sm:$0xff] }
 0x57f   : > { %v10393_v8 = vpop.permute.xlu2 %3530  ;;  %v10399_v6 = vpop.eup %6526  ;;  %6538 = vpow2.f32 %v2148_v48  ;;  %v2043_v62 = vsub.f32 %v13083_v21, %v13082_v52 }
 0x580   : > { %v10407_v25 = vpop.eup %6528  ;;  %v3317_v51 = vadd.f32 %v10399_v6, %v13081_v57  ;;  %v3635_v46 = vadd.f32 %v10081_v39, %v3315_v3  ;;  %6540 = vpow2.f32 %v2146_v24  ;;  %v2150_v39 = vmul.f32 1.442695, %v2041_v5 }
 0x581   : > { %v3316_v45 = vadd.f32 %v10407_v25, %v13084_v15  ;;  %v10423_v57 = vpop.eup %6530  ;;  %v2154_v12 = vmul.f32 1.442695, %v2043_v62  ;;  %v13092_v62 = vld [vmem:[#allocation152_spill] sm:$0xff]  ;;  %v13093_v15 = vld [vmem:[#allocation86_spill] sm:$0xff] }
 0x582   : > { %v3637_v55 = vadd.f32 %v10231_v16, %v3317_v51  ;;  %13087 = vst [vmem:[#allocation30_spill] sm:$0xff] %v10423_v57  ;;  %v10430_v21 = vpop.eup %6532  ;;  %6542 = vrcp.f32 %v3635_v46  ;;  %v2152_v16 = vmul.f32 1.442695, %v2042_v10  ;;  %v3760_v5 = vmul.f32 %v10423_v57, %v10358_v33  ;;  %v13098_v57 = vld [vmem:[#allocation156_spill] sm:$0xff] }
 0x583   : > { %v3636_v27 = vadd.f32 %v10233_v37, %v3316_v45  ;;  %13088 = vst [vmem:[#allocation232_spill] sm:$0xff] %v10430_v21  ;;  %v13091_v37 = vld [vmem:[#allocation151_spill] sm:$0xff]  ;;  %v3762_v51 = vmul.f32 %v10430_v21, %v10360_v38  ;;  %v2044_v46 = vsub.f32 %v13093_v15, %v13092_v62  ;;  %v13097_v38 = vld [vmem:[#allocation126_spill] sm:$0xff] }
 0x584   : > { %3965 = vperm.xlu0 %6109, %v3759_v59   ;;  %3955 = vperm.xlu1 %6110, %v3757_v19   ;;  %v10434_v59 = vpop.eup %6534  ;;  %6544 = vrcp.f32 %v3637_v55  ;;  %v13099_v62 = vld [vmem:[#allocation91_spill] sm:$0xff] }
 0x585   : > { %3960 = vperm.xlu2 %6111, %v3758_v42   ;;  %13090 = vst [vmem:[#allocation29_spill] sm:$0xff] %v10434_v59  ;;  %v10436_v24 = vpop.eup %6536  ;;  %6546 = vrcp.f32 %v3636_v27  ;;  %v3761_v55 = vmul.f32 %v10434_v59, %v10368_v11  ;;  %v13096_v27 = vld [vmem:[#allocation94_spill] sm:$0xff] }
 0x586   : > { %v10426_v48 = vpop.permute.xlu1 %3516  ;;  %v10428_v52 = vpop.permute.xlu0 %3514  ;;  %v3318_v45 = vadd.f32 %v10436_v24, %v13091_v37  ;;  %6548 = vpow2.f32 %v2150_v39  ;;  %v13095_v37 = vld [vmem:[#allocation158_spill] sm:$0xff]  ;;  %v2045_v39 = vsub.f32 %v13099_v62, %v13098_v57  ;;  %v13107_v62 = vld [vmem:[#allocation177_spill] sm:$0xff] }
 0x587   : > { %v10432_v3 = vpop.permute.xlu2 %3800  ;;  %v10438_v19 = vpop.eup %6538  ;;  %6550 = vpow2.f32 %v2154_v12 }
 0x588   : > { %13089 = vst [vmem:[#allocation66_spill] sm:$0xff] %v10432_v3  ;;  %v10446_v42 = vpop.eup %6540  ;;  %v3320_v10 = vadd.f32 %v10438_v19, %v13094_v54  ;;  %v2046_v3 = vsub.f32 %v13096_v27, %v13095_v37  ;;  %v3638_v33 = vadd.f32 %v10120_v4, %v3318_v45  ;;  %6552 = vpow2.f32 %v2152_v16 }
 0x589   : > { %v3319_v21 = vadd.f32 %v10446_v42, %v13097_v38  ;;  %v10462_v54 = vpop.eup %6542  ;;  %v2156_v4 = vmul.f32 1.442695, %v2044_v46  ;;  %v13106_v38 = vld [vmem:[#allocation101_spill] sm:$0xff] }
 0x58a   : > { %v3640_v15 = vadd.f32 %v10270_v60, %v3320_v10  ;;  %13100 = vst [vmem:[#allocation88_spill] sm:$0xff] %v10462_v54  ;;  %v10469_v27 = vpop.eup %6544  ;;  %v2160_v57 = vmul.f32 1.442695, %v2046_v3  ;;  %6554 = vrcp.f32 %v3638_v33  ;;  %v2158_v60 = vmul.f32 1.442695, %v2045_v39  ;;  %v13105_v3 = vld [vmem:[#allocation160_spill] sm:$0xff] }
 0x58b   : > { %v3639_v11 = vadd.f32 %v10272_v30, %v3319_v21  ;;  %13101 = vst [vmem:[#allocation77_spill] sm:$0xff] %v10469_v27  ;;  %v13104_v30 = vld [vmem:[#allocation162_spill] sm:$0xff]  ;;  %v3765_v10 = vmul.f32 %v10469_v27, %v10399_v6  ;;  %v3763_v46 = vmul.f32 %v10462_v54, %v10397_v2  ;;  %v2047_v33 = vsub.f32 %v13106_v38, %v13105_v3 }
 0x58c   : > { %3980 = vperm.xlu0 %6109, %v3762_v51   ;;  %3970 = vperm.xlu1 %6110, %v3760_v5   ;;  %v10473_v51 = vpop.eup %6546  ;;  %6556 = vrcp.f32 %v3640_v15  ;;  %v13110_v6 = vld [vmem:[#allocation42_spill] sm:$0xff] }
 0x58d   : > { %3975 = vperm.xlu2 %6111, %v3761_v55   ;;  %13103 = vst [vmem:[#allocation258_spill] sm:$0xff] %v10473_v51  ;;  %v10475_v16 = vpop.eup %6548  ;;  %6558 = vrcp.f32 %v3639_v11  ;;  %v3764_v15 = vmul.f32 %v10473_v51, %v10407_v25  ;;  %v13108_v11 = vld [vmem:[#allocation167_spill] sm:$0xff]  ;;  %v13112_v54 = vld [vmem:[#allocation106_spill] sm:$0xff] }
 0x58e   : > { %v10465_v37 = vpop.permute.xlu1 %3522  ;;  %v10467_v12 = vpop.permute.xlu0 %3520  ;;  %v3321_v21 = vadd.f32 %v10475_v16, %v13104_v30  ;;  %6560 = vpow2.f32 %v2156_v4  ;;  %v13109_v30 = vld [vmem:[#allocation109_spill] sm:$0xff]  ;;  %v13111_v4 = vld [vmem:[#allocation164_spill] sm:$0xff] }
 0x58f   : > { %v10471_v45 = vpop.permute.xlu2 %3810  ;;  %v10477_v5 = vpop.eup %6550  ;;  %6562 = vpow2.f32 %v2160_v57  ;;  %v2048_v3 = vsub.f32 %v13112_v54, %v13111_v4  ;;  %v13120_v4 = vld [vmem:[#allocation189_spill] sm:$0xff] }
 0x590   : > { %13102 = vst [vmem:[#allocation33_spill] sm:$0xff] %v10471_v45  ;;  %v10485_v55 = vpop.eup %6552  ;;  %v3323_v39 = vadd.f32 %v10477_v5, %v13107_v62  ;;  %v2049_v45 = vsub.f32 %v13109_v30, %v13108_v11  ;;  %v3641_v2 = vadd.f32 %v10159_v34, %v3321_v21  ;;  %6564 = vpow2.f32 %v2158_v60 }
 0x591   : > { %v3322_v27 = vadd.f32 %v10485_v55, %v13110_v6  ;;  %v10501_v62 = vpop.eup %6554  ;;  %v2162_v34 = vmul.f32 1.442695, %v2047_v33  ;;  %v13119_v6 = vld [vmem:[#allocation116_spill] sm:$0xff] }
 0x592   : > { %v3643_v38 = vadd.f32 %v10309_v35, %v3323_v39  ;;  %13113 = vst [vmem:[#allocation83_spill] sm:$0xff] %v10501_v62  ;;  %v10508_v30 = vpop.eup %6556  ;;  %v2166_v54 = vmul.f32 1.442695, %v2049_v45  ;;  %6566 = vrcp.f32 %v3641_v2  ;;  %v2164_v35 = vmul.f32 1.442695, %v2048_v3  ;;  %v13118_v45 = vld [vmem:[#allocation169_spill] sm:$0xff] }
 0x593   : > { %v3642_v25 = vadd.f32 %v10311_v41, %v3322_v27  ;;  %13114 = vst [vmem:[#allocation38_spill] sm:$0xff] %v10508_v30  ;;  %v13117_v41 = vld [vmem:[#allocation124_spill] sm:$0xff]  ;;  %v3768_v39 = vmul.f32 %v10508_v30, %v10438_v19  ;;  %v3766_v33 = vmul.f32 %v10501_v62, %v10436_v24  ;;  %v2050_v2 = vsub.f32 %v13119_v6, %v13118_v45  ;;  %v13123_v19 = vld [vmem:[#allocation47_spill] sm:$0xff]  ;;  %v13125_v62 = vld [vmem:[#allocation121_spill] sm:$0xff] }
 0x594   : > { %3995 = vperm.xlu0 %6109, %v3765_v10   ;;  %3985 = vperm.xlu1 %6110, %v3763_v46   ;;  %v10512_v10 = vpop.eup %6558  ;;  %6568 = vrcp.f32 %v3643_v38 }
 0x595   : > { %3990 = vperm.xlu2 %6111, %v3764_v15   ;;  %13116 = vst [vmem:[#allocation79_spill] sm:$0xff] %v10512_v10  ;;  %v10514_v60 = vpop.eup %6560  ;;  %6570 = vrcp.f32 %v3642_v25  ;;  %v3767_v38 = vmul.f32 %v10512_v10, %v10446_v42  ;;  %v13121_v25 = vld [vmem:[#allocation174_spill] sm:$0xff] }
 0x596   : > { %v10504_v57 = vpop.permute.xlu1 %3528  ;;  %v10506_v11 = vpop.permute.xlu0 %3526  ;;  %v3324_v27 = vadd.f32 %v10514_v60, %v13117_v41  ;;  %6572 = vpow2.f32 %v2162_v34  ;;  %v13122_v41 = vld [vmem:[#allocation123_spill] sm:$0xff] }
 0x597   : > { %v10510_v21 = vpop.permute.xlu2 %3825  ;;  %v10516_v46 = vpop.eup %6562  ;;  %6574 = vpow2.f32 %v2166_v54  ;;  %v13124_v34 = vld [vmem:[#allocation171_spill] sm:$0xff] }
 0x598   : > { %13115 = vst [vmem:[#allocation238_spill] sm:$0xff] %v10510_v21  ;;  %v10524_v15 = vpop.eup %6564  ;;  %v3326_v3 = vadd.f32 %v10516_v46, %v13120_v4  ;;  %v2052_v21 = vsub.f32 %v13122_v41, %v13121_v25  ;;  %v3644_v24 = vadd.f32 %v10198_v56, %v3324_v27  ;;  %v2051_v45 = vsub.f32 %v13125_v62, %v13124_v34  ;;  %v13135_v34 = vld [vmem:[#allocation78_spill] sm:$0xff] }
 0x599   : > { %v3325_v30 = vadd.f32 %v10524_v15, %v13123_v19  ;;  %6576 = vpow2.f32 %v2164_v35  ;;  %v10540_v4 = vpop.eup %6566  ;;  %v2168_v56 = vmul.f32 1.442695, %v2050_v2  ;;  %v13134_v19 = vld [vmem:[#allocation129_spill] sm:$0xff] }
 0x59a   : > { %v3646_v6 = vadd.f32 %v10348_v61, %v3326_v3  ;;  %13126 = vst [vmem:[#allocation36_spill] sm:$0xff] %v10540_v4  ;;  %v10547_v41 = vpop.eup %6568  ;;  %v2172_v62 = vmul.f32 1.442695, %v2052_v21  ;;  %6578 = vrcp.f32 %v3644_v24  ;;  %v2170_v61 = vmul.f32 1.442695, %v2051_v45  ;;  %v13133_v21 = vld [vmem:[#allocation176_spill] sm:$0xff] }
 0x59b   : > { %v3645_v42 = vadd.f32 %v10350_v23, %v3325_v30  ;;  %13129 = vst [vmem:[#allocation39_spill] sm:$0xff] %v10547_v41  ;;  %v13132_v23 = vld [vmem:[#allocation185_spill] sm:$0xff]  ;;  %v3771_v3 = vmul.f32 %v10547_v41, %v10477_v5  ;;  %v3769_v2 = vmul.f32 %v10540_v4, %v10475_v16  ;;  %v2053_v24 = vsub.f32 %v13134_v19, %v13133_v21 }
 0x59c   : > { %4010 = vperm.xlu0 %6109, %v3768_v39   ;;  %4000 = vperm.xlu1 %6110, %v3766_v33   ;;  %v10551_v39 = vpop.eup %6570  ;;  %6580 = vrcp.f32 %v3646_v6  ;;  %v13138_v5 = vld [vmem:[#allocation161_spill] sm:$0xff] }
 0x59d   : > { %4005 = vperm.xlu2 %6111, %v3767_v38   ;;  %13131 = vst [vmem:[#allocation99_spill] sm:$0xff] %v10551_v39  ;;  %v10553_v35 = vpop.eup %6572  ;;  %6582 = vrcp.f32 %v3645_v42  ;;  %v3770_v6 = vmul.f32 %v10551_v39, %v10485_v55  ;;  %v13136_v42 = vld [vmem:[#allocation181_spill] sm:$0xff] }
 0x59e   : > { %v10543_v54 = vpop.permute.xlu1 %3795  ;;  %v10545_v25 = vpop.permute.xlu0 %3790  ;;  %v3327_v30 = vadd.f32 %v10553_v35, %v13132_v23  ;;  %6584 = vpow2.f32 %v2168_v56  ;;  %v13137_v23 = vld [vmem:[#allocation138_spill] sm:$0xff]  ;;  %v13139_v56 = vld [vmem:[#allocation137_spill] sm:$0xff] }
 0x59f   : > { %13127 = vst [vmem:[#allocation133_spill] sm:$0xff] %v10543_v54  ;;  %v10549_v27 = vpop.permute.xlu2 %3840  ;;  %v10555_v33 = vpop.eup %6574  ;;  %6586 = vpow2.f32 %v2172_v62 }
 0x5a0   : > { %13128 = vst [vmem:[#allocation89_spill] sm:$0xff] %v10545_v25  ;;  %v10563_v38 = vpop.eup %6576  ;;  %v3329_v45 = vadd.f32 %v10555_v33, %v13135_v34  ;;  %v3647_v16 = vadd.f32 %v10237_v18, %v3327_v30  ;;  %v13140_v25 = vld [vmem:[#allocation135_spill] sm:$0xff]  ;;  %6588 = vpow2.f32 %v2170_v61  ;;  %v2174_v18 = vmul.f32 1.442695, %v2053_v24 }
 0x5a1   : > { %13130 = vst [vmem:[#allocation14_spill] sm:$0xff] %v10549_v27  ;;  %v2055_v27 = vsub.f32 %v13137_v23, %v13136_v42  ;;  %v3328_v54 = vadd.f32 %v10563_v38, %v13138_v5  ;;  %v2054_v21 = vsub.f32 %v13140_v25, %v13139_v56  ;;  %v10579_v34 = vpop.eup %6578  ;;  %v13149_v5 = vld [vmem:[#allocation67_spill] sm:$0xff]  ;;  %v13150_v56 = vld [vmem:[#allocation118_spill] sm:$0xff] }
 0x5a2   : > { %v3649_v19 = vadd.f32 %v10387_v44, %v3329_v45  ;;  %13141 = vst [vmem:[#allocation44_spill] sm:$0xff] %v10579_v34  ;;  %v10586_v23 = vpop.eup %6580  ;;  %6590 = vrcp.f32 %v3647_v16  ;;  %v3772_v24 = vmul.f32 %v10579_v34, %v10514_v60 }
 0x5a3   : > { %v3648_v55 = vadd.f32 %v10389_v49, %v3328_v54  ;;  %13144 = vst [vmem:[#allocation58_spill] sm:$0xff] %v10586_v23  ;;  %v2178_v25 = vmul.f32 1.442695, %v2055_v27  ;;  %v2176_v44 = vmul.f32 1.442695, %v2054_v21  ;;  %v13147_v49 = vld [vmem:[#allocation195_spill] sm:$0xff]  ;;  %v3774_v45 = vmul.f32 %v10586_v23, %v10516_v46 }
 0x5a4   : > { %4025 = vperm.xlu0 %6109, %v3771_v3   ;;  %4015 = vperm.xlu1 %6110, %v3769_v2   ;;  %v10590_v3 = vpop.eup %6582  ;;  %6592 = vrcp.f32 %v3649_v19  ;;  %v13148_v27 = vld [vmem:[#allocation183_spill] sm:$0xff]  ;;  %v13153_v46 = vld [vmem:[#allocation65_spill] sm:$0xff] }
 0x5a5   : > { %4020 = vperm.xlu2 %6111, %v3770_v6   ;;  %13146 = vst [vmem:[#allocation46_spill] sm:$0xff] %v10590_v3  ;;  %v10592_v61 = vpop.eup %6584  ;;  %6594 = vrcp.f32 %v3648_v55  ;;  %v2056_v16 = vsub.f32 %v13149_v5, %v13148_v27  ;;  %v3773_v19 = vmul.f32 %v10590_v3, %v10524_v15  ;;  %v13151_v55 = vld [vmem:[#allocation192_spill] sm:$0xff] }
 0x5a6   : > { %v10582_v62 = vpop.permute.xlu1 %3805  ;;  %v10584_v42 = vpop.permute.xlu0 %3815  ;;  %v3330_v54 = vadd.f32 %v10592_v61, %v13147_v49  ;;  %6596 = vpow2.f32 %v2174_v18  ;;  %v13152_v49 = vld [vmem:[#allocation31_spill] sm:$0xff] }
 0x5a7   : > { %13142 = vst [vmem:[#allocation244_spill] sm:$0xff] %v10582_v62  ;;  %v10588_v30 = vpop.permute.xlu2 %3855  ;;  %v10594_v2 = vpop.eup %6586  ;;  %6598 = vpow2.f32 %v2178_v25  ;;  %v13154_v18 = vld [vmem:[#allocation187_spill] sm:$0xff] }
 0x5a8   : > { %13143 = vst [vmem:[#allocation96_spill] sm:$0xff] %v10584_v42  ;;  %v10602_v6 = vpop.eup %6588  ;;  %v3332_v21 = vadd.f32 %v10594_v2, %v13150_v56  ;;  %v3650_v60 = vadd.f32 %v10276_v29, %v3330_v54  ;;  %v13155_v42 = vld [vmem:[#allocation28_spill] sm:$0xff]  ;;  %6600 = vpow2.f32 %v2176_v44  ;;  %v2180_v29 = vmul.f32 1.442695, %v2056_v16 }
 0x5a9   : > { %13145 = vst [vmem:[#allocation104_spill] sm:$0xff] %v10588_v30  ;;  %v2058_v30 = vsub.f32 %v13152_v49, %v13151_v55  ;;  %v3331_v62 = vadd.f32 %v10602_v6, %v13153_v46  ;;  %v2057_v27 = vsub.f32 %v13155_v42, %v13154_v18  ;;  %v10618_v56 = vpop.eup %6590  ;;  %v13163_v46 = vld [vmem:[#allocation298_spill] sm:$0xff] }
 0x5aa   : > { %v3652_v5 = vadd.f32 %v10426_v48, %v3332_v21  ;;  %13156 = vst [vmem:[#allocation16_spill] sm:$0xff] %v10618_v56  ;;  %v10625_v49 = vpop.eup %6592  ;;  %6602 = vrcp.f32 %v3650_v60  ;;  %v13162_v21 = vld [vmem:[#allocation110_spill] sm:$0xff] }
 0x5ab   : > { %v3651_v15 = vadd.f32 %v10428_v52, %v3331_v62  ;;  %13159 = vst [vmem:[#allocation250_spill] sm:$0xff] %v10625_v49  ;;  %v2184_v42 = vmul.f32 1.442695, %v2058_v30  ;;  %v2182_v48 = vmul.f32 1.442695, %v2057_v27  ;;  %v3777_v52 = vmul.f32 %v10625_v49, %v10555_v33  ;;  %v13164_v60 = vld [vmem:[#allocation194_spill] sm:$0xff] }
 0x5ac   : > { %4040 = vperm.xlu0 %6109, %v3774_v45   ;;  %4030 = vperm.xlu1 %6110, %v3772_v24   ;;  %v10629_v45 = vpop.eup %6594  ;;  %6604 = vrcp.f32 %v3652_v5  ;;  %v3775_v62 = vmul.f32 %v10618_v56, %v10553_v35  ;;  %v13165_v27 = vld [vmem:[#allocation154_spill] sm:$0xff] }
 0x5ad   : > { %4035 = vperm.xlu2 %6111, %v3773_v19   ;;  %13161 = vst [vmem:[#allocation56_spill] sm:$0xff] %v10629_v45  ;;  %v6597_v44 = vpop.eup %6596  ;;  %6606 = vrcp.f32 %v3651_v15  ;;  %v3776_v30 = vmul.f32 %v10629_v45, %v10563_v38  ;;  %v2059_v5 = vsub.f32 %v13165_v27, %v13164_v60 }
 0x5ae   : > { %v10621_v25 = vpop.permute.xlu1 %3820  ;;  %v10623_v55 = vpop.permute.xlu0 %3830  ;;  %v3333_v19 = vadd.f32 %v6597_v44, %v13162_v21  ;;  %6608 = vpow2.f32 %v2180_v29 }
 0x5af   : > { %13157 = vst [vmem:[#allocation114_spill] sm:$0xff] %v10621_v25  ;;  %v10627_v54 = vpop.permute.xlu2 %3870  ;;  %v6599_v24 = vpop.eup %6598  ;;  %6610 = vpow2.f32 %v2184_v42 }
 0x5b0   : > { %13158 = vst [vmem:[#allocation50_spill] sm:$0xff] %v10623_v55  ;;  %v6601_v16 = vpop.eup %6600  ;;  %v3335_v18 = vadd.f32 %v6599_v24, %v13163_v46  ;;  %v3653_v15 = vadd.f32 %v10315_v43, %v3333_v19  ;;  %6612 = vpow2.f32 %v2182_v48  ;;  %v2186_v43 = vmul.f32 1.442695, %v2059_v5  ;;  %v13173_v19 = vld [vmem:[#allocation208_spill] sm:$0xff]  ;;  %v13175_v5 = vld [vmem:[#allocation75_spill] sm:$0xff] }
 0x5b1   : > { %13160 = vst [vmem:[#allocation111_spill] sm:$0xff] %v10627_v54  ;;  %v13166_v54 = vld [vmem:[#allocation190_spill] sm:$0xff]  ;;  %v10644_v33 = vpop.eup %6602 }
 0x5b2   : > { %v3334_v21 = vadd.f32 %v6601_v16, %v13166_v54  ;;  %v3655_v35 = vadd.f32 %v10465_v37, %v3335_v18  ;;  %13167 = vst [vmem:[#allocation119_spill] sm:$0xff] %v10644_v33  ;;  %v10651_v42 = vpop.eup %6604  ;;  %6614 = vrcp.f32 %v3653_v15 }
 0x5b3   : > { %13170 = vst [vmem:[#allocation59_spill] sm:$0xff] %v10651_v42  ;;  %v10655_v54 = vpop.eup %6606 }
 0x5b4   : > { %4055 = vperm.xlu0 %6109, %v3777_v52   ;;  %4045 = vperm.xlu1 %6110, %v3775_v62   ;;  %v3654_v29 = vadd.f32 %v10467_v12, %v3334_v21  ;;  %13172 = vst [vmem:[#allocation125_spill] sm:$0xff] %v10655_v54  ;;  %v6609_v48 = vpop.eup %6608  ;;  %6616 = vrcp.f32 %v3655_v35  ;;  %v3780_v12 = vmul.f32 %v10651_v42, %v10594_v2 }
 0x5b5   : > { %4050 = vperm.xlu2 %6111, %v3776_v30   ;;  %v6611_v37 = vpop.eup %6610  ;;  %v3336_v52 = vadd.f32 %v6609_v48, %v13173_v19  ;;  %v3778_v62 = vmul.f32 %v10644_v33, %v10592_v61  ;;  %v13174_v30 = vld [vmem:[#allocation302_spill] sm:$0xff]  ;;  %v3779_v21 = vmul.f32 %v10655_v54, %v10602_v6 }
 0x5b6   : > { %v10647_v46 = vpop.permute.xlu1 %3835  ;;  %v10649_v38 = vpop.permute.xlu0 %3845  ;;  %6618 = vrcp.f32 %v3654_v29  ;;  %v3338_v27 = vadd.f32 %v6611_v37, %v13174_v30 }
 0x5b7   : > { %13168 = vst [vmem:[#allocation19_spill] sm:$0xff] %v10647_v46  ;;  %v10653_v60 = vpop.permute.xlu2 %3885  ;;  %v6613_v18 = vpop.eup %6612  ;;  %6620 = vpow2.f32 %v2186_v43  ;;  %v3656_v35 = vadd.f32 %v10354_v1, %v3336_v52 }
 0x5b8   : > { %13169 = vst [vmem:[#allocation128_spill] sm:$0xff] %v10649_v38  ;;  %v3337_v15 = vadd.f32 %v6613_v18, %v13175_v5  ;;  %v3658_v29 = vadd.f32 %v10504_v57, %v3338_v27  ;;  %v10668_v2 = vpop.eup %6614 }
 0x5b9   : > { %13171 = vst [vmem:[#allocation254_spill] sm:$0xff] %v10653_v60  ;;  %6622 = vrcp.f32 %v3656_v35  ;;  %v3781_v52 = vmul.f32 %v10668_v2, %v6597_v44 }
 0x5ba   : > { %13176 = vst [vmem:[#allocation69_spill] sm:$0xff] %v10668_v2  ;;  %v3657_v61 = vadd.f32 %v10506_v11, %v3337_v15  ;;  %v10675_v60 = vpop.eup %6616  ;;  %6624 = vrcp.f32 %v3658_v29 }
 0x5bb   : > { %13179 = vst [vmem:[#allocation87_spill] sm:$0xff] %v10675_v60  ;;  %v3783_v57 = vmul.f32 %v10675_v60, %v6599_v24 }
 0x5bc   : > { %4070 = vperm.xlu0 %6109, %v3780_v12   ;;  %4060 = vperm.xlu1 %6110, %v3778_v62   ;;  %v10679_v43 = vpop.eup %6618  ;;  %6626 = vrcp.f32 %v3657_v61  ;;  %v13182_v12 = vld [vmem:[#allocation179_spill] sm:$0xff] }
 0x5bd   : > { %4065 = vperm.xlu2 %6111, %v3779_v21   ;;  %13181 = vst [vmem:[#allocation73_spill] sm:$0xff] %v10679_v43  ;;  %v6621_v1 = vpop.eup %6620  ;;  %v3782_v62 = vmul.f32 %v10679_v43, %v6601_v16 }
 0x5be   : > { %v10671_v19 = vpop.permute.xlu1 %3850  ;;  %v10673_v30 = vpop.permute.xlu0 %3860  ;;  %v3339_v11 = vadd.f32 %v6621_v1, %v13182_v12 }
 0x5bf   : > { %13177 = vst [vmem:[#allocation134_spill] sm:$0xff] %v10671_v19  ;;  %v10677_v6 = vpop.permute.xlu2 %3900  ;;  %v10686_v21 = vpop.eup %6622 }
 0x5c0   : > { %13178 = vst [vmem:[#allocation63_spill] sm:$0xff] %v10673_v30  ;;  %v3659_v27 = vadd.f32 %v10393_v8, %v3339_v11  ;;  %v10692_v35 = vpop.eup %6624  ;;  %v3784_v29 = vmul.f32 %v10686_v21, %v6609_v48  ;;  %v13194_v48 = vld [vmem:[#allocation220_spill] sm:$0xff] }
 0x5c1   : > { %13180 = vst [vmem:[#allocation143_spill] sm:$0xff] %v10677_v6  ;;  %v3786_v16 = vmul.f32 %v10692_v35, %v6611_v37 }
 0x5c2   : > { %13183 = vst [vmem:[#allocation259_spill] sm:$0xff] %v10686_v21  ;;  %v10696_v44 = vpop.eup %6626  ;;  %6628 = vrcp.f32 %v3659_v27 }
 0x5c3   : > { %13186 = vst [vmem:[#allocation147_spill] sm:$0xff] %v10692_v35  ;;  %v3785_v8 = vmul.f32 %v10696_v44, %v6613_v18 }
 0x5c4   : > { %4085 = vperm.xlu0 %6109, %v3783_v57   ;;  %4075 = vperm.xlu1 %6110, %v3781_v52   ;;  %13188 = vst [vmem:[#allocation153_spill] sm:$0xff] %v10696_v44 }
 0x5c5   : > { %4080 = vperm.xlu2 %6111, %v3782_v62   ;;  %v13193_v62 = vld [vmem:[#allocation237_spill] sm:$0xff] }
 0x5c6   : > { %v10688_v5 = vpop.permute.xlu1 %3865  ;;  %v10690_v15 = vpop.permute.xlu0 %3875 }
 0x5c7   : > { %13184 = vst [vmem:[#allocation139_spill] sm:$0xff] %v10688_v5  ;;  %v10694_v24 = vpop.permute.xlu2 %3915 }
 0x5c8   : > { %13185 = vst [vmem:[#allocation82_spill] sm:$0xff] %v10690_v15  ;;  %v10705_v52 = vpop.eup %6628 }
 0x5c9   : > { %13187 = vst [vmem:[#allocation97_spill] sm:$0xff] %v10694_v24  ;;  %v3787_v11 = vmul.f32 %v10705_v52, %v6621_v1  ;;  %v13200_v1 = vld [vmem:[#allocation45_spill] sm:$0xff] }
 0x5ca   : > { %13191 = vst [vmem:[#allocation93_spill] sm:$0xff] %v10705_v52 }
 0x5cc   : > { %4100 = vperm.xlu0 %6109, %v3786_v16   ;;  %4090 = vperm.xlu1 %6110, %v3784_v29   ;;  %v13198_v16 = vld [vmem:[#allocation236_spill] sm:$0xff] }
 0x5cd   : > { %4095 = vperm.xlu2 %6111, %v3785_v8   ;;  %v13199_v29 = vld [vmem:[#allocation224_spill] sm:$0xff] }
 0x5ce   : > { %v10701_v61 = vpop.permute.xlu1 %3880  ;;  %v10703_v57 = vpop.permute.xlu0 %3890 }
 0x5cf   : > { %13189 = vst [vmem:[#allocation263_spill] sm:$0xff] %v10701_v61  ;;  %v10707_v12 = vpop.permute.xlu2 %3930 }
 0x5d0   : > { %13190 = vst [vmem:[#allocation149_spill] sm:$0xff] %v10703_v57 }
 0x5d1   : > { %13192 = vst [vmem:[#allocation157_spill] sm:$0xff] %v10707_v12 }
 0x5d4   : > { %4238 = vrot.lane.b32.xlu0 %v13193_v62, %s6989_s28  ;;  %4105 = vperm.xlu1 %6110, %v3787_v11  }
 0x5d5   : > { %4236 = vrot.lane.b32.xlu2 %v13194_v48, %s6989_s28 }
 0x5d6   : > { %v10714_v37 = vpop.permute.xlu1 %3895  ;;  %v10716_v18 = vpop.permute.xlu0 %3905 }
 0x5d7   : > { %13195 = vst [vmem:[#allocation107_spill] sm:$0xff] %v10714_v37  ;;  %v10718_v27 = vpop.permute.xlu2 %3945  ;;  %v13204_v37 = vld [vmem:[#allocation20_spill] sm:$0xff] }
 0x5d8   : > { %13196 = vst [vmem:[#allocation163_spill] sm:$0xff] %v10716_v18 }
 0x5d9   : > { %13197 = vst [vmem:[#allocation60_spill] sm:$0xff] %v10718_v27  ;;  %v13205_v27 = vld [vmem:[#allocation49_spill] sm:$0xff] }
 0x5dc   : > { %4240 = vrot.lane.b32.xlu1 %v13198_v16, %s6989_s28  ;;  %4244 = vrot.lane.b32.xlu0 %v13199_v29, %s6989_s28 }
 0x5dd   : > { %4242 = vrot.lane.b32.xlu2 %v13200_v1, %s6989_s28 }
 0x5de   : > { %v10726_v8 = vpop.permute.xlu1 %3910  ;;  %v10728_v11 = vpop.permute.xlu0 %3920 }
 0x5df   : > { %13201 = vst [vmem:[#allocation159_spill] sm:$0xff] %v10726_v8  ;;  %v10730_v12 = vpop.permute.xlu2 %3960  ;;  %v13209_v8 = vld [vmem:[#allocation22_spill] sm:$0xff] }
 0x5e0   : > { %13202 = vst [vmem:[#allocation103_spill] sm:$0xff] %v10728_v11 }
 0x5e1   : > { %13203 = vst [vmem:[#allocation165_spill] sm:$0xff] %v10730_v12  ;;  %v13210_v12 = vld [vmem:[#allocation243_spill] sm:$0xff] }
 0x5e4   : > { %4246 = vrot.lane.b32.xlu1 %v13204_v37, %s6989_s28  ;;  %4250 = vrot.lane.b32.xlu0 %v10044_v47, %s6989_s28 }
 0x5e5   : > { %4248 = vrot.lane.b32.xlu2 %v13205_v27, %s6989_s28 }
 0x5e6   : > { %v10738_v61 = vpop.permute.xlu1 %3925  ;;  %v10740_v24 = vpop.permute.xlu0 %3935 }
 0x5e7   : > { %13206 = vst [vmem:[#allocation117_spill] sm:$0xff] %v10738_v61  ;;  %v10742_v18 = vpop.permute.xlu2 %3975  ;;  %v13214_v61 = vld [vmem:[#allocation48_spill] sm:$0xff] }
 0x5e8   : > { %13207 = vst [vmem:[#allocation170_spill] sm:$0xff] %v10740_v24 }
 0x5e9   : > { %13208 = vst [vmem:[#allocation74_spill] sm:$0xff] %v10742_v18 }
 0x5ec   : > { %4252 = vrot.lane.b32.xlu1 %v13209_v8, %s6989_s28  ;;  %4256 = vrot.lane.b32.xlu0 %v10083_v40, %s6989_s28 }
 0x5ed   : > { %4254 = vrot.lane.b32.xlu2 %v13210_v12, %s6989_s28 }
 0x5ee   : > { %v10750_v11 = vpop.permute.xlu1 %3940  ;;  %v10752_v5 = vpop.permute.xlu0 %3950 }
 0x5ef   : > { %13211 = vst [vmem:[#allocation168_spill] sm:$0xff] %v10750_v11  ;;  %v10754_v6 = vpop.permute.xlu2 %3990  ;;  %v13218_v11 = vld [vmem:[#allocation21_spill] sm:$0xff] }
 0x5f0   : > { %13212 = vst [vmem:[#allocation113_spill] sm:$0xff] %v10752_v5 }
 0x5f1   : > { %13213 = vst [vmem:[#allocation172_spill] sm:$0xff] %v10754_v6  ;;  %v13219_v6 = vld [vmem:[#allocation242_spill] sm:$0xff] }
 0x5f4   : > { %4258 = vrot.lane.b32.xlu1 %v13214_v61, %s6989_s28  ;;  %4262 = vrot.lane.b32.xlu0 %v10122_v14, %s6989_s28 }
 0x5f5   : > { %4260 = vrot.lane.b32.xlu2 %v10111_v63, %s6989_s28 }
 0x5f6   : > { %v10762_v18 = vpop.permute.xlu1 %3955  ;;  %v10764_v24 = vpop.permute.xlu0 %3965 }
 0x5f7   : > { %13215 = vst [vmem:[#allocation131_spill] sm:$0xff] %v10762_v18  ;;  %v10766_v57 = vpop.permute.xlu2 %4005  ;;  %v13223_v18 = vld [vmem:[#allocation53_spill] sm:$0xff] }
 0x5f8   : > { %13216 = vst [vmem:[#allocation130_spill] sm:$0xff] %v10764_v24 }
 0x5f9   : > { %13217 = vst [vmem:[#allocation95_spill] sm:$0xff] %v10766_v57 }
 0x5fc   : > { %4264 = vrot.lane.b32.xlu1 %v13218_v11, %s6989_s28  ;;  %4268 = vrot.lane.b32.xlu0 %v10161_v20, %s6989_s28 }
 0x5fd   : > { %4266 = vrot.lane.b32.xlu2 %v13219_v6, %s6989_s28 }
 0x5fe   : > { %v10774_v5 = vpop.permute.xlu1 %3970  ;;  %v10776_v19 = vpop.permute.xlu0 %3980 }
 0x5ff   : > { %13220 = vst [vmem:[#allocation175_spill] sm:$0xff] %v10774_v5  ;;  %v10778_v15 = vpop.permute.xlu2 %4020 }
 0x600   : > { %13221 = vst [vmem:[#allocation127_spill] sm:$0xff] %v10776_v19 }
 0x601   : > { %13222 = vst [vmem:[#allocation178_spill] sm:$0xff] %v10778_v15 }
 0x604   : > { %4270 = vrot.lane.b32.xlu1 %v13223_v18, %s6989_s28  ;;  %4274 = vrot.lane.b32.xlu0 %v10200_v7, %s6989_s28 }
 0x605   : > { %4272 = vrot.lane.b32.xlu2 %v10189_v50, %s6989_s28 }
 0x606   : > { %v10786_v57 = vpop.permute.xlu1 %3985  ;;  %v10788_v24 = vpop.permute.xlu0 %3995 }
 0x607   : > { %13224 = vst [vmem:[#allocation144_spill] sm:$0xff] %v10786_v57  ;;  %v10790_v46 = vpop.permute.xlu2 %4035 }
 0x608   : > { %13225 = vst [vmem:[#allocation186_spill] sm:$0xff] %v10788_v24 }
 0x609   : > { %13226 = vst [vmem:[#allocation26_spill] sm:$0xff] %v10790_v46 }
 0x60c   : > { %4276 = vrot.lane.b32.xlu1 %v10196_v58, %s6989_s28  ;;  %4280 = vrot.lane.b32.xlu0 %v10239_v17, %s6989_s28 }
 0x60d   : > { %4278 = vrot.lane.b32.xlu2 %v10228_v13, %s6989_s28 }
 0x60e   : > { %v10798_v15 = vpop.permute.xlu1 %4000  ;;  %v10800_v5 = vpop.permute.xlu0 %4010 }
 0x60f   : > { %13227 = vst [vmem:[#allocation105_spill] sm:$0xff] %v10798_v15  ;;  %v10802_v19 = vpop.permute.xlu2 %4050 }
 0x610   : > { %13228 = vst [vmem:[#allocation182_spill] sm:$0xff] %v10800_v5 }
 0x611   : > { %13229 = vst [vmem:[#allocation140_spill] sm:$0xff] %v10802_v19 }
 0x614   : > { %4282 = vrot.lane.b32.xlu1 %v10235_v0, %s6989_s28  ;;  %4286 = vrot.lane.b32.xlu0 %v10278_v32, %s6989_s28 }
 0x615   : > { %4284 = vrot.lane.b32.xlu2 %v10267_v53, %s6989_s28 }
 0x616   : > { %v10810_v46 = vpop.permute.xlu1 %4015  ;;  %v10812_v57 = vpop.permute.xlu0 %4025 }
 0x617   : > { %13230 = vst [vmem:[#allocation142_spill] sm:$0xff] %v10810_v46  ;;  %v10814_v24 = vpop.permute.xlu2 %4065 }
 0x618   : > { %13231 = vst [vmem:[#allocation188_spill] sm:$0xff] %v10812_v57 }
 0x619   : > { %13232 = vst [vmem:[#allocation71_spill] sm:$0xff] %v10814_v24  ;;  %v13236_v24 = vld [vmem:[#allocation24_spill] sm:$0xff] }
 0x61c   : > { %4288 = vrot.lane.b32.xlu1 %v10274_v22, %s6989_s28  ;;  %4292 = vrot.lane.b32.xlu0 %v10317_v9, %s6989_s28  ;;  %v13261_v22 = vld [vmem:[#allocation201_spill] sm:$0xff]  ;;  %v13262_v9 = vld [vmem:[#allocation198_spill] sm:$0xff] }
 0x61d   : > { %4290 = vrot.lane.b32.xlu2 %v10306_v31, %s6989_s28  ;;  %v13259_v31 = vld [vmem:[#allocation197_spill] sm:$0xff] }
 0x61e   : > { %v10822_v19 = vpop.permute.xlu1 %4030  ;;  %v10824_v15 = vpop.permute.xlu0 %4040 }
 0x61f   : > { %13233 = vst [vmem:[#allocation34_spill] sm:$0xff] %v10822_v19  ;;  %v10826_v5 = vpop.permute.xlu2 %4080  ;;  %v13240_v19 = vld [vmem:[#allocation248_spill] sm:$0xff] }
 0x620   : > { %13234 = vst [vmem:[#allocation196_spill] sm:$0xff] %v10824_v15 }
 0x621   : > { %13235 = vst [vmem:[#allocation155_spill] sm:$0xff] %v10826_v5  ;;  %v13241_v5 = vld [vmem:[#allocation27_spill] sm:$0xff] }
 0x624   : > { %4294 = vrot.lane.b32.xlu1 %v10313_v36, %s6989_s28  ;;  %4298 = vrot.lane.b32.xlu0 %v10356_v26, %s6989_s28 }
 0x625   : > { %4296 = vrot.lane.b32.xlu2 %v13236_v24, %s6989_s28 }
 0x626   : > { %v10834_v46 = vpop.permute.xlu1 %4045  ;;  %v10836_v57 = vpop.permute.xlu0 %4055 }
 0x627   : > { %13237 = vst [vmem:[#allocation115_spill] sm:$0xff] %v10834_v46  ;;  %v10838_v30 = vpop.permute.xlu2 %4095  ;;  %v13244_v46 = vld [vmem:[#allocation108_spill] sm:$0xff] }
 0x628   : > { %13238 = vst [vmem:[#allocation193_spill] sm:$0xff] %v10836_v57 }
 0x629   : > { %13239 = vst [vmem:[#allocation148_spill] sm:$0xff] %v10838_v30  ;;  %v13245_v30 = vld [vmem:[#allocation30_spill] sm:$0xff] }
 0x62c   : > { %4300 = vrot.lane.b32.xlu1 %v13240_v19, %s6989_s28  ;;  %4304 = vrot.lane.b32.xlu0 %v10395_v28, %s6989_s28  ;;  %v13258_v28 = vld [vmem:[#allocation100_spill] sm:$0xff] }
 0x62d   : > { %4302 = vrot.lane.b32.xlu2 %v13241_v5, %s6989_s28 }
 0x62e   : > { %v10846_v15 = vpop.permute.xlu1 %4060  ;;  %v10848_v25 = vpop.permute.xlu0 %4070 }
 0x62f   : > { %13242 = vst [vmem:[#allocation151_spill] sm:$0xff] %v10846_v15  ;;  %v4237_v38 = vpop.permute.xlu2 %4236  ;;  %v13248_v15 = vld [vmem:[#allocation232_spill] sm:$0xff] }
 0x630   : > { %13243 = vst [vmem:[#allocation152_spill] sm:$0xff] %v10848_v25  ;;  %v13249_v25 = vld [vmem:[#allocation88_spill] sm:$0xff] }
 0x634   : > { %4306 = vrot.lane.b32.xlu1 %v13244_v46, %s6989_s28  ;;  %4310 = vrot.lane.b32.xlu0 %v10434_v59, %s6989_s28 }
 0x635   : > { %4308 = vrot.lane.b32.xlu2 %v13245_v30, %s6989_s28 }
 0x636   : > { %v10856_v57 = vpop.permute.xlu1 %4075  ;;  %v10858_v55 = vpop.permute.xlu0 %4085 }
 0x637   : > { %13246 = vst [vmem:[#allocation86_spill] sm:$0xff] %v10856_v57  ;;  %v10860_v19 = vpop.permute.xlu2 %4242  ;;  %v13252_v57 = vld [vmem:[#allocation77_spill] sm:$0xff] }
 0x638   : > { %13247 = vst [vmem:[#allocation166_spill] sm:$0xff] %v10858_v55  ;;  %v13253_v55 = vld [vmem:[#allocation83_spill] sm:$0xff] }
 0x63c   : > { %4312 = vrot.lane.b32.xlu1 %v13248_v15, %s6989_s28  ;;  %4316 = vrot.lane.b32.xlu0 %v10473_v51, %s6989_s28 }
 0x63d   : > { %4314 = vrot.lane.b32.xlu2 %v13249_v25, %s6989_s28 }
 0x63e   : > { %v10868_v46 = vpop.permute.xlu1 %4090  ;;  %v10870_v5 = vpop.permute.xlu0 %4100 }
 0x63f   : > { %13250 = vst [vmem:[#allocation158_spill] sm:$0xff] %v10868_v46  ;;  %v10872_v30 = vpop.permute.xlu2 %4248  ;;  %v13255_v46 = vld [vmem:[#allocation38_spill] sm:$0xff] }
 0x640   : > { %13251 = vst [vmem:[#allocation94_spill] sm:$0xff] %v10870_v5 }
 0x644   : > { %4318 = vrot.lane.b32.xlu1 %v13252_v57, %s6989_s28  ;;  %4322 = vrot.lane.b32.xlu0 %v10512_v10, %s6989_s28 }
 0x645   : > { %4320 = vrot.lane.b32.xlu2 %v13253_v55, %s6989_s28 }
 0x646   : > { %v10880_v15 = vpop.permute.xlu1 %4105  ;;  %v4239_v51 = vpop.permute.xlu0 %4238 }
 0x647   : > { %13254 = vst [vmem:[#allocation126_spill] sm:$0xff] %v10880_v15  ;;  %v10882_v59 = vpop.permute.xlu2 %4254 }
 0x64c   : > { %4324 = vrot.lane.b32.xlu1 %v13255_v46, %s6989_s28  ;;  %4328 = vrot.lane.b32.xlu0 %v10551_v39, %s6989_s28  ;;  %v6991_v39 = vmov 1  }
 0x64d   : > { %4326 = vrot.lane.b32.xlu2 %v10540_v4, %s6989_s28  ;;  %6112 = vset.pattern.permute.xlu0 %v6991_v39 }
 0x64e   : > { %v4241_v5 = vpop.permute.xlu1 %4240  ;;  %v4245_v57 = vpop.permute.xlu0 %4244  ;;  %6113 = vset.pattern.permute.xlu1 %v6991_v39  ;;  %6114 = vset.pattern.permute.xlu2 %v6991_v39 }
 0x64f   : > { %v10890_v25 = vpop.permute.xlu2 %4260  ;;  %v4430_v26 = vmul.f32 %v13259_v31, %v4241_v5  ;;  %v4432_v0 = vmul.f32 %v13262_v9, %v4245_v57  ;;  %v13268_v57 = vld [vmem:[#allocation202_spill] sm:$0xff] }
 0x654   : > { %4330 = vrot.lane.b32.xlu1 %v10547_v41, %s6989_s28  ;;  %4334 = vrot.lane.b32.xlu0 %v10590_v3, %s6989_s28 }
 0x655   : > { %4332 = vrot.lane.b32.xlu2 %v10579_v34, %s6989_s28 }
 0x656   : > { %v4247_v15 = vpop.permute.xlu1 %4246  ;;  %v4251_v46 = vpop.permute.xlu0 %4250 }
 0x657   : > { %v10898_v55 = vpop.permute.xlu2 %4266  ;;  %v4433_v36 = vmul.f32 %v13258_v28, %v4247_v15  ;;  %v13265_v15 = vld [vmem:[#allocation199_spill] sm:$0xff] }
 0x65c   : > { %4336 = vrot.lane.b32.xlu1 %v10586_v23, %s6989_s28  ;;  %4340 = vrot.lane.b32.xlu0 %v10629_v45, %s6989_s28 }
 0x65d   : > { %4338 = vrot.lane.b32.xlu2 %v10618_v56, %s6989_s28 }
 0x65e   : > { %v4253_v41 = vpop.permute.xlu1 %4252  ;;  %v4257_v4 = vpop.permute.xlu0 %4256 }
 0x65f   : > { %v10906_v34 = vpop.permute.xlu2 %4272  ;;  %v4436_v53 = vmul.f32 %v13261_v22, %v4253_v41 }
 0x664   : > { %4342 = vrot.lane.b32.xlu1 %v10625_v49, %s6989_s28  ;;  %4346 = vrot.lane.b32.xlu0 %v10655_v54, %s6989_s28  ;;  %v13256_v54 = vld [vmem:[#allocation61_spill] sm:$0xff] }
 0x665   : > { %4344 = vrot.lane.b32.xlu2 %v10644_v33, %s6989_s28 }
 0x666   : > { %v4259_v39 = vpop.permute.xlu1 %4258  ;;  %v4263_v23 = vpop.permute.xlu0 %4262 }
 0x667   : > { %v10914_v3 = vpop.permute.xlu2 %4278 }
 0x66c   : > { %4348 = vrot.lane.b32.xlu1 %v10651_v42, %s6989_s28  ;;  %4352 = vrot.lane.b32.xlu0 %v10679_v43, %s6989_s28 }
 0x66d   : > { %4350 = vrot.lane.b32.xlu2 %v10668_v2, %s6989_s28  ;;  %v4428_v2 = vmul.f32 %v13256_v54, %v4237_v38 }
 0x66e   : > { %v4265_v49 = vpop.permute.xlu1 %4264  ;;  %v4269_v56 = vpop.permute.xlu0 %4268 }
 0x66f   : > { %v10922_v45 = vpop.permute.xlu2 %4284 }
 0x674   : > { %4354 = vrot.lane.b32.xlu1 %v10675_v60, %s6989_s28  ;;  %4358 = vrot.lane.b32.xlu0 %v10696_v44, %s6989_s28 }
 0x675   : > { %4356 = vrot.lane.b32.xlu2 %v10686_v21, %s6989_s28  ;;  %v13257_v21 = vld [vmem:[#allocation68_spill] sm:$0xff] }
 0x676   : > { %v4271_v42 = vpop.permute.xlu1 %4270  ;;  %v10930_v33 = vpop.permute.xlu0 %4274  ;;  %v4429_v24 = vmul.f32 %v13257_v21, %v4239_v51  ;;  %v13264_v21 = vld [vmem:[#allocation120_spill] sm:$0xff] }
 0x677   : > { %v10932_v43 = vpop.permute.xlu2 %4290  ;;  %v4439_v5 = vmul.f32 %v13264_v21, %v4259_v39  ;;  %v13270_v21 = vld [vmem:[#allocation145_spill] sm:$0xff] }
 0x67c   : > { %4360 = vrot.lane.b32.xlu1 %v10692_v35, %s6989_s28  ;;  %4494 = vperm.xlu0 %6112, %v4428_v2  }
 0x67d   : > { %4362 = vrot.lane.b32.xlu2 %v10705_v52, %s6989_s28  ;;  %v13260_v52 = vld [vmem:[#allocation90_spill] sm:$0xff] }
 0x67e   : > { %v4277_v60 = vpop.permute.xlu1 %4276  ;;  %v10939_v10 = vpop.permute.xlu0 %4280  ;;  %v4431_v35 = vmul.f32 %v13260_v52, %v10860_v19  ;;  %v13267_v19 = vld [vmem:[#allocation205_spill] sm:$0xff]  ;;  %v4438_v52 = vmul.f32 %v13268_v57, %v4257_v4  ;;  %v13274_v57 = vld [vmem:[#allocation206_spill] sm:$0xff] }
 0x67f   : > { %v10941_v44 = vpop.permute.xlu2 %4296 }
 0x684   : > { %4519 = vperm.xlu0 %6112, %v4433_v36   ;;  %4499 = vperm.xlu1 %6113, %v4429_v24   ;;  %v4435_v24 = vmul.f32 %v13265_v15, %v4251_v46  ;;  %v13271_v15 = vld [vmem:[#allocation203_spill] sm:$0xff] }
 0x685   : > { %4504 = vperm.xlu2 %6114, %v4430_v26   ;;  %v13263_v26 = vld [vmem:[#allocation92_spill] sm:$0xff] }
 0x686   : > { %v4283_v38 = vpop.permute.xlu1 %4282  ;;  %v10946_v54 = vpop.permute.xlu0 %4286  ;;  %v4434_v51 = vmul.f32 %v13263_v26, %v10872_v30  ;;  %v13269_v26 = vld [vmem:[#allocation112_spill] sm:$0xff] }
 0x687   : > { %v10948_v2 = vpop.permute.xlu2 %4302 }
 0x68c   : > { %4534 = vperm.xlu0 %6112, %v4436_v53   ;;  %4509 = vperm.xlu1 %6113, %v4431_v35   ;;  %v4442_v35 = vmul.f32 %v13267_v19, %v4265_v49  ;;  %v13273_v19 = vld [vmem:[#allocation210_spill] sm:$0xff] }
 0x68d   : > { %4514 = vperm.xlu2 %6114, %v4432_v0   ;;  %v13266_v0 = vld [vmem:[#allocation200_spill] sm:$0xff] }
 0x68e   : > { %v4289_v28 = vpop.permute.xlu1 %4288  ;;  %v10954_v31 = vpop.permute.xlu0 %4292  ;;  %v4437_v41 = vmul.f32 %v13266_v0, %v10882_v59  ;;  %v13272_v0 = vld [vmem:[#allocation204_spill] sm:$0xff] }
 0x68f   : > { %v10956_v36 = vpop.permute.xlu2 %4308 }
 0x694   : > { %4549 = vperm.xlu0 %6112, %v4439_v5   ;;  %4524 = vperm.xlu1 %6113, %v4434_v51   ;;  %v4440_v51 = vmul.f32 %v13269_v26, %v10890_v25  ;;  %v4445_v5 = vmul.f32 %v13270_v21, %v4271_v42  ;;  %v13275_v26 = vld [vmem:[#allocation136_spill] sm:$0xff]  ;;  %v13276_v21 = vld [vmem:[#allocation213_spill] sm:$0xff] }
 0x695   : > { %4529 = vperm.xlu2 %6114, %v4435_v24   ;;  %v4441_v24 = vmul.f32 %v13271_v15, %v4263_v23  ;;  %v13277_v15 = vld [vmem:[#allocation207_spill] sm:$0xff] }
 0x696   : > { %v4295_v22 = vpop.permute.xlu1 %4294  ;;  %v10962_v9 = vpop.permute.xlu0 %4298 }
 0x697   : > { %v10964_v53 = vpop.permute.xlu2 %4314 }
 0x69c   : > { %4564 = vperm.xlu0 %6112, %v4442_v35   ;;  %4539 = vperm.xlu1 %6113, %v4437_v41   ;;  %v4443_v41 = vmul.f32 %v13272_v0, %v10898_v55  ;;  %v4448_v35 = vmul.f32 %v13273_v19, %v4277_v60  ;;  %v4447_v55 = vmul.f32 %v13277_v15, %v10930_v33  ;;  %v13278_v0 = vld [vmem:[#allocation209_spill] sm:$0xff]  ;;  %v13279_v19 = vld [vmem:[#allocation216_spill] sm:$0xff] }
 0x69d   : > { %4544 = vperm.xlu2 %6114, %v4438_v52   ;;  %v4444_v52 = vmul.f32 %v13274_v57, %v4269_v56 }
 0x69e   : > { %v4301_v30 = vpop.permute.xlu1 %4300  ;;  %v10970_v46 = vpop.permute.xlu0 %4304 }
 0x69f   : > { %v10972_v39 = vpop.permute.xlu2 %4320 }
 0x6a4   : > { %4579 = vperm.xlu0 %6112, %v4445_v5   ;;  %4554 = vperm.xlu1 %6113, %v4440_v51   ;;  %v4446_v51 = vmul.f32 %v13275_v26, %v10906_v34  ;;  %v4451_v5 = vmul.f32 %v13276_v21, %v4283_v38  ;;  %v13280_v34 = vld [vmem:[#allocation211_spill] sm:$0xff]  ;;  %v13281_v26 = vld [vmem:[#allocation212_spill] sm:$0xff]  ;;  %v13282_v21 = vld [vmem:[#allocation218_spill] sm:$0xff] }
 0x6a5   : > { %4559 = vperm.xlu2 %6114, %v4441_v24   ;;  %v4450_v57 = vmul.f32 %v13280_v34, %v10939_v10 }
 0x6a6   : > { %v4307_v59 = vpop.permute.xlu1 %4306  ;;  %v10978_v4 = vpop.permute.xlu0 %4310 }
 0x6a7   : > { %v10980_v49 = vpop.permute.xlu2 %4326 }
 0x6ac   : > { %4594 = vperm.xlu0 %6112, %v4448_v35   ;;  %4569 = vperm.xlu1 %6113, %v4443_v41   ;;  %v4449_v41 = vmul.f32 %v13278_v0, %v10914_v3  ;;  %v4454_v35 = vmul.f32 %v13279_v19, %v4289_v28  ;;  %v13283_v3 = vld [vmem:[#allocation214_spill] sm:$0xff]  ;;  %v13284_v0 = vld [vmem:[#allocation215_spill] sm:$0xff] }
 0x6ad   : > { %4574 = vperm.xlu2 %6114, %v4444_v52   ;;  %v4453_v15 = vmul.f32 %v13283_v3, %v10946_v54  ;;  %v13285_v19 = vld [vmem:[#allocation222_spill] sm:$0xff] }
 0x6ae   : > { %v4313_v25 = vpop.permute.xlu1 %4312  ;;  %v10986_v23 = vpop.permute.xlu0 %4316 }
 0x6af   : > { %v10988_v42 = vpop.permute.xlu2 %4332 }
 0x6b4   : > { %4609 = vperm.xlu0 %6112, %v4451_v5   ;;  %4584 = vperm.xlu1 %6113, %v4446_v51   ;;  %v4452_v51 = vmul.f32 %v13281_v26, %v10922_v45  ;;  %v4457_v5 = vmul.f32 %v13282_v21, %v4295_v22  ;;  %v13286_v45 = vld [vmem:[#allocation217_spill] sm:$0xff]  ;;  %v13288_v21 = vld [vmem:[#allocation226_spill] sm:$0xff] }
 0x6b5   : > { %4589 = vperm.xlu2 %6114, %v4447_v55   ;;  %v4456_v34 = vmul.f32 %v13286_v45, %v10954_v31  ;;  %v13287_v26 = vld [vmem:[#allocation85_spill] sm:$0xff] }
 0x6b6   : > { %v4319_v56 = vpop.permute.xlu1 %4318  ;;  %v10995_v60 = vpop.permute.xlu0 %4322 }
 0x6b7   : > { %v10997_v24 = vpop.permute.xlu2 %4338 }
 0x6bc   : > { %4624 = vperm.xlu0 %6112, %v4454_v35   ;;  %4599 = vperm.xlu1 %6113, %v4449_v41   ;;  %v4455_v41 = vmul.f32 %v13284_v0, %v10932_v43  ;;  %v4460_v35 = vmul.f32 %v13285_v19, %v4301_v30  ;;  %v13289_v43 = vld [vmem:[#allocation219_spill] sm:$0xff]  ;;  %v13290_v0 = vld [vmem:[#allocation221_spill] sm:$0xff]  ;;  %v13291_v19 = vld [vmem:[#allocation230_spill] sm:$0xff] }
 0x6bd   : > { %4604 = vperm.xlu2 %6114, %v4450_v57   ;;  %v4459_v3 = vmul.f32 %v13289_v43, %v10962_v9 }
 0x6be   : > { %v4325_v33 = vpop.permute.xlu1 %4324  ;;  %v11004_v38 = vpop.permute.xlu0 %4328 }
 0x6bf   : > { %v11006_v52 = vpop.permute.xlu2 %4344 }
 0x6c4   : > { %4639 = vperm.xlu0 %6112, %v4457_v5   ;;  %4614 = vperm.xlu1 %6113, %v4452_v51   ;;  %v4458_v51 = vmul.f32 %v13287_v26, %v10941_v44  ;;  %v4463_v5 = vmul.f32 %v13288_v21, %v4307_v59  ;;  %v13292_v44 = vld [vmem:[#allocation223_spill] sm:$0xff]  ;;  %v13293_v26 = vld [vmem:[#allocation225_spill] sm:$0xff]  ;;  %v13294_v21 = vld [vmem:[#allocation234_spill] sm:$0xff] }
 0x6c5   : > { %4619 = vperm.xlu2 %6114, %v4453_v15   ;;  %v4462_v45 = vmul.f32 %v13292_v44, %v10970_v46 }
 0x6c6   : > { %v4331_v10 = vpop.permute.xlu1 %4330  ;;  %v11013_v28 = vpop.permute.xlu0 %4334 }
 0x6c7   : > { %v11015_v55 = vpop.permute.xlu2 %4350 }
 0x6cc   : > { %4654 = vperm.xlu0 %6112, %v4460_v35   ;;  %4629 = vperm.xlu1 %6113, %v4455_v41   ;;  %v4461_v41 = vmul.f32 %v13290_v0, %v10948_v2  ;;  %v4466_v35 = vmul.f32 %v13291_v19, %v4313_v25  ;;  %v13295_v2 = vld [vmem:[#allocation227_spill] sm:$0xff]  ;;  %v13296_v0 = vld [vmem:[#allocation229_spill] sm:$0xff]  ;;  %v13297_v19 = vld [vmem:[#allocation240_spill] sm:$0xff] }
 0x6cd   : > { %4634 = vperm.xlu2 %6114, %v4456_v34   ;;  %v4465_v43 = vmul.f32 %v13295_v2, %v10978_v4 }
 0x6ce   : > { %v4337_v54 = vpop.permute.xlu1 %4336  ;;  %v11022_v22 = vpop.permute.xlu0 %4340 }
 0x6cf   : > { %v11024_v57 = vpop.permute.xlu2 %4356 }
 0x6d4   : > { %4669 = vperm.xlu0 %6112, %v4463_v5   ;;  %4644 = vperm.xlu1 %6113, %v4458_v51   ;;  %v4464_v51 = vmul.f32 %v13293_v26, %v10956_v36  ;;  %v4469_v5 = vmul.f32 %v13294_v21, %v4319_v56  ;;  %v13298_v36 = vld [vmem:[#allocation231_spill] sm:$0xff]  ;;  %v13299_v26 = vld [vmem:[#allocation233_spill] sm:$0xff]  ;;  %v13300_v21 = vld [vmem:[#allocation246_spill] sm:$0xff] }
 0x6d5   : > { %4649 = vperm.xlu2 %6114, %v4459_v3   ;;  %v4468_v44 = vmul.f32 %v13298_v36, %v10986_v23 }
 0x6d6   : > { %v4343_v31 = vpop.permute.xlu1 %4342  ;;  %v11031_v30 = vpop.permute.xlu0 %4346 }
 0x6d7   : > { %v11033_v15 = vpop.permute.xlu2 %4362 }
 0x6dc   : > { %4684 = vperm.xlu0 %6112, %v4466_v35   ;;  %4659 = vperm.xlu1 %6113, %v4461_v41   ;;  %v4467_v41 = vmul.f32 %v13296_v0, %v10964_v53  ;;  %v4472_v35 = vmul.f32 %v13297_v19, %v4325_v33  ;;  %v13301_v53 = vld [vmem:[#allocation235_spill] sm:$0xff]  ;;  %v13303_v19 = vld [vmem:[#allocation252_spill] sm:$0xff] }
 0x6dd   : > { %4664 = vperm.xlu2 %6114, %v4462_v45   ;;  %v4471_v2 = vmul.f32 %v13301_v53, %v10995_v60  ;;  %v13302_v0 = vld [vmem:[#allocation239_spill] sm:$0xff] }
 0x6de   : > { %v4349_v9 = vpop.permute.xlu1 %4348  ;;  %v11040_v59 = vpop.permute.xlu0 %4352 }
 0x6df   : > { %v11042_v34 = vpop.permute.xlu2 %4504 }
 0x6e4   : > { %4699 = vperm.xlu0 %6112, %v4469_v5   ;;  %4674 = vperm.xlu1 %6113, %v4464_v51   ;;  %v4470_v51 = vmul.f32 %v13299_v26, %v10972_v39  ;;  %v4475_v5 = vmul.f32 %v13300_v21, %v4331_v10  ;;  %v13304_v39 = vld [vmem:[#allocation241_spill] sm:$0xff]  ;;  %v13306_v21 = vld [vmem:[#allocation256_spill] sm:$0xff] }
 0x6e5   : > { %4679 = vperm.xlu2 %6114, %v4465_v43   ;;  %v4474_v10 = vmul.f32 %v13304_v39, %v11004_v38  ;;  %v13305_v26 = vld [vmem:[#allocation245_spill] sm:$0xff] }
 0x6e6   : > { %v4355_v46 = vpop.permute.xlu1 %4354  ;;  %v11049_v25 = vpop.permute.xlu0 %4358 }
 0x6e7   : > { %v11051_v3 = vpop.permute.xlu2 %4514 }
 0x6ec   : > { %4714 = vperm.xlu0 %6112, %v4472_v35   ;;  %4689 = vperm.xlu1 %6113, %v4467_v41   ;;  %v4473_v41 = vmul.f32 %v13302_v0, %v10980_v49  ;;  %v4478_v35 = vmul.f32 %v13303_v19, %v4337_v54  ;;  %v13307_v49 = vld [vmem:[#allocation247_spill] sm:$0xff]  ;;  %v13309_v19 = vld [vmem:[#allocation261_spill] sm:$0xff] }
 0x6ed   : > { %4694 = vperm.xlu2 %6114, %v4468_v44   ;;  %v4477_v54 = vmul.f32 %v13307_v49, %v11013_v28  ;;  %v13308_v0 = vld [vmem:[#allocation251_spill] sm:$0xff] }
 0x6ee   : > { %v4361_v4 = vpop.permute.xlu1 %4360  ;;  %v11058_v56 = vpop.permute.xlu0 %4494 }
 0x6ef   : > { %v11060_v45 = vpop.permute.xlu2 %4529 }
 0x6f4   : > { %4729 = vperm.xlu0 %6112, %v4475_v5   ;;  %4704 = vperm.xlu1 %6113, %v4470_v51   ;;  %v4476_v51 = vmul.f32 %v13305_v26, %v10988_v42  ;;  %v4481_v5 = vmul.f32 %v13306_v21, %v4343_v31  ;;  %v13310_v42 = vld [vmem:[#allocation253_spill] sm:$0xff]  ;;  %v13311_v26 = vld [vmem:[#allocation255_spill] sm:$0xff] }
 0x6f5   : > { %4709 = vperm.xlu2 %6114, %v4471_v2   ;;  %v4480_v31 = vmul.f32 %v13310_v42, %v11022_v22  ;;  %v13312_v21 = vld [vmem:[#allocation265_spill] sm:$0xff] }
 0x6f6   : > { %v11067_v23 = vpop.permute.xlu1 %4499  ;;  %v11069_v33 = vpop.permute.xlu0 %4519 }
 0x6f7   : > { %v11071_v43 = vpop.permute.xlu2 %4544 }
 0x6fc   : > { %4744 = vperm.xlu0 %6112, %v4478_v35   ;;  %4719 = vperm.xlu1 %6113, %v4473_v41   ;;  %v4479_v41 = vmul.f32 %v13308_v0, %v10997_v24  ;;  %v4484_v35 = vmul.f32 %v13309_v19, %v4349_v9  ;;  %v13313_v24 = vld [vmem:[#allocation257_spill] sm:$0xff]  ;;  %v13314_v0 = vld [vmem:[#allocation260_spill] sm:$0xff] }
 0x6fd   : > { %4724 = vperm.xlu2 %6114, %v4474_v10   ;;  %v4483_v9 = vmul.f32 %v13313_v24, %v11031_v30  ;;  %v13315_v19 = vld [vmem:[#allocation72_spill] sm:$0xff]  ;;  %v13320_v24 = vld [vmem:[#allocation15_spill] sm:$0xff] }
 0x6fe   : > { %v11078_v60 = vpop.permute.xlu1 %4509  ;;  %v11080_v36 = vpop.permute.xlu0 %4534 }
 0x6ff   : > { %v11082_v44 = vpop.permute.xlu2 %4559 }
 0x704   : > { %4759 = vperm.xlu0 %6112, %v4481_v5   ;;  %4734 = vperm.xlu1 %6113, %v4476_v51   ;;  %v4482_v51 = vmul.f32 %v13311_v26, %v11006_v52  ;;  %v4487_v5 = vmul.f32 %v13312_v21, %v4355_v46  ;;  %v13316_v52 = vld [vmem:[#allocation262_spill] sm:$0xff]  ;;  %v13317_v26 = vld [vmem:[#allocation264_spill] sm:$0xff] }
 0x705   : > { %4739 = vperm.xlu2 %6114, %v4477_v54   ;;  %v4486_v46 = vmul.f32 %v13316_v52, %v11040_v59  ;;  %v13318_v21 = vld [vmem:[#allocation266_spill] sm:$0xff] }
 0x706   : > { %v11089_v38 = vpop.permute.xlu1 %4524  ;;  %v11091_v53 = vpop.permute.xlu0 %4549  ;;  %v13352_v52 = vld [vmem:[#allocation62_spill] sm:$0xff] }
 0x707   : > { %v11093_v2 = vpop.permute.xlu2 %4574 }
 0x70c   : > { %4774 = vperm.xlu0 %6112, %v4484_v35   ;;  %4749 = vperm.xlu1 %6113, %v4479_v41   ;;  %v4485_v41 = vmul.f32 %v13314_v0, %v11015_v55  ;;  %v4490_v35 = vmul.f32 %v13315_v19, %v4361_v4  ;;  %v4489_v55 = vmul.f32 %v13318_v21, %v11049_v25  ;;  %v13345_v0 = vld [vmem:[#allocation23_spill] sm:$0xff] }
 0x70d   : > { %4754 = vperm.xlu2 %6114, %v4480_v31  }
 0x70e   : > { %v11100_v28 = vpop.permute.xlu1 %4539  ;;  %v11102_v39 = vpop.permute.xlu0 %4564 }
 0x70f   : > { %v11104_v10 = vpop.permute.xlu2 %4589 }
 0x714   : > { %4789 = vperm.xlu0 %6112, %v4487_v5   ;;  %4764 = vperm.xlu1 %6113, %v4482_v51   ;;  %v4488_v51 = vmul.f32 %v13317_v26, %v11024_v57 }
 0x715   : > { %4769 = vperm.xlu2 %6114, %v4483_v9   ;;  %v4491_v9 = vmul.f32 %v13320_v24, %v11033_v15  ;;  %v13358_v24 = vld [vmem:[#allocation70_spill] sm:$0xff] }
 0x716   : > { %v11111_v22 = vpop.permute.xlu1 %4554  ;;  %v11113_v49 = vpop.permute.xlu0 %4579 }
 0x717   : > { %v11115_v54 = vpop.permute.xlu2 %4604 }
 0x71c   : > { %4804 = vperm.xlu0 %6112, %v4490_v35   ;;  %4779 = vperm.xlu1 %6113, %v4485_v41   ;;  %v13346_v41 = vld [vmem:[#allocation54_spill] sm:$0xff]  ;;  %v13351_v35 = vld [vmem:[#allocation57_spill] sm:$0xff] }
 0x71d   : > { %4784 = vperm.xlu2 %6114, %v4486_v46   ;;  %v13353_v46 = vld [vmem:[#allocation25_spill] sm:$0xff] }
 0x71e   : > { %v11122_v30 = vpop.permute.xlu1 %4569  ;;  %v11124_v42 = vpop.permute.xlu0 %4594 }
 0x71f   : > { %v11126_v31 = vpop.permute.xlu2 %4619 }
 0x724   : > { %4942 = vrot.lane.b32.xlu0 %v13193_v62, %s6988_s23  ;;  %4794 = vperm.xlu1 %6113, %v4488_v51  }
 0x725   : > { %4799 = vperm.xlu2 %6114, %v4489_v55   ;;  %v13357_v55 = vld [vmem:[#allocation228_spill] sm:$0xff] }
 0x726   : > { %v11134_v59 = vpop.permute.xlu1 %4584  ;;  %v11136_v4 = vpop.permute.xlu0 %4609 }
 0x727   : > { %v11138_v5 = vpop.permute.xlu2 %4634 }
 0x728   : > { %13319 = vst [vmem:[#allocation156_spill] sm:$0xff] %v11138_v5  ;;  %v13407_v5 = vld [vmem:[#allocation269_spill] sm:$0xff] }
 0x72c   : > { %4948 = vrot.lane.b32.xlu0 %v13199_v29, %s6988_s23  ;;  %4809 = vperm.xlu1 %6113, %v4491_v9   ;;  %v13359_v9 = vld [vmem:[#allocation24_spill] sm:$0xff] }
 0x72d   : > { %4940 = vrot.lane.b32.xlu2 %v13194_v48, %s6988_s23 }
 0x72e   : > { %v11146_v57 = vpop.permute.xlu1 %4599  ;;  %v11148_v62 = vpop.permute.xlu0 %4624 }
 0x72f   : > { %13321 = vst [vmem:[#allocation91_spill] sm:$0xff] %v11146_v57  ;;  %v11150_v25 = vpop.permute.xlu2 %4649 }
 0x730   : > { %13322 = vst [vmem:[#allocation162_spill] sm:$0xff] %v11148_v62 }
 0x731   : > { %13323 = vst [vmem:[#allocation160_spill] sm:$0xff] %v11150_v25 }
 0x734   : > { %4954 = vrot.lane.b32.xlu0 %v10044_v47, %s6988_s23  ;;  %4944 = vrot.lane.b32.xlu1 %v13198_v16, %s6988_s23 }
 0x735   : > { %4946 = vrot.lane.b32.xlu2 %v13200_v1, %s6988_s23 }
 0x736   : > { %v11158_v29 = vpop.permute.xlu1 %4614  ;;  %v11160_v15 = vpop.permute.xlu0 %4639 }
 0x737   : > { %13324 = vst [vmem:[#allocation101_spill] sm:$0xff] %v11158_v29  ;;  %v11162_v48 = vpop.permute.xlu2 %4664  ;;  %v13404_v29 = vld [vmem:[#allocation18_spill] sm:$0xff] }
 0x738   : > { %13325 = vst [vmem:[#allocation177_spill] sm:$0xff] %v11160_v15  ;;  %v13406_v15 = vld [vmem:[#allocation274_spill] sm:$0xff] }
 0x739   : > { %13326 = vst [vmem:[#allocation167_spill] sm:$0xff] %v11162_v48  ;;  %v13403_v48 = vld [vmem:[#allocation271_spill] sm:$0xff] }
 0x73c   : > { %4960 = vrot.lane.b32.xlu0 %v10083_v40, %s6988_s23  ;;  %4950 = vrot.lane.b32.xlu1 %v13204_v37, %s6988_s23 }
 0x73d   : > { %4952 = vrot.lane.b32.xlu2 %v13205_v27, %s6988_s23 }
 0x73e   : > { %v11170_v47 = vpop.permute.xlu1 %4629  ;;  %v11172_v16 = vpop.permute.xlu0 %4654 }
 0x73f   : > { %13327 = vst [vmem:[#allocation109_spill] sm:$0xff] %v11170_v47  ;;  %v11174_v1 = vpop.permute.xlu2 %4679 }
 0x740   : > { %13328 = vst [vmem:[#allocation42_spill] sm:$0xff] %v11172_v16 }
 0x741   : > { %13329 = vst [vmem:[#allocation164_spill] sm:$0xff] %v11174_v1 }
 0x744   : > { %4966 = vrot.lane.b32.xlu0 %v10122_v14, %s6988_s23  ;;  %4956 = vrot.lane.b32.xlu1 %v13209_v8, %s6988_s23 }
 0x745   : > { %4958 = vrot.lane.b32.xlu2 %v13210_v12, %s6988_s23 }
 0x746   : > { %v11182_v40 = vpop.permute.xlu1 %4644  ;;  %v11184_v37 = vpop.permute.xlu0 %4669 }
 0x747   : > { %13330 = vst [vmem:[#allocation106_spill] sm:$0xff] %v11182_v40  ;;  %v11186_v27 = vpop.permute.xlu2 %4694 }
 0x748   : > { %13331 = vst [vmem:[#allocation124_spill] sm:$0xff] %v11184_v37  ;;  %v13400_v37 = vld [vmem:[#allocation147_spill] sm:$0xff] }
 0x749   : > { %13332 = vst [vmem:[#allocation169_spill] sm:$0xff] %v11186_v27  ;;  %v13397_v27 = vld [vmem:[#allocation87_spill] sm:$0xff] }
 0x74c   : > { %4972 = vrot.lane.b32.xlu0 %v10161_v20, %s6988_s23  ;;  %4962 = vrot.lane.b32.xlu1 %v13214_v61, %s6988_s23 }
 0x74d   : > { %4964 = vrot.lane.b32.xlu2 %v10111_v63, %s6988_s23 }
 0x74e   : > { %v11194_v14 = vpop.permute.xlu1 %4659  ;;  %v11196_v8 = vpop.permute.xlu0 %4684 }
 0x74f   : > { %13333 = vst [vmem:[#allocation116_spill] sm:$0xff] %v11194_v14  ;;  %v11198_v12 = vpop.permute.xlu2 %4709 }
 0x750   : > { %13334 = vst [vmem:[#allocation189_spill] sm:$0xff] %v11196_v8  ;;  %v13398_v8 = vld [vmem:[#allocation259_spill] sm:$0xff] }
 0x751   : > { %13335 = vst [vmem:[#allocation174_spill] sm:$0xff] %v11198_v12  ;;  %v13395_v12 = vld [vmem:[#allocation69_spill] sm:$0xff] }
 0x754   : > { %4978 = vrot.lane.b32.xlu0 %v10200_v7, %s6988_s23  ;;  %4968 = vrot.lane.b32.xlu1 %v13218_v11, %s6988_s23 }
 0x755   : > { %4970 = vrot.lane.b32.xlu2 %v13219_v6, %s6988_s23 }
 0x756   : > { %v11206_v20 = vpop.permute.xlu1 %4674  ;;  %v11208_v61 = vpop.permute.xlu0 %4699 }
 0x757   : > { %13336 = vst [vmem:[#allocation123_spill] sm:$0xff] %v11206_v20  ;;  %v11210_v63 = vpop.permute.xlu2 %4724  ;;  %v13394_v20 = vld [vmem:[#allocation153_spill] sm:$0xff] }
 0x758   : > { %13337 = vst [vmem:[#allocation47_spill] sm:$0xff] %v11208_v61 }
 0x759   : > { %13338 = vst [vmem:[#allocation171_spill] sm:$0xff] %v11210_v63  ;;  %v13392_v63 = vld [vmem:[#allocation119_spill] sm:$0xff] }
 0x75c   : > { %4974 = vrot.lane.b32.xlu1 %v13223_v18, %s6988_s23  ;;  %4984 = vrot.lane.b32.xlu0 %v10239_v17, %s6988_s23 }
 0x75d   : > { %4976 = vrot.lane.b32.xlu2 %v10189_v50, %s6988_s23 }
 0x75e   : > { %v11218_v7 = vpop.permute.xlu1 %4689  ;;  %v11220_v11 = vpop.permute.xlu0 %4714 }
 0x75f   : > { %13339 = vst [vmem:[#allocation121_spill] sm:$0xff] %v11218_v7  ;;  %v11222_v6 = vpop.permute.xlu2 %4739  ;;  %v13391_v7 = vld [vmem:[#allocation73_spill] sm:$0xff] }
 0x760   : > { %13340 = vst [vmem:[#allocation185_spill] sm:$0xff] %v11220_v11 }
 0x761   : > { %13341 = vst [vmem:[#allocation176_spill] sm:$0xff] %v11222_v6  ;;  %v13388_v6 = vld [vmem:[#allocation125_spill] sm:$0xff] }
 0x764   : > { %4980 = vrot.lane.b32.xlu1 %v10196_v58, %s6988_s23  ;;  %4990 = vrot.lane.b32.xlu0 %v10278_v32, %s6988_s23  ;;  %v13347_v58 = vld [vmem:[#allocation249_spill] sm:$0xff] }
 0x765   : > { %4982 = vrot.lane.b32.xlu2 %v10228_v13, %s6988_s23 }
 0x766   : > { %v11230_v18 = vpop.permute.xlu1 %4704  ;;  %v11232_v17 = vpop.permute.xlu0 %4729 }
 0x767   : > { %13342 = vst [vmem:[#allocation129_spill] sm:$0xff] %v11230_v18  ;;  %v11234_v50 = vpop.permute.xlu2 %4754  ;;  %v13387_v18 = vld [vmem:[#allocation58_spill] sm:$0xff] }
 0x768   : > { %13343 = vst [vmem:[#allocation78_spill] sm:$0xff] %v11232_v17 }
 0x769   : > { %13344 = vst [vmem:[#allocation181_spill] sm:$0xff] %v11234_v50 }
 0x76c   : > { %4986 = vrot.lane.b32.xlu1 %v13345_v0, %s6988_s23  ;;  %4996 = vrot.lane.b32.xlu0 %v13346_v41, %s6988_s23 }
 0x76d   : > { %4988 = vrot.lane.b32.xlu2 %v13347_v58, %s6988_s23 }
 0x76e   : > { %v11242_v19 = vpop.permute.xlu1 %4719  ;;  %v11244_v32 = vpop.permute.xlu0 %4744 }
 0x76f   : > { %13348 = vst [vmem:[#allocation138_spill] sm:$0xff] %v11242_v19  ;;  %v11246_v13 = vpop.permute.xlu2 %4769 }
 0x770   : > { %13349 = vst [vmem:[#allocation161_spill] sm:$0xff] %v11244_v32 }
 0x771   : > { %13350 = vst [vmem:[#allocation137_spill] sm:$0xff] %v11246_v13 }
 0x774   : > { %4992 = vrot.lane.b32.xlu1 %v13351_v35, %s6988_s23  ;;  %5002 = vrot.lane.b32.xlu0 %v13352_v52, %s6988_s23  ;;  %v13363_v35 = vld [vmem:[#allocation248_spill] sm:$0xff]  ;;  %v13364_v52 = vld [vmem:[#allocation29_spill] sm:$0xff] }
 0x775   : > { %4994 = vrot.lane.b32.xlu2 %v13353_v46, %s6988_s23  ;;  %v13365_v46 = vld [vmem:[#allocation27_spill] sm:$0xff] }
 0x776   : > { %v11254_v26 = vpop.permute.xlu1 %4734  ;;  %v11256_v51 = vpop.permute.xlu0 %4759 }
 0x777   : > { %13354 = vst [vmem:[#allocation135_spill] sm:$0xff] %v11254_v26  ;;  %v11258_v21 = vpop.permute.xlu2 %4784 }
 0x778   : > { %13355 = vst [vmem:[#allocation195_spill] sm:$0xff] %v11256_v51  ;;  %v13383_v51 = vld [vmem:[#allocation36_spill] sm:$0xff] }
 0x779   : > { %13356 = vst [vmem:[#allocation183_spill] sm:$0xff] %v11258_v21  ;;  %v13369_v21 = vld [vmem:[#allocation258_spill] sm:$0xff] }
 0x77c   : > { %4998 = vrot.lane.b32.xlu1 %v13357_v55, %s6988_s23  ;;  %5008 = vrot.lane.b32.xlu0 %v13358_v24, %s6988_s23 }
 0x77d   : > { %5000 = vrot.lane.b32.xlu2 %v13359_v9, %s6988_s23 }
 0x77e   : > { %v11266_v0 = vpop.permute.xlu1 %4749  ;;  %v11268_v41 = vpop.permute.xlu0 %4774 }
 0x77f   : > { %13360 = vst [vmem:[#allocation67_spill] sm:$0xff] %v11266_v0  ;;  %v11270_v58 = vpop.permute.xlu2 %4799  ;;  %v13368_v0 = vld [vmem:[#allocation108_spill] sm:$0xff] }
 0x780   : > { %13361 = vst [vmem:[#allocation118_spill] sm:$0xff] %v11268_v41 }
 0x781   : > { %13362 = vst [vmem:[#allocation192_spill] sm:$0xff] %v11270_v58  ;;  %v13370_v58 = vld [vmem:[#allocation30_spill] sm:$0xff] }
 0x784   : > { %5004 = vrot.lane.b32.xlu1 %v13363_v35, %s6988_s23  ;;  %5014 = vrot.lane.b32.xlu0 %v13364_v52, %s6988_s23 }
 0x785   : > { %5006 = vrot.lane.b32.xlu2 %v13365_v46, %s6988_s23  ;;  %v13373_v46 = vld [vmem:[#allocation232_spill] sm:$0xff] }
 0x786   : > { %v11278_v55 = vpop.permute.xlu1 %4764  ;;  %v11280_v24 = vpop.permute.xlu0 %4789 }
 0x787   : > { %13366 = vst [vmem:[#allocation31_spill] sm:$0xff] %v11278_v55  ;;  %v4941_v9 = vpop.permute.xlu2 %4940  ;;  %v13374_v55 = vld [vmem:[#allocation79_spill] sm:$0xff] }
 0x788   : > { %13367 = vst [vmem:[#allocation65_spill] sm:$0xff] %v11280_v24 }
 0x78c   : > { %5010 = vrot.lane.b32.xlu1 %v13368_v0, %s6988_s23  ;;  %5020 = vrot.lane.b32.xlu0 %v13369_v21, %s6988_s23  ;;  %v13375_v0 = vld [vmem:[#allocation88_spill] sm:$0xff] }
 0x78d   : > { %5012 = vrot.lane.b32.xlu2 %v13370_v58, %s6988_s23  ;;  %v13377_v58 = vld [vmem:[#allocation77_spill] sm:$0xff] }
 0x78e   : > { %v11288_v35 = vpop.permute.xlu1 %4779  ;;  %v11290_v52 = vpop.permute.xlu0 %4804 }
 0x78f   : > { %13371 = vst [vmem:[#allocation187_spill] sm:$0xff] %v11288_v35  ;;  %v11292_v41 = vpop.permute.xlu2 %4946  ;;  %v13378_v35 = vld [vmem:[#allocation99_spill] sm:$0xff] }
 0x790   : > { %13372 = vst [vmem:[#allocation28_spill] sm:$0xff] %v11290_v52  ;;  %v13379_v52 = vld [vmem:[#allocation83_spill] sm:$0xff] }
 0x794   : > { %5016 = vrot.lane.b32.xlu1 %v13373_v46, %s6988_s23  ;;  %5026 = vrot.lane.b32.xlu0 %v13374_v55, %s6988_s23 }
 0x795   : > { %5018 = vrot.lane.b32.xlu2 %v13375_v0, %s6988_s23  ;;  %v13381_v0 = vld [vmem:[#allocation38_spill] sm:$0xff] }
 0x796   : > { %v11300_v24 = vpop.permute.xlu1 %4794  ;;  %v4943_v21 = vpop.permute.xlu0 %4942 }
 0x797   : > { %13376 = vst [vmem:[#allocation110_spill] sm:$0xff] %v11300_v24  ;;  %v11302_v26 = vpop.permute.xlu2 %4952  ;;  %v13382_v24 = vld [vmem:[#allocation46_spill] sm:$0xff] }
 0x79c   : > { %5022 = vrot.lane.b32.xlu1 %v13377_v58, %s6988_s23  ;;  %5032 = vrot.lane.b32.xlu0 %v13378_v35, %s6988_s23 }
 0x79d   : > { %5024 = vrot.lane.b32.xlu2 %v13379_v52, %s6988_s23  ;;  %v6992_v52 = vmov 2  }
 0x79e   : > { %v11310_v46 = vpop.permute.xlu1 %4809  ;;  %v4949_v55 = vpop.permute.xlu0 %4948  ;;  %6115 = vset.pattern.permute.xlu0 %v6992_v52  ;;  %6116 = vset.pattern.permute.xlu1 %v6992_v52 }
 0x79f   : > { %13380 = vst [vmem:[#allocation298_spill] sm:$0xff] %v11310_v46  ;;  %v11312_v13 = vpop.permute.xlu2 %4958  ;;  %6117 = vset.pattern.permute.xlu2 %v6992_v52  ;;  %v13384_v46 = vld [vmem:[#allocation39_spill] sm:$0xff]  ;;  %v13389_v52 = vld [vmem:[#allocation16_spill] sm:$0xff]  ;;  %v5136_v62 = vmul.f32 %v13407_v5, %v4949_v55 }
 0x7a4   : > { %5028 = vrot.lane.b32.xlu1 %v13381_v0, %s6988_s23  ;;  %5038 = vrot.lane.b32.xlu0 %v13382_v24, %s6988_s23  ;;  %v13385_v0 = vld [vmem:[#allocation56_spill] sm:$0xff] }
 0x7a5   : > { %5030 = vrot.lane.b32.xlu2 %v13383_v51, %s6988_s23  ;;  %v13386_v24 = vld [vmem:[#allocation44_spill] sm:$0xff] }
 0x7a6   : > { %v4945_v58 = vpop.permute.xlu1 %4944  ;;  %v11320_v19 = vpop.permute.xlu0 %4954 }
 0x7a7   : > { %v11322_v35 = vpop.permute.xlu2 %4964  ;;  %v5134_v25 = vmul.f32 %v13404_v29, %v4945_v58 }
 0x7ac   : > { %5034 = vrot.lane.b32.xlu1 %v13384_v46, %s6988_s23  ;;  %5044 = vrot.lane.b32.xlu0 %v13385_v0, %s6988_s23 }
 0x7ad   : > { %5036 = vrot.lane.b32.xlu2 %v13386_v24, %s6988_s23  ;;  %v13390_v24 = vld [vmem:[#allocation250_spill] sm:$0xff] }
 0x7ae   : > { %v4951_v50 = vpop.permute.xlu1 %4950  ;;  %v11330_v51 = vpop.permute.xlu0 %4960 }
 0x7af   : > { %v11332_v32 = vpop.permute.xlu2 %4970 }
 0x7b4   : > { %5040 = vrot.lane.b32.xlu1 %v13387_v18, %s6988_s23  ;;  %5050 = vrot.lane.b32.xlu0 %v13388_v6, %s6988_s23 }
 0x7b5   : > { %5042 = vrot.lane.b32.xlu2 %v13389_v52, %s6988_s23  ;;  %v13393_v52 = vld [vmem:[#allocation59_spill] sm:$0xff] }
 0x7b6   : > { %v4957_v46 = vpop.permute.xlu1 %4956  ;;  %v11340_v17 = vpop.permute.xlu0 %4966 }
 0x7b7   : > { %v11342_v0 = vpop.permute.xlu2 %4976  ;;  %v5140_v16 = vmul.f32 %v13403_v48, %v4957_v46  ;;  %v13410_v46 = vld [vmem:[#allocation272_spill] sm:$0xff] }
 0x7bc   : > { %5046 = vrot.lane.b32.xlu1 %v13390_v24, %s6988_s23  ;;  %5056 = vrot.lane.b32.xlu0 %v13391_v7, %s6988_s23 }
 0x7bd   : > { %5048 = vrot.lane.b32.xlu2 %v13392_v63, %s6988_s23  ;;  %v13396_v63 = vld [vmem:[#allocation17_spill] sm:$0xff] }
 0x7be   : > { %v4963_v18 = vpop.permute.xlu1 %4962  ;;  %v11350_v11 = vpop.permute.xlu0 %4972  ;;  %v5132_v14 = vmul.f32 %v13396_v63, %v4941_v9  ;;  %v13401_v9 = vld [vmem:[#allocation93_spill] sm:$0xff] }
 0x7bf   : > { %v11352_v6 = vpop.permute.xlu2 %4982  ;;  %v5143_v57 = vmul.f32 %v13406_v15, %v4963_v18  ;;  %v13411_v15 = vld [vmem:[#allocation273_spill] sm:$0xff] }
 0x7c0   : > { %v5141_v55 = vmul.f32 %v13411_v15, %v11312_v13  ;;  %v13412_v18 = vld [vmem:[#allocation141_spill] sm:$0xff]  ;;  %v13416_v13 = vld [vmem:[#allocation278_spill] sm:$0xff]  ;;  %v13417_v15 = vld [vmem:[#allocation279_spill] sm:$0xff] }
 0x7c4   : > { %5052 = vrot.lane.b32.xlu1 %v13393_v52, %s6988_s23  ;;  %5062 = vrot.lane.b32.xlu0 %v13394_v20, %s6988_s23 }
 0x7c5   : > { %5054 = vrot.lane.b32.xlu2 %v13395_v12, %s6988_s23  ;;  %v13399_v12 = vld [vmem:[#allocation268_spill] sm:$0xff] }
 0x7c6   : > { %v4969_v24 = vpop.permute.xlu1 %4968  ;;  %v11360_v61 = vpop.permute.xlu0 %4978  ;;  %v5137_v1 = vmul.f32 %v13399_v12, %v4951_v50  ;;  %v13405_v12 = vld [vmem:[#allocation267_spill] sm:$0xff] }
 0x7c7   : > { %v11362_v7 = vpop.permute.xlu2 %4988 }
 0x7cc   : > { %5058 = vrot.lane.b32.xlu1 %v13397_v27, %s6988_s23  ;;  %5198 = vperm.xlu0 %6115, %v5132_v14  }
 0x7cd   : > { %5060 = vrot.lane.b32.xlu2 %v13398_v8, %s6988_s23  ;;  %v13402_v8 = vld [vmem:[#allocation84_spill] sm:$0xff] }
 0x7ce   : > { %v4975_v52 = vpop.permute.xlu1 %4974  ;;  %v11369_v40 = vpop.permute.xlu0 %4984  ;;  %v5133_v47 = vmul.f32 %v13402_v8, %v4943_v21  ;;  %v13409_v21 = vld [vmem:[#allocation277_spill] sm:$0xff] }
 0x7cf   : > { %v11371_v20 = vpop.permute.xlu2 %4994  ;;  %v5146_v58 = vmul.f32 %v13409_v21, %v4969_v24  ;;  %v5149_v8 = vmul.f32 %v13412_v18, %v4975_v52  ;;  %v13415_v21 = vld [vmem:[#allocation150_spill] sm:$0xff]  ;;  %v13418_v18 = vld [vmem:[#allocation283_spill] sm:$0xff] }
 0x7d4   : > { %5064 = vrot.lane.b32.xlu1 %v13400_v37, %s6988_s23  ;;  %5223 = vperm.xlu0 %6115, %v5137_v1  }
 0x7d5   : > { %5066 = vrot.lane.b32.xlu2 %v13401_v9, %s6988_s23  ;;  %v5135_v9 = vmul.f32 %v13405_v12, %v11292_v41  ;;  %v5139_v41 = vmul.f32 %v13410_v46, %v11320_v19  ;;  %v5145_v46 = vmul.f32 %v13416_v13, %v11340_v17 }
 0x7d6   : > { %v4981_v63 = vpop.permute.xlu1 %4980  ;;  %v11378_v27 = vpop.permute.xlu0 %4990 }
 0x7d7   : > { %v11380_v14 = vpop.permute.xlu2 %5000 }
 0x7dc   : > { %5238 = vperm.xlu0 %6115, %v5140_v16   ;;  %5203 = vperm.xlu1 %6116, %v5133_v47  }
 0x7dd   : > { %5208 = vperm.xlu2 %6117, %v5134_v25   ;;  %v13408_v25 = vld [vmem:[#allocation270_spill] sm:$0xff] }
 0x7de   : > { %v4987_v50 = vpop.permute.xlu1 %4986  ;;  %v11385_v37 = vpop.permute.xlu0 %4996  ;;  %v5138_v16 = vmul.f32 %v13408_v25, %v11302_v26  ;;  %v13413_v26 = vld [vmem:[#allocation275_spill] sm:$0xff]  ;;  %v13414_v25 = vld [vmem:[#allocation276_spill] sm:$0xff] }
 0x7df   : > { %v11387_v1 = vpop.permute.xlu2 %5006  ;;  %v5142_v12 = vmul.f32 %v13413_v26, %v11330_v51 }
 0x7e4   : > { %5253 = vperm.xlu0 %6115, %v5143_v57   ;;  %5213 = vperm.xlu1 %6116, %v5135_v9  }
 0x7e5   : > { %5218 = vperm.xlu2 %6117, %v5136_v62  }
 0x7e6   : > { %v4993_v48 = vpop.permute.xlu1 %4992  ;;  %v11393_v29 = vpop.permute.xlu0 %5002 }
 0x7e7   : > { %v11395_v47 = vpop.permute.xlu2 %5012 }
 0x7ec   : > { %5268 = vperm.xlu0 %6115, %v5146_v58   ;;  %5228 = vperm.xlu1 %6116, %v5138_v16   ;;  %v5144_v16 = vmul.f32 %v13414_v25, %v11322_v35  ;;  %v5152_v58 = vmul.f32 %v13415_v21, %v4981_v63  ;;  %v13419_v35 = vld [vmem:[#allocation280_spill] sm:$0xff]  ;;  %v13420_v25 = vld [vmem:[#allocation281_spill] sm:$0xff] }
 0x7ed   : > { %5233 = vperm.xlu2 %6117, %v5139_v41   ;;  %v5148_v26 = vmul.f32 %v13419_v35, %v11350_v11  ;;  %v13421_v21 = vld [vmem:[#allocation173_spill] sm:$0xff] }
 0x7ee   : > { %v4999_v5 = vpop.permute.xlu1 %4998  ;;  %v11402_v57 = vpop.permute.xlu0 %5008 }
 0x7ef   : > { %v11404_v62 = vpop.permute.xlu2 %5018 }
 0x7f4   : > { %5283 = vperm.xlu0 %6115, %v5149_v8   ;;  %5243 = vperm.xlu1 %6116, %v5141_v55   ;;  %v5147_v55 = vmul.f32 %v13417_v15, %v11332_v32  ;;  %v5155_v8 = vmul.f32 %v13418_v18, %v4987_v50  ;;  %v13422_v32 = vld [vmem:[#allocation52_spill] sm:$0xff]  ;;  %v13423_v15 = vld [vmem:[#allocation282_spill] sm:$0xff]  ;;  %v13424_v18 = vld [vmem:[#allocation287_spill] sm:$0xff] }
 0x7f5   : > { %5248 = vperm.xlu2 %6117, %v5142_v12   ;;  %v5151_v13 = vmul.f32 %v13422_v32, %v11360_v61 }
 0x7f6   : > { %v5005_v19 = vpop.permute.xlu1 %5004  ;;  %v11411_v24 = vpop.permute.xlu0 %5014 }
 0x7f7   : > { %v11413_v9 = vpop.permute.xlu2 %5024 }
 0x7fc   : > { %5298 = vperm.xlu0 %6115, %v5152_v58   ;;  %5258 = vperm.xlu1 %6116, %v5144_v16   ;;  %v5150_v16 = vmul.f32 %v13420_v25, %v11342_v0  ;;  %v5158_v58 = vmul.f32 %v13421_v21, %v4993_v48  ;;  %v13425_v0 = vld [vmem:[#allocation284_spill] sm:$0xff]  ;;  %v13426_v25 = vld [vmem:[#allocation285_spill] sm:$0xff]  ;;  %v13427_v21 = vld [vmem:[#allocation290_spill] sm:$0xff] }
 0x7fd   : > { %5263 = vperm.xlu2 %6117, %v5145_v46   ;;  %v5154_v35 = vmul.f32 %v13425_v0, %v11369_v40 }
 0x7fe   : > { %v5011_v51 = vpop.permute.xlu1 %5010  ;;  %v11420_v52 = vpop.permute.xlu0 %5020 }
 0x7ff   : > { %v11422_v41 = vpop.permute.xlu2 %5030 }
 0x804   : > { %5313 = vperm.xlu0 %6115, %v5155_v8   ;;  %5273 = vperm.xlu1 %6116, %v5147_v55   ;;  %v5153_v55 = vmul.f32 %v13423_v15, %v11352_v6  ;;  %v5161_v8 = vmul.f32 %v13424_v18, %v4999_v5  ;;  %v13428_v6 = vld [vmem:[#allocation76_spill] sm:$0xff]  ;;  %v13429_v15 = vld [vmem:[#allocation286_spill] sm:$0xff] }
 0x805   : > { %5278 = vperm.xlu2 %6117, %v5148_v26   ;;  %v5157_v32 = vmul.f32 %v13428_v6, %v11378_v27  ;;  %v13430_v18 = vld [vmem:[#allocation122_spill] sm:$0xff] }
 0x806   : > { %v5017_v17 = vpop.permute.xlu1 %5016  ;;  %v11429_v63 = vpop.permute.xlu0 %5026 }
 0x807   : > { %v11431_v12 = vpop.permute.xlu2 %5036 }
 0x80c   : > { %5328 = vperm.xlu0 %6115, %v5158_v58   ;;  %5288 = vperm.xlu1 %6116, %v5150_v16   ;;  %v5156_v16 = vmul.f32 %v13426_v25, %v11362_v7  ;;  %v5164_v58 = vmul.f32 %v13427_v21, %v5005_v19  ;;  %v13431_v7 = vld [vmem:[#allocation288_spill] sm:$0xff]  ;;  %v13432_v25 = vld [vmem:[#allocation289_spill] sm:$0xff]  ;;  %v13433_v21 = vld [vmem:[#allocation295_spill] sm:$0xff] }
 0x80d   : > { %5293 = vperm.xlu2 %6117, %v5151_v13   ;;  %v5160_v19 = vmul.f32 %v13431_v7, %v11385_v37  ;;  %v6630_v7 = vld [vmem:[%s7177_s10 + $0x10] sm:$0xff] }
 0x80e   : > { %v5023_v11 = vpop.permute.xlu1 %5022  ;;  %v11438_v50 = vpop.permute.xlu0 %5032 }
 0x80f   : > { %v11440_v46 = vpop.permute.xlu2 %5042 }
 0x814   : > { %5343 = vperm.xlu0 %6115, %v5161_v8   ;;  %5303 = vperm.xlu1 %6116, %v5153_v55   ;;  %v5159_v55 = vmul.f32 %v13429_v15, %v11371_v20  ;;  %v5167_v8 = vmul.f32 %v13430_v18, %v5011_v51  ;;  %v5170_v20 = vmul.f32 %v13433_v21, %v5017_v17  ;;  %v13434_v51 = vld [vmem:[#allocation291_spill] sm:$0xff]  ;;  %v13435_v15 = vld [vmem:[#allocation292_spill] sm:$0xff]  ;;  %v13437_v17 = vld [vmem:[#allocation293_spill] sm:$0xff] }
 0x815   : > { %5308 = vperm.xlu2 %6117, %v5154_v35  }
 0x816   : > { %v5029_v61 = vpop.permute.xlu1 %5028  ;;  %v11447_v48 = vpop.permute.xlu0 %5038 }
 0x817   : > { %v11449_v26 = vpop.permute.xlu2 %5048 }
 0x81c   : > { %5358 = vperm.xlu0 %6115, %v5164_v58   ;;  %5318 = vperm.xlu1 %6116, %v5156_v16   ;;  %v5162_v16 = vmul.f32 %v13432_v25, %v11380_v14  ;;  %v5163_v58 = vmul.f32 %v13434_v51, %v11393_v29  ;;  %v13436_v14 = vld [vmem:[#allocation299_spill] sm:$0xff]  ;;  %v4814_v29 = vmul.f32 %v6630_v7, %v11042_v34  ;;  %v13438_v25 = vld [vmem:[#allocation66_spill] sm:$0xff] }
 0x81d   : > { %5323 = vperm.xlu2 %6117, %v5157_v32   ;;  %v5173_v18 = vmul.f32 %v13436_v14, %v5023_v11 }
 0x81e   : > { %v11456_v40 = vpop.permute.xlu1 %5034  ;;  %v11458_v5 = vpop.permute.xlu0 %5044 }
 0x81f   : > { %v11460_v13 = vpop.permute.xlu2 %5054 }
 0x824   : > { %5373 = vperm.xlu0 %6115, %v5167_v8   ;;  %5333 = vperm.xlu1 %6116, %v5159_v55   ;;  %v5165_v55 = vmul.f32 %v13435_v15, %v11387_v1  ;;  %v5166_v8 = vmul.f32 %v13437_v17, %v11402_v57  ;;  %v6632_v57 = vld [vmem:[%s7291_s29 + $0x10] sm:$0xff]  ;;  %v13440_v15 = vld [vmem:[#allocation303_spill] sm:$0xff] }
 0x825   : > { %5338 = vperm.xlu2 %6117, %v5160_v19   ;;  %v6631_v19 = vld [vmem:[%s7169_s30 + $0x10] sm:$0xff] }
 0x826   : > { %v11467_v27 = vpop.permute.xlu1 %5040  ;;  %v11469_v0 = vpop.permute.xlu0 %5050 }
 0x827   : > { %v11471_v35 = vpop.permute.xlu2 %5060 }
 0x82c   : > { %5388 = vperm.xlu0 %6115, %v5170_v20   ;;  %5348 = vperm.xlu1 %6116, %v5162_v16   ;;  %v4110_v16 = vmul.f32 %v6631_v19, %v13438_v25  ;;  %v6634_v19 = vld [vmem:[%s7177_s10 + $0x20] sm:$0xff] }
 0x82d   : > { %5353 = vperm.xlu2 %6117, %v5163_v58   ;;  %v13439_v58 = vld [vmem:[#allocation294_spill] sm:$0xff]  ;;  %v4816_v25 = vmul.f32 %v6634_v19, %v11051_v3 }
 0x82e   : > { %v11478_v37 = vpop.permute.xlu1 %5046  ;;  %v11480_v6 = vpop.permute.xlu0 %5056  ;;  %v4878_v20 = vadd.f32 %v4814_v29, %v4110_v16  ;;  %v5168_v34 = vmul.f32 %v13439_v58, %v11395_v47  ;;  %v6635_v47 = vld [vmem:[%s7169_s30] sm:$0xff]  ;;  %v13443_v16 = vld [vmem:[#allocation33_spill] sm:$0xff] }
 0x82f   : > { %v11482_v32 = vpop.permute.xlu2 %5066 }
 0x834   : > { %5403 = vperm.xlu0 %6115, %v5173_v18   ;;  %5363 = vperm.xlu1 %6116, %v5165_v55   ;;  %v5176_v55 = vmul.f32 %v13440_v15, %v5029_v61  ;;  %v6633_v18 = vld [vmem:[%s7177_s10] sm:$0xff]  ;;  %v13442_v61 = vld [vmem:[#allocation89_spill] sm:$0xff] }
 0x835   : > { %5368 = vperm.xlu2 %6117, %v5166_v8   ;;  %v4812_v17 = vmul.f32 %v6633_v18, %v11058_v56  ;;  %v13441_v8 = vld [vmem:[#allocation296_spill] sm:$0xff]  ;;  %v4108_v29 = vmul.f32 %v6635_v47, %v13442_v61  ;;  %v6636_v56 = vld [vmem:[%s7169_s30 + $0x20] sm:$0xff]  ;;  %v13444_v18 = vld [vmem:[#allocation297_spill] sm:$0xff] }
 0x836   : > { %v11493_v21 = vpop.permute.xlu1 %5052  ;;  %v11495_v1 = vpop.permute.xlu0 %5062  ;;  %v5169_v7 = vmul.f32 %v13441_v8, %v11411_v24  ;;  %v5171_v8 = vmul.f32 %v13444_v18, %v11404_v62  ;;  %v6639_v61 = vld [vmem:[%s7177_s10 + $0x28] sm:$0xff] }
 0x837   : > { %v5209_v11 = vpop.permute.xlu2 %5208  ;;  %v4876_v3 = vadd.f32 %v4812_v17, %v4108_v29  ;;  %v4817_v17 = vmul.f32 %v6639_v61, %v11069_v33  ;;  %v13446_v29 = vld [vmem:[#allocation300_spill] sm:$0xff]  ;;  %v6641_v62 = vld [vmem:[%s7169_s30 + $0x28] sm:$0xff] }
 0x838   : > { %v5518_v51 = vmul.f32 %v6632_v57, %v5209_v11  ;;  %v4112_v11 = vmul.f32 %v6636_v56, %v13443_v16  ;;  %v5172_v56 = vmul.f32 %v13446_v29, %v11420_v52 }
 0x83a   : > { %v5582_v14 = vadd.f32 %v5518_v51, %v4878_v20  ;;  %v6637_v51 = vld [vmem:[%s7291_s29] sm:$0xff]  ;;  %v4880_v15 = vadd.f32 %v4816_v25, %v4112_v11  ;;  %v6640_v25 = vld [vmem:[%s7177_s10 + $0x38] sm:$0xff]  ;;  %v13447_v11 = vld [vmem:[#allocation96_spill] sm:$0xff] }
 0x83b   : > { %v4819_v16 = vmul.f32 %v6640_v25, %v11060_v45  ;;  %v6643_v45 = vld [vmem:[%s7291_s29 + $0x28] sm:$0xff] }
 0x83c   : > { %5646 = vst [vmem:[%s11508_s8 + $0x10] sm:$0xff] %v5582_v14  ;;  %5418 = vperm.xlu0 %6115, %v5176_v55   ;;  %5378 = vperm.xlu1 %6116, %v5168_v34   ;;  %v6638_v34 = vld [vmem:[%s7291_s29 + $0x20] sm:$0xff] }
 0x83d   : > { %5383 = vperm.xlu2 %6117, %v5169_v7   ;;  %v13445_v7 = vld [vmem:[#allocation180_spill] sm:$0xff] }
 0x83e   : > { %v11515_v24 = vpop.permute.xlu1 %5058  ;;  %v5199_v20 = vpop.permute.xlu0 %5198  ;;  %v5179_v19 = vmul.f32 %v13445_v7, %v11456_v40  ;;  %v6642_v40 = vld [vmem:[%s7169_s30 + $0x38] sm:$0xff] }
 0x83f   : > { %v5219_v57 = vpop.permute.xlu2 %5218  ;;  %v5516_v58 = vmul.f32 %v6637_v51, %v5199_v20  ;;  %v4113_v20 = vmul.f32 %v6641_v62, %v13447_v11  ;;  %v6647_v11 = vld [vmem:[%s7177_s10 + $0x50] sm:$0xff] }
 0x840   : > { %v5520_v55 = vmul.f32 %v6638_v34, %v5219_v57 }
 0x841   : > { %v5580_v14 = vadd.f32 %v5516_v58, %v4876_v3  ;;  %v13448_v3 = vld [vmem:[#allocation238_spill] sm:$0xff]  ;;  %v4881_v51 = vadd.f32 %v4817_v17, %v4113_v20  ;;  %v6645_v17 = vld [vmem:[%s7177_s10 + $0x8] sm:$0xff]  ;;  %v13452_v20 = vld [vmem:[#allocation133_spill] sm:$0xff] }
 0x842   : > { %v5584_v47 = vadd.f32 %v5520_v55, %v4880_v15  ;;  %v4115_v33 = vmul.f32 %v6642_v40, %v13448_v3  ;;  %v6644_v55 = vld [vmem:[%s7291_s29 + $0x38] sm:$0xff]  ;;  %v4813_v29 = vmul.f32 %v6645_v17, %v11067_v23  ;;  %v6649_v23 = vld [vmem:[%s7169_s30 + $0x40] sm:$0xff] }
 0x843   : > { %5644 = vst [vmem:[%s11508_s8] sm:$0xff] %v5580_v14  ;;  %v13453_v3 = vld [vmem:[#allocation50_spill] sm:$0xff]  ;;  %v13455_v17 = vld [vmem:[#allocation305_spill] sm:$0xff] }
 0x844   : > { %5648 = vst [vmem:[%s11508_s8 + $0x20] sm:$0xff] %v5584_v47  ;;  %5433 = vperm.xlu0 %6115, %v5179_v19   ;;  %5393 = vperm.xlu1 %6116, %v5171_v8   ;;  %v4883_v34 = vadd.f32 %v4819_v16, %v4115_v33  ;;  %v13449_v8 = vld [vmem:[#allocation301_spill] sm:$0xff]  ;;  %v13450_v19 = vld [vmem:[#allocation191_spill] sm:$0xff]  ;;  %v13451_v16 = vld [vmem:[#allocation304_spill] sm:$0xff]  ;;  %v4116_v33 = vmul.f32 %v6649_v23, %v13453_v3 }
 0x845   : > { %5398 = vperm.xlu2 %6117, %v5172_v56   ;;  %v5174_v7 = vmul.f32 %v13449_v8, %v11413_v9  ;;  %v5182_v47 = vmul.f32 %v13450_v19, %v11467_v27  ;;  %v6646_v56 = vld [vmem:[%s7177_s10 + $0x40] sm:$0xff]  ;;  %v5175_v62 = vmul.f32 %v13451_v16, %v11429_v63  ;;  %v4822_v9 = vmul.f32 %v6647_v11, %v11071_v43  ;;  %v6648_v27 = vld [vmem:[%s7169_s30 + $0x8] sm:$0xff]  ;;  %v13458_v3 = vld [vmem:[#allocation244_spill] sm:$0xff] }
 0x846   : > { %v11535_v57 = vpop.permute.xlu1 %5064  ;;  %v5224_v52 = vpop.permute.xlu0 %5223  ;;  %v4820_v25 = vmul.f32 %v6646_v56, %v11080_v36  ;;  %v4109_v40 = vmul.f32 %v6648_v27, %v13452_v20  ;;  %v6650_v36 = vld [vmem:[%s7169_s30 + $0x50] sm:$0xff]  ;;  %v5177_v56 = vmul.f32 %v13455_v17, %v11422_v41  ;;  %v6656_v23 = vld [vmem:[%s7177_s10 + $0x68] sm:$0xff] }
 0x847   : > { %v5234_v58 = vpop.permute.xlu2 %5233  ;;  %v5521_v15 = vmul.f32 %v6643_v45, %v5224_v52  ;;  %v13454_v52 = vld [vmem:[#allocation14_spill] sm:$0xff]  ;;  %v13457_v20 = vld [vmem:[#allocation184_spill] sm:$0xff]  ;;  %v4825_v41 = vmul.f32 %v6656_v23, %v11082_v44 }
 0x848   : > { %v5523_v14 = vmul.f32 %v6644_v55, %v5234_v58  ;;  %v4118_v63 = vmul.f32 %v6650_v36, %v13454_v52  ;;  %v4877_v45 = vadd.f32 %v4813_v29, %v4109_v40  ;;  %v4884_v43 = vadd.f32 %v4820_v25, %v4116_v33  ;;  %v13456_v29 = vld [vmem:[#allocation81_spill] sm:$0xff]  ;;  %v13459_v36 = vld [vmem:[#allocation128_spill] sm:$0xff]  ;;  %v13464_v23 = vld [vmem:[#allocation114_spill] sm:$0xff] }
 0x849   : > { %v5585_v18 = vadd.f32 %v5521_v15, %v4881_v51  ;;  %v6651_v15 = vld [vmem:[%s7291_s29 + $0x8] sm:$0xff]  ;;  %v5185_v25 = vmul.f32 %v13456_v29, %v11478_v37  ;;  %v5178_v40 = vmul.f32 %v13457_v20, %v11438_v50  ;;  %v6657_v37 = vld [vmem:[%s7169_s30 + $0x18] sm:$0xff]  ;;  %v13460_v50 = vld [vmem:[#allocation104_spill] sm:$0xff] }
 0x84a   : > { %v5587_v61 = vadd.f32 %v5523_v14, %v4883_v34  ;;  %v6652_v14 = vld [vmem:[%s7291_s29 + $0x40] sm:$0xff]  ;;  %v4886_v8 = vadd.f32 %v4822_v9, %v4118_v63  ;;  %v6655_v9 = vld [vmem:[%s7177_s10 + $0x58] sm:$0xff]  ;;  %v4111_v33 = vmul.f32 %v6657_v37, %v13458_v3  ;;  %v13465_v37 = vld [vmem:[#allocation63_spill] sm:$0xff] }
 0x84b   : > { %5649 = vst [vmem:[%s11508_s8 + $0x28] sm:$0xff] %v5585_v18  ;;  %v4823_v27 = vmul.f32 %v6655_v9, %v11091_v53  ;;  %v6659_v53 = vld [vmem:[%s7169_s30 + $0x68] sm:$0xff] }
 0x84c   : > { %5651 = vst [vmem:[%s11508_s8 + $0x38] sm:$0xff] %v5587_v61  ;;  %5448 = vperm.xlu0 %6115, %v5182_v47   ;;  %5408 = vperm.xlu1 %6116, %v5174_v7   ;;  %v6653_v7 = vld [vmem:[%s7291_s29 + $0x50] sm:$0xff]  ;;  %v4121_v63 = vmul.f32 %v6659_v53, %v13460_v50 }
 0x84d   : > { %5413 = vperm.xlu2 %6117, %v5175_v62   ;;  %v6654_v62 = vld [vmem:[%s7177_s10 + $0x18] sm:$0xff]  ;;  %v6669_v53 = vld [vmem:[%s7291_s29 + $0x30] sm:$0xff] }
 0x84e   : > { %v5204_v51 = vpop.permute.xlu1 %5203  ;;  %v5239_v58 = vpop.permute.xlu0 %5238  ;;  %v4815_v11 = vmul.f32 %v6654_v62, %v11078_v60  ;;  %v6658_v60 = vld [vmem:[%s7169_s30 + $0x58] sm:$0xff] }
 0x84f   : > { %v5517_v34 = vmul.f32 %v6651_v15, %v5204_v51  ;;  %v5249_v55 = vpop.permute.xlu2 %5248  ;;  %v5524_v18 = vmul.f32 %v6652_v14, %v5239_v58  ;;  %v4119_v52 = vmul.f32 %v6658_v60, %v13459_v36 }
 0x850   : > { %v5526_v19 = vmul.f32 %v6653_v7, %v5249_v55  ;;  %v4879_v44 = vadd.f32 %v4815_v11, %v4111_v33  ;;  %v6661_v55 = vld [vmem:[%s7291_s29 + $0x58] sm:$0xff]  ;;  %v6664_v11 = vld [vmem:[%s7177_s10 + $0x70] sm:$0xff] }
 0x851   : > { %v5581_v47 = vadd.f32 %v5517_v34, %v4877_v45  ;;  %v5588_v61 = vadd.f32 %v5524_v18, %v4884_v43  ;;  %v4887_v45 = vadd.f32 %v4823_v27, %v4119_v52  ;;  %v6660_v43 = vld [vmem:[%s7291_s29 + $0x18] sm:$0xff]  ;;  %v4889_v18 = vadd.f32 %v4825_v41, %v4121_v63  ;;  %v13463_v27 = vld [vmem:[#allocation51_spill] sm:$0xff] }
 0x852   : > { %v5590_v16 = vadd.f32 %v5526_v19, %v4886_v8  ;;  %v6662_v8 = vld [vmem:[%s7291_s29 + $0x68] sm:$0xff]  ;;  %v4826_v9 = vmul.f32 %v6664_v11, %v11102_v39  ;;  %v5181_v20 = vmul.f32 %v13463_v27, %v11447_v48  ;;  %v6668_v39 = vld [vmem:[%s7169_s30 + $0x80] sm:$0xff] }
 0x853   : > { %5645 = vst [vmem:[%s11508_s8 + $0x8] sm:$0xff] %v5581_v47  ;;  %v13466_v48 = vld [vmem:[#allocation111_spill] sm:$0xff]  ;;  %v13471_v11 = vld [vmem:[#allocation82_spill] sm:$0xff] }
 0x854   : > { %5654 = vst [vmem:[%s11508_s8 + $0x50] sm:$0xff] %v5590_v16  ;;  %5463 = vperm.xlu0 %6115, %v5185_v25   ;;  %5423 = vperm.xlu1 %6116, %v5177_v56   ;;  %v13462_v56 = vld [vmem:[#allocation32_spill] sm:$0xff]  ;;  %v4124_v33 = vmul.f32 %v6668_v39, %v13466_v48  ;;  %v6680_v39 = vld [vmem:[%s7291_s29 + $0x98] sm:$0xff] }
 0x855   : > { %5652 = vst [vmem:[%s11508_s8 + $0x40] sm:$0xff] %v5588_v61  ;;  %5428 = vperm.xlu2 %6117, %v5178_v40   ;;  %v13461_v61 = vld [vmem:[#allocation64_spill] sm:$0xff]  ;;  %v5188_v29 = vmul.f32 %v13462_v56, %v11493_v21  ;;  %v6665_v40 = vld [vmem:[%s7177_s10 + $0x80] sm:$0xff] }
 0x856   : > { %v5214_v51 = vpop.permute.xlu1 %5213  ;;  %v5254_v58 = vpop.permute.xlu0 %5253  ;;  %v5180_v17 = vmul.f32 %v13461_v61, %v11431_v12  ;;  %v6663_v16 = vld [vmem:[%s7177_s10 + $0x30] sm:$0xff]  ;;  %v4828_v12 = vmul.f32 %v6665_v40, %v11093_v2  ;;  %v6673_v61 = vld [vmem:[%s7177_s10 + $0x88] sm:$0xff]  ;;  %v13469_v56 = vld [vmem:[#allocation98_spill] sm:$0xff] }
 0x857   : > { %v5519_v15 = vmul.f32 %v6660_v43, %v5214_v51  ;;  %v5264_v34 = vpop.permute.xlu2 %5263  ;;  %v5527_v14 = vmul.f32 %v6661_v55, %v5254_v58  ;;  %v4818_v62 = vmul.f32 %v6663_v16, %v11089_v38  ;;  %v6666_v21 = vld [vmem:[%s7169_s30 + $0x30] sm:$0xff]  ;;  %v13467_v55 = vld [vmem:[#allocation102_spill] sm:$0xff]  ;;  %v13470_v16 = vld [vmem:[#allocation19_spill] sm:$0xff] }
 0x858   : > { %v5529_v7 = vmul.f32 %v6662_v8, %v5264_v34  ;;  %v4114_v41 = vmul.f32 %v6666_v21, %v13464_v23  ;;  %v6667_v38 = vld [vmem:[%s7169_s30 + $0x70] sm:$0xff]  ;;  %v6678_v21 = vld [vmem:[%s7291_s29 + $0x48] sm:$0xff] }
 0x859   : > { %v5583_v19 = vadd.f32 %v5519_v15, %v4879_v44  ;;  %v5591_v47 = vadd.f32 %v5527_v14, %v4887_v45  ;;  %v4122_v3 = vmul.f32 %v6667_v38, %v13465_v37  ;;  %v6670_v51 = vld [vmem:[%s7291_s29 + $0x70] sm:$0xff]  ;;  %v4892_v44 = vadd.f32 %v4828_v12, %v4124_v33  ;;  %v6671_v45 = vld [vmem:[%s7291_s29 + $0x80] sm:$0xff]  ;;  %v6679_v38 = vld [vmem:[%s7291_s29 + $0x88] sm:$0xff] }
 0x85a   : > { %v5593_v25 = vadd.f32 %v5529_v7, %v4889_v18  ;;  %v4882_v2 = vadd.f32 %v4818_v62, %v4114_v41  ;;  %v5183_v14 = vmul.f32 %v13467_v55, %v11440_v46  ;;  %v13468_v18 = vld [vmem:[#allocation132_spill] sm:$0xff] }
 0x85b   : > { %5647 = vst [vmem:[%s11508_s8 + $0x18] sm:$0xff] %v5583_v19  ;;  %v4890_v52 = vadd.f32 %v4826_v9, %v4122_v3  ;;  %v5191_v8 = vmul.f32 %v13468_v18, %v11515_v24  ;;  %v6672_v19 = vld [vmem:[%s7177_s10 + $0x48] sm:$0xff] }
 0x85c   : > { %5657 = vst [vmem:[%s11508_s8 + $0x68] sm:$0xff] %v5593_v25  ;;  %5478 = vperm.xlu0 %6115, %v5188_v29   ;;  %5438 = vperm.xlu1 %6116, %v5180_v17   ;;  %v4829_v17 = vmul.f32 %v6673_v61, %v11113_v49  ;;  %v5184_v29 = vmul.f32 %v13469_v56, %v11458_v5  ;;  %v6674_v25 = vld [vmem:[%s7177_s10 + $0x98] sm:$0xff]  ;;  %v6675_v24 = vld [vmem:[%s7169_s30 + $0x48] sm:$0xff]  ;;  %v13472_v5 = vld [vmem:[#allocation254_spill] sm:$0xff] }
 0x85d   : > { %5655 = vst [vmem:[%s11508_s8 + $0x58] sm:$0xff] %v5591_v47  ;;  %5443 = vperm.xlu2 %6117, %v5181_v20   ;;  %v4821_v47 = vmul.f32 %v6672_v19, %v11100_v28  ;;  %v4831_v46 = vmul.f32 %v6674_v25, %v11104_v10  ;;  %v4117_v62 = vmul.f32 %v6675_v24, %v13470_v16  ;;  %v6676_v28 = vld [vmem:[%s7169_s30 + $0x88] sm:$0xff]  ;;  %v6677_v49 = vld [vmem:[%s7169_s30 + $0x98] sm:$0xff]  ;;  %v6687_v61 = vld [vmem:[%s7291_s29 + $0x60] sm:$0xff] }
 0x85e   : > { %v5229_v60 = vpop.permute.xlu1 %5228  ;;  %v5269_v36 = vpop.permute.xlu0 %5268  ;;  %v4125_v9 = vmul.f32 %v6676_v28, %v13471_v11  ;;  %v4127_v27 = vmul.f32 %v6677_v49, %v13472_v5  ;;  %v6689_v24 = vld [vmem:[%s7291_s29 + $0xb0] sm:$0xff]  ;;  %v13479_v11 = vld [vmem:[#allocation37_spill] sm:$0xff] }
 0x85f   : > { %v5522_v50 = vmul.f32 %v6669_v53, %v5229_v60  ;;  %v5279_v63 = vpop.permute.xlu2 %5278  ;;  %v5530_v58 = vmul.f32 %v6670_v51, %v5269_v36  ;;  %v4885_v10 = vadd.f32 %v4821_v47, %v4117_v62  ;;  %v13473_v36 = vld [vmem:[#allocation55_spill] sm:$0xff]  ;;  %v6690_v5 = vld [vmem:[%s7177_s10 + $0x78] sm:$0xff] }
 0x860   : > { %v5532_v43 = vmul.f32 %v6671_v45, %v5279_v63  ;;  %v4893_v12 = vadd.f32 %v4829_v17, %v4125_v9  ;;  %v4895_v3 = vadd.f32 %v4831_v46, %v4127_v27  ;;  %v6681_v63 = vld [vmem:[%s7177_s10 + $0x60] sm:$0xff]  ;;  %v13475_v45 = vld [vmem:[#allocation35_spill] sm:$0xff]  ;;  %v5189_v9 = vmul.f32 %v13479_v11, %v11460_v13  ;;  %v6693_v13 = vld [vmem:[%s7169_s30 + $0x78] sm:$0xff] }
 0x861   : > { %v5586_v15 = vadd.f32 %v5522_v50, %v4882_v2  ;;  %v5594_v34 = vadd.f32 %v5530_v58, %v4890_v52  ;;  %v5186_v2 = vmul.f32 %v13473_v36, %v11449_v26  ;;  %v13474_v52 = vld [vmem:[#allocation40_spill] sm:$0xff]  ;;  %v4824_v51 = vmul.f32 %v6681_v63, %v11111_v22  ;;  %v6682_v58 = vld [vmem:[%s7177_s10 + $0xa0] sm:$0xff]  ;;  %v6696_v36 = vld [vmem:[%s7291_s29 + $0x78] sm:$0xff] }
 0x862   : > { %v5596_v7 = vadd.f32 %v5532_v43, %v4892_v44  ;;  %v5194_v53 = vmul.f32 %v13474_v52, %v11535_v57  ;;  %v4832_v44 = vmul.f32 %v6682_v58, %v11124_v42  ;;  %v5187_v43 = vmul.f32 %v13475_v45, %v11469_v0  ;;  %v6684_v57 = vld [vmem:[%s7169_s30 + $0x60] sm:$0xff]  ;;  %v6686_v42 = vld [vmem:[%s7169_s30 + $0xb0] sm:$0xff]  ;;  %v13478_v0 = vld [vmem:[#allocation143_spill] sm:$0xff] }
 0x863   : > { %5650 = vst [vmem:[%s11508_s8 + $0x30] sm:$0xff] %v5586_v15  ;;  %v6683_v15 = vld [vmem:[%s7177_s10 + $0xb0] sm:$0xff]  ;;  %v6685_v22 = vld [vmem:[%s7169_s30 + $0xa0] sm:$0xff]  ;;  %v4827_v27 = vmul.f32 %v6690_v5, %v11122_v30 }
 0x864   : > { %5660 = vst [vmem:[%s11508_s8 + $0x80] sm:$0xff] %v5596_v7  ;;  %5493 = vperm.xlu0 %6115, %v5191_v8   ;;  %5453 = vperm.xlu1 %6116, %v5183_v14   ;;  %v4834_v26 = vmul.f32 %v6683_v15, %v11115_v54  ;;  %v13477_v14 = vld [vmem:[#allocation149_spill] sm:$0xff]  ;;  %v4130_v8 = vmul.f32 %v6686_v42, %v13478_v0  ;;  %v6701_v0 = vld [vmem:[%s7177_s10 + $0xe0] sm:$0xff]  ;;  %v6706_v11 = vld [vmem:[%s7291_s29 + $0xd0] sm:$0xff] }
 0x865   : > { %5658 = vst [vmem:[%s11508_s8 + $0x70] sm:$0xff] %v5594_v34  ;;  %5458 = vperm.xlu2 %6117, %v5184_v29   ;;  %v13476_v34 = vld [vmem:[#allocation134_spill] sm:$0xff]  ;;  %v4128_v18 = vmul.f32 %v6685_v22, %v13477_v14 }
 0x866   : > { %v5244_v20 = vpop.permute.xlu1 %5243  ;;  %v5284_v40 = vpop.permute.xlu0 %5283  ;;  %v4120_v55 = vmul.f32 %v6684_v57, %v13476_v34  ;;  %v6688_v29 = vld [vmem:[%s7291_s29 + $0xa0] sm:$0xff]  ;;  %v4898_v46 = vadd.f32 %v4834_v26, %v4130_v8  ;;  %v6699_v57 = vld [vmem:[%s7177_s10 + $0x90] sm:$0xff] }
 0x867   : > { %v5525_v23 = vmul.f32 %v6678_v21, %v5244_v20  ;;  %v5294_v41 = vpop.permute.xlu2 %5293  ;;  %v5533_v37 = vmul.f32 %v6679_v38, %v5284_v40  ;;  %v4896_v47 = vadd.f32 %v4832_v44, %v4128_v18  ;;  %v6691_v20 = vld [vmem:[%s7177_s10 + $0xb8] sm:$0xff]  ;;  %v6692_v21 = vld [vmem:[%s7177_s10 + $0xc8] sm:$0xff]  ;;  %v4830_v34 = vmul.f32 %v6699_v57, %v11134_v59  ;;  %v13485_v22 = vld [vmem:[#allocation162_spill] sm:$0xff] }
 0x868   : > { %v5535_v48 = vmul.f32 %v6680_v39, %v5294_v41  ;;  %v4888_v19 = vadd.f32 %v4824_v51, %v4120_v55  ;;  %v4835_v40 = vmul.f32 %v6691_v20, %v11136_v4  ;;  %v13481_v41 = vld [vmem:[#allocation139_spill] sm:$0xff]  ;;  %v13483_v39 = vld [vmem:[#allocation97_spill] sm:$0xff]  ;;  %v6700_v55 = vld [vmem:[%s7177_s10 + $0xd0] sm:$0xff] }
 0x869   : > { %v5589_v33 = vadd.f32 %v5525_v23, %v4885_v10  ;;  %v5597_v60 = vadd.f32 %v5533_v37, %v4893_v12  ;;  %v13480_v10 = vld [vmem:[#allocation146_spill] sm:$0xff]  ;;  %v4837_v23 = vmul.f32 %v6692_v21, %v11126_v31  ;;  %v4123_v38 = vmul.f32 %v6693_v13, %v13481_v41  ;;  %v6694_v37 = vld [vmem:[%s7169_s30 + $0xb8] sm:$0xff]  ;;  %v6695_v4 = vld [vmem:[%s7169_s30 + $0xc8] sm:$0xff] }
 0x86a   : > { %v5599_v50 = vadd.f32 %v5535_v48, %v4895_v3  ;;  %v5190_v12 = vmul.f32 %v13480_v10, %v11480_v6  ;;  %v13482_v3 = vld [vmem:[#allocation163_spill] sm:$0xff]  ;;  %v4133_v6 = vmul.f32 %v6695_v4, %v13483_v39  ;;  %v4838_v14 = vmul.f32 %v6700_v55, %v13485_v22  ;;  %v13487_v8 = vld [vmem:[#allocation156_spill] sm:$0xff]  ;;  %v6707_v5 = vld [vmem:[%s7291_s29 + $0xe0] sm:$0xff] }
 0x86b   : > { %5653 = vst [vmem:[%s11508_s8 + $0x48] sm:$0xff] %v5589_v33  ;;  %v4131_v30 = vmul.f32 %v6694_v37, %v13482_v3  ;;  %v6698_v51 = vld [vmem:[%s7291_s29 + $0xc8] sm:$0xff]  ;;  %v13491_v10 = vld [vmem:[#allocation80_spill] sm:$0xff]  ;;  %v13493_v37 = vld [vmem:[#allocation177_spill] sm:$0xff] }
 0x86c   : > { %5663 = vst [vmem:[%s11508_s8 + $0x98] sm:$0xff] %v5599_v50  ;;  %5508 = vperm.xlu0 %6115, %v5194_v53   ;;  %5468 = vperm.xlu1 %6116, %v5186_v2   ;;  %v6697_v53 = vld [vmem:[%s7291_s29 + $0xb8] sm:$0xff]  ;;  %v4901_v63 = vadd.f32 %v4837_v23, %v4133_v6  ;;  %v13486_v18 = vld [vmem:[#allocation43_spill] sm:$0xff]  ;;  %v13494_v4 = vld [vmem:[#allocation160_spill] sm:$0xff] }
 0x86d   : > { %5661 = vst [vmem:[%s11508_s8 + $0x88] sm:$0xff] %v5597_v60  ;;  %5473 = vperm.xlu2 %6117, %v5187_v43   ;;  %v4891_v60 = vadd.f32 %v4827_v27, %v4123_v38  ;;  %v4899_v31 = vadd.f32 %v4835_v40, %v4131_v30  ;;  %v13484_v43 = vld [vmem:[#allocation41_spill] sm:$0xff]  ;;  %v5193_v42 = vmul.f32 %v13486_v18, %v11495_v1  ;;  %v6708_v23 = vld [vmem:[%s7177_s10 + $0xa8] sm:$0xff]  ;;  %v6717_v18 = vld [vmem:[%s7177_s10 + $0xc0] sm:$0xff] }
 0x86e   : > { %v5259_v7 = vpop.permute.xlu1 %5258  ;;  %v5299_v54 = vpop.permute.xlu0 %5298  ;;  %v5192_v15 = vmul.f32 %v13484_v43, %v11471_v35  ;;  %v6702_v35 = vld [vmem:[%s7169_s30 + $0x90] sm:$0xff]  ;;  %v13492_v13 = vld [vmem:[#allocation91_spill] sm:$0xff]  ;;  %v6710_v30 = vld [vmem:[%s7177_s10 + $0xf8] sm:$0xff] }
 0x86f   : > { %v5528_v17 = vmul.f32 %v6687_v61, %v5259_v7  ;;  %v5309_v56 = vpop.permute.xlu2 %5308  ;;  %v5536_v25 = vmul.f32 %v6688_v29, %v5299_v54  ;;  %v4840_v7 = vmul.f32 %v6701_v0, %v13487_v8  ;;  %v13488_v54 = vld [vmem:[#allocation263_spill] sm:$0xff]  ;;  %v4833_v41 = vmul.f32 %v6708_v23, %v13492_v13  ;;  %v6716_v57 = vld [vmem:[%s7291_s29 + $0xf8] sm:$0xff]  ;;  %v6718_v8 = vld [vmem:[%s7177_s10 + $0x100] sm:$0xff] }
 0x870   : > { %v5538_v16 = vmul.f32 %v6689_v24, %v5309_v56  ;;  %v13489_v61 = vld [vmem:[#allocation103_spill] sm:$0xff]  ;;  %v13490_v56 = vld [vmem:[#allocation157_spill] sm:$0xff]  ;;  %v4843_v39 = vmul.f32 %v6710_v30, %v13494_v4  ;;  %v13505_v30 = vld [vmem:[#allocation124_spill] sm:$0xff] }
 0x871   : > { %v5592_v62 = vadd.f32 %v5528_v17, %v4888_v19  ;;  %v5600_v28 = vadd.f32 %v5536_v25, %v4896_v47  ;;  %v4126_v19 = vmul.f32 %v6702_v35, %v13488_v54  ;;  %v6703_v47 = vld [vmem:[%s7169_s30 + $0xd0] sm:$0xff]  ;;  %v6704_v17 = vld [vmem:[%s7169_s30 + $0xe0] sm:$0xff]  ;;  %v6709_v38 = vld [vmem:[%s7177_s10 + $0xe8] sm:$0xff] }
 0x872   : > { %v5602_v49 = vadd.f32 %v5538_v16, %v4898_v46  ;;  %v4134_v59 = vmul.f32 %v6703_v47, %v13489_v61  ;;  %v4136_v1 = vmul.f32 %v6704_v17, %v13490_v56  ;;  %v6705_v16 = vld [vmem:[%s7291_s29 + $0x90] sm:$0xff]  ;;  %v4841_v3 = vmul.f32 %v6709_v38, %v13493_v37  ;;  %v6711_v6 = vld [vmem:[%s7169_s30 + $0xa8] sm:$0xff]  ;;  %v6720_v61 = vld [vmem:[%s7169_s30 + $0xc0] sm:$0xff] }
 0x873   : > { %5656 = vst [vmem:[%s11508_s8 + $0x60] sm:$0xff] %v5592_v62  ;;  %v4894_v46 = vadd.f32 %v4830_v34, %v4126_v19  ;;  %v6715_v43 = vld [vmem:[%s7291_s29 + $0xe8] sm:$0xff]  ;;  %v6719_v54 = vld [vmem:[%s7177_s10 + $0x110] sm:$0xff]  ;;  %v6721_v56 = vld [vmem:[%s7169_s30 + $0x100] sm:$0xff] }
 0x874   : > { %5666 = vst [vmem:[%s11508_s8 + $0xb0] sm:$0xff] %v5602_v49  ;;  %5483 = vperm.xlu1 %6116, %v5189_v9   ;;  %v4902_v24 = vadd.f32 %v4838_v14, %v4134_v59  ;;  %v4904_v49 = vadd.f32 %v4840_v7, %v4136_v1  ;;  %v13499_v7 = vld [vmem:[#allocation42_spill] sm:$0xff]  ;;  %v13500_v19 = vld [vmem:[#allocation167_spill] sm:$0xff]  ;;  %v13502_v1 = vld [vmem:[#allocation113_spill] sm:$0xff] }
 0x875   : > { %5664 = vst [vmem:[%s11508_s8 + $0xa0] sm:$0xff] %v5600_v28  ;;  %5488 = vperm.xlu2 %6117, %v5190_v12   ;;  %v5195_v12 = vmul.f32 %v13491_v10, %v11482_v32  ;;  %v6712_v32 = vld [vmem:[%s7169_s30 + $0xe8] sm:$0xff]  ;;  %v4844_v35 = vmul.f32 %v6718_v8, %v13499_v7  ;;  %v4846_v47 = vmul.f32 %v6719_v54, %v13500_v19  ;;  %v6725_v10 = vld [vmem:[%s7291_s29 + $0x110] sm:$0xff]  ;;  %v13504_v38 = vld [vmem:[#allocation109_spill] sm:$0xff] }
 0x876   : > { %v5274_v48 = vpop.permute.xlu1 %5273  ;;  %v5314_v33 = vpop.permute.xlu0 %5313  ;;  %v13501_v59 = vld [vmem:[#allocation159_spill] sm:$0xff]  ;;  %v13510_v8 = vld [vmem:[#allocation106_spill] sm:$0xff]  ;;  %v13511_v54 = vld [vmem:[#allocation189_spill] sm:$0xff] }
 0x877   : > { %v5531_v2 = vmul.f32 %v6696_v36, %v5274_v48  ;;  %v5324_v52 = vpop.permute.xlu2 %5323  ;;  %v5539_v50 = vmul.f32 %v6697_v53, %v5314_v33  ;;  %v13495_v48 = vld [vmem:[#allocation107_spill] sm:$0xff]  ;;  %v6713_v36 = vld [vmem:[%s7169_s30 + $0xf8] sm:$0xff]  ;;  %v4132_v17 = vmul.f32 %v6720_v61, %v13501_v59 }
 0x878   : > { %v5541_v58 = vmul.f32 %v6698_v51, %v5324_v52  ;;  %v4129_v33 = vmul.f32 %v6711_v6, %v13495_v48  ;;  %v13506_v6 = vld [vmem:[#allocation164_spill] sm:$0xff]  ;;  %v13512_v61 = vld [vmem:[#allocation169_spill] sm:$0xff] }
 0x879   : > { %v5595_v44 = vadd.f32 %v5531_v2, %v4891_v60  ;;  %v5603_v45 = vadd.f32 %v5539_v50, %v4899_v31  ;;  %v13496_v60 = vld [vmem:[#allocation170_spill] sm:$0xff]  ;;  %v13497_v2 = vld [vmem:[#allocation60_spill] sm:$0xff] }
 0x87a   : > { %v5605_v26 = vadd.f32 %v5541_v58, %v4901_v63  ;;  %v4137_v31 = vmul.f32 %v6712_v32, %v13496_v60  ;;  %v4139_v52 = vmul.f32 %v6713_v36, %v13497_v2  ;;  %v4897_v63 = vadd.f32 %v4833_v41, %v4129_v33  ;;  %v6714_v58 = vld [vmem:[%s7291_s29 + $0xa8] sm:$0xff]  ;;  %v6726_v41 = vld [vmem:[%s7177_s10 + $0xd8] sm:$0xff]  ;;  %v13508_v36 = vld [vmem:[#allocation130_spill] sm:$0xff] }
 0x87b   : > { %5659 = vst [vmem:[%s11508_s8 + $0x78] sm:$0xff] %v5595_v44  ;;  %v4839_v37 = vmul.f32 %v6726_v41, %v13504_v38  ;;  %v6729_v33 = vld [vmem:[%s7169_s30 + $0xd8] sm:$0xff] }
 0x87c   : > { %5669 = vst [vmem:[%s11508_s8 + $0xc8] sm:$0xff] %v5605_v26  ;;  %5498 = vperm.xlu1 %6116, %v5192_v15   ;;  %v4905_v51 = vadd.f32 %v4841_v3, %v4137_v31  ;;  %v4907_v26 = vadd.f32 %v4843_v39, %v4139_v52  ;;  %v6727_v3 = vld [vmem:[%s7177_s10 + $0x118] sm:$0xff]  ;;  %v6728_v39 = vld [vmem:[%s7177_s10 + $0x128] sm:$0xff] }
 0x87d   : > { %5667 = vst [vmem:[%s11508_s8 + $0xb8] sm:$0xff] %v5603_v45  ;;  %5503 = vperm.xlu2 %6117, %v5193_v42   ;;  %v13498_v42 = vld [vmem:[#allocation101_spill] sm:$0xff]  ;;  %v4847_v4 = vmul.f32 %v6727_v3, %v13505_v30  ;;  %v4849_v48 = vmul.f32 %v6728_v39, %v13506_v6  ;;  %v6731_v52 = vld [vmem:[%s7169_s30 + $0x128] sm:$0xff]  ;;  %v13516_v3 = vld [vmem:[#allocation116_spill] sm:$0xff] }
 0x87e   : > { %v5289_v29 = vpop.permute.xlu1 %5288  ;;  %v5329_v25 = vpop.permute.xlu0 %5328  ;;  %v4836_v0 = vmul.f32 %v6717_v18, %v13498_v42  ;;  %v13507_v32 = vld [vmem:[#allocation117_spill] sm:$0xff]  ;;  %v13517_v39 = vld [vmem:[#allocation47_spill] sm:$0xff] }
 0x87f   : > { %v5534_v62 = vmul.f32 %v6705_v16, %v5289_v29  ;;  %v5339_v28 = vpop.permute.xlu2 %5338  ;;  %v5542_v9 = vmul.f32 %v6706_v11, %v5329_v25  ;;  %v4140_v29 = vmul.f32 %v6721_v56, %v13502_v1  ;;  %v6722_v25 = vld [vmem:[%s7169_s30 + $0x110] sm:$0xff]  ;;  %v4135_v60 = vmul.f32 %v6729_v33, %v13507_v32  ;;  %v6730_v31 = vld [vmem:[%s7169_s30 + $0x118] sm:$0xff]  ;;  %v13518_v33 = vld [vmem:[#allocation174_spill] sm:$0xff] }
 0x880   : > { %v5544_v27 = vmul.f32 %v6707_v5, %v5339_v28  ;;  %v4900_v28 = vadd.f32 %v4836_v0, %v4132_v17  ;;  %v4143_v2 = vmul.f32 %v6730_v31, %v13508_v36  ;;  %v6735_v0 = vld [vmem:[%s7177_s10 + $0xf0] sm:$0xff]  ;;  %v13519_v31 = vld [vmem:[#allocation131_spill] sm:$0xff] }
 0x881   : > { %v5598_v20 = vadd.f32 %v5534_v62, %v4894_v46  ;;  %v5606_v40 = vadd.f32 %v5542_v9, %v4902_v24  ;;  %v13503_v46 = vld [vmem:[#allocation165_spill] sm:$0xff]  ;;  %v4908_v11 = vadd.f32 %v4844_v35, %v4140_v29  ;;  %v6723_v9 = vld [vmem:[%s7291_s29 + $0xc0] sm:$0xff]  ;;  %v4842_v7 = vmul.f32 %v6735_v0, %v13510_v8  ;;  %v6736_v35 = vld [vmem:[%s7177_s10 + $0x130] sm:$0xff] }
 0x882   : > { %v5608_v21 = vadd.f32 %v5544_v27, %v4904_v49  ;;  %v4142_v24 = vmul.f32 %v6722_v25, %v13503_v46  ;;  %v6724_v27 = vld [vmem:[%s7291_s29 + $0x100] sm:$0xff]  ;;  %v4850_v19 = vmul.f32 %v6736_v35, %v13511_v54  ;;  %v6738_v17 = vld [vmem:[%s7169_s30 + $0xf0] sm:$0xff]  ;;  %v13514_v25 = vld [vmem:[#allocation127_spill] sm:$0xff] }
 0x883   : > { %5662 = vst [vmem:[%s11508_s8 + $0x90] sm:$0xff] %v5598_v20  ;;  %v13513_v56 = vld [vmem:[#allocation168_spill] sm:$0xff]  ;;  %v13522_v35 = vld [vmem:[#allocation123_spill] sm:$0xff] }
 0x884   : > { %5672 = vst [vmem:[%s11508_s8 + $0xe0] sm:$0xff] %v5608_v21  ;;  %5513 = vperm.xlu1 %6116, %v5195_v12   ;;  %v4138_v1 = vmul.f32 %v6738_v17, %v13513_v56  ;;  %v6739_v29 = vld [vmem:[%s7169_s30 + $0x130] sm:$0xff]  ;;  %v13524_v17 = vld [vmem:[#allocation171_spill] sm:$0xff] }
 0x885   : > { %5670 = vst [vmem:[%s11508_s8 + $0xd0] sm:$0xff] %v5606_v40  ;;  %v4910_v40 = vadd.f32 %v4846_v47, %v4142_v24  ;;  %v6737_v47 = vld [vmem:[%s7177_s10 + $0x140] sm:$0xff]  ;;  %v4146_v46 = vmul.f32 %v6739_v29, %v13514_v25  ;;  %v13525_v29 = vld [vmem:[#allocation175_spill] sm:$0xff] }
 0x886   : > { %v5304_v53 = vpop.permute.xlu1 %5303  ;;  %v5344_v50 = vpop.permute.xlu0 %5343  ;;  %v4852_v59 = vmul.f32 %v6737_v47, %v13512_v61  ;;  %v6740_v24 = vld [vmem:[%s7169_s30 + $0x140] sm:$0xff]  ;;  %v13523_v47 = vld [vmem:[#allocation185_spill] sm:$0xff] }
 0x887   : > { %v5537_v44 = vmul.f32 %v6714_v58, %v5304_v53  ;;  %v5354_v45 = vpop.permute.xlu2 %5353  ;;  %v5545_v15 = vmul.f32 %v6715_v43, %v5344_v50  ;;  %v13509_v53 = vld [vmem:[#allocation74_spill] sm:$0xff]  ;;  %v4903_v58 = vadd.f32 %v4839_v37, %v4135_v60  ;;  %v6744_v37 = vld [vmem:[%s7177_s10 + $0x108] sm:$0xff] }
 0x888   : > { %v5547_v34 = vmul.f32 %v6716_v57, %v5354_v45  ;;  %v4145_v50 = vmul.f32 %v6731_v52, %v13509_v53  ;;  %v6732_v45 = vld [vmem:[%s7291_s29 + $0xd8] sm:$0xff]  ;;  %v4845_v30 = vmul.f32 %v6744_v37, %v13516_v3  ;;  %v6747_v60 = vld [vmem:[%s7169_s30 + $0x108] sm:$0xff]  ;;  %v13520_v52 = vld [vmem:[#allocation186_spill] sm:$0xff] }
 0x889   : > { %v5601_v55 = vadd.f32 %v5537_v44, %v4897_v63  ;;  %v5609_v22 = vadd.f32 %v5545_v15, %v4905_v51  ;;  %v4911_v44 = vadd.f32 %v4847_v4, %v4143_v2  ;;  %v6745_v4 = vld [vmem:[%s7177_s10 + $0x148] sm:$0xff]  ;;  %v4141_v36 = vmul.f32 %v6747_v60, %v13519_v31  ;;  %v13530_v60 = vld [vmem:[#allocation176_spill] sm:$0xff] }
 0x88a   : > { %v5611_v14 = vadd.f32 %v5547_v34, %v4907_v26  ;;  %v6733_v26 = vld [vmem:[%s7291_s29 + $0x118] sm:$0xff]  ;;  %v4913_v34 = vadd.f32 %v4849_v48, %v4145_v50  ;;  %v4853_v6 = vmul.f32 %v6745_v4, %v13517_v39  ;;  %v6748_v2 = vld [vmem:[%s7169_s30 + $0x148] sm:$0xff] }
 0x88b   : > { %5665 = vst [vmem:[%s11508_s8 + $0xa8] sm:$0xff] %v5601_v55  ;;  %v6734_v55 = vld [vmem:[%s7291_s29 + $0x128] sm:$0xff]  ;;  %v6746_v48 = vld [vmem:[%s7177_s10 + $0x158] sm:$0xff]  ;;  %v4149_v53 = vmul.f32 %v6748_v2, %v13520_v52  ;;  %v13531_v2 = vld [vmem:[#allocation144_spill] sm:$0xff] }
 0x88c   : > { %5675 = vst [vmem:[%s11508_s8 + $0xf8] sm:$0xff] %v5611_v14  ;;  %v4855_v32 = vmul.f32 %v6746_v48, %v13518_v33  ;;  %v6749_v50 = vld [vmem:[%s7169_s30 + $0x158] sm:$0xff]  ;;  %v13529_v48 = vld [vmem:[#allocation78_spill] sm:$0xff] }
 0x88d   : > { %5673 = vst [vmem:[%s11508_s8 + $0xe8] sm:$0xff] %v5609_v22  ;;  %v13528_v4 = vld [vmem:[#allocation121_spill] sm:$0xff] }
 0x88e   : > { %v5319_v16 = vpop.permute.xlu1 %5318  ;;  %v5359_v62 = vpop.permute.xlu0 %5358 }
 0x88f   : > { %v5540_v49 = vmul.f32 %v6723_v9, %v5319_v16  ;;  %v5369_v5 = vpop.permute.xlu2 %5368  ;;  %v5548_v20 = vmul.f32 %v6724_v27, %v5359_v62  ;;  %v13515_v16 = vld [vmem:[#allocation172_spill] sm:$0xff]  ;;  %v4906_v9 = vadd.f32 %v4842_v7, %v4138_v1  ;;  %v6753_v7 = vld [vmem:[%s7177_s10 + $0x120] sm:$0xff] }
 0x890   : > { %v5550_v12 = vmul.f32 %v6725_v10, %v5369_v5  ;;  %v4148_v62 = vmul.f32 %v6740_v24, %v13515_v16  ;;  %v6741_v5 = vld [vmem:[%s7291_s29 + $0xf0] sm:$0xff]  ;;  %v4848_v54 = vmul.f32 %v6753_v7, %v13522_v35  ;;  %v6756_v1 = vld [vmem:[%s7169_s30 + $0x120] sm:$0xff] }
 0x891   : > { %v5604_v21 = vadd.f32 %v5540_v49, %v4900_v28  ;;  %v5612_v23 = vadd.f32 %v5548_v20, %v4908_v11  ;;  %v4914_v49 = vadd.f32 %v4850_v19, %v4146_v46  ;;  %v6754_v19 = vld [vmem:[%s7177_s10 + $0x160] sm:$0xff]  ;;  %v4144_v25 = vmul.f32 %v6756_v1, %v13525_v29  ;;  %v13536_v1 = vld [vmem:[#allocation181_spill] sm:$0xff] }
 0x892   : > { %v5614_v13 = vadd.f32 %v5550_v12, %v4910_v40  ;;  %v6742_v40 = vld [vmem:[%s7291_s29 + $0x130] sm:$0xff]  ;;  %v4916_v12 = vadd.f32 %v4852_v59, %v4148_v62  ;;  %v4856_v61 = vmul.f32 %v6754_v19, %v13523_v47  ;;  %v6757_v46 = vld [vmem:[%s7169_s30 + $0x160] sm:$0xff]  ;;  %v13534_v19 = vld [vmem:[#allocation129_spill] sm:$0xff] }
 0x893   : > { %5668 = vst [vmem:[%s11508_s8 + $0xc0] sm:$0xff] %v5604_v21  ;;  %v6743_v21 = vld [vmem:[%s7291_s29 + $0x140] sm:$0xff]  ;;  %v6755_v59 = vld [vmem:[%s7177_s10 + $0x170] sm:$0xff] }
 0x894   : > { %5678 = vst [vmem:[%s11508_s8 + $0x110] sm:$0xff] %v5614_v13  ;;  %v4858_v56 = vmul.f32 %v6755_v59, %v13524_v17  ;;  %v13526_v24 = vld [vmem:[#allocation182_spill] sm:$0xff]  ;;  %v6758_v62 = vld [vmem:[%s7169_s30 + $0x170] sm:$0xff]  ;;  %v13535_v59 = vld [vmem:[#allocation161_spill] sm:$0xff] }
 0x895   : > { %5676 = vst [vmem:[%s11508_s8 + $0x100] sm:$0xff] %v5612_v23  ;;  %v4152_v16 = vmul.f32 %v6757_v46, %v13526_v24  ;;  %v13537_v46 = vld [vmem:[#allocation105_spill] sm:$0xff] }
 0x896   : > { %v5334_v63 = vpop.permute.xlu1 %5333  ;;  %v5374_v51 = vpop.permute.xlu0 %5373 }
 0x897   : > { %v5543_v43 = vmul.f32 %v6732_v45, %v5334_v63  ;;  %v5384_v15 = vpop.permute.xlu2 %5383  ;;  %v5551_v57 = vmul.f32 %v6733_v26, %v5374_v51  ;;  %v13521_v63 = vld [vmem:[#allocation95_spill] sm:$0xff]  ;;  %v4909_v45 = vadd.f32 %v4845_v30, %v4141_v36  ;;  %v6762_v30 = vld [vmem:[%s7177_s10 + $0x138] sm:$0xff] }
 0x898   : > { %v5553_v22 = vmul.f32 %v6734_v55, %v5384_v15  ;;  %v4151_v51 = vmul.f32 %v6749_v50, %v13521_v63  ;;  %v6750_v15 = vld [vmem:[%s7291_s29 + $0x108] sm:$0xff]  ;;  %v4851_v39 = vmul.f32 %v6762_v30, %v13528_v4  ;;  %v6765_v36 = vld [vmem:[%s7169_s30 + $0x138] sm:$0xff]  ;;  %v13532_v50 = vld [vmem:[#allocation188_spill] sm:$0xff] }
 0x899   : > { %v5607_v14 = vadd.f32 %v5543_v43, %v4903_v58  ;;  %v5615_v18 = vadd.f32 %v5551_v57, %v4911_v44  ;;  %v4917_v43 = vadd.f32 %v4853_v6, %v4149_v53  ;;  %v6763_v6 = vld [vmem:[%s7177_s10 + $0x178] sm:$0xff]  ;;  %v4147_v52 = vmul.f32 %v6765_v36, %v13531_v2 }
 0x89a   : > { %v5617_v42 = vadd.f32 %v5553_v22, %v4913_v34  ;;  %v6751_v34 = vld [vmem:[%s7291_s29 + $0x148] sm:$0xff]  ;;  %v4919_v22 = vadd.f32 %v4855_v32, %v4151_v51  ;;  %v4859_v33 = vmul.f32 %v6763_v6, %v13529_v48  ;;  %v6766_v53 = vld [vmem:[%s7169_s30 + $0x178] sm:$0xff]  ;;  %v13540_v6 = vld [vmem:[#allocation138_spill] sm:$0xff] }
 0x89b   : > { %5671 = vst [vmem:[%s11508_s8 + $0xd8] sm:$0xff] %v5607_v14  ;;  %v6752_v14 = vld [vmem:[%s7291_s29 + $0x158] sm:$0xff]  ;;  %v6764_v32 = vld [vmem:[%s7177_s10 + $0x188] sm:$0xff]  ;;  %v4155_v63 = vmul.f32 %v6766_v53, %v13532_v50  ;;  %v13543_v53 = vld [vmem:[#allocation142_spill] sm:$0xff] }
 0x89c   : > { %5681 = vst [vmem:[%s11508_s8 + $0x128] sm:$0xff] %v5617_v42  ;;  %v4861_v31 = vmul.f32 %v6764_v32, %v13530_v60  ;;  %v6767_v51 = vld [vmem:[%s7169_s30 + $0x188] sm:$0xff]  ;;  %v13542_v36 = vld [vmem:[#allocation137_spill] sm:$0xff] }
 0x89d   : > { %5679 = vst [vmem:[%s11508_s8 + $0x118] sm:$0xff] %v5615_v18  ;;  %v13541_v32 = vld [vmem:[#allocation195_spill] sm:$0xff] }
 0x89e   : > { %v5349_v28 = vpop.permute.xlu1 %5348  ;;  %v5389_v11 = vpop.permute.xlu0 %5388 }
 0x89f   : > { %v5546_v27 = vmul.f32 %v6741_v5, %v5349_v28  ;;  %v5399_v20 = vpop.permute.xlu2 %5398  ;;  %v5554_v10 = vmul.f32 %v6742_v40, %v5389_v11  ;;  %v13527_v28 = vld [vmem:[#allocation178_spill] sm:$0xff]  ;;  %v4912_v5 = vadd.f32 %v4848_v54, %v4144_v25  ;;  %v6771_v54 = vld [vmem:[%s7177_s10 + $0x150] sm:$0xff] }
 0x8a0   : > { %v5556_v23 = vmul.f32 %v6743_v21, %v5399_v20  ;;  %v4154_v11 = vmul.f32 %v6758_v62, %v13527_v28  ;;  %v6759_v20 = vld [vmem:[%s7291_s29 + $0x120] sm:$0xff]  ;;  %v4854_v47 = vmul.f32 %v6771_v54, %v13534_v19  ;;  %v6774_v25 = vld [vmem:[%s7169_s30 + $0x150] sm:$0xff] }
 0x8a1   : > { %v5610_v13 = vadd.f32 %v5546_v27, %v4906_v9  ;;  %v5618_v41 = vadd.f32 %v5554_v10, %v4914_v49  ;;  %v4920_v27 = vadd.f32 %v4856_v61, %v4152_v16  ;;  %v6772_v61 = vld [vmem:[%s7177_s10 + $0x190] sm:$0xff]  ;;  %v4150_v24 = vmul.f32 %v6774_v25, %v13537_v46  ;;  %v13548_v25 = vld [vmem:[#allocation183_spill] sm:$0xff] }
 0x8a2   : > { %v5620_v38 = vadd.f32 %v5556_v23, %v4916_v12  ;;  %v6760_v12 = vld [vmem:[%s7291_s29 + $0x160] sm:$0xff]  ;;  %v4922_v23 = vadd.f32 %v4858_v56, %v4154_v11  ;;  %v4862_v17 = vmul.f32 %v6772_v61, %v13535_v59  ;;  %v6775_v16 = vld [vmem:[%s7169_s30 + $0x190] sm:$0xff]  ;;  %v13546_v61 = vld [vmem:[#allocation135_spill] sm:$0xff] }
 0x8a3   : > { %5674 = vst [vmem:[%s11508_s8 + $0xf0] sm:$0xff] %v5610_v13  ;;  %v6761_v13 = vld [vmem:[%s7291_s29 + $0x170] sm:$0xff]  ;;  %v6773_v56 = vld [vmem:[%s7177_s10 + $0x1a0] sm:$0xff] }
 0x8a4   : > { %5684 = vst [vmem:[%s11508_s8 + $0x140] sm:$0xff] %v5620_v38  ;;  %v4864_v29 = vmul.f32 %v6773_v56, %v13536_v1  ;;  %v13538_v62 = vld [vmem:[#allocation196_spill] sm:$0xff]  ;;  %v6776_v11 = vld [vmem:[%s7169_s30 + $0x1a0] sm:$0xff] }
 0x8a5   : > { %5682 = vst [vmem:[%s11508_s8 + $0x130] sm:$0xff] %v5618_v41  ;;  %v4158_v28 = vmul.f32 %v6775_v16, %v13538_v62  ;;  %v13547_v56 = vld [vmem:[#allocation118_spill] sm:$0xff] }
 0x8a6   : > { %v5364_v58 = vpop.permute.xlu1 %5363  ;;  %v5404_v44 = vpop.permute.xlu0 %5403  ;;  %v13549_v16 = vld [vmem:[#allocation34_spill] sm:$0xff] }
 0x8a7   : > { %v5549_v26 = vmul.f32 %v6750_v15, %v5364_v58  ;;  %v5414_v57 = vpop.permute.xlu2 %5413  ;;  %v5557_v55 = vmul.f32 %v6751_v34, %v5404_v44  ;;  %v13533_v58 = vld [vmem:[#allocation26_spill] sm:$0xff]  ;;  %v4915_v15 = vadd.f32 %v4851_v39, %v4147_v52  ;;  %v6780_v39 = vld [vmem:[%s7177_s10 + $0x168] sm:$0xff] }
 0x8a8   : > { %v5559_v18 = vmul.f32 %v6752_v14, %v5414_v57  ;;  %v4157_v44 = vmul.f32 %v6767_v51, %v13533_v58  ;;  %v6768_v57 = vld [vmem:[%s7291_s29 + $0x138] sm:$0xff]  ;;  %v4857_v48 = vmul.f32 %v6780_v39, %v13540_v6  ;;  %v6783_v52 = vld [vmem:[%s7169_s30 + $0x168] sm:$0xff] }
 0x8a9   : > { %v5613_v42 = vadd.f32 %v5549_v26, %v4909_v45  ;;  %v5621_v0 = vadd.f32 %v5557_v55, %v4917_v43  ;;  %v4923_v26 = vadd.f32 %v4859_v33, %v4155_v63  ;;  %v6781_v33 = vld [vmem:[%s7177_s10 + $0x1a8] sm:$0xff]  ;;  %v4153_v50 = vmul.f32 %v6783_v52, %v13543_v53  ;;  %v13544_v51 = vld [vmem:[#allocation193_spill] sm:$0xff]  ;;  %v13554_v52 = vld [vmem:[#allocation192_spill] sm:$0xff] }
 0x8aa   : > { %v5623_v8 = vadd.f32 %v5559_v18, %v4919_v22  ;;  %v6769_v22 = vld [vmem:[%s7291_s29 + $0x178] sm:$0xff]  ;;  %v4925_v18 = vadd.f32 %v4861_v31, %v4157_v44  ;;  %v4865_v60 = vmul.f32 %v6781_v33, %v13541_v32  ;;  %v6784_v63 = vld [vmem:[%s7169_s30 + $0x1a8] sm:$0xff] }
 0x8ab   : > { %5677 = vst [vmem:[%s11508_s8 + $0x108] sm:$0xff] %v5613_v42  ;;  %v6770_v42 = vld [vmem:[%s7291_s29 + $0x188] sm:$0xff]  ;;  %v6782_v31 = vld [vmem:[%s7177_s10 + $0x1b8] sm:$0xff]  ;;  %v4161_v58 = vmul.f32 %v6784_v63, %v13544_v51 }
 0x8ac   : > { %5687 = vst [vmem:[%s11508_s8 + $0x158] sm:$0xff] %v5623_v8  ;;  %v4867_v2 = vmul.f32 %v6782_v31, %v13542_v36  ;;  %v6785_v44 = vld [vmem:[%s7169_s30 + $0x1b8] sm:$0xff]  ;;  %v13552_v33 = vld [vmem:[#allocation67_spill] sm:$0xff] }
 0x8ad   : > { %5685 = vst [vmem:[%s11508_s8 + $0x148] sm:$0xff] %v5621_v0  ;;  %v13553_v31 = vld [vmem:[#allocation65_spill] sm:$0xff]  ;;  %v13555_v63 = vld [vmem:[#allocation115_spill] sm:$0xff] }
 0x8ae   : > { %v5379_v9 = vpop.permute.xlu1 %5378  ;;  %v5419_v49 = vpop.permute.xlu0 %5418 }
 0x8af   : > { %v5552_v40 = vmul.f32 %v6759_v20, %v5379_v9  ;;  %v5429_v10 = vpop.permute.xlu2 %5428  ;;  %v5560_v21 = vmul.f32 %v6760_v12, %v5419_v49  ;;  %v13539_v9 = vld [vmem:[#allocation140_spill] sm:$0xff]  ;;  %v4918_v20 = vadd.f32 %v4854_v47, %v4150_v24  ;;  %v6789_v47 = vld [vmem:[%s7177_s10 + $0x180] sm:$0xff] }
 0x8b0   : > { %v5562_v41 = vmul.f32 %v6761_v13, %v5429_v10  ;;  %v4160_v49 = vmul.f32 %v6776_v11, %v13539_v9  ;;  %v6777_v10 = vld [vmem:[%s7291_s29 + $0x150] sm:$0xff]  ;;  %v4860_v59 = vmul.f32 %v6789_v47, %v13546_v61  ;;  %v6792_v24 = vld [vmem:[%s7169_s30 + $0x180] sm:$0xff] }
 0x8b1   : > { %v5616_v38 = vadd.f32 %v5552_v40, %v4912_v5  ;;  %v5624_v37 = vadd.f32 %v5560_v21, %v4920_v27  ;;  %v4926_v40 = vadd.f32 %v4862_v17, %v4158_v28  ;;  %v6790_v17 = vld [vmem:[%s7177_s10 + $0x1c0] sm:$0xff]  ;;  %v4156_v62 = vmul.f32 %v6792_v24, %v13549_v16  ;;  %v13550_v11 = vld [vmem:[#allocation152_spill] sm:$0xff]  ;;  %v13560_v24 = vld [vmem:[#allocation151_spill] sm:$0xff] }
 0x8b2   : > { %v5626_v3 = vadd.f32 %v5562_v41, %v4922_v23  ;;  %v6778_v23 = vld [vmem:[%s7291_s29 + $0x190] sm:$0xff]  ;;  %v4928_v41 = vadd.f32 %v4864_v29, %v4160_v49  ;;  %v4868_v1 = vmul.f32 %v6790_v17, %v13547_v56  ;;  %v6793_v28 = vld [vmem:[%s7169_s30 + $0x1c0] sm:$0xff]  ;;  %v13558_v17 = vld [vmem:[#allocation31_spill] sm:$0xff] }
 0x8b3   : > { %5680 = vst [vmem:[%s11508_s8 + $0x120] sm:$0xff] %v5616_v38  ;;  %v6779_v38 = vld [vmem:[%s7291_s29 + $0x1a0] sm:$0xff]  ;;  %v6791_v29 = vld [vmem:[%s7177_s10 + $0x1d0] sm:$0xff]  ;;  %v4164_v9 = vmul.f32 %v6793_v28, %v13550_v11 }
 0x8b4   : > { %5690 = vst [vmem:[%s11508_s8 + $0x170] sm:$0xff] %v5626_v3  ;;  %v4870_v46 = vmul.f32 %v6791_v29, %v13548_v25  ;;  %v6794_v49 = vld [vmem:[%s7169_s30 + $0x1d0] sm:$0xff]  ;;  %v13561_v28 = vld [vmem:[#allocation94_spill] sm:$0xff] }
 0x8b5   : > { %5688 = vst [vmem:[%s11508_s8 + $0x160] sm:$0xff] %v5624_v37  ;;  %v13559_v29 = vld [vmem:[#allocation28_spill] sm:$0xff] }
 0x8b6   : > { %v5394_v45 = vpop.permute.xlu1 %5393  ;;  %v5434_v43 = vpop.permute.xlu0 %5433 }
 0x8b7   : > { %v5555_v34 = vmul.f32 %v6768_v57, %v5394_v45  ;;  %v5444_v55 = vpop.permute.xlu2 %5443  ;;  %v5563_v14 = vmul.f32 %v6769_v22, %v5434_v43  ;;  %v13545_v45 = vld [vmem:[#allocation71_spill] sm:$0xff]  ;;  %v4921_v57 = vadd.f32 %v4857_v48, %v4153_v50  ;;  %v6798_v48 = vld [vmem:[%s7177_s10 + $0x198] sm:$0xff] }
 0x8b8   : > { %v5565_v0 = vmul.f32 %v6770_v42, %v5444_v55  ;;  %v4163_v43 = vmul.f32 %v6785_v44, %v13545_v45  ;;  %v6786_v55 = vld [vmem:[%s7291_s29 + $0x168] sm:$0xff]  ;;  %v4863_v32 = vmul.f32 %v6798_v48, %v13552_v33  ;;  %v6801_v50 = vld [vmem:[%s7169_s30 + $0x198] sm:$0xff]  ;;  %v13556_v44 = vld [vmem:[#allocation166_spill] sm:$0xff] }
 0x8b9   : > { %v5619_v8 = vadd.f32 %v5555_v34, %v4915_v15  ;;  %v5627_v7 = vadd.f32 %v5563_v14, %v4923_v26  ;;  %v4929_v34 = vadd.f32 %v4865_v60, %v4161_v58  ;;  %v6799_v60 = vld [vmem:[%s7177_s10 + $0x1d8] sm:$0xff]  ;;  %v4159_v51 = vmul.f32 %v6801_v50, %v13555_v63  ;;  %v6818_v63 = vld [vmem:[%s7291_s29 + $0x1e0] sm:$0xff] }
 0x8ba   : > { %v5629_v35 = vadd.f32 %v5565_v0, %v4925_v18  ;;  %v6787_v18 = vld [vmem:[%s7291_s29 + $0x1a8] sm:$0xff]  ;;  %v4931_v0 = vadd.f32 %v4867_v2, %v4163_v43  ;;  %v4871_v36 = vmul.f32 %v6799_v60, %v13553_v31  ;;  %v6802_v58 = vld [vmem:[%s7169_s30 + $0x1d8] sm:$0xff]  ;;  %v13564_v60 = vld [vmem:[#allocation110_spill] sm:$0xff] }
 0x8bb   : > { %5683 = vst [vmem:[%s11508_s8 + $0x138] sm:$0xff] %v5619_v8  ;;  %v6788_v8 = vld [vmem:[%s7291_s29 + $0x1b8] sm:$0xff]  ;;  %v6800_v2 = vld [vmem:[%s7177_s10 + $0x1e8] sm:$0xff]  ;;  %v4167_v45 = vmul.f32 %v6802_v58, %v13556_v44 }
 0x8bc   : > { %5693 = vst [vmem:[%s11508_s8 + $0x188] sm:$0xff] %v5629_v35  ;;  %v4873_v53 = vmul.f32 %v6800_v2, %v13554_v52  ;;  %v6803_v43 = vld [vmem:[%s7169_s30 + $0x1e8] sm:$0xff]  ;;  %v13565_v2 = vld [vmem:[#allocation158_spill] sm:$0xff]  ;;  %v6819_v44 = vld [vmem:[%s7177_s10 + $0x1f8] sm:$0xff] }
 0x8bd   : > { %5691 = vst [vmem:[%s11508_s8 + $0x178] sm:$0xff] %v5627_v7 }
 0x8be   : > { %v5409_v5 = vpop.permute.xlu1 %5408  ;;  %v5449_v27 = vpop.permute.xlu0 %5448 }
 0x8bf   : > { %v5558_v12 = vmul.f32 %v6777_v10, %v5409_v5  ;;  %v5459_v21 = vpop.permute.xlu2 %5458  ;;  %v5566_v13 = vmul.f32 %v6778_v23, %v5449_v27  ;;  %v13551_v5 = vld [vmem:[#allocation155_spill] sm:$0xff]  ;;  %v4924_v10 = vadd.f32 %v4860_v59, %v4156_v62  ;;  %v6807_v59 = vld [vmem:[%s7177_s10 + $0x1b0] sm:$0xff] }
 0x8c0   : > { %v5568_v37 = vmul.f32 %v6779_v38, %v5459_v21  ;;  %v4166_v27 = vmul.f32 %v6794_v49, %v13551_v5  ;;  %v6795_v21 = vld [vmem:[%s7291_s29 + $0x180] sm:$0xff]  ;;  %v4866_v56 = vmul.f32 %v6807_v59, %v13558_v17  ;;  %v6810_v62 = vld [vmem:[%s7169_s30 + $0x1f0] sm:$0xff] }
 0x8c1   : > { %v5622_v3 = vadd.f32 %v5558_v12, %v4918_v20  ;;  %v5630_v30 = vadd.f32 %v5566_v13, %v4926_v40  ;;  %v4932_v12 = vadd.f32 %v4868_v1, %v4164_v9  ;;  %v6808_v1 = vld [vmem:[%s7177_s10 + $0x1f0] sm:$0xff]  ;;  %v4170_v11 = vmul.f32 %v6810_v62, %v13561_v28 }
 0x8c2   : > { %v5632_v4 = vadd.f32 %v5568_v37, %v4928_v41  ;;  %v6796_v41 = vld [vmem:[%s7291_s29 + $0x1c0] sm:$0xff]  ;;  %v4934_v37 = vadd.f32 %v4870_v46, %v4166_v27  ;;  %v4874_v25 = vmul.f32 %v6808_v1, %v13559_v29  ;;  %v6809_v46 = vld [vmem:[%s7169_s30 + $0x1b0] sm:$0xff] }
 0x8c3   : > { %5686 = vst [vmem:[%s11508_s8 + $0x150] sm:$0xff] %v5622_v3  ;;  %v6797_v3 = vld [vmem:[%s7291_s29 + $0x1d0] sm:$0xff]  ;;  %v4162_v16 = vmul.f32 %v6809_v46, %v13560_v24 }
 0x8c4   : > { %5696 = vst [vmem:[%s11508_s8 + $0x1a0] sm:$0xff] %v5632_v4  ;;  %v4938_v27 = vadd.f32 %v4874_v25, %v4170_v11 }
 0x8c5   : > { %5694 = vst [vmem:[%s11508_s8 + $0x190] sm:$0xff] %v5630_v30  ;;  %v4930_v5 = vadd.f32 %v4866_v56, %v4162_v16 }
 0x8c6   : > { %v5424_v15 = vpop.permute.xlu1 %5423  ;;  %v5464_v26 = vpop.permute.xlu0 %5463 }
 0x8c7   : > { %v5561_v22 = vmul.f32 %v6786_v55, %v5424_v15  ;;  %v5474_v14 = vpop.permute.xlu2 %5473  ;;  %v5569_v42 = vmul.f32 %v6787_v18, %v5464_v26  ;;  %v13557_v15 = vld [vmem:[#allocation148_spill] sm:$0xff]  ;;  %v4927_v55 = vadd.f32 %v4863_v32, %v4159_v51  ;;  %v6816_v32 = vld [vmem:[%s7177_s10 + $0x1e0] sm:$0xff] }
 0x8c8   : > { %v5571_v7 = vmul.f32 %v6788_v8, %v5474_v14  ;;  %v4169_v26 = vmul.f32 %v6803_v43, %v13557_v15  ;;  %v6804_v14 = vld [vmem:[%s7291_s29 + $0x198] sm:$0xff]  ;;  %v4872_v31 = vmul.f32 %v6816_v32, %v13564_v60 }
 0x8c9   : > { %v5625_v35 = vadd.f32 %v5561_v22, %v4921_v57  ;;  %v5633_v54 = vadd.f32 %v5569_v42, %v4929_v34  ;;  %v4935_v22 = vadd.f32 %v4871_v36, %v4167_v45  ;;  %v6817_v36 = vld [vmem:[%s7169_s30 + $0x1e0] sm:$0xff]  ;;  %v6820_v15 = vld [vmem:[%s7169_s30 + $0x1f8] sm:$0xff] }
 0x8ca   : > { %v5635_v19 = vadd.f32 %v5571_v7, %v4931_v0  ;;  %v6805_v0 = vld [vmem:[%s7291_s29 + $0x1d8] sm:$0xff]  ;;  %v4937_v7 = vadd.f32 %v4873_v53, %v4169_v26  ;;  %v4168_v52 = vmul.f32 %v6817_v36, %v13565_v2  ;;  %v13566_v45 = vld [vmem:[#allocation298_spill] sm:$0xff] }
 0x8cb   : > { %5689 = vst [vmem:[%s11508_s8 + $0x168] sm:$0xff] %v5625_v35  ;;  %v6806_v35 = vld [vmem:[%s7291_s29 + $0x1e8] sm:$0xff]  ;;  %v4875_v43 = vmul.f32 %v6819_v44, %v13566_v45  ;;  %v13567_v26 = vld [vmem:[#allocation126_spill] sm:$0xff] }
 0x8cc   : > { %5699 = vst [vmem:[%s11508_s8 + $0x1b8] sm:$0xff] %v5635_v19  ;;  %v4936_v50 = vadd.f32 %v4872_v31, %v4168_v52 }
 0x8cd   : > { %5697 = vst [vmem:[%s11508_s8 + $0x1a8] sm:$0xff] %v5633_v54 }
 0x8ce   : > { %v5439_v20 = vpop.permute.xlu1 %5438  ;;  %v5479_v40 = vpop.permute.xlu0 %5478 }
 0x8cf   : > { %v5564_v23 = vmul.f32 %v6795_v21, %v5439_v20  ;;  %v5489_v13 = vpop.permute.xlu2 %5488  ;;  %v5572_v38 = vmul.f32 %v6796_v41, %v5479_v40  ;;  %v6811_v20 = vld [vmem:[%s7291_s29 + $0x1b0] sm:$0xff]  ;;  %v13562_v41 = vld [vmem:[#allocation187_spill] sm:$0xff] }
 0x8d0   : > { %v5574_v30 = vmul.f32 %v6797_v3, %v5489_v13  ;;  %v6813_v13 = vld [vmem:[%s7177_s10 + $0x1c8] sm:$0xff]  ;;  %v13563_v3 = vld [vmem:[#allocation86_spill] sm:$0xff]  ;;  %s6928_s10 = scalar_lea.hbm %s6927_s25, 512 }
 0x8d1   : > { %v5628_v4 = vadd.f32 %v5564_v23, %v4924_v10  ;;  %v5636_v39 = vadd.f32 %v5572_v38, %v4932_v12  ;;  %v6812_v10 = vld [vmem:[%s7291_s29 + $0x1f0] sm:$0xff]  ;;  %v4869_v38 = vmul.f32 %v6813_v13, %v13562_v41  ;;  %p6929_p6 = scmp.ne.s32.totalorder %s6927_s25, %s6928_s10  ;;  %p6934_p8 = scmp.lt.s32.totalorder %s6932_s22, %s6928_s10 }
 0x8d2   : > { %v5638_v6 = vadd.f32 %v5574_v30, %v4934_v37  ;;  %v6814_v37 = vld [vmem:[%s7169_s30 + $0x1c8] sm:$0xff] }
 0x8d3   : > { %5692 = vst [vmem:[%s11508_s8 + $0x180] sm:$0xff] %v5628_v4  ;;  %v4165_v30 = vmul.f32 %v6814_v37, %v13563_v3  ;;  %p6930_p12 = pnand %p6929_p6, %p7065_p10  ;;  %p6935_p9 = por %p6934_p8, %p6933_p0 }
 0x8d4   : > { %5702 = vst [vmem:[%s11508_s8 + $0x1d0] sm:$0xff] %v5638_v6  ;;  %v6815_v6 = vld [vmem:[%s7291_s29 + $0x1c8] sm:$0xff] }
 0x8d5   : > { %5700 = vst [vmem:[%s11508_s8 + $0x1c0] sm:$0xff] %v5636_v39  ;;  %v4933_v39 = vadd.f32 %v4869_v38, %v4165_v30  ;;  %p6931_p1 = pneg %p6930_p12 }
 0x8d6   : > { %v5454_v57 = vpop.permute.xlu1 %5453  ;;  %v5494_v34 = vpop.permute.xlu0 %5493 }
 0x8d7   : > { %v5567_v18 = vmul.f32 %v6804_v14, %v5454_v57  ;;  %v5504_v42 = vpop.permute.xlu2 %5503  ;;  %v5575_v8 = vmul.f32 %v6805_v0, %v5494_v34  ;;  %v4171_v57 = vmul.f32 %v6820_v15, %v13567_v26  ;;  %p6936_p2 = pnand %p6935_p9, %p6931_p1 }
 0x8d8   : > { %v5577_v54 = vmul.f32 %v6806_v35, %v5504_v42 }
 0x8d9   : > { %v5631_v19 = vadd.f32 %v5567_v18, %v4927_v55  ;;  %v5639_v47 = vadd.f32 %v5575_v8, %v4935_v22  ;;  %v4939_v55 = vadd.f32 %v4875_v43, %v4171_v57  ;;  %v6821_v22 = vld [vmem:[%s7291_s29 + $0x1f8] sm:$0xff] }
 0x8da   : > { %v5641_v61 = vadd.f32 %v5577_v54, %v4937_v7 }
 0x8db   : > { %5695 = vst [vmem:[%s11508_s8 + $0x198] sm:$0xff] %v5631_v19 }
 0x8dc   : > { %5705 = vst [vmem:[%s11508_s8 + $0x1e8] sm:$0xff] %v5641_v61 }
 0x8dd   : > { %5703 = vst [vmem:[%s11508_s8 + $0x1d8] sm:$0xff] %v5639_v47 }
 0x8de   : > { %v5469_v9 = vpop.permute.xlu1 %5468  ;;  %v5509_v49 = vpop.permute.xlu0 %5508 }
 0x8df   : > { %v5570_v40 = vmul.f32 %v6811_v20, %v5469_v9  ;;  %v5578_v12 = vmul.f32 %v6812_v10, %v5509_v49 }
 0x8e1   : > { %v5634_v21 = vadd.f32 %v5570_v40, %v4930_v5  ;;  %v5642_v23 = vadd.f32 %v5578_v12, %v4938_v27 }
 0x8e3   : > { %5698 = vst [vmem:[%s11508_s8 + $0x1b0] sm:$0xff] %v5634_v21 }
 0x8e4   : > { %5706 = vst [vmem:[%s11508_s8 + $0x1f0] sm:$0xff] %v5642_v23 }
 0x8e6   : > { %v5484_v4 = vpop.permute.xlu1 %5483 }
 0x8e7   : > { %v5573_v48 = vmul.f32 %v6815_v6, %v5484_v4 }
 0x8e9   : > { %v5637_v33 = vadd.f32 %v5573_v48, %v4933_v39 }
 0x8eb   : > { %5701 = vst [vmem:[%s11508_s8 + $0x1c8] sm:$0xff] %v5637_v33 }
 0x8ee   : > { %v5499_v53 = vpop.permute.xlu1 %5498 }
 0x8ef   : > { %v5576_v51 = vmul.f32 %v6818_v63, %v5499_v53 }
 0x8f1   : > { %v5640_v58 = vadd.f32 %v5576_v51, %v4936_v50 }
 0x8f3   : > { %5704 = vst [vmem:[%s11508_s8 + $0x1e0] sm:$0xff] %v5640_v58 }
 0x8f6   : > { %v5514_v34 = vpop.permute.xlu1 %5513 }
 0x8f7   : > { %v5579_v14 = vmul.f32 %v6821_v22, %v5514_v34 }
 0x8f9   : > { %v5643_v18 = vadd.f32 %v5579_v14, %v4939_v55 }
 0x8fb   : > { %5707 = vst [vmem:[%s11508_s8 + $0x1f8] sm:$0xff] %v5643_v18 }
 0x8fc   : > { %6939 = shalt.err (!%p6936_p2)
}
 0x8fd   : > { %s6993_s0 = smov 128   ;;  %s6994_s9 = smov 8  }
 0x8fe   : > { %6048 = dma.vmem_to_hbm [thread:$0]  (%p7065_p10), %s5722_s24, 8192, %s5724_s11, %s5709_s19, %s6993_s0, %s6993_s0, %s6994_s9  }
 0x8ff PF: > { %p6065_p3 = scmp.ge.s32.totalorder %s6982_s18, 2  ;;  %s5738_s29 = sand.u32 1, %s6970_s15  }
 0x900   : > { %s5739_s5 = scalar_lea.sflag [#allocation4], %s5738_s29 }
 0x901   : > { %p6061_p4 = pnand %p6065_p3, %p7069_p11 }
 0x903   : > { %p6062_p13 = pneg %p6061_p4 }
 0x905   : > { %6965 = dma.done.wait (%p6062_p13), %s5739_s5, 8192  }
 0x906   : > { %6967 = vsyncadd (%p6062_p13), %s5739_s5, 4294959104  ;;  %s13568_s13 = sld [smem:[#allocation12_spill]]  ;;  %p20_p5 = scmp.ge.s32.totalorder %s7045_s21, 10  }
 0x907   : > { %s13569_s17 = sld [smem:[#allocation13_spill]]  ;;  %s13570_s15 = smov %s6974_s16 }
 0x908   : > { %s13572_s18 = smov %s7045_s21  ;;  %22 = sbr.rel (!%p20_p5) target bundleno = 10 (0xa), region = 107 }
 0x90c   : > { %s13571_s16 = smov %s13568_s13 }
 0x90d   :  { %5745 = vsyncpa [#allocation3], 1 }
 0x90e   :  { %5747 = vsyncpa [#allocation3 + $0x1], 1 }
 0x90f   :  { %5748 = vsyncpa [#allocation6], 1 }
 0x910   :  { %5750 = vsyncpa [#allocation6 + $0x1], 1 }
 0x911   :  { %5751 = vsyncpa [#allocation4], 1 }
 0x912   :  { %5753 = vsyncpa [#allocation4 + $0x1], 1 }

</bundles_post_ra>
